<compile_context>
chip_gen: v7x
topology: tpu7x:2x2x1
jax: 0.10.0
libtpu: 0.0.40
codegen_flags: <defaults>
</compile_context>

<pallas_src>
import jax
import jax.numpy as jnp
from jax.experimental import pallas as pl
from jax.experimental.pallas import tpu as pltpu


_LANES = 128
_MAX_TILE_ROWS = 2048  # folded rows per grid step -> 1 MiB f32 x-block per DMA


def _cal_forward_kernel(x_ref, w_ref, b_ref, out_ref):
    """p[:, k] = sigmoid(<x_folded, w_masked_k> + b_eff) for one folded row tile.

    x_ref:   (TILE, D_FOLD)  VMEM, native dtype (cast to f32 in-kernel)
    w_ref:   (FOLD, D_FOLD)  f32 VMEM, row k = w_eff in segment k, 0 elsewhere
    b_ref:   (1, 1)          f32 SMEM scalar (b_eff = b[0,1] - b[0,0])
    out_ref: (TILE, FOLD)    f32 VMEM
    """
    x = x_ref[...].astype(jnp.float32)          # no-op for f32 callers
    b = b_ref[0, 0]
    fold = out_ref.shape[1]
    for k in range(fold):                        # static, unrolled (fold <= 4)
        wk = w_ref[k:k + 1, :]                   # (1, D_FOLD) masked weight row
        # Exact f32: VPU broadcast-multiply + full-width XLU lane reduce.
        logit = jnp.sum(x * wk, axis=-1, keepdims=True)     # (TILE, 1)
        # exp runs on the EUP; divide touches only TILE/8 vregs.
        out_ref[:, k:k + 1] = 1.0 / (1.0 + jnp.exp(-(logit + b)))


def sklearn_calibrated_forward(x: jax.Array, w: jax.Array, b: jax.Array) -> jax.Array:
    """SklearnCalibrated.forward for a binary linear probabilistic base.

    x: (N, D), w: (D, 2), b: (1, 2).  Returns positive-class probability, (N,).
    """
    n, d = x.shape
    c = w.shape[1]
    assert c == 2, "fused sigmoid kernel implements the binary predict_proba path"
    # TODO(synk): multiclass (C > 2) predict_proba branch (full prob matrix) is not
    # fused here; the calibrated-PU use case of this module is binary.

    # Fold the 2-class softmax into a sigmoid of the logit difference.
    w_eff = (w[:, 1] - w[:, 0]).astype(jnp.float32)                 # (D,)
    b_eff = (b[0, 1] - b[0, 0]).astype(jnp.float32).reshape(1, 1)   # (1, 1)

    # Lane fold: pack `fold` consecutive rows into one 128-lane row.
    if d <= _LANES and _LANES % d == 0:
        fold = _LANES // d
    else:
        fold = 1                                   # irregular D: no fold
    d_fold = d * fold

    # Masked weight rows: w_rows[k, j] = w_eff[j % d] if j // d == k else 0.
    seg = jnp.arange(d_fold) // d
    w_rows = jnp.where(seg[None, :] == jnp.arange(fold)[:, None],
                       jnp.tile(w_eff, fold)[None, :],
                       jnp.float32(0.0)).astype(jnp.float32)        # (fold, d_fold)

    # Pad N to a multiple of `fold` (<= fold-1 rows) only when needed so the
    # fold reshape below stays metadata-only.
    n_pad = ((n + fold - 1) // fold) * fold
    if n_pad != n:
        x = jnp.pad(x, ((0, n_pad - n), (0, 0)))
    n_f = n_pad // fold
    x_f = x.reshape(n_f, d_fold)                   # free row-major reshape

    if n_f <= _MAX_TILE_ROWS:
        tile_rows = n_f                            # single grid step, one DMA
    else:
        tile_rows = _MAX_TILE_ROWS                 # multiple of 8/16/32: valid tiling
    num_tiles = pl.cdiv(n_f, tile_rows)

    itemsize = jnp.dtype(x_f.dtype).itemsize
    cost = pl.CostEstimate(
        flops=2 * n_pad * d,
        transcendentals=n_pad,
        bytes_accessed=n_f * d_fold * itemsize + n_f * fold * 4 + fold * d_fold * 4,
    )

    probs = pl.pallas_call(
        _cal_forward_kernel,
        out_shape=jax.ShapeDtypeStruct((n_f, fold), jnp.float32),
        grid_spec=pltpu.PrefetchScalarGridSpec(
            num_scalar_prefetch=0,
            grid=(num_tiles,),
            in_specs=[
                pl.BlockSpec((tile_rows, d_fold), lambda i: (i, 0)),   # folded x tile
                pl.BlockSpec((fold, d_fold), lambda i: (0, 0)),        # masked w rows (resident)
                pl.BlockSpec((1, 1), lambda i: (0, 0),
                             memory_space=pltpu.MemorySpace.SMEM),     # b_eff scalar
            ],
            out_specs=pl.BlockSpec((tile_rows, fold), lambda i: (i, 0)),
        ),
        compiler_params=pltpu.CompilerParams(
            # Only pays on v7x (2 TCs); free elsewhere.
            dimension_semantics=("parallel",),
        ),
        cost_estimate=cost,
    )(x_f, w_rows, b_eff)

    # Un-fold for free (row-major reshape), drop fold padding, match torch .squeeze().
    return jnp.squeeze(probs.reshape(n_f * fold)[:n])


if __name__ == "__main__":
    # Deterministic synthetic parameters + inputs (no checkpoint / sklearn load).
    # TODO(synk): sklearn .fit() (LBFGS/AdamW training loop in _BaseLearner) is
    # training-time logic with no forward-pass Pallas analog.
    N, D, C = 4096, 32, 2   # folds to (1024, 128) -> one 512 KiB block, single grid step
    key = jax.random.PRNGKey(0)
    kx, kw, kb = jax.random.split(key, 3)

    x = jax.random.normal(kx, (N, D), dtype=jnp.float32)
    w = jax.random.normal(kw, (D, C), dtype=jnp.float32) * 0.1
    b = jax.random.normal(kb, (1, C), dtype=jnp.float32) * 0.1

    y = jax.jit(sklearn_calibrated_forward)(x, w, b)
    y = jax.block_until_ready(y)

    # Reference: softmax positive-class column — exactly the module's semantics.
    logits_ref = jnp.dot(x, w, precision=jax.lax.Precision.HIGHEST) + b
    ref = jax.nn.softmax(logits_ref, axis=-1)[:, 1]

    assert y.shape == (N,)
    assert bool(jnp.all((y >= 0.0) & (y <= 1.0)))
    assert bool(jnp.max(jnp.abs(y - ref)) < 1e-5)
    print("KERNEL_OK")
</pallas_src>

<mosaic_0001>
module attributes {stable_mosaic.version = 11 : i64} {
  func.func @_cal_forward_kernel(%arg0: i32, %arg1: memref<1024x128xf32, #tpu.memory_space<vmem>>, %arg2: memref<4x128xf32, #tpu.memory_space<vmem>>, %arg3: memref<1x1xf32, #tpu.memory_space<smem>>, %arg4: memref<1024x4xf32, #tpu.memory_space<vmem>>) attributes {dimension_semantics = [#tpu.dimension_semantics<parallel>], iteration_bounds = array<i64: 1>, scalar_prefetch = 0 : i64, scratch_operands = 0 : i64, tpu.core_type = #tpu.core_type<tc>, window_params = [{transform_indices = @transform_0, window_bounds = array<i64: 1024, 128>}, {pipeline_mode = #tpu.pipeline_mode<synchronous>, transform_indices = @transform_1, window_bounds = array<i64: 4, 128>}, {transform_indices = @transform_2, window_bounds = array<i64: 1, 1>}, {transform_indices = @transform_3, window_bounds = array<i64: 1024, 4>}]} {
    %c0 = arith.constant 0 : index
    %c0_0 = arith.constant 0 : index
    %0 = vector.load %arg1[%c0, %c0_0] : memref<1024x128xf32, #tpu.memory_space<vmem>>, vector<1024x128xf32>
    %c0_1 = arith.constant 0 : index
    %c0_2 = arith.constant 0 : index
    %1 = memref.load %arg3[%c0_1, %c0_2] : memref<1x1xf32, #tpu.memory_space<smem>>
    %c0_3 = arith.constant 0 : index
    %c0_4 = arith.constant 0 : index
    %2 = vector.load %arg2[%c0_3, %c0_4] : memref<4x128xf32, #tpu.memory_space<vmem>>, vector<1x128xf32>
    %3 = vector.broadcast %2 : vector<1x128xf32> to vector<1024x128xf32>
    %4 = arith.mulf %0, %3 : vector<1024x128xf32>
    %cst = arith.constant dense<0.000000e+00> : vector<1024xf32>
    %5 = vector.multi_reduction <add>, %4, %cst [1] : vector<1024x128xf32> to vector<1024xf32>
    %6 = vector.shape_cast %5 : vector<1024xf32> to vector<1024x1xf32>
    %7 = vector.broadcast %1 : f32 to vector<1024x1xf32>
    %8 = arith.addf %6, %7 : vector<1024x1xf32>
    %cst_5 = arith.constant 0.000000e+00 : f32
    %9 = vector.broadcast %cst_5 : f32 to vector<1024x1xf32>
    %10 = arith.subf %9, %8 : vector<1024x1xf32>
    %11 = math.exp %10 : vector<1024x1xf32>
    %cst_6 = arith.constant 1.000000e+00 : f32
    %12 = vector.broadcast %cst_6 : f32 to vector<1024x1xf32>
    %13 = arith.addf %12, %11 : vector<1024x1xf32>
    %cst_7 = arith.constant 1.000000e+00 : f32
    %14 = vector.broadcast %cst_7 : f32 to vector<1024x1xf32>
    %15 = arith.divf %14, %13 : vector<1024x1xf32>
    %c0_8 = arith.constant 0 : index
    %c0_9 = arith.constant 0 : index
    %16 = vector.load %arg4[%c0_8, %c0_9] : memref<1024x4xf32, #tpu.memory_space<vmem>>, vector<1024x1xf32>
    tpu.vector_store %arg4[%c0_8, %c0_9], %15 {strides = array<i32>} : memref<1024x4xf32, #tpu.memory_space<vmem>>, vector<1024x1xf32>,
    %c1 = arith.constant 1 : index
    %c0_10 = arith.constant 0 : index
    %17 = vector.load %arg2[%c1, %c0_10] : memref<4x128xf32, #tpu.memory_space<vmem>>, vector<1x128xf32>
    %18 = vector.broadcast %17 : vector<1x128xf32> to vector<1024x128xf32>
    %19 = arith.mulf %0, %18 : vector<1024x128xf32>
    %cst_11 = arith.constant dense<0.000000e+00> : vector<1024xf32>
    %20 = vector.multi_reduction <add>, %19, %cst_11 [1] : vector<1024x128xf32> to vector<1024xf32>
    %21 = vector.shape_cast %20 : vector<1024xf32> to vector<1024x1xf32>
    %22 = vector.broadcast %1 : f32 to vector<1024x1xf32>
    %23 = arith.addf %21, %22 : vector<1024x1xf32>
    %cst_12 = arith.constant 0.000000e+00 : f32
    %24 = vector.broadcast %cst_12 : f32 to vector<1024x1xf32>
    %25 = arith.subf %24, %23 : vector<1024x1xf32>
    %26 = math.exp %25 : vector<1024x1xf32>
    %cst_13 = arith.constant 1.000000e+00 : f32
    %27 = vector.broadcast %cst_13 : f32 to vector<1024x1xf32>
    %28 = arith.addf %27, %26 : vector<1024x1xf32>
    %cst_14 = arith.constant 1.000000e+00 : f32
    %29 = vector.broadcast %cst_14 : f32 to vector<1024x1xf32>
    %30 = arith.divf %29, %28 : vector<1024x1xf32>
    %c0_15 = arith.constant 0 : index
    %c1_16 = arith.constant 1 : index
    %31 = vector.load %arg4[%c0_15, %c1_16] : memref<1024x4xf32, #tpu.memory_space<vmem>>, vector<1024x1xf32>
    tpu.vector_store %arg4[%c0_15, %c1_16], %30 {strides = array<i32>} : memref<1024x4xf32, #tpu.memory_space<vmem>>, vector<1024x1xf32>,
    %c2 = arith.constant 2 : index
    %c0_17 = arith.constant 0 : index
    %32 = vector.load %arg2[%c2, %c0_17] : memref<4x128xf32, #tpu.memory_space<vmem>>, vector<1x128xf32>
    %33 = vector.broadcast %32 : vector<1x128xf32> to vector<1024x128xf32>
    %34 = arith.mulf %0, %33 : vector<1024x128xf32>
    %cst_18 = arith.constant dense<0.000000e+00> : vector<1024xf32>
    %35 = vector.multi_reduction <add>, %34, %cst_18 [1] : vector<1024x128xf32> to vector<1024xf32>
    %36 = vector.shape_cast %35 : vector<1024xf32> to vector<1024x1xf32>
    %37 = vector.broadcast %1 : f32 to vector<1024x1xf32>
    %38 = arith.addf %36, %37 : vector<1024x1xf32>
    %cst_19 = arith.constant 0.000000e+00 : f32
    %39 = vector.broadcast %cst_19 : f32 to vector<1024x1xf32>
    %40 = arith.subf %39, %38 : vector<1024x1xf32>
    %41 = math.exp %40 : vector<1024x1xf32>
    %cst_20 = arith.constant 1.000000e+00 : f32
    %42 = vector.broadcast %cst_20 : f32 to vector<1024x1xf32>
    %43 = arith.addf %42, %41 : vector<1024x1xf32>
    %cst_21 = arith.constant 1.000000e+00 : f32
    %44 = vector.broadcast %cst_21 : f32 to vector<1024x1xf32>
    %45 = arith.divf %44, %43 : vector<1024x1xf32>
    %c0_22 = arith.constant 0 : index
    %c2_23 = arith.constant 2 : index
    %46 = vector.load %arg4[%c0_22, %c2_23] : memref<1024x4xf32, #tpu.memory_space<vmem>>, vector<1024x1xf32>
    tpu.vector_store %arg4[%c0_22, %c2_23], %45 {strides = array<i32>} : memref<1024x4xf32, #tpu.memory_space<vmem>>, vector<1024x1xf32>,
    %c3 = arith.constant 3 : index
    %c0_24 = arith.constant 0 : index
    %47 = vector.load %arg2[%c3, %c0_24] : memref<4x128xf32, #tpu.memory_space<vmem>>, vector<1x128xf32>
    %48 = vector.broadcast %47 : vector<1x128xf32> to vector<1024x128xf32>
    %49 = arith.mulf %0, %48 : vector<1024x128xf32>
    %cst_25 = arith.constant dense<0.000000e+00> : vector<1024xf32>
    %50 = vector.multi_reduction <add>, %49, %cst_25 [1] : vector<1024x128xf32> to vector<1024xf32>
    %51 = vector.shape_cast %50 : vector<1024xf32> to vector<1024x1xf32>
    %52 = vector.broadcast %1 : f32 to vector<1024x1xf32>
    %53 = arith.addf %51, %52 : vector<1024x1xf32>
    %cst_26 = arith.constant 0.000000e+00 : f32
    %54 = vector.broadcast %cst_26 : f32 to vector<1024x1xf32>
    %55 = arith.subf %54, %53 : vector<1024x1xf32>
    %56 = math.exp %55 : vector<1024x1xf32>
    %cst_27 = arith.constant 1.000000e+00 : f32
    %57 = vector.broadcast %cst_27 : f32 to vector<1024x1xf32>
    %58 = arith.addf %57, %56 : vector<1024x1xf32>
    %cst_28 = arith.constant 1.000000e+00 : f32
    %59 = vector.broadcast %cst_28 : f32 to vector<1024x1xf32>
    %60 = arith.divf %59, %58 : vector<1024x1xf32>
    %c0_29 = arith.constant 0 : index
    %c3_30 = arith.constant 3 : index
    %61 = vector.load %arg4[%c0_29, %c3_30] : memref<1024x4xf32, #tpu.memory_space<vmem>>, vector<1024x1xf32>
    tpu.vector_store %arg4[%c0_29, %c3_30], %60 {strides = array<i32>} : memref<1024x4xf32, #tpu.memory_space<vmem>>, vector<1024x1xf32>,
    return
  }
  func.func @transform_0(%arg0: i32) -> (i32, i32) {
    %c0_i32 = arith.constant 0 : i32
    %c0_i32_0 = arith.constant 0 : i32
    return %arg0, %c0_i32 : i32, i32
  }
  func.func @transform_1(%arg0: i32) -> (i32, i32) {
    %c0_i32 = arith.constant 0 : i32
    %c0_i32_0 = arith.constant 0 : i32
    %c0_i32_1 = arith.constant 0 : i32
    return %c0_i32, %c0_i32_0 : i32, i32
  }
  func.func @transform_2(%arg0: i32) -> (i32, i32) {
    %c0_i32 = arith.constant 0 : i32
    %c0_i32_0 = arith.constant 0 : i32
    %c0_i32_1 = arith.constant 0 : i32
    return %c0_i32, %c0_i32_0 : i32, i32
  }
  func.func @transform_3(%arg0: i32) -> (i32, i32) {
    %c0_i32 = arith.constant 0 : i32
    %c0_i32_0 = arith.constant 0 : i32
    return %arg0, %c0_i32 : i32, i32
  }
}

</mosaic_0001>

<bundles_post_ra>
// kernel: tile.8
= control target key start
LH: loop header
LB: loop body
LE: loop exit
PB: predicated region body
PF: predicated region fallthrough
CT: control target
= control target key end

     0   :  { %s22_s0 = inlined_call_operand.vmem [shape: f32[32], index: 0, kind: input, shape index: {}]   ;;  %s23_s1 = inlined_call_operand.vmem [shape: f32[4,32], index: 1, kind: output, shape index: {}]  }
   0x1   :  { %v4_v0 = vld [vmem:[%s22_s0] ss:$0 sm:$0xff] }
   0x2   :  { %5 = vst [vmem:[%s23_s1] sm:$0xf] %v4_v0 }

// kernel: sklearn_calibrated_forward.1
= control target key start
LH: loop header
LB: loop body
LE: loop exit
PB: predicated region body
PF: predicated region fallthrough
CT: control target
= control target key end

     0   :  { %vm1430_vm0 = vcmask 7168   ;;  %vm2844_vm1 = vcmask 15368   ;;  %vm4258_vm2 = vcmask 23568   ;;  %vm5672_vm3 = vcmask 31768   ;;  %s12936_s0 = inlined_call_operand.vmem [shape: f32[1024,128], index: 0, kind: input, shape index: {}]   ;;  %s12937_s1 = inlined_call_operand.vmem [shape: f32[4,128], index: 1, kind: input, shape index: {}]   ;;  %s12938_s2 = inlined_call_operand.<no memory space> [shape: f32[1,1], index: 2, kind: input, shape index: {}]   ;;  %s12939_s3 = inlined_call_operand.vmem [shape: f32[1024,4], index: 3, kind: output, shape index: {}]  }
   0x1   :  { %v17_v0 = vld [vmem:[%s12936_s0 + $0x10] sm:$0xff]  ;;  %v8274_v1 = vld [vmem:[%s12937_s1] ss:$0 sm:$0xff]  ;;  %v18_v5 = vld [vmem:[%s12936_s0 + $0x18] sm:$0xff] }
   0x2   :  { %v15_v2 = vld [vmem:[%s12936_s0] sm:$0xff]  ;;  %v151_v3 = vmul.f32 %v8274_v1, %v17_v0  ;;  %v16_v6 = vld [vmem:[%s12936_s0 + $0x8] sm:$0xff]  ;;  %v152_v7 = vmul.f32 %v8274_v1, %v18_v5  ;;  %v22_v13 = vld [vmem:[%s12936_s0 + $0x38] sm:$0xff] }
   0x3   :  { %v149_v4 = vmul.f32 %v8274_v1, %v15_v2  ;;  %v150_v8 = vmul.f32 %v8274_v1, %v16_v6  ;;  %v20_v9 = vld [vmem:[%s12936_s0 + $0x28] sm:$0xff]  ;;  %v19_v10 = vld [vmem:[%s12936_s0 + $0x20] sm:$0xff]  ;;  %v21_v14 = vld [vmem:[%s12936_s0 + $0x30] sm:$0xff]  ;;  %v156_v15 = vmul.f32 %v8274_v1, %v22_v13 }
   0x4   :  { %281 = vadd.xlane.f32.xlu1 %v151_v3  ;;  %v154_v11 = vmul.f32 %v8274_v1, %v20_v9  ;;  %v153_v12 = vmul.f32 %v8274_v1, %v19_v10  ;;  %v155_v16 = vmul.f32 %v8274_v1, %v21_v14  ;;  %v24_v17 = vld [vmem:[%s12936_s0 + $0x48] sm:$0xff]  ;;  %v23_v18 = vld [vmem:[%s12936_s0 + $0x40] sm:$0xff]  ;;  %v26_v21 = vld [vmem:[%s12936_s0 + $0x58] sm:$0xff] }
   0x5   :  { %277 = vadd.xlane.f32.xlu0 %v149_v4  ;;  %v158_v19 = vmul.f32 %v8274_v1, %v24_v17  ;;  %v157_v20 = vmul.f32 %v8274_v1, %v23_v18  ;;  %v25_v22 = vld [vmem:[%s12936_s0 + $0x50] sm:$0xff]  ;;  %v160_v23 = vmul.f32 %v8274_v1, %v26_v21  ;;  %v28_v25 = vld [vmem:[%s12936_s0 + $0x68] sm:$0xff]  ;;  %v27_v26 = vld [vmem:[%s12936_s0 + $0x60] sm:$0xff] }
   0x6   :  { %v159_v24 = vmul.f32 %v8274_v1, %v25_v22  ;;  %v162_v27 = vmul.f32 %v8274_v1, %v28_v25  ;;  %v161_v28 = vmul.f32 %v8274_v1, %v27_v26  ;;  %v30_v29 = vld [vmem:[%s12936_s0 + $0x78] sm:$0xff]  ;;  %v29_v30 = vld [vmem:[%s12936_s0 + $0x70] sm:$0xff]  ;;  %v32_v33 = vld [vmem:[%s12936_s0 + $0x88] sm:$0xff] }
   0x7   :  { %v164_v31 = vmul.f32 %v8274_v1, %v30_v29  ;;  %v163_v32 = vmul.f32 %v8274_v1, %v29_v30  ;;  %v31_v34 = vld [vmem:[%s12936_s0 + $0x80] sm:$0xff]  ;;  %v166_v35 = vmul.f32 %v8274_v1, %v32_v33  ;;  %v34_v37 = vld [vmem:[%s12936_s0 + $0x98] sm:$0xff]  ;;  %v33_v38 = vld [vmem:[%s12936_s0 + $0x90] sm:$0xff] }
   0x8   :  { %283 = vadd.xlane.f32.xlu1 %v152_v7  ;;  %v165_v36 = vmul.f32 %v8274_v1, %v31_v34  ;;  %v168_v39 = vmul.f32 %v8274_v1, %v34_v37  ;;  %v167_v40 = vmul.f32 %v8274_v1, %v33_v38  ;;  %v36_v41 = vld [vmem:[%s12936_s0 + $0xa8] sm:$0xff]  ;;  %v35_v42 = vld [vmem:[%s12936_s0 + $0xa0] sm:$0xff]  ;;  %v38_v45 = vld [vmem:[%s12936_s0 + $0xb8] sm:$0xff] }
   0x9   :  { %279 = vadd.xlane.f32.xlu0 %v150_v8  ;;  %v170_v43 = vmul.f32 %v8274_v1, %v36_v41  ;;  %v169_v44 = vmul.f32 %v8274_v1, %v35_v42  ;;  %v37_v46 = vld [vmem:[%s12936_s0 + $0xb0] sm:$0xff]  ;;  %v172_v47 = vmul.f32 %v8274_v1, %v38_v45  ;;  %v40_v49 = vld [vmem:[%s12936_s0 + $0xc8] sm:$0xff]  ;;  %v39_v50 = vld [vmem:[%s12936_s0 + $0xc0] sm:$0xff] }
   0xa   :  { %v171_v48 = vmul.f32 %v8274_v1, %v37_v46  ;;  %v174_v51 = vmul.f32 %v8274_v1, %v40_v49  ;;  %v173_v52 = vmul.f32 %v8274_v1, %v39_v50  ;;  %v42_v53 = vld [vmem:[%s12936_s0 + $0xd8] sm:$0xff]  ;;  %v41_v54 = vld [vmem:[%s12936_s0 + $0xd0] sm:$0xff]  ;;  %v44_v57 = vld [vmem:[%s12936_s0 + $0xe8] sm:$0xff] }
   0xb   :  { %v176_v55 = vmul.f32 %v8274_v1, %v42_v53  ;;  %v175_v56 = vmul.f32 %v8274_v1, %v41_v54  ;;  %v43_v58 = vld [vmem:[%s12936_s0 + $0xe0] sm:$0xff]  ;;  %v178_v59 = vmul.f32 %v8274_v1, %v44_v57  ;;  %v46_v61 = vld [vmem:[%s12936_s0 + $0xf8] sm:$0xff]  ;;  %v45_v62 = vld [vmem:[%s12936_s0 + $0xf0] sm:$0xff] }
   0xc   :  { %287 = vadd.xlane.f32.xlu1 %v154_v11  ;;  %v177_v60 = vmul.f32 %v8274_v1, %v43_v58  ;;  %v180_v63 = vmul.f32 %v8274_v1, %v46_v61  ;;  %v179_v0 = vmul.f32 %v8274_v1, %v45_v62  ;;  %v48_v2 = vld [vmem:[%s12936_s0 + $0x108] sm:$0xff]  ;;  %v47_v3 = vld [vmem:[%s12936_s0 + $0x100] sm:$0xff]  ;;  %v50_v6 = vld [vmem:[%s12936_s0 + $0x118] sm:$0xff] }
   0xd   :  { %285 = vadd.xlane.f32.xlu0 %v153_v12  ;;  %v182_v4 = vmul.f32 %v8274_v1, %v48_v2  ;;  %v181_v5 = vmul.f32 %v8274_v1, %v47_v3  ;;  %v49_v7 = vld [vmem:[%s12936_s0 + $0x110] sm:$0xff]  ;;  %v184_v8 = vmul.f32 %v8274_v1, %v50_v6  ;;  %v52_v10 = vld [vmem:[%s12936_s0 + $0x128] sm:$0xff]  ;;  %v51_v11 = vld [vmem:[%s12936_s0 + $0x120] sm:$0xff] }
   0xe   :  { %v183_v9 = vmul.f32 %v8274_v1, %v49_v7  ;;  %v186_v12 = vmul.f32 %v8274_v1, %v52_v10  ;;  %v185_v13 = vmul.f32 %v8274_v1, %v51_v11  ;;  %v54_v14 = vld [vmem:[%s12936_s0 + $0x138] sm:$0xff]  ;;  %v56_v18 = vld [vmem:[%s12936_s0 + $0x148] sm:$0xff] }
   0xf   :  { %v58_v22 = vld [vmem:[%s12936_s0 + $0x158] sm:$0xff]  ;;  %v60_v26 = vld [vmem:[%s12936_s0 + $0x168] sm:$0xff] }
  0x10   :  { %291 = vadd.xlane.f32.xlu1 %v156_v15  ;;  %v53_v15 = vld [vmem:[%s12936_s0 + $0x130] sm:$0xff]  ;;  %v62_v30 = vld [vmem:[%s12936_s0 + $0x178] sm:$0xff]  ;;  %v64_v34 = vld [vmem:[%s12936_s0 + $0x188] sm:$0xff] }
  0x11   :  { %289 = vadd.xlane.f32.xlu0 %v155_v16  ;;  %v188_v16 = vmul.f32 %v8274_v1, %v54_v14  ;;  %v187_v17 = vmul.f32 %v8274_v1, %v53_v15  ;;  %v66_v38 = vld [vmem:[%s12936_s0 + $0x198] sm:$0xff]  ;;  %v68_v42 = vld [vmem:[%s12936_s0 + $0x1a8] sm:$0xff] }
  0x12   :  { %v70_v46 = vld [vmem:[%s12936_s0 + $0x1b8] sm:$0xff]  ;;  %v72_v50 = vld [vmem:[%s12936_s0 + $0x1c8] sm:$0xff] }
  0x13   :  { %v74_v54 = vld [vmem:[%s12936_s0 + $0x1d8] sm:$0xff]  ;;  %v76_v58 = vld [vmem:[%s12936_s0 + $0x1e8] sm:$0xff] }
  0x14   :  { %295 = vadd.xlane.f32.xlu1 %v158_v19  ;;  %v55_v19 = vld [vmem:[%s12936_s0 + $0x140] sm:$0xff]  ;;  %v78_v62 = vld [vmem:[%s12936_s0 + $0x1f8] sm:$0xff]  ;;  %v80_v3 = vld [vmem:[%s12936_s0 + $0x208] sm:$0xff] }
  0x15   :  { %293 = vadd.xlane.f32.xlu0 %v157_v20  ;;  %v190_v20 = vmul.f32 %v8274_v1, %v56_v18  ;;  %v189_v21 = vmul.f32 %v8274_v1, %v55_v19  ;;  %v82_v7 = vld [vmem:[%s12936_s0 + $0x218] sm:$0xff]  ;;  %v84_v11 = vld [vmem:[%s12936_s0 + $0x228] sm:$0xff] }
  0x16   :  { %v86_v15 = vld [vmem:[%s12936_s0 + $0x238] sm:$0xff]  ;;  %v88_v19 = vld [vmem:[%s12936_s0 + $0x248] sm:$0xff] }
  0x18   :  { %299 = vadd.xlane.f32.xlu1 %v160_v23  ;;  %v57_v23 = vld [vmem:[%s12936_s0 + $0x150] sm:$0xff] }
  0x19   :  { %297 = vadd.xlane.f32.xlu0 %v159_v24  ;;  %v192_v24 = vmul.f32 %v8274_v1, %v58_v22  ;;  %v191_v25 = vmul.f32 %v8274_v1, %v57_v23  ;;  %v222_v22 = vmul.f32 %v8274_v1, %v88_v19 }
  0x1c   :  { %303 = vadd.xlane.f32.xlu1 %v162_v27  ;;  %v59_v27 = vld [vmem:[%s12936_s0 + $0x160] sm:$0xff] }
  0x1d   :  { %301 = vadd.xlane.f32.xlu0 %v161_v28  ;;  %v194_v28 = vmul.f32 %v8274_v1, %v60_v26  ;;  %v193_v29 = vmul.f32 %v8274_v1, %v59_v27  ;;  %v90_v26 = vld [vmem:[%s12936_s0 + $0x258] sm:$0xff]  ;;  %v89_v27 = vld [vmem:[%s12936_s0 + $0x250] sm:$0xff] }
  0x20   :  { %307 = vadd.xlane.f32.xlu1 %v164_v31  ;;  %v61_v31 = vld [vmem:[%s12936_s0 + $0x170] sm:$0xff] }
  0x21   :  { %305 = vadd.xlane.f32.xlu0 %v163_v32  ;;  %v196_v32 = vmul.f32 %v8274_v1, %v62_v30  ;;  %v195_v33 = vmul.f32 %v8274_v1, %v61_v31 }
  0x24   :  { %311 = vadd.xlane.f32.xlu1 %v166_v35  ;;  %v63_v35 = vld [vmem:[%s12936_s0 + $0x180] sm:$0xff] }
  0x25   :  { %309 = vadd.xlane.f32.xlu0 %v165_v36  ;;  %v198_v36 = vmul.f32 %v8274_v1, %v64_v34  ;;  %v197_v37 = vmul.f32 %v8274_v1, %v63_v35  ;;  %v92_v34 = vld [vmem:[%s12936_s0 + $0x268] sm:$0xff] }
  0x28   :  { %315 = vadd.xlane.f32.xlu1 %v168_v39  ;;  %v65_v39 = vld [vmem:[%s12936_s0 + $0x190] sm:$0xff] }
  0x29   :  { %313 = vadd.xlane.f32.xlu0 %v167_v40  ;;  %v200_v40 = vmul.f32 %v8274_v1, %v66_v38  ;;  %v199_v41 = vmul.f32 %v8274_v1, %v65_v39 }
  0x2c   :  { %319 = vadd.xlane.f32.xlu1 %v170_v43  ;;  %v67_v43 = vld [vmem:[%s12936_s0 + $0x1a0] sm:$0xff] }
  0x2d   :  { %317 = vadd.xlane.f32.xlu0 %v169_v44  ;;  %v202_v44 = vmul.f32 %v8274_v1, %v68_v42  ;;  %v201_v45 = vmul.f32 %v8274_v1, %v67_v43  ;;  %v226_v42 = vmul.f32 %v8274_v1, %v92_v34 }
  0x30   :  { %323 = vadd.xlane.f32.xlu1 %v172_v47  ;;  %v69_v47 = vld [vmem:[%s12936_s0 + $0x1b0] sm:$0xff] }
  0x31   :  { %321 = vadd.xlane.f32.xlu0 %v171_v48  ;;  %v204_v48 = vmul.f32 %v8274_v1, %v70_v46  ;;  %v203_v49 = vmul.f32 %v8274_v1, %v69_v47  ;;  %v94_v46 = vld [vmem:[%s12936_s0 + $0x278] sm:$0xff] }
  0x34   :  { %327 = vadd.xlane.f32.xlu1 %v174_v51  ;;  %v71_v51 = vld [vmem:[%s12936_s0 + $0x1c0] sm:$0xff] }
  0x35   :  { %325 = vadd.xlane.f32.xlu0 %v173_v52  ;;  %v206_v52 = vmul.f32 %v8274_v1, %v72_v50  ;;  %v205_v53 = vmul.f32 %v8274_v1, %v71_v51 }
  0x38   :  { %331 = vadd.xlane.f32.xlu1 %v176_v55  ;;  %v73_v55 = vld [vmem:[%s12936_s0 + $0x1d0] sm:$0xff] }
  0x39   :  { %329 = vadd.xlane.f32.xlu0 %v175_v56  ;;  %v208_v56 = vmul.f32 %v8274_v1, %v74_v54  ;;  %v207_v57 = vmul.f32 %v8274_v1, %v73_v55  ;;  %v228_v54 = vmul.f32 %v8274_v1, %v94_v46 }
  0x3c   :  { %335 = vadd.xlane.f32.xlu1 %v178_v59  ;;  %v75_v59 = vld [vmem:[%s12936_s0 + $0x1e0] sm:$0xff] }
  0x3d   :  { %333 = vadd.xlane.f32.xlu0 %v177_v60  ;;  %v210_v60 = vmul.f32 %v8274_v1, %v76_v58  ;;  %v209_v61 = vmul.f32 %v8274_v1, %v75_v59  ;;  %v96_v58 = vld [vmem:[%s12936_s0 + $0x288] sm:$0xff] }
  0x40   :  { %339 = vadd.xlane.f32.xlu1 %v180_v63  ;;  %v77_v63 = vld [vmem:[%s12936_s0 + $0x1f0] sm:$0xff] }
  0x41   :  { %337 = vadd.xlane.f32.xlu0 %v179_v0  ;;  %v212_v0 = vmul.f32 %v8274_v1, %v78_v62  ;;  %v211_v2 = vmul.f32 %v8274_v1, %v77_v63 }
  0x44   :  { %343 = vadd.xlane.f32.xlu1 %v182_v4  ;;  %v79_v4 = vld [vmem:[%s12936_s0 + $0x200] sm:$0xff] }
  0x45   :  { %341 = vadd.xlane.f32.xlu0 %v181_v5  ;;  %v214_v5 = vmul.f32 %v8274_v1, %v80_v3  ;;  %v213_v6 = vmul.f32 %v8274_v1, %v79_v4  ;;  %v230_v3 = vmul.f32 %v8274_v1, %v96_v58  ;;  %v104_v58 = vld [vmem:[%s12936_s0 + $0x2c8] sm:$0xff] }
  0x48   :  { %347 = vadd.xlane.f32.xlu1 %v184_v8  ;;  %v81_v8 = vld [vmem:[%s12936_s0 + $0x210] sm:$0xff] }
  0x49   :  { %345 = vadd.xlane.f32.xlu0 %v183_v9  ;;  %v216_v9 = vmul.f32 %v8274_v1, %v82_v7  ;;  %v215_v10 = vmul.f32 %v8274_v1, %v81_v8  ;;  %v98_v7 = vld [vmem:[%s12936_s0 + $0x298] sm:$0xff]  ;;  %v97_v8 = vld [vmem:[%s12936_s0 + $0x290] sm:$0xff] }
  0x4a   :  { %v231_v19 = vmul.f32 %v8274_v1, %v97_v8 }
  0x4c   :  { %351 = vadd.xlane.f32.xlu1 %v186_v12  ;;  %v83_v12 = vld [vmem:[%s12936_s0 + $0x220] sm:$0xff] }
  0x4d   :  { %349 = vadd.xlane.f32.xlu0 %v185_v13  ;;  %v218_v13 = vmul.f32 %v8274_v1, %v84_v11  ;;  %v217_v14 = vmul.f32 %v8274_v1, %v83_v12 }
  0x50   :  { %355 = vadd.xlane.f32.xlu1 %v188_v16  ;;  %v85_v16 = vld [vmem:[%s12936_s0 + $0x230] sm:$0xff] }
  0x51   :  { %353 = vadd.xlane.f32.xlu0 %v187_v17  ;;  %v220_v17 = vmul.f32 %v8274_v1, %v86_v15  ;;  %v219_v18 = vmul.f32 %v8274_v1, %v85_v16 }
  0x54   :  { %359 = vadd.xlane.f32.xlu1 %v190_v20  ;;  %v87_v20 = vld [vmem:[%s12936_s0 + $0x240] sm:$0xff] }
  0x55   :  { %357 = vadd.xlane.f32.xlu0 %v189_v21  ;;  %v8570_v21 = vstv %s12938_s2  ;;  %v221_v23 = vmul.f32 %v8274_v1, %v87_v20  ;;  %v100_v20 = vld [vmem:[%s12936_s0 + $0x2a8] sm:$0xff] }
  0x58   :  { %363 = vadd.xlane.f32.xlu1 %v192_v24 }
  0x59   :  { %361 = vadd.xlane.f32.xlu0 %v191_v25 }
  0x5c   :  { %367 = vadd.xlane.f32.xlu1 %v194_v28 }
  0x5d   :  { %365 = vadd.xlane.f32.xlu0 %v193_v29 }
  0x60   :  { %371 = vadd.xlane.f32.xlu1 %v196_v32  ;;  %v224_v32 = vmul.f32 %v8274_v1, %v90_v26 }
  0x61   :  { %369 = vadd.xlane.f32.xlu0 %v195_v33  ;;  %v223_v33 = vmul.f32 %v8274_v1, %v89_v27  ;;  %v99_v27 = vld [vmem:[%s12936_s0 + $0x2a0] sm:$0xff] }
  0x64   :  { %375 = vadd.xlane.f32.xlu1 %v198_v36 }
  0x65   :  { %373 = vadd.xlane.f32.xlu0 %v197_v37  ;;  %v91_v37 = vld [vmem:[%s12936_s0 + $0x260] sm:$0xff] }
  0x68   :  { %379 = vadd.xlane.f32.xlu1 %v200_v40 }
  0x69   :  { %377 = vadd.xlane.f32.xlu0 %v199_v41 }
  0x6c   :  { %383 = vadd.xlane.f32.xlu1 %v202_v44 }
  0x6d   :  { %381 = vadd.xlane.f32.xlu0 %v201_v45  ;;  %v225_v45 = vmul.f32 %v8274_v1, %v91_v37 }
  0x70   :  { %387 = vadd.xlane.f32.xlu1 %v204_v48 }
  0x71   :  { %385 = vadd.xlane.f32.xlu0 %v203_v49  ;;  %v93_v49 = vld [vmem:[%s12936_s0 + $0x270] sm:$0xff] }
  0x74   :  { %391 = vadd.xlane.f32.xlu1 %v206_v52 }
  0x75   :  { %389 = vadd.xlane.f32.xlu0 %v205_v53 }
  0x78   :  { %395 = vadd.xlane.f32.xlu1 %v208_v56 }
  0x79   :  { %393 = vadd.xlane.f32.xlu0 %v207_v57  ;;  %v227_v57 = vmul.f32 %v8274_v1, %v93_v49 }
  0x7c   :  { %399 = vadd.xlane.f32.xlu1 %v210_v60 }
  0x7d   :  { %397 = vadd.xlane.f32.xlu0 %v209_v61  ;;  %v95_v61 = vld [vmem:[%s12936_s0 + $0x280] sm:$0xff] }
  0x80   :  { %403 = vadd.xlane.f32.xlu1 %v212_v0 }
  0x81   :  { %401 = vadd.xlane.f32.xlu0 %v211_v2 }
  0x84   :  { %407 = vadd.xlane.f32.xlu1 %v214_v5 }
  0x85   :  { %405 = vadd.xlane.f32.xlu0 %v213_v6  ;;  %v229_v6 = vmul.f32 %v8274_v1, %v95_v61 }
  0x88   :  { %411 = vadd.xlane.f32.xlu1 %v216_v9 }
  0x89   :  { %409 = vadd.xlane.f32.xlu0 %v215_v10 }
  0x8c   :  { %415 = vadd.xlane.f32.xlu1 %v218_v13 }
  0x8d   :  { %413 = vadd.xlane.f32.xlu0 %v217_v14 }
  0x90   :  { %419 = vadd.xlane.f32.xlu1 %v220_v17 }
  0x91   :  { %417 = vadd.xlane.f32.xlu0 %v219_v18  ;;  %v282_v24 = vpop.xlane.xlu1 %281  ;;  %v232_v18 = vmul.f32 %v8274_v1, %v98_v7 }
  0x92   :  { %v278_v25 = vpop.xlane.xlu0 %277  ;;  %v536_v28 = vadd.f32 %v8570_v21, %v282_v24 }
  0x93   :  { %v534_v29 = vadd.f32 %v8570_v21, %v278_v25 }
  0x94   :  { %v664_v30 = vsub.f32 0.0, %v536_v28  ;;  %423 = vadd.xlane.f32.xlu1 %v222_v22 }
  0x95   :  { %v662_v31 = vsub.f32 0.0, %v534_v29  ;;  %421 = vadd.xlane.f32.xlu0 %v221_v23  ;;  %v284_v35 = vpop.xlane.xlu1 %283 }
  0x96   :  { %v280_v36 = vpop.xlane.xlu0 %279  ;;  %v794_v38 = vmul.f32 1.442695, %v664_v30  ;;  %v537_v40 = vadd.f32 %v8570_v21, %v284_v35 }
  0x97   :  { %v790_v39 = vmul.f32 1.442695, %v662_v31  ;;  %v535_v41 = vadd.f32 %v8570_v21, %v280_v36  ;;  %v234_v31 = vmul.f32 %v8274_v1, %v100_v20 }
  0x98   :  { %5809 = vpow2.f32 %v794_v38  ;;  %v665_v43 = vsub.f32 0.0, %v537_v40  ;;  %427 = vadd.xlane.f32.xlu1 %v224_v32  ;;  %v102_v32 = vld [vmem:[%s12936_s0 + $0x2b8] sm:$0xff]  ;;  %v101_v40 = vld [vmem:[%s12936_s0 + $0x2b0] sm:$0xff] }
  0x99   :  { %v663_v44 = vsub.f32 0.0, %v535_v41  ;;  %425 = vadd.xlane.f32.xlu0 %v223_v33  ;;  %5811 = vpow2.f32 %v790_v39  ;;  %v288_v47 = vpop.xlane.xlu1 %287  ;;  %v233_v39 = vmul.f32 %v8274_v1, %v99_v27 }
  0x9a   :  { %v286_v48 = vpop.xlane.xlu0 %285  ;;  %v796_v50 = vmul.f32 1.442695, %v665_v43  ;;  %v539_v52 = vadd.f32 %v8570_v21, %v288_v47 }
  0x9b   :  { %v792_v51 = vmul.f32 1.442695, %v663_v44  ;;  %v538_v53 = vadd.f32 %v8570_v21, %v286_v48  ;;  %v236_v44 = vmul.f32 %v8274_v1, %v102_v32  ;;  %v107_v32 = vld [vmem:[%s12936_s0 + $0x2e0] sm:$0xff] }
  0x9c   :  { %5813 = vpow2.f32 %v796_v50  ;;  %v667_v55 = vsub.f32 0.0, %v539_v52  ;;  %431 = vadd.xlane.f32.xlu1 %v226_v42  ;;  %v235_v52 = vmul.f32 %v8274_v1, %v101_v40 }
  0x9d   :  { %v666_v56 = vsub.f32 0.0, %v538_v53  ;;  %429 = vadd.xlane.f32.xlu0 %v225_v45  ;;  %5815 = vpow2.f32 %v792_v51  ;;  %v292_v59 = vpop.xlane.xlu1 %291 }
  0x9e   :  { %v290_v60 = vpop.xlane.xlu0 %289  ;;  %v800_v62 = vmul.f32 1.442695, %v667_v55  ;;  %v541_v0 = vadd.f32 %v8570_v21, %v292_v59  ;;  %v103_v59 = vld [vmem:[%s12936_s0 + $0x2c0] sm:$0xff] }
  0x9f   :  { %v798_v63 = vmul.f32 1.442695, %v666_v56  ;;  %v540_v2 = vadd.f32 %v8570_v21, %v290_v60  ;;  %v237_v7 = vmul.f32 %v8274_v1, %v103_v59 }
  0xa0   :  { %5817 = vpow2.f32 %v800_v62  ;;  %v669_v4 = vsub.f32 0.0, %v541_v0  ;;  %435 = vadd.xlane.f32.xlu1 %v228_v54 }
  0xa1   :  { %v668_v5 = vsub.f32 0.0, %v540_v2  ;;  %433 = vadd.xlane.f32.xlu0 %v227_v57  ;;  %5819 = vpow2.f32 %v798_v63  ;;  %v296_v9 = vpop.xlane.xlu1 %295 }
  0xa2   :  { %v294_v10 = vpop.xlane.xlu0 %293  ;;  %v5810_v11 = vpop.eup %5809  ;;  %v804_v12 = vmul.f32 1.442695, %v669_v4  ;;  %v543_v13 = vadd.f32 %v8570_v21, %v296_v9 }
  0xa3   :  { %v542_v14 = vadd.f32 %v8570_v21, %v294_v10  ;;  %v5812_v15 = vpop.eup %5811  ;;  %v1048_v16 = vadd.f32 1.0, %v5810_v11  ;;  %v802_v17 = vmul.f32 1.442695, %v668_v5 }
  0xa4   :  { %v1046_v22 = vadd.f32 1.0, %v5812_v15  ;;  %5821 = vpow2.f32 %v804_v12  ;;  %v671_v23 = vsub.f32 0.0, %v543_v13  ;;  %439 = vadd.xlane.f32.xlu1 %v230_v3  ;;  %v106_v12 = vld [vmem:[%s12936_s0 + $0x2d8] sm:$0xff]  ;;  %v105_v13 = vld [vmem:[%s12936_s0 + $0x2d0] sm:$0xff] }
  0xa5   :  { %v670_v24 = vsub.f32 0.0, %v542_v14  ;;  %437 = vadd.xlane.f32.xlu0 %v229_v6  ;;  %5823 = vrcp.f32 %v1048_v16  ;;  %v300_v25 = vpop.xlane.xlu1 %299  ;;  %v238_v6 = vmul.f32 %v8274_v1, %v104_v58 }
  0xa6   :  { %v298_v26 = vpop.xlane.xlu0 %297  ;;  %v5814_v28 = vpop.eup %5813  ;;  %5825 = vrcp.f32 %v1046_v22  ;;  %v808_v29 = vmul.f32 1.442695, %v671_v23  ;;  %v545_v30 = vadd.f32 %v8570_v21, %v300_v25  ;;  %v240_v25 = vmul.f32 %v8274_v1, %v106_v12 }
  0xa7   :  { %v5816_v33 = vpop.eup %5815  ;;  %v1049_v34 = vadd.f32 1.0, %v5814_v28  ;;  %5827 = vpow2.f32 %v802_v17  ;;  %v806_v35 = vmul.f32 1.442695, %v670_v24  ;;  %v544_v36 = vadd.f32 %v8570_v21, %v298_v26 }
  0xa8   :  { %v1047_v37 = vadd.f32 1.0, %v5816_v33  ;;  %5829 = vpow2.f32 %v808_v29  ;;  %v673_v38 = vsub.f32 0.0, %v545_v30  ;;  %443 = vadd.xlane.f32.xlu1 %v232_v18  ;;  %v239_v26 = vmul.f32 %v8274_v1, %v105_v13 }
  0xa9   :  { %441 = vadd.xlane.f32.xlu0 %v231_v19  ;;  %5831 = vrcp.f32 %v1049_v34  ;;  %v672_v41 = vsub.f32 0.0, %v544_v36  ;;  %v304_v42 = vpop.xlane.xlu1 %303 }
  0xaa   :  { %v302_v43 = vpop.xlane.xlu0 %301  ;;  %v5818_v45 = vpop.eup %5817  ;;  %5833 = vrcp.f32 %v1047_v37  ;;  %v812_v46 = vmul.f32 1.442695, %v673_v38  ;;  %v547_v47 = vadd.f32 %v8570_v21, %v304_v42 }
  0xab   :  { %v546_v48 = vadd.f32 %v8570_v21, %v302_v43  ;;  %v5820_v49 = vpop.eup %5819  ;;  %v1051_v50 = vadd.f32 1.0, %v5818_v45  ;;  %5835 = vpow2.f32 %v806_v35  ;;  %v810_v51 = vmul.f32 1.442695, %v672_v41  ;;  %v110_v45 = vld [vmem:[%s12936_s0 + $0x2f8] sm:$0xff] }
  0xac   :  { %v1050_v53 = vadd.f32 1.0, %v5820_v49  ;;  %5837 = vpow2.f32 %v812_v46  ;;  %v675_v54 = vsub.f32 0.0, %v547_v47  ;;  %447 = vadd.xlane.f32.xlu1 %v234_v31  ;;  %v108_v31 = vld [vmem:[%s12936_s0 + $0x2e8] sm:$0xff]  ;;  %v244_v58 = vmul.f32 %v8274_v1, %v110_v45 }
  0xad   :  { %v674_v55 = vsub.f32 0.0, %v546_v48  ;;  %445 = vadd.xlane.f32.xlu0 %v233_v39  ;;  %5839 = vrcp.f32 %v1051_v50  ;;  %v308_v56 = vpop.xlane.xlu1 %307  ;;  %v242_v43 = vmul.f32 %v8274_v1, %v108_v31  ;;  %v109_v50 = vld [vmem:[%s12936_s0 + $0x2f0] sm:$0xff] }
  0xae   :  { %v306_v57 = vpop.xlane.xlu0 %305  ;;  %v5822_v60 = vpop.eup %5821  ;;  %5841 = vrcp.f32 %v1050_v53  ;;  %v816_v61 = vmul.f32 1.442695, %v675_v54  ;;  %v549_v63 = vadd.f32 %v8570_v21, %v308_v56 }
  0xaf   :  { %v814_v62 = vmul.f32 1.442695, %v674_v55  ;;  %v5824_v0 = vpop.eup %5823  ;;  %v1053_v2 = vadd.f32 1.0, %v5822_v60  ;;  %5843 = vpow2.f32 %v810_v51  ;;  %v548_v3 = vadd.f32 %v8570_v21, %v306_v57 }
  0xb0   :  { %v5826_v4 = vpop.eup %5825  ;;  %1433 = vst.msk [vmem:[%s12939_s3 + $0x10] sm:$0xff] %vm1430_vm0, %v5824_v0  ;;  %5845 = vpow2.f32 %v816_v61  ;;  %v677_v5 = vsub.f32 0.0, %v549_v63  ;;  %451 = vadd.xlane.f32.xlu1 %v236_v44  ;;  %v241_v44 = vmul.f32 %v8274_v1, %v107_v32  ;;  %v112_v63 = vld [vmem:[%s12936_s0 + $0x308] sm:$0xff] }
  0xb1   :  { %449 = vadd.xlane.f32.xlu0 %v235_v52  ;;  %v5828_v8 = vpop.eup %5827  ;;  %1431 = vst.msk [vmem:[%s12939_s3] sm:$0xff] %vm1430_vm0, %v5826_v4  ;;  %5847 = vrcp.f32 %v1053_v2  ;;  %v676_v9 = vsub.f32 0.0, %v548_v3  ;;  %v312_v10 = vpop.xlane.xlu1 %311  ;;  %v246_v12 = vmul.f32 %v8274_v1, %v112_v63 }
  0xb2   :  { %v310_v11 = vpop.xlane.xlu0 %309  ;;  %v5830_v14 = vpop.eup %5829  ;;  %v1052_v15 = vadd.f32 1.0, %v5828_v8  ;;  %5849 = vpow2.f32 %v814_v62  ;;  %v820_v16 = vmul.f32 1.442695, %v677_v5  ;;  %v551_v17 = vadd.f32 %v8570_v21, %v312_v10  ;;  %v111_v5 = vld [vmem:[%s12936_s0 + $0x300] sm:$0xff] }
  0xb3   :  { %v5832_v18 = vpop.eup %5831  ;;  %v1055_v19 = vadd.f32 1.0, %v5830_v14  ;;  %v818_v20 = vmul.f32 1.442695, %v676_v9  ;;  %v550_v22 = vadd.f32 %v8570_v21, %v310_v11  ;;  %v243_v62 = vmul.f32 %v8274_v1, %v109_v50  ;;  %v118_v50 = vld [vmem:[%s12936_s0 + $0x338] sm:$0xff] }
  0xb4   :  { %v5834_v23 = vpop.eup %5833  ;;  %1434 = vst.msk [vmem:[%s12939_s3 + $0x18] sm:$0xff] %vm1430_vm0, %v5832_v18  ;;  %5851 = vrcp.f32 %v1052_v15  ;;  %v679_v24 = vsub.f32 0.0, %v551_v17  ;;  %455 = vadd.xlane.f32.xlu1 %v238_v6 }
  0xb5   :  { %453 = vadd.xlane.f32.xlu0 %v237_v7  ;;  %v5836_v27 = vpop.eup %5835  ;;  %1432 = vst.msk [vmem:[%s12939_s3 + $0x8] sm:$0xff] %vm1430_vm0, %v5834_v23  ;;  %5853 = vrcp.f32 %v1055_v19  ;;  %v678_v28 = vsub.f32 0.0, %v550_v22  ;;  %v316_v29 = vpop.xlane.xlu1 %315  ;;  %v114_v22 = vld [vmem:[%s12936_s0 + $0x318] sm:$0xff]  ;;  %v113_v23 = vld [vmem:[%s12936_s0 + $0x310] sm:$0xff] }
  0xb6   :  { %v314_v30 = vpop.xlane.xlu0 %313  ;;  %v5838_v33 = vpop.eup %5837  ;;  %v1054_v34 = vadd.f32 1.0, %v5836_v27  ;;  %5855 = vpow2.f32 %v820_v16  ;;  %v824_v35 = vmul.f32 1.442695, %v679_v24  ;;  %v553_v36 = vadd.f32 %v8570_v21, %v316_v29 }
  0xb7   :  { %v5840_v37 = vpop.eup %5839  ;;  %v1057_v38 = vadd.f32 1.0, %v5838_v33  ;;  %5857 = vpow2.f32 %v818_v20  ;;  %v822_v39 = vmul.f32 1.442695, %v678_v28  ;;  %v552_v40 = vadd.f32 %v8570_v21, %v314_v30 }
  0xb8   :  { %v5842_v41 = vpop.eup %5841  ;;  %1436 = vst.msk [vmem:[%s12939_s3 + $0x28] sm:$0xff] %vm1430_vm0, %v5840_v37  ;;  %5859 = vrcp.f32 %v1054_v34  ;;  %v681_v42 = vsub.f32 0.0, %v553_v36  ;;  %459 = vadd.xlane.f32.xlu1 %v240_v25  ;;  %v245_v16 = vmul.f32 %v8274_v1, %v111_v5  ;;  %v248_v32 = vmul.f32 %v8274_v1, %v114_v22  ;;  %v116_v34 = vld [vmem:[%s12936_s0 + $0x328] sm:$0xff] }
  0xb9   :  { %457 = vadd.xlane.f32.xlu0 %v239_v26  ;;  %v5844_v46 = vpop.eup %5843  ;;  %1435 = vst.msk [vmem:[%s12939_s3 + $0x20] sm:$0xff] %vm1430_vm0, %v5842_v41  ;;  %5861 = vrcp.f32 %v1057_v38  ;;  %v680_v47 = vsub.f32 0.0, %v552_v40  ;;  %v320_v48 = vpop.xlane.xlu1 %319  ;;  %v247_v33 = vmul.f32 %v8274_v1, %v113_v23  ;;  %v115_v41 = vld [vmem:[%s12936_s0 + $0x320] sm:$0xff] }
  0xba   :  { %v318_v49 = vpop.xlane.xlu0 %317  ;;  %v5846_v51 = vpop.eup %5845  ;;  %v1056_v52 = vadd.f32 1.0, %v5844_v46  ;;  %5863 = vpow2.f32 %v824_v35  ;;  %v828_v53 = vmul.f32 1.442695, %v681_v42  ;;  %v555_v54 = vadd.f32 %v8570_v21, %v320_v48  ;;  %v8763_v48 = vld [vmem:[%s12937_s1] ss:$0 sm:$0xff] }
  0xbb   :  { %v5848_v55 = vpop.eup %5847  ;;  %v1059_v56 = vadd.f32 1.0, %v5846_v51  ;;  %5865 = vpow2.f32 %v822_v39  ;;  %v554_v57 = vadd.f32 %v8570_v21, %v318_v49  ;;  %v826_v60 = vmul.f32 1.442695, %v680_v47 }
  0xbc   :  { %v5850_v59 = vpop.eup %5849  ;;  %1438 = vst.msk [vmem:[%s12939_s3 + $0x38] sm:$0xff] %vm1430_vm0, %v5848_v55  ;;  %5867 = vrcp.f32 %v1056_v52  ;;  %v683_v61 = vsub.f32 0.0, %v555_v54  ;;  %463 = vadd.xlane.f32.xlu1 %v242_v43  ;;  %v250_v49 = vmul.f32 %v8763_v48, %v116_v34  ;;  %v249_v54 = vmul.f32 %v8763_v48, %v115_v41  ;;  %v117_v55 = vld [vmem:[%s12936_s0 + $0x330] sm:$0xff] }
  0xbd   :  { %461 = vadd.xlane.f32.xlu0 %v241_v44  ;;  %5869 = vrcp.f32 %v1059_v56  ;;  %v1058_v0 = vadd.f32 1.0, %v5850_v59  ;;  %v682_v2 = vsub.f32 0.0, %v554_v57  ;;  %v324_v3 = vpop.xlane.xlu1 %323  ;;  %v252_v63 = vmul.f32 %v8763_v48, %v118_v50 }
  0xbe   :  { %v322_v4 = vpop.xlane.xlu0 %321  ;;  %v5852_v6 = vpop.eup %5851  ;;  %5871 = vpow2.f32 %v828_v53  ;;  %v832_v7 = vmul.f32 1.442695, %v683_v61  ;;  %v557_v8 = vadd.f32 %v8570_v21, %v324_v3 }
  0xbf   :  { %v556_v9 = vadd.f32 %v8570_v21, %v322_v4  ;;  %v5854_v10 = vpop.eup %5853  ;;  %1437 = vst.msk [vmem:[%s12939_s3 + $0x30] sm:$0xff] %vm1430_vm0, %v5852_v6  ;;  %5873 = vrcp.f32 %v1058_v0  ;;  %v830_v11 = vmul.f32 1.442695, %v682_v2  ;;  %v251_v4 = vmul.f32 %v8763_v48, %v117_v55 }
  0xc0   :  { %v5856_v13 = vpop.eup %5855  ;;  %1440 = vst.msk [vmem:[%s12939_s3 + $0x48] sm:$0xff] %vm1430_vm0, %v5854_v10  ;;  %5875 = vpow2.f32 %v826_v60  ;;  %v685_v14 = vsub.f32 0.0, %v557_v8  ;;  %467 = vadd.xlane.f32.xlu1 %v244_v58  ;;  %v119_v10 = vld [vmem:[%s12936_s0 + $0x340] sm:$0xff] }
  0xc1   :  { %v684_v15 = vsub.f32 0.0, %v556_v9  ;;  %465 = vadd.xlane.f32.xlu0 %v243_v62  ;;  %v5858_v17 = vpop.eup %5857  ;;  %v1061_v18 = vadd.f32 1.0, %v5856_v13  ;;  %5877 = vpow2.f32 %v832_v7  ;;  %v328_v19 = vpop.xlane.xlu1 %327  ;;  %v120_v9 = vld [vmem:[%s12936_s0 + $0x348] sm:$0xff] }
  0xc2   :  { %v326_v20 = vpop.xlane.xlu0 %325  ;;  %v5860_v24 = vpop.eup %5859  ;;  %v1060_v25 = vadd.f32 1.0, %v5858_v17  ;;  %5879 = vpow2.f32 %v830_v11  ;;  %v836_v26 = vmul.f32 1.442695, %v685_v14  ;;  %v559_v29 = vadd.f32 %v8570_v21, %v328_v19 }
  0xc3   :  { %v834_v27 = vmul.f32 1.442695, %v684_v15  ;;  %v5862_v28 = vpop.eup %5861  ;;  %1439 = vst.msk [vmem:[%s12939_s3 + $0x40] sm:$0xff] %vm1430_vm0, %v5860_v24  ;;  %5881 = vrcp.f32 %v1061_v18  ;;  %v558_v30 = vadd.f32 %v8570_v21, %v326_v20  ;;  %v254_v23 = vmul.f32 %v8763_v48, %v120_v9 }
  0xc4   :  { %v5864_v31 = vpop.eup %5863  ;;  %1442 = vst.msk [vmem:[%s12939_s3 + $0x58] sm:$0xff] %vm1430_vm0, %v5862_v28  ;;  %5883 = vrcp.f32 %v1060_v25  ;;  %471 = vadd.xlane.f32.xlu1 %v246_v12  ;;  %v687_v37 = vsub.f32 0.0, %v559_v29  ;;  %v253_v24 = vmul.f32 %v8763_v48, %v119_v10  ;;  %v122_v29 = vld [vmem:[%s12936_s0 + $0x358] sm:$0xff] }
  0xc5   :  { %469 = vadd.xlane.f32.xlu0 %v245_v16  ;;  %v5866_v35 = vpop.eup %5865  ;;  %v1063_v36 = vadd.f32 1.0, %v5864_v31  ;;  %5885 = vpow2.f32 %v836_v26  ;;  %v686_v38 = vsub.f32 0.0, %v558_v30  ;;  %v332_v39 = vpop.xlane.xlu1 %331  ;;  %v121_v30 = vld [vmem:[%s12936_s0 + $0x350] sm:$0xff] }
  0xc6   :  { %v330_v40 = vpop.xlane.xlu0 %329  ;;  %v5868_v42 = vpop.eup %5867  ;;  %v1062_v43 = vadd.f32 1.0, %v5866_v35  ;;  %5887 = vpow2.f32 %v834_v27  ;;  %v561_v1 = vadd.f32 %v8570_v21, %v332_v39  ;;  %v840_v46 = vmul.f32 1.442695, %v687_v37 }
  0xc7   :  { %v560_v44 = vadd.f32 %v8570_v21, %v330_v40  ;;  %v5870_v45 = vpop.eup %5869  ;;  %1441 = vst.msk [vmem:[%s12939_s3 + $0x50] sm:$0xff] %vm1430_vm0, %v5868_v42  ;;  %5889 = vrcp.f32 %v1063_v36  ;;  %v838_v47 = vmul.f32 1.442695, %v686_v38  ;;  %v256_v40 = vmul.f32 %v8763_v48, %v122_v29 }
  0xc8   :  { %v5872_v51 = vpop.eup %5871  ;;  %1444 = vst.msk [vmem:[%s12939_s3 + $0x68] sm:$0xff] %vm1430_vm0, %v5870_v45  ;;  %5891 = vrcp.f32 %v1062_v43  ;;  %v689_v52 = vsub.f32 0.0, %v561_v1  ;;  %475 = vadd.xlane.f32.xlu1 %v248_v32  ;;  %v255_v41 = vmul.f32 %v8763_v48, %v121_v30  ;;  %v124_v45 = vld [vmem:[%s12936_s0 + $0x368] sm:$0xff] }
  0xc9   :  { %v688_v53 = vsub.f32 0.0, %v560_v44  ;;  %473 = vadd.xlane.f32.xlu0 %v247_v33  ;;  %v5874_v56 = vpop.eup %5873  ;;  %v1065_v57 = vadd.f32 1.0, %v5872_v51  ;;  %5893 = vpow2.f32 %v840_v46  ;;  %v336_v58 = vpop.xlane.xlu1 %335 }
  0xca   :  { %v334_v59 = vpop.xlane.xlu0 %333  ;;  %v5876_v60 = vpop.eup %5875  ;;  %1443 = vst.msk [vmem:[%s12939_s3 + $0x60] sm:$0xff] %vm1430_vm0, %v5874_v56  ;;  %5895 = vpow2.f32 %v838_v47  ;;  %v844_v61 = vmul.f32 1.442695, %v689_v52  ;;  %v563_v62 = vadd.f32 %v8570_v21, %v336_v58  ;;  %v123_v52 = vld [vmem:[%s12936_s0 + $0x360] sm:$0xff] }
  0xcb   :  { %v5878_v0 = vpop.eup %5877  ;;  %5897 = vrcp.f32 %v1065_v57  ;;  %v1064_v2 = vadd.f32 1.0, %v5876_v60  ;;  %v562_v3 = vadd.f32 %v8570_v21, %v334_v59  ;;  %v842_v7 = vmul.f32 1.442695, %v688_v53 }
  0xcc   :  { %v5880_v5 = vpop.eup %5879  ;;  %v1067_v6 = vadd.f32 1.0, %v5878_v0  ;;  %5899 = vpow2.f32 %v844_v61  ;;  %v691_v8 = vsub.f32 0.0, %v563_v62  ;;  %479 = vadd.xlane.f32.xlu1 %v250_v49  ;;  %v258_v60 = vmul.f32 %v8763_v48, %v124_v45  ;;  %v126_v61 = vld [vmem:[%s12936_s0 + $0x378] sm:$0xff] }
  0xcd   :  { %477 = vadd.xlane.f32.xlu0 %v249_v54  ;;  %v5882_v11 = vpop.eup %5881  ;;  %5901 = vrcp.f32 %v1064_v2  ;;  %v1066_v12 = vadd.f32 1.0, %v5880_v5  ;;  %v690_v13 = vsub.f32 0.0, %v562_v3  ;;  %v340_v14 = vpop.xlane.xlu1 %339  ;;  %v257_v2 = vmul.f32 %v8763_v48, %v123_v52 }
  0xce   :  { %v338_v15 = vpop.xlane.xlu0 %337  ;;  %v5884_v16 = vpop.eup %5883  ;;  %1446 = vst.msk [vmem:[%s12939_s3 + $0x78] sm:$0xff] %vm1430_vm0, %v5882_v11  ;;  %5903 = vrcp.f32 %v1067_v6  ;;  %v848_v17 = vmul.f32 1.442695, %v691_v8  ;;  %v565_v18 = vadd.f32 %v8570_v21, %v340_v14  ;;  %v125_v6 = vld [vmem:[%s12936_s0 + $0x370] sm:$0xff]  ;;  %v260_v10 = vmul.f32 %v8763_v48, %v126_v61  ;;  %v128_v11 = vld [vmem:[%s12936_s0 + $0x388] sm:$0xff]  ;;  %v131_v61 = vld [vmem:[%s12936_s0 + $0x3a0] sm:$0xff] }
  0xcf   :  { %v564_v19 = vadd.f32 %v8570_v21, %v338_v15  ;;  %v5886_v20 = vpop.eup %5885  ;;  %1445 = vst.msk [vmem:[%s12939_s3 + $0x70] sm:$0xff] %vm1430_vm0, %v5884_v16  ;;  %5905 = vrcp.f32 %v1066_v12  ;;  %v846_v22 = vmul.f32 1.442695, %v690_v13 }
  0xd0   :  { %v5888_v25 = vpop.eup %5887  ;;  %v1069_v26 = vadd.f32 1.0, %v5886_v20  ;;  %5907 = vpow2.f32 %v842_v7  ;;  %v693_v27 = vsub.f32 0.0, %v565_v18  ;;  %483 = vadd.xlane.f32.xlu1 %v252_v63  ;;  %v127_v20 = vld [vmem:[%s12936_s0 + $0x380] sm:$0xff] }
  0xd1   :  { %v692_v28 = vsub.f32 0.0, %v564_v19  ;;  %481 = vadd.xlane.f32.xlu0 %v251_v4  ;;  %v5890_v31 = vpop.eup %5889  ;;  %v1068_v32 = vadd.f32 1.0, %v5888_v25  ;;  %5909 = vpow2.f32 %v848_v17  ;;  %v344_v33 = vpop.xlane.xlu1 %343  ;;  %v259_v19 = vmul.f32 %v8763_v48, %v125_v6 }
  0xd2   :  { %v342_v34 = vpop.xlane.xlu0 %341  ;;  %v5892_v35 = vpop.eup %5891  ;;  %1448 = vst.msk [vmem:[%s12939_s3 + $0x88] sm:$0xff] %vm1430_vm0, %v5890_v31  ;;  %5911 = vrcp.f32 %v1069_v26  ;;  %v852_v36 = vmul.f32 1.442695, %v693_v27  ;;  %v567_v37 = vadd.f32 %v8570_v21, %v344_v33  ;;  %v262_v26 = vmul.f32 %v8763_v48, %v128_v11 }
  0xd3   :  { %v5894_v38 = vpop.eup %5893  ;;  %1447 = vst.msk [vmem:[%s12939_s3 + $0x80] sm:$0xff] %vm1430_vm0, %v5892_v35  ;;  %5913 = vrcp.f32 %v1068_v32  ;;  %v566_v39 = vadd.f32 %v8570_v21, %v342_v34  ;;  %v850_v1 = vmul.f32 1.442695, %v692_v28  ;;  %v261_v34 = vmul.f32 %v8763_v48, %v127_v20 }
  0xd4   :  { %v5896_v42 = vpop.eup %5895  ;;  %v1071_v43 = vadd.f32 1.0, %v5894_v38  ;;  %5915 = vpow2.f32 %v846_v22  ;;  %v695_v44 = vsub.f32 0.0, %v567_v37  ;;  %487 = vadd.xlane.f32.xlu1 %v254_v23 }
  0xd5   :  { %485 = vadd.xlane.f32.xlu0 %v253_v24  ;;  %v5898_v46 = vpop.eup %5897  ;;  %v1070_v47 = vadd.f32 1.0, %v5896_v42  ;;  %5917 = vpow2.f32 %v852_v36  ;;  %v694_v49 = vsub.f32 0.0, %v566_v39  ;;  %v348_v50 = vpop.xlane.xlu1 %347  ;;  %v130_v42 = vld [vmem:[%s12936_s0 + $0x398] sm:$0xff] }
  0xd6   :  { %v346_v51 = vpop.xlane.xlu0 %345  ;;  %v5900_v53 = vpop.eup %5899  ;;  %1450 = vst.msk [vmem:[%s12939_s3 + $0x98] sm:$0xff] %vm1430_vm0, %v5898_v46  ;;  %5919 = vrcp.f32 %v1071_v43  ;;  %v856_v54 = vmul.f32 1.442695, %v695_v44  ;;  %v569_v55 = vadd.f32 %v8570_v21, %v348_v50  ;;  %v129_v43 = vld [vmem:[%s12936_s0 + $0x390] sm:$0xff] }
  0xd7   :  { %v568_v56 = vadd.f32 %v8570_v21, %v346_v51  ;;  %v5902_v57 = vpop.eup %5901  ;;  %5921 = vrcp.f32 %v1070_v47  ;;  %v1073_v58 = vadd.f32 1.0, %v5900_v53  ;;  %v854_v59 = vmul.f32 1.442695, %v694_v49 }
  0xd8   :  { %v5904_v62 = vpop.eup %5903  ;;  %1449 = vst.msk [vmem:[%s12939_s3 + $0x90] sm:$0xff] %vm1430_vm0, %v5902_v57  ;;  %5923 = vpow2.f32 %v850_v1  ;;  %v697_v63 = vsub.f32 0.0, %v569_v55  ;;  %491 = vadd.xlane.f32.xlu1 %v256_v40  ;;  %v264_v53 = vmul.f32 %v8763_v48, %v130_v42 }
  0xd9   :  { %v696_v0 = vsub.f32 0.0, %v568_v56  ;;  %489 = vadd.xlane.f32.xlu0 %v255_v41  ;;  %v5906_v3 = vpop.eup %5905  ;;  %1452 = vst.msk [vmem:[%s12939_s3 + $0xa8] sm:$0xff] %vm1430_vm0, %v5904_v62  ;;  %5925 = vrcp.f32 %v1073_v58  ;;  %v352_v4 = vpop.xlane.xlu1 %351 }
  0xda   :  { %v350_v5 = vpop.xlane.xlu0 %349  ;;  %v5908_v7 = vpop.eup %5907  ;;  %1451 = vst.msk [vmem:[%s12939_s3 + $0xa0] sm:$0xff] %vm1430_vm0, %v5906_v3  ;;  %5927 = vpow2.f32 %v856_v54  ;;  %v860_v8 = vmul.f32 1.442695, %v697_v63  ;;  %v571_v9 = vadd.f32 %v8570_v21, %v352_v4  ;;  %v263_v54 = vmul.f32 %v8763_v48, %v129_v43 }
  0xdb   :  { %v5910_v12 = vpop.eup %5909  ;;  %v1072_v13 = vadd.f32 1.0, %v5908_v7  ;;  %5929 = vpow2.f32 %v854_v59  ;;  %v858_v14 = vmul.f32 1.442695, %v696_v0  ;;  %v570_v15 = vadd.f32 %v8570_v21, %v350_v5 }
  0xdc   :  { %v5912_v16 = vpop.eup %5911  ;;  %v1075_v17 = vadd.f32 1.0, %v5910_v12  ;;  %5931 = vpow2.f32 %v860_v8  ;;  %v699_v18 = vsub.f32 0.0, %v571_v9  ;;  %495 = vadd.xlane.f32.xlu1 %v258_v60  ;;  %v132_v60 = vld [vmem:[%s12936_s0 + $0x3a8] sm:$0xff] }
  0xdd   :  { %493 = vadd.xlane.f32.xlu0 %v257_v2  ;;  %v5914_v22 = vpop.eup %5913  ;;  %1454 = vst.msk [vmem:[%s12939_s3 + $0xb8] sm:$0xff] %vm1430_vm0, %v5912_v16  ;;  %5933 = vrcp.f32 %v1072_v13  ;;  %v698_v23 = vsub.f32 0.0, %v570_v15  ;;  %v356_v24 = vpop.xlane.xlu1 %355  ;;  %v266_v9 = vmul.f32 %v8763_v48, %v132_v60  ;;  %v134_v15 = vld [vmem:[%s12936_s0 + $0x3b8] sm:$0xff]  ;;  %v133_v16 = vld [vmem:[%s12936_s0 + $0x3b0] sm:$0xff] }
  0xde   :  { %v354_v25 = vpop.xlane.xlu0 %353  ;;  %v5916_v27 = vpop.eup %5915  ;;  %1453 = vst.msk [vmem:[%s12939_s3 + $0xb0] sm:$0xff] %vm1430_vm0, %v5914_v22  ;;  %5935 = vrcp.f32 %v1075_v17  ;;  %v864_v28 = vmul.f32 1.442695, %v699_v18  ;;  %v573_v29 = vadd.f32 %v8570_v21, %v356_v24 }
  0xdf   :  { %v572_v30 = vadd.f32 %v8570_v21, %v354_v25  ;;  %v5918_v31 = vpop.eup %5917  ;;  %v1074_v32 = vadd.f32 1.0, %v5916_v27  ;;  %5937 = vpow2.f32 %v858_v14  ;;  %v862_v33 = vmul.f32 1.442695, %v698_v23 }
  0xe0   :  { %v5920_v35 = vpop.eup %5919  ;;  %v1077_v36 = vadd.f32 1.0, %v5918_v31  ;;  %5939 = vpow2.f32 %v864_v28  ;;  %v701_v37 = vsub.f32 0.0, %v573_v29  ;;  %499 = vadd.xlane.f32.xlu1 %v260_v10  ;;  %v265_v10 = vmul.f32 %v8763_v48, %v131_v61 }
  0xe1   :  { %v700_v38 = vsub.f32 0.0, %v572_v30  ;;  %497 = vadd.xlane.f32.xlu0 %v259_v19  ;;  %v5922_v39 = vpop.eup %5921  ;;  %1456 = vst.msk [vmem:[%s12939_s3 + $0xc8] sm:$0xff] %vm1430_vm0, %v5920_v35  ;;  %5941 = vrcp.f32 %v1074_v32  ;;  %v360_v40 = vpop.xlane.xlu1 %359  ;;  %v268_v28 = vmul.f32 %v8763_v48, %v134_v15  ;;  %v267_v29 = vmul.f32 %v8763_v48, %v133_v16  ;;  %v136_v30 = vld [vmem:[%s12936_s0 + $0x3c8] sm:$0xff]  ;;  %v135_v35 = vld [vmem:[%s12936_s0 + $0x3c0] sm:$0xff] }
  0xe2   :  { %v358_v41 = vpop.xlane.xlu0 %357  ;;  %v5924_v1 = vpop.eup %5923  ;;  %1455 = vst.msk [vmem:[%s12939_s3 + $0xc0] sm:$0xff] %vm1430_vm0, %v5922_v39  ;;  %5943 = vrcp.f32 %v1077_v36  ;;  %v868_v44 = vmul.f32 1.442695, %v701_v37  ;;  %v575_v46 = vadd.f32 %v8570_v21, %v360_v40  ;;  %v270_v43 = vmul.f32 %v8763_v48, %v136_v30 }
  0xe3   :  { %v866_v45 = vmul.f32 1.442695, %v700_v38  ;;  %v5926_v47 = vpop.eup %5925  ;;  %v1076_v49 = vadd.f32 1.0, %v5924_v1  ;;  %5945 = vpow2.f32 %v862_v33  ;;  %v574_v50 = vadd.f32 %v8570_v21, %v358_v41 }
  0xe4   :  { %v5928_v51 = vpop.eup %5927  ;;  %1458 = vst.msk [vmem:[%s12939_s3 + $0xd8] sm:$0xff] %vm1430_vm0, %v5926_v47  ;;  %5947 = vpow2.f32 %v868_v44  ;;  %v703_v52 = vsub.f32 0.0, %v575_v46  ;;  %503 = vadd.xlane.f32.xlu1 %v262_v26  ;;  %v269_v46 = vmul.f32 %v8763_v48, %v135_v35  ;;  %v138_v47 = vld [vmem:[%s12936_s0 + $0x3d8] sm:$0xff] }
  0xe5   :  { %501 = vadd.xlane.f32.xlu0 %v261_v34  ;;  %v5930_v55 = vpop.eup %5929  ;;  %5949 = vrcp.f32 %v1076_v49  ;;  %v1079_v56 = vadd.f32 1.0, %v5928_v51  ;;  %v702_v57 = vsub.f32 0.0, %v574_v50  ;;  %v364_v58 = vpop.xlane.xlu1 %363  ;;  %v272_v61 = vmul.f32 %v8763_v48, %v138_v47  ;;  %v7858_v47 = vld [vmem:[%s12936_s0 + $0x8] sm:$0xff] }
  0xe6   :  { %v362_v59 = vpop.xlane.xlu0 %361  ;;  %v5932_v62 = vpop.eup %5931  ;;  %v1078_v63 = vadd.f32 1.0, %v5930_v55  ;;  %5951 = vpow2.f32 %v866_v45  ;;  %v872_v0 = vmul.f32 1.442695, %v703_v52  ;;  %v577_v2 = vadd.f32 %v8570_v21, %v364_v58 }
  0xe7   :  { %v5934_v3 = vpop.eup %5933  ;;  %5953 = vrcp.f32 %v1079_v56  ;;  %v1081_v4 = vadd.f32 1.0, %v5932_v62  ;;  %v870_v5 = vmul.f32 1.442695, %v702_v57  ;;  %v576_v6 = vadd.f32 %v8570_v21, %v362_v59 }
  0xe8   :  { %v5936_v7 = vpop.eup %5935  ;;  %1457 = vst.msk [vmem:[%s12939_s3 + $0xd0] sm:$0xff] %vm1430_vm0, %v5934_v3  ;;  %5955 = vrcp.f32 %v1078_v63  ;;  %v705_v8 = vsub.f32 0.0, %v577_v2  ;;  %507 = vadd.xlane.f32.xlu1 %v264_v53 }
  0xe9   :  { %505 = vadd.xlane.f32.xlu0 %v263_v54  ;;  %v5938_v11 = vpop.eup %5937  ;;  %1460 = vst.msk [vmem:[%s12939_s3 + $0xe8] sm:$0xff] %vm1430_vm0, %v5936_v7  ;;  %5957 = vrcp.f32 %v1081_v4  ;;  %v704_v12 = vsub.f32 0.0, %v576_v6  ;;  %v368_v13 = vpop.xlane.xlu1 %367  ;;  %v137_v54 = vld [vmem:[%s12936_s0 + $0x3d0] sm:$0xff]  ;;  %v140_v7 = vld [vmem:[%s12936_s0 + $0x3e8] sm:$0xff] }
  0xea   :  { %v366_v14 = vpop.xlane.xlu0 %365  ;;  %v5940_v17 = vpop.eup %5939  ;;  %v1080_v18 = vadd.f32 1.0, %v5938_v11  ;;  %5959 = vpow2.f32 %v872_v0  ;;  %v876_v19 = vmul.f32 1.442695, %v705_v8  ;;  %v579_v20 = vadd.f32 %v8570_v21, %v368_v13  ;;  %v139_v8 = vld [vmem:[%s12936_s0 + $0x3e0] sm:$0xff] }
  0xeb   :  { %v5942_v22 = vpop.eup %5941  ;;  %v1083_v23 = vadd.f32 1.0, %v5940_v17  ;;  %5961 = vpow2.f32 %v870_v5  ;;  %v874_v24 = vmul.f32 1.442695, %v704_v12  ;;  %v578_v25 = vadd.f32 %v8570_v21, %v366_v14 }
  0xec   :  { %v5944_v26 = vpop.eup %5943  ;;  %1459 = vst.msk [vmem:[%s12939_s3 + $0xe0] sm:$0xff] %vm1430_vm0, %v5942_v22  ;;  %5963 = vrcp.f32 %v1080_v18  ;;  %v707_v27 = vsub.f32 0.0, %v579_v20  ;;  %511 = vadd.xlane.f32.xlu1 %v266_v9  ;;  %v271_v2 = vmul.f32 %v8763_v48, %v137_v54  ;;  %v274_v17 = vmul.f32 %v8763_v48, %v140_v7 }
  0xed   :  { %509 = vadd.xlane.f32.xlu0 %v265_v10  ;;  %v5946_v31 = vpop.eup %5945  ;;  %1462 = vst.msk [vmem:[%s12939_s3 + $0xf8] sm:$0xff] %vm1430_vm0, %v5944_v26  ;;  %5965 = vrcp.f32 %v1083_v23  ;;  %v706_v32 = vsub.f32 0.0, %v578_v25  ;;  %v372_v33 = vpop.xlane.xlu1 %371  ;;  %v273_v18 = vmul.f32 %v8763_v48, %v139_v8  ;;  %v7861_v8 = vld [vmem:[%s12936_s0 + $0x10] sm:$0xff] }
  0xee   :  { %v370_v34 = vpop.xlane.xlu0 %369  ;;  %v5948_v36 = vpop.eup %5947  ;;  %v1082_v37 = vadd.f32 1.0, %v5946_v31  ;;  %5967 = vpow2.f32 %v876_v19  ;;  %v880_v38 = vmul.f32 1.442695, %v707_v27  ;;  %v581_v39 = vadd.f32 %v8570_v21, %v372_v33  ;;  %v142_v19 = vld [vmem:[%s12936_s0 + $0x3f8] sm:$0xff]  ;;  %v141_v27 = vld [vmem:[%s12936_s0 + $0x3f0] sm:$0xff] }
  0xef   :  { %v5950_v40 = vpop.eup %5949  ;;  %v1085_v41 = vadd.f32 1.0, %v5948_v36  ;;  %5969 = vpow2.f32 %v874_v24  ;;  %v580_v42 = vadd.f32 %v8570_v21, %v370_v34  ;;  %v878_v44 = vmul.f32 1.442695, %v706_v32  ;;  %v9003_v36 = vld [vmem:[%s12937_s1 + $0x1] ss:$0 sm:$0xff] }
  0xf0   :  { %v5952_v1 = vpop.eup %5951  ;;  %1461 = vst.msk [vmem:[%s12939_s3 + $0xf0] sm:$0xff] %vm1430_vm0, %v5950_v40  ;;  %5971 = vrcp.f32 %v1082_v37  ;;  %v709_v45 = vsub.f32 0.0, %v581_v39  ;;  %515 = vadd.xlane.f32.xlu1 %v268_v28  ;;  %v276_v35 = vmul.f32 %v8763_v48, %v142_v19  ;;  %v275_v40 = vmul.f32 %v8763_v48, %v141_v27 }
  0xf1   :  { %513 = vadd.xlane.f32.xlu0 %v267_v29  ;;  %v5954_v49 = vpop.eup %5953  ;;  %5973 = vrcp.f32 %v1085_v41  ;;  %v1084_v50 = vadd.f32 1.0, %v5952_v1  ;;  %v708_v51 = vsub.f32 0.0, %v580_v42  ;;  %v376_v52 = vpop.xlane.xlu1 %375  ;;  %v1565_v48 = vmul.f32 %v7858_v47, %v9003_v36 }
  0xf2   :  { %v374_v53 = vpop.xlane.xlu0 %373  ;;  %v5956_v55 = vpop.eup %5955  ;;  %1464 = vst.msk [vmem:[%s12939_s3 + $0x108] sm:$0xff] %vm1430_vm0, %v5954_v49  ;;  %5975 = vpow2.f32 %v880_v38  ;;  %v884_v56 = vmul.f32 1.442695, %v709_v45  ;;  %v583_v57 = vadd.f32 %v8570_v21, %v376_v52  ;;  %v7859_v52 = vld [vmem:[%s12936_s0] sm:$0xff] }
  0xf3   :  { %v582_v58 = vadd.f32 %v8570_v21, %v374_v53  ;;  %v5958_v59 = vpop.eup %5957  ;;  %1463 = vst.msk [vmem:[%s12939_s3 + $0x100] sm:$0xff] %vm1430_vm0, %v5956_v55  ;;  %5977 = vrcp.f32 %v1084_v50  ;;  %v882_v60 = vmul.f32 1.442695, %v708_v51  ;;  %v1564_v53 = vmul.f32 %v7859_v52, %v9003_v36 }
  0xf4   :  { %v5960_v62 = vpop.eup %5959  ;;  %1466 = vst.msk [vmem:[%s12939_s3 + $0x118] sm:$0xff] %vm1430_vm0, %v5958_v59  ;;  %5979 = vpow2.f32 %v878_v44  ;;  %v711_v63 = vsub.f32 0.0, %v583_v57  ;;  %519 = vadd.xlane.f32.xlu1 %v270_v43 }
  0xf5   :  { %v710_v0 = vsub.f32 0.0, %v582_v58  ;;  %517 = vadd.xlane.f32.xlu0 %v269_v46  ;;  %v5962_v3 = vpop.eup %5961  ;;  %v1087_v4 = vadd.f32 1.0, %v5960_v62  ;;  %5981 = vpow2.f32 %v884_v56  ;;  %v380_v5 = vpop.xlane.xlu1 %379 }
  0xf6   :  { %v378_v6 = vpop.xlane.xlu0 %377  ;;  %v5964_v9 = vpop.eup %5963  ;;  %v1086_v10 = vadd.f32 1.0, %v5962_v3  ;;  %5983 = vpow2.f32 %v882_v60  ;;  %v888_v11 = vmul.f32 1.442695, %v711_v63  ;;  %v585_v14 = vadd.f32 %v8570_v21, %v380_v5 }
  0xf7   :  { %v886_v12 = vmul.f32 1.442695, %v710_v0  ;;  %v5966_v13 = vpop.eup %5965  ;;  %1465 = vst.msk [vmem:[%s12939_s3 + $0x110] sm:$0xff] %vm1430_vm0, %v5964_v9  ;;  %5985 = vrcp.f32 %v1087_v4  ;;  %v584_v15 = vadd.f32 %v8570_v21, %v378_v6  ;;  %v7860_v6 = vld [vmem:[%s12936_s0 + $0x18] sm:$0xff]  ;;  %v1566_v9 = vmul.f32 %v7861_v8, %v9003_v36 }
  0xf8   :  { %v5968_v16 = vpop.eup %5967  ;;  %1468 = vst.msk [vmem:[%s12939_s3 + $0x128] sm:$0xff] %vm1430_vm0, %v5966_v13  ;;  %5987 = vrcp.f32 %v1086_v10  ;;  %523 = vadd.xlane.f32.xlu1 %v272_v61  ;;  %v713_v23 = vsub.f32 0.0, %v585_v14  ;;  %v1567_v7 = vmul.f32 %v7860_v6, %v9003_v36 }
  0xf9   :  { %521 = vadd.xlane.f32.xlu0 %v271_v2  ;;  %v5970_v20 = vpop.eup %5969  ;;  %v1089_v22 = vadd.f32 1.0, %v5968_v16  ;;  %5989 = vpow2.f32 %v888_v11  ;;  %v712_v24 = vsub.f32 0.0, %v584_v15  ;;  %v384_v25 = vpop.xlane.xlu1 %383 }
  0xfa   :  { %v382_v26 = vpop.xlane.xlu0 %381  ;;  %v5972_v28 = vpop.eup %5971  ;;  %v1088_v29 = vadd.f32 1.0, %v5970_v20  ;;  %5991 = vpow2.f32 %v886_v12  ;;  %v587_v30 = vadd.f32 %v8570_v21, %v384_v25  ;;  %v892_v33 = vmul.f32 1.442695, %v713_v23 }
  0xfb   :  { %v586_v31 = vadd.f32 %v8570_v21, %v382_v26  ;;  %v5974_v32 = vpop.eup %5973  ;;  %1467 = vst.msk [vmem:[%s12939_s3 + $0x120] sm:$0xff] %vm1430_vm0, %v5972_v28  ;;  %5993 = vrcp.f32 %v1089_v22  ;;  %v890_v34 = vmul.f32 1.442695, %v712_v24  ;;  %v7862_v24 = vld [vmem:[%s12936_s0 + $0x28] sm:$0xff]  ;;  %v7863_v26 = vld [vmem:[%s12936_s0 + $0x20] sm:$0xff] }
  0xfc   :  { %v5976_v37 = vpop.eup %5975  ;;  %1470 = vst.msk [vmem:[%s12939_s3 + $0x138] sm:$0xff] %vm1430_vm0, %v5974_v32  ;;  %5995 = vrcp.f32 %v1088_v29  ;;  %v715_v38 = vsub.f32 0.0, %v587_v30  ;;  %527 = vadd.xlane.f32.xlu1 %v274_v17  ;;  %v1569_v25 = vmul.f32 %v7862_v24, %v9003_v36  ;;  %v1568_v27 = vmul.f32 %v7863_v26, %v9003_v36 }
  0xfd   :  { %v714_v39 = vsub.f32 0.0, %v586_v31  ;;  %525 = vadd.xlane.f32.xlu0 %v273_v18  ;;  %v5978_v41 = vpop.eup %5977  ;;  %v1091_v42 = vadd.f32 1.0, %v5976_v37  ;;  %5997 = vpow2.f32 %v892_v33  ;;  %v388_v43 = vpop.xlane.xlu1 %387 }
  0xfe   :  { %v386_v1 = vpop.xlane.xlu0 %385  ;;  %v5980_v44 = vpop.eup %5979  ;;  %1469 = vst.msk [vmem:[%s12939_s3 + $0x130] sm:$0xff] %vm1430_vm0, %v5978_v41  ;;  %5999 = vpow2.f32 %v890_v34  ;;  %v896_v45 = vmul.f32 1.442695, %v715_v38  ;;  %v589_v46 = vadd.f32 %v8570_v21, %v388_v43 }
  0xff   :  { %v5982_v49 = vpop.eup %5981  ;;  %6001 = vrcp.f32 %v1091_v42  ;;  %v1090_v50 = vadd.f32 1.0, %v5980_v44  ;;  %v588_v51 = vadd.f32 %v8570_v21, %v386_v1  ;;  %v894_v56 = vmul.f32 1.442695, %v714_v39  ;;  %v7864_v44 = vld [vmem:[%s12936_s0 + $0x38] sm:$0xff] }
 0x100   :  { %v5984_v54 = vpop.eup %5983  ;;  %v1093_v55 = vadd.f32 1.0, %v5982_v49  ;;  %6003 = vpow2.f32 %v896_v45  ;;  %v717_v57 = vsub.f32 0.0, %v589_v46  ;;  %531 = vadd.xlane.f32.xlu1 %v276_v35  ;;  %v1571_v45 = vmul.f32 %v7864_v44, %v9003_v36  ;;  %v7865_v49 = vld [vmem:[%s12936_s0 + $0x30] sm:$0xff] }
 0x101   :  { %529 = vadd.xlane.f32.xlu0 %v275_v40  ;;  %v5986_v58 = vpop.eup %5985  ;;  %6005 = vrcp.f32 %v1090_v50  ;;  %v1092_v59 = vadd.f32 1.0, %v5984_v54  ;;  %v716_v60 = vsub.f32 0.0, %v588_v51  ;;  %v392_v61 = vpop.xlane.xlu1 %391  ;;  %v1570_v50 = vmul.f32 %v7865_v49, %v9003_v36 }
 0x102   :  { %v390_v62 = vpop.xlane.xlu0 %389  ;;  %v5988_v63 = vpop.eup %5987  ;;  %1472 = vst.msk [vmem:[%s12939_s3 + $0x148] sm:$0xff] %vm1430_vm0, %v5986_v58  ;;  %6007 = vrcp.f32 %v1093_v55  ;;  %v900_v0 = vmul.f32 1.442695, %v717_v57  ;;  %v591_v2 = vadd.f32 %v8570_v21, %v392_v61  ;;  %v7866_v57 = vld [vmem:[%s12936_s0 + $0x48] sm:$0xff] }
 0x103   :  { %v590_v3 = vadd.f32 %v8570_v21, %v390_v62  ;;  %v5990_v4 = vpop.eup %5989  ;;  %1471 = vst.msk [vmem:[%s12939_s3 + $0x140] sm:$0xff] %vm1430_vm0, %v5988_v63  ;;  %6009 = vrcp.f32 %v1092_v59  ;;  %v898_v5 = vmul.f32 1.442695, %v716_v60  ;;  %v1573_v58 = vmul.f32 %v7866_v57, %v9003_v36 }
 0x104   :  { %v5992_v10 = vpop.eup %5991  ;;  %v1095_v11 = vadd.f32 1.0, %v5990_v4  ;;  %6011 = vpow2.f32 %v894_v56  ;;  %v719_v12 = vsub.f32 0.0, %v591_v2  ;;  %1694 = vadd.xlane.f32.xlu1 %v1565_v48 }
 0x105   :  { %v718_v13 = vsub.f32 0.0, %v590_v3  ;;  %1692 = vadd.xlane.f32.xlu0 %v1564_v53  ;;  %v5994_v14 = vpop.eup %5993  ;;  %v1094_v15 = vadd.f32 1.0, %v5992_v10  ;;  %6013 = vpow2.f32 %v900_v0  ;;  %v396_v16 = vpop.xlane.xlu1 %395  ;;  %v7867_v3 = vld [vmem:[%s12936_s0 + $0x40] sm:$0xff] }
 0x106   :  { %v394_v17 = vpop.xlane.xlu0 %393  ;;  %v5996_v18 = vpop.eup %5995  ;;  %1474 = vst.msk [vmem:[%s12939_s3 + $0x158] sm:$0xff] %vm1430_vm0, %v5994_v14  ;;  %6015 = vrcp.f32 %v1095_v11  ;;  %v904_v19 = vmul.f32 1.442695, %v719_v12  ;;  %v593_v20 = vadd.f32 %v8570_v21, %v396_v16  ;;  %v1572_v4 = vmul.f32 %v7867_v3, %v9003_v36 }
 0x107   :  { %v5998_v22 = vpop.eup %5997  ;;  %1473 = vst.msk [vmem:[%s12939_s3 + $0x150] sm:$0xff] %vm1430_vm0, %v5996_v18  ;;  %6017 = vrcp.f32 %v1094_v15  ;;  %v592_v23 = vadd.f32 %v8570_v21, %v394_v17  ;;  %v902_v30 = vmul.f32 1.442695, %v718_v13  ;;  %v7869_v18 = vld [vmem:[%s12936_s0 + $0x50] sm:$0xff] }
 0x108   :  { %v6000_v28 = vpop.eup %5999  ;;  %v1097_v29 = vadd.f32 1.0, %v5998_v22  ;;  %6019 = vpow2.f32 %v898_v5  ;;  %v721_v31 = vsub.f32 0.0, %v593_v20  ;;  %1698 = vadd.xlane.f32.xlu1 %v1567_v7 }
 0x109   :  { %1696 = vadd.xlane.f32.xlu0 %v1566_v9  ;;  %v6002_v32 = vpop.eup %6001  ;;  %v1096_v33 = vadd.f32 1.0, %v6000_v28  ;;  %6021 = vpow2.f32 %v904_v19  ;;  %v720_v34 = vsub.f32 0.0, %v592_v23  ;;  %v400_v35 = vpop.xlane.xlu1 %399  ;;  %v7868_v9 = vld [vmem:[%s12936_s0 + $0x58] sm:$0xff]  ;;  %v1574_v19 = vmul.f32 %v7869_v18, %v9003_v36 }
 0x10a   :  { %v398_v37 = vpop.xlane.xlu0 %397  ;;  %v6004_v38 = vpop.eup %6003  ;;  %1476 = vst.msk [vmem:[%s12939_s3 + $0x168] sm:$0xff] %vm1430_vm0, %v6002_v32  ;;  %6023 = vrcp.f32 %v1097_v29  ;;  %v908_v39 = vmul.f32 1.442695, %v721_v31  ;;  %v595_v40 = vadd.f32 %v8570_v21, %v400_v35  ;;  %v1575_v10 = vmul.f32 %v7868_v9, %v9003_v36 }
 0x10b   :  { %v594_v41 = vadd.f32 %v8570_v21, %v398_v37  ;;  %v6006_v42 = vpop.eup %6005  ;;  %6025 = vrcp.f32 %v1096_v33  ;;  %v1099_v43 = vadd.f32 1.0, %v6004_v38  ;;  %v906_v1 = vmul.f32 1.442695, %v720_v34  ;;  %v7870_v38 = vld [vmem:[%s12936_s0 + $0x68] sm:$0xff] }
 0x10c   :  { %v6008_v46 = vpop.eup %6007  ;;  %1475 = vst.msk [vmem:[%s12939_s3 + $0x160] sm:$0xff] %vm1430_vm0, %v6006_v42  ;;  %6027 = vpow2.f32 %v902_v30  ;;  %v723_v47 = vsub.f32 0.0, %v595_v40  ;;  %1702 = vadd.xlane.f32.xlu1 %v1569_v25  ;;  %v7871_v40 = vld [vmem:[%s12936_s0 + $0x60] sm:$0xff] }
 0x10d   :  { %v722_v48 = vsub.f32 0.0, %v594_v41  ;;  %1700 = vadd.xlane.f32.xlu0 %v1568_v27  ;;  %v6010_v51 = vpop.eup %6009  ;;  %1478 = vst.msk [vmem:[%s12939_s3 + $0x178] sm:$0xff] %vm1430_vm0, %v6008_v46  ;;  %6029 = vrcp.f32 %v1099_v43  ;;  %v404_v52 = vpop.xlane.xlu1 %403  ;;  %v1576_v41 = vmul.f32 %v7871_v40, %v9003_v36 }
 0x10e   :  { %v402_v53 = vpop.xlane.xlu0 %401  ;;  %v6012_v54 = vpop.eup %6011  ;;  %1477 = vst.msk [vmem:[%s12939_s3 + $0x170] sm:$0xff] %vm1430_vm0, %v6010_v51  ;;  %6031 = vpow2.f32 %v908_v39  ;;  %v912_v55 = vmul.f32 1.442695, %v723_v47  ;;  %v597_v56 = vadd.f32 %v8570_v21, %v404_v52  ;;  %v1577_v39 = vmul.f32 %v7870_v38, %v9003_v36 }
 0x10f   :  { %v6014_v59 = vpop.eup %6013  ;;  %v1098_v60 = vadd.f32 1.0, %v6012_v54  ;;  %6033 = vpow2.f32 %v906_v1  ;;  %v910_v61 = vmul.f32 1.442695, %v722_v48  ;;  %v596_v62 = vadd.f32 %v8570_v21, %v402_v53 }
 0x110   :  { %v6016_v63 = vpop.eup %6015  ;;  %v1101_v0 = vadd.f32 1.0, %v6014_v59  ;;  %6035 = vpow2.f32 %v912_v55  ;;  %v725_v2 = vsub.f32 0.0, %v597_v56  ;;  %1706 = vadd.xlane.f32.xlu1 %v1571_v45  ;;  %v7872_v56 = vld [vmem:[%s12936_s0 + $0x78] sm:$0xff] }
 0x111   :  { %1704 = vadd.xlane.f32.xlu0 %v1570_v50  ;;  %v6018_v5 = vpop.eup %6017  ;;  %1480 = vst.msk [vmem:[%s12939_s3 + $0x188] sm:$0xff] %vm1430_vm0, %v6016_v63  ;;  %6037 = vrcp.f32 %v1098_v60  ;;  %v724_v6 = vsub.f32 0.0, %v596_v62  ;;  %v408_v7 = vpop.xlane.xlu1 %407  ;;  %v1579_v57 = vmul.f32 %v7872_v56, %v9003_v36 }
 0x112   :  { %v406_v8 = vpop.xlane.xlu0 %405  ;;  %v6020_v11 = vpop.eup %6019  ;;  %1479 = vst.msk [vmem:[%s12939_s3 + $0x180] sm:$0xff] %vm1430_vm0, %v6018_v5  ;;  %6039 = vrcp.f32 %v1101_v0  ;;  %v916_v12 = vmul.f32 1.442695, %v725_v2  ;;  %v599_v13 = vadd.f32 %v8570_v21, %v408_v7 }
 0x113   :  { %v598_v14 = vadd.f32 %v8570_v21, %v406_v8  ;;  %v6022_v15 = vpop.eup %6021  ;;  %v1100_v16 = vadd.f32 1.0, %v6020_v11  ;;  %6041 = vpow2.f32 %v910_v61  ;;  %v914_v17 = vmul.f32 1.442695, %v724_v6  ;;  %v7874_v11 = vld [vmem:[%s12936_s0 + $0x88] sm:$0xff] }
 0x114   :  { %v6024_v20 = vpop.eup %6023  ;;  %v1103_v22 = vadd.f32 1.0, %v6022_v15  ;;  %6043 = vpow2.f32 %v916_v12  ;;  %v727_v23 = vsub.f32 0.0, %v599_v13  ;;  %1710 = vadd.xlane.f32.xlu1 %v1573_v58  ;;  %v7873_v58 = vld [vmem:[%s12936_s0 + $0x70] sm:$0xff]  ;;  %v1581_v12 = vmul.f32 %v7874_v11, %v9003_v36  ;;  %v7875_v13 = vld [vmem:[%s12936_s0 + $0x80] sm:$0xff] }
 0x115   :  { %v726_v24 = vsub.f32 0.0, %v598_v14  ;;  %1708 = vadd.xlane.f32.xlu0 %v1572_v4  ;;  %v6026_v25 = vpop.eup %6025  ;;  %1482 = vst.msk [vmem:[%s12939_s3 + $0x198] sm:$0xff] %vm1430_vm0, %v6024_v20  ;;  %6045 = vrcp.f32 %v1100_v16  ;;  %v412_v26 = vpop.xlane.xlu1 %411  ;;  %v1578_v59 = vmul.f32 %v7873_v58, %v9003_v36  ;;  %v1580_v14 = vmul.f32 %v7875_v13, %v9003_v36 }
 0x116   :  { %v410_v27 = vpop.xlane.xlu0 %409  ;;  %v6028_v28 = vpop.eup %6027  ;;  %1481 = vst.msk [vmem:[%s12939_s3 + $0x190] sm:$0xff] %vm1430_vm0, %v6026_v25  ;;  %6047 = vrcp.f32 %v1103_v22  ;;  %v920_v29 = vmul.f32 1.442695, %v727_v23  ;;  %v601_v31 = vadd.f32 %v8570_v21, %v412_v26 }
 0x117   :  { %v918_v30 = vmul.f32 1.442695, %v726_v24  ;;  %v6030_v32 = vpop.eup %6029  ;;  %v1102_v33 = vadd.f32 1.0, %v6028_v28  ;;  %6049 = vpow2.f32 %v914_v17  ;;  %v600_v34 = vadd.f32 %v8570_v21, %v410_v27  ;;  %v7876_v27 = vld [vmem:[%s12936_s0 + $0x98] sm:$0xff] }
 0x118   :  { %v6032_v35 = vpop.eup %6031  ;;  %1484 = vst.msk [vmem:[%s12939_s3 + $0x1a8] sm:$0xff] %vm1430_vm0, %v6030_v32  ;;  %6051 = vpow2.f32 %v920_v29  ;;  %v729_v37 = vsub.f32 0.0, %v601_v31  ;;  %1714 = vadd.xlane.f32.xlu1 %v1575_v10  ;;  %v1583_v28 = vmul.f32 %v7876_v27, %v9003_v36  ;;  %v7877_v32 = vld [vmem:[%s12936_s0 + $0x90] sm:$0xff] }
 0x119   :  { %1712 = vadd.xlane.f32.xlu0 %v1574_v19  ;;  %v6034_v42 = vpop.eup %6033  ;;  %6053 = vrcp.f32 %v1102_v33  ;;  %v1105_v43 = vadd.f32 1.0, %v6032_v35  ;;  %v728_v1 = vsub.f32 0.0, %v600_v34  ;;  %v416_v44 = vpop.xlane.xlu1 %415  ;;  %v1582_v33 = vmul.f32 %v7877_v32, %v9003_v36 }
 0x11a   :  { %v414_v45 = vpop.xlane.xlu0 %413  ;;  %v6036_v46 = vpop.eup %6035  ;;  %v1104_v47 = vadd.f32 1.0, %v6034_v42  ;;  %6055 = vpow2.f32 %v918_v30  ;;  %v924_v48 = vmul.f32 1.442695, %v729_v37  ;;  %v603_v49 = vadd.f32 %v8570_v21, %v416_v44 }
 0x11b   :  { %v6038_v50 = vpop.eup %6037  ;;  %6057 = vrcp.f32 %v1105_v43  ;;  %v1107_v51 = vadd.f32 1.0, %v6036_v46  ;;  %v922_v52 = vmul.f32 1.442695, %v728_v1  ;;  %v602_v53 = vadd.f32 %v8570_v21, %v414_v45  ;;  %v7878_v45 = vld [vmem:[%s12936_s0 + $0xa8] sm:$0xff] }
 0x11c   :  { %v6040_v54 = vpop.eup %6039  ;;  %1483 = vst.msk [vmem:[%s12939_s3 + $0x1a0] sm:$0xff] %vm1430_vm0, %v6038_v50  ;;  %6059 = vrcp.f32 %v1104_v47  ;;  %v731_v55 = vsub.f32 0.0, %v603_v49  ;;  %1718 = vadd.xlane.f32.xlu1 %v1577_v39  ;;  %v1585_v46 = vmul.f32 %v7878_v45, %v9003_v36  ;;  %v7879_v50 = vld [vmem:[%s12936_s0 + $0xa0] sm:$0xff] }
 0x11d   :  { %1716 = vadd.xlane.f32.xlu0 %v1576_v41  ;;  %v6042_v60 = vpop.eup %6041  ;;  %1486 = vst.msk [vmem:[%s12939_s3 + $0x1b8] sm:$0xff] %vm1430_vm0, %v6040_v54  ;;  %6061 = vrcp.f32 %v1107_v51  ;;  %v730_v61 = vsub.f32 0.0, %v602_v53  ;;  %v420_v62 = vpop.xlane.xlu1 %419  ;;  %v1584_v51 = vmul.f32 %v7879_v50, %v9003_v36 }
 0x11e   :  { %v418_v63 = vpop.xlane.xlu0 %417  ;;  %v6044_v0 = vpop.eup %6043  ;;  %v1106_v2 = vadd.f32 1.0, %v6042_v60  ;;  %6063 = vpow2.f32 %v924_v48  ;;  %v928_v3 = vmul.f32 1.442695, %v731_v55  ;;  %v605_v4 = vadd.f32 %v8570_v21, %v420_v62 }
 0x11f   :  { %v6046_v5 = vpop.eup %6045  ;;  %v1109_v6 = vadd.f32 1.0, %v6044_v0  ;;  %6065 = vpow2.f32 %v922_v52  ;;  %v926_v7 = vmul.f32 1.442695, %v730_v61  ;;  %v604_v8 = vadd.f32 %v8570_v21, %v418_v63  ;;  %v7880_v0 = vld [vmem:[%s12936_s0 + $0xb8] sm:$0xff] }
 0x120   :  { %v6048_v9 = vpop.eup %6047  ;;  %1485 = vst.msk [vmem:[%s12939_s3 + $0x1b0] sm:$0xff] %vm1430_vm0, %v6046_v5  ;;  %6067 = vrcp.f32 %v1106_v2  ;;  %v733_v10 = vsub.f32 0.0, %v605_v4  ;;  %1722 = vadd.xlane.f32.xlu1 %v1579_v57  ;;  %v1587_v2 = vmul.f32 %v7880_v0, %v9003_v36 }
 0x121   :  { %1720 = vadd.xlane.f32.xlu0 %v1578_v59  ;;  %v6050_v15 = vpop.eup %6049  ;;  %1488 = vst.msk [vmem:[%s12939_s3 + $0x1c8] sm:$0xff] %vm1430_vm0, %v6048_v9  ;;  %6069 = vrcp.f32 %v1109_v6  ;;  %v732_v16 = vsub.f32 0.0, %v604_v8  ;;  %v424_v17 = vpop.xlane.xlu1 %423 }
 0x122   :  { %v422_v18 = vpop.xlane.xlu0 %421  ;;  %v6052_v19 = vpop.eup %6051  ;;  %v1108_v20 = vadd.f32 1.0, %v6050_v15  ;;  %6071 = vpow2.f32 %v928_v3  ;;  %v932_v22 = vmul.f32 1.442695, %v733_v10  ;;  %v607_v23 = vadd.f32 %v8570_v21, %v424_v17  ;;  %v7881_v3 = vld [vmem:[%s12936_s0 + $0xb0] sm:$0xff] }
 0x123   :  { %v6054_v24 = vpop.eup %6053  ;;  %v1111_v25 = vadd.f32 1.0, %v6052_v19  ;;  %6073 = vpow2.f32 %v926_v7  ;;  %v606_v26 = vadd.f32 %v8570_v21, %v422_v18  ;;  %v930_v30 = vmul.f32 1.442695, %v732_v16  ;;  %v7882_v18 = vld [vmem:[%s12936_s0 + $0xc8] sm:$0xff] }
 0x124   :  { %v6056_v29 = vpop.eup %6055  ;;  %1487 = vst.msk [vmem:[%s12939_s3 + $0x1c0] sm:$0xff] %vm1430_vm0, %v6054_v24  ;;  %6075 = vrcp.f32 %v1108_v20  ;;  %v735_v31 = vsub.f32 0.0, %v607_v23  ;;  %1726 = vadd.xlane.f32.xlu1 %v1581_v12  ;;  %v1586_v4 = vmul.f32 %v7881_v3, %v9003_v36  ;;  %v1589_v19 = vmul.f32 %v7882_v18, %v9003_v36  ;;  %v7883_v24 = vld [vmem:[%s12936_s0 + $0xc0] sm:$0xff] }
 0x125   :  { %1724 = vadd.xlane.f32.xlu0 %v1580_v14  ;;  %v6058_v34 = vpop.eup %6057  ;;  %6077 = vrcp.f32 %v1111_v25  ;;  %v1110_v35 = vadd.f32 1.0, %v6056_v29  ;;  %v734_v37 = vsub.f32 0.0, %v606_v26  ;;  %v428_v38 = vpop.xlane.xlu1 %427  ;;  %v1588_v25 = vmul.f32 %v7883_v24, %v9003_v36 }
 0x126   :  { %v426_v39 = vpop.xlane.xlu0 %425  ;;  %v6060_v40 = vpop.eup %6059  ;;  %1490 = vst.msk [vmem:[%s12939_s3 + $0x1d8] sm:$0xff] %vm1430_vm0, %v6058_v34  ;;  %6079 = vpow2.f32 %v932_v22  ;;  %v936_v41 = vmul.f32 1.442695, %v735_v31  ;;  %v609_v42 = vadd.f32 %v8570_v21, %v428_v38 }
 0x127   :  { %v608_v43 = vadd.f32 %v8570_v21, %v426_v39  ;;  %v6062_v1 = vpop.eup %6061  ;;  %1489 = vst.msk [vmem:[%s12939_s3 + $0x1d0] sm:$0xff] %vm1430_vm0, %v6060_v40  ;;  %6081 = vrcp.f32 %v1110_v35  ;;  %v934_v44 = vmul.f32 1.442695, %v734_v37  ;;  %v7885_v39 = vld [vmem:[%s12936_s0 + $0xd0] sm:$0xff] }
 0x128   :  { %v6064_v47 = vpop.eup %6063  ;;  %1492 = vst.msk [vmem:[%s12939_s3 + $0x1e8] sm:$0xff] %vm1430_vm0, %v6062_v1  ;;  %6083 = vpow2.f32 %v930_v30  ;;  %v737_v48 = vsub.f32 0.0, %v609_v42  ;;  %1730 = vadd.xlane.f32.xlu1 %v1583_v28  ;;  %v1590_v40 = vmul.f32 %v7885_v39, %v9003_v36 }
 0x129   :  { %v736_v49 = vsub.f32 0.0, %v608_v43  ;;  %1728 = vadd.xlane.f32.xlu0 %v1582_v33  ;;  %v6066_v52 = vpop.eup %6065  ;;  %v1113_v53 = vadd.f32 1.0, %v6064_v47  ;;  %6085 = vpow2.f32 %v936_v41  ;;  %v432_v54 = vpop.xlane.xlu1 %431  ;;  %v7884_v33 = vld [vmem:[%s12936_s0 + $0xd8] sm:$0xff] }
 0x12a   :  { %v430_v55 = vpop.xlane.xlu0 %429  ;;  %v6068_v56 = vpop.eup %6067  ;;  %v1112_v57 = vadd.f32 1.0, %v6066_v52  ;;  %6087 = vpow2.f32 %v934_v44  ;;  %v940_v58 = vmul.f32 1.442695, %v737_v48  ;;  %v611_v61 = vadd.f32 %v8570_v21, %v432_v54 }
 0x12b   :  { %v938_v59 = vmul.f32 1.442695, %v736_v49  ;;  %v6070_v60 = vpop.eup %6069  ;;  %1491 = vst.msk [vmem:[%s12939_s3 + $0x1e0] sm:$0xff] %vm1430_vm0, %v6068_v56  ;;  %6089 = vrcp.f32 %v1113_v53  ;;  %v610_v62 = vadd.f32 %v8570_v21, %v430_v55  ;;  %v1591_v34 = vmul.f32 %v7884_v33, %v9003_v36  ;;  %v7886_v55 = vld [vmem:[%s12936_s0 + $0xe8] sm:$0xff] }
 0x12c   :  { %v6072_v63 = vpop.eup %6071  ;;  %1494 = vst.msk [vmem:[%s12939_s3 + $0x1f8] sm:$0xff] %vm1430_vm0, %v6070_v60  ;;  %6091 = vrcp.f32 %v1112_v57  ;;  %1734 = vadd.xlane.f32.xlu1 %v1585_v46  ;;  %v739_v7 = vsub.f32 0.0, %v611_v61  ;;  %v1593_v56 = vmul.f32 %v7886_v55, %v9003_v36  ;;  %v7887_v57 = vld [vmem:[%s12936_s0 + $0xe0] sm:$0xff] }
 0x12d   :  { %1732 = vadd.xlane.f32.xlu0 %v1584_v51  ;;  %v6074_v5 = vpop.eup %6073  ;;  %v1115_v6 = vadd.f32 1.0, %v6072_v63  ;;  %6093 = vpow2.f32 %v940_v58  ;;  %v738_v8 = vsub.f32 0.0, %v610_v62  ;;  %v436_v9 = vpop.xlane.xlu1 %435  ;;  %v1592_v58 = vmul.f32 %v7887_v57, %v9003_v36 }
 0x12e   :  { %v434_v10 = vpop.xlane.xlu0 %433  ;;  %v6076_v11 = vpop.eup %6075  ;;  %v1114_v12 = vadd.f32 1.0, %v6074_v5  ;;  %6095 = vpow2.f32 %v938_v59  ;;  %v613_v13 = vadd.f32 %v8570_v21, %v436_v9  ;;  %v944_v16 = vmul.f32 1.442695, %v739_v7  ;;  %v7888_v9 = vld [vmem:[%s12936_s0 + $0xf8] sm:$0xff] }
 0x12f   :  { %v612_v14 = vadd.f32 %v8570_v21, %v434_v10  ;;  %v6078_v15 = vpop.eup %6077  ;;  %1493 = vst.msk [vmem:[%s12939_s3 + $0x1f0] sm:$0xff] %vm1430_vm0, %v6076_v11  ;;  %6097 = vrcp.f32 %v1115_v6  ;;  %v942_v17 = vmul.f32 1.442695, %v738_v8  ;;  %v1595_v10 = vmul.f32 %v7888_v9, %v9003_v36  ;;  %v7889_v11 = vld [vmem:[%s12936_s0 + $0xf0] sm:$0xff] }
 0x130   :  { %v6080_v20 = vpop.eup %6079  ;;  %1496 = vst.msk [vmem:[%s12939_s3 + $0x208] sm:$0xff] %vm1430_vm0, %v6078_v15  ;;  %6099 = vrcp.f32 %v1114_v12  ;;  %v741_v22 = vsub.f32 0.0, %v613_v13  ;;  %1738 = vadd.xlane.f32.xlu1 %v1587_v2  ;;  %v1594_v12 = vmul.f32 %v7889_v11, %v9003_v36 }
 0x131   :  { %v740_v23 = vsub.f32 0.0, %v612_v14  ;;  %1736 = vadd.xlane.f32.xlu0 %v1586_v4  ;;  %v6082_v26 = vpop.eup %6081  ;;  %v1117_v27 = vadd.f32 1.0, %v6080_v20  ;;  %6101 = vpow2.f32 %v944_v16  ;;  %v440_v28 = vpop.xlane.xlu1 %439 }
 0x132   :  { %v438_v29 = vpop.xlane.xlu0 %437  ;;  %v6084_v30 = vpop.eup %6083  ;;  %1495 = vst.msk [vmem:[%s12939_s3 + $0x200] sm:$0xff] %vm1430_vm0, %v6082_v26  ;;  %6103 = vpow2.f32 %v942_v17  ;;  %v948_v31 = vmul.f32 1.442695, %v741_v22  ;;  %v615_v32 = vadd.f32 %v8570_v21, %v440_v28 }
 0x133   :  { %v6086_v35 = vpop.eup %6085  ;;  %6105 = vrcp.f32 %v1117_v27  ;;  %v1116_v37 = vadd.f32 1.0, %v6084_v30  ;;  %v614_v38 = vadd.f32 %v8570_v21, %v438_v29  ;;  %v946_v43 = vmul.f32 1.442695, %v740_v23  ;;  %v7890_v30 = vld [vmem:[%s12936_s0 + $0x108] sm:$0xff] }
 0x134   :  { %v6088_v41 = vpop.eup %6087  ;;  %v1119_v42 = vadd.f32 1.0, %v6086_v35  ;;  %6107 = vpow2.f32 %v948_v31  ;;  %v743_v1 = vsub.f32 0.0, %v615_v32  ;;  %1742 = vadd.xlane.f32.xlu1 %v1589_v19  ;;  %v1597_v31 = vmul.f32 %v7890_v30, %v9003_v36  ;;  %v7891_v35 = vld [vmem:[%s12936_s0 + $0x100] sm:$0xff] }
 0x135   :  { %1740 = vadd.xlane.f32.xlu0 %v1588_v25  ;;  %v6090_v44 = vpop.eup %6089  ;;  %6109 = vrcp.f32 %v1116_v37  ;;  %v1118_v45 = vadd.f32 1.0, %v6088_v41  ;;  %v742_v46 = vsub.f32 0.0, %v614_v38  ;;  %v444_v47 = vpop.xlane.xlu1 %443  ;;  %v1596_v37 = vmul.f32 %v7891_v35, %v9003_v36 }
 0x136   :  { %v442_v48 = vpop.xlane.xlu0 %441  ;;  %v6092_v49 = vpop.eup %6091  ;;  %1498 = vst.msk [vmem:[%s12939_s3 + $0x218] sm:$0xff] %vm1430_vm0, %v6090_v44  ;;  %6111 = vrcp.f32 %v1119_v42  ;;  %v952_v50 = vmul.f32 1.442695, %v743_v1  ;;  %v617_v51 = vadd.f32 %v8570_v21, %v444_v47  ;;  %v7892_v1 = vld [vmem:[%s12936_s0 + $0x118] sm:$0xff] }
 0x137   :  { %v616_v52 = vadd.f32 %v8570_v21, %v442_v48  ;;  %v6094_v53 = vpop.eup %6093  ;;  %1497 = vst.msk [vmem:[%s12939_s3 + $0x210] sm:$0xff] %vm1430_vm0, %v6092_v49  ;;  %6113 = vrcp.f32 %v1118_v45  ;;  %v950_v54 = vmul.f32 1.442695, %v742_v46  ;;  %v1599_v44 = vmul.f32 %v7892_v1, %v9003_v36 }
 0x138   :  { %v6096_v59 = vpop.eup %6095  ;;  %v1121_v60 = vadd.f32 1.0, %v6094_v53  ;;  %6115 = vpow2.f32 %v946_v43  ;;  %v745_v61 = vsub.f32 0.0, %v617_v51  ;;  %1746 = vadd.xlane.f32.xlu1 %v1591_v34 }
 0x139   :  { %v744_v62 = vsub.f32 0.0, %v616_v52  ;;  %1744 = vadd.xlane.f32.xlu0 %v1590_v40  ;;  %v6098_v63 = vpop.eup %6097  ;;  %v1120_v0 = vadd.f32 1.0, %v6096_v59  ;;  %6117 = vpow2.f32 %v952_v50  ;;  %v448_v2 = vpop.xlane.xlu1 %447  ;;  %v7893_v52 = vld [vmem:[%s12936_s0 + $0x110] sm:$0xff] }
 0x13a   :  { %v446_v3 = vpop.xlane.xlu0 %445  ;;  %v6100_v4 = vpop.eup %6099  ;;  %1500 = vst.msk [vmem:[%s12939_s3 + $0x228] sm:$0xff] %vm1430_vm0, %v6098_v63  ;;  %6119 = vrcp.f32 %v1121_v60  ;;  %v956_v5 = vmul.f32 1.442695, %v745_v61  ;;  %v619_v6 = vadd.f32 %v8570_v21, %v448_v2  ;;  %v1598_v53 = vmul.f32 %v7893_v52, %v9003_v36 }
 0x13b   :  { %v6102_v7 = vpop.eup %6101  ;;  %1499 = vst.msk [vmem:[%s12939_s3 + $0x220] sm:$0xff] %vm1430_vm0, %v6100_v4  ;;  %6121 = vrcp.f32 %v1120_v0  ;;  %v618_v8 = vadd.f32 %v8570_v21, %v446_v3  ;;  %v954_v15 = vmul.f32 1.442695, %v744_v62  ;;  %v7895_v4 = vld [vmem:[%s12936_s0 + $0x120] sm:$0xff] }
 0x13c   :  { %v6104_v13 = vpop.eup %6103  ;;  %v1123_v14 = vadd.f32 1.0, %v6102_v7  ;;  %6123 = vpow2.f32 %v950_v54  ;;  %v747_v16 = vsub.f32 0.0, %v619_v6  ;;  %1750 = vadd.xlane.f32.xlu1 %v1593_v56 }
 0x13d   :  { %1748 = vadd.xlane.f32.xlu0 %v1592_v58  ;;  %v6106_v17 = vpop.eup %6105  ;;  %v1122_v18 = vadd.f32 1.0, %v6104_v13  ;;  %6125 = vpow2.f32 %v956_v5  ;;  %v746_v19 = vsub.f32 0.0, %v618_v8  ;;  %v452_v20 = vpop.xlane.xlu1 %451  ;;  %v7894_v58 = vld [vmem:[%s12936_s0 + $0x128] sm:$0xff]  ;;  %v1600_v5 = vmul.f32 %v7895_v4, %v9003_v36 }
 0x13e   :  { %v450_v22 = vpop.xlane.xlu0 %449  ;;  %v6108_v23 = vpop.eup %6107  ;;  %1502 = vst.msk [vmem:[%s12939_s3 + $0x238] sm:$0xff] %vm1430_vm0, %v6106_v17  ;;  %6127 = vrcp.f32 %v1123_v14  ;;  %v960_v24 = vmul.f32 1.442695, %v747_v16  ;;  %v621_v25 = vadd.f32 %v8570_v21, %v452_v20  ;;  %v1601_v59 = vmul.f32 %v7894_v58, %v9003_v36 }
 0x13f   :  { %v620_v26 = vadd.f32 %v8570_v21, %v450_v22  ;;  %v6110_v27 = vpop.eup %6109  ;;  %6129 = vrcp.f32 %v1122_v18  ;;  %v1125_v28 = vadd.f32 1.0, %v6108_v23  ;;  %v958_v29 = vmul.f32 1.442695, %v746_v19  ;;  %v7896_v23 = vld [vmem:[%s12936_s0 + $0x138] sm:$0xff] }
 0x140   :  { %v6112_v32 = vpop.eup %6111  ;;  %1501 = vst.msk [vmem:[%s12939_s3 + $0x230] sm:$0xff] %vm1430_vm0, %v6110_v27  ;;  %6131 = vpow2.f32 %v954_v15  ;;  %v749_v33 = vsub.f32 0.0, %v621_v25  ;;  %1754 = vadd.xlane.f32.xlu1 %v1595_v10  ;;  %v7897_v25 = vld [vmem:[%s12936_s0 + $0x130] sm:$0xff] }
 0x141   :  { %v748_v34 = vsub.f32 0.0, %v620_v26  ;;  %1752 = vadd.xlane.f32.xlu0 %v1594_v12  ;;  %v6114_v38 = vpop.eup %6113  ;;  %1504 = vst.msk [vmem:[%s12939_s3 + $0x248] sm:$0xff] %vm1430_vm0, %v6112_v32  ;;  %6133 = vrcp.f32 %v1125_v28  ;;  %v456_v39 = vpop.xlane.xlu1 %455  ;;  %v1602_v26 = vmul.f32 %v7897_v25, %v9003_v36 }
 0x142   :  { %v454_v40 = vpop.xlane.xlu0 %453  ;;  %v6116_v41 = vpop.eup %6115  ;;  %1503 = vst.msk [vmem:[%s12939_s3 + $0x240] sm:$0xff] %vm1430_vm0, %v6114_v38  ;;  %6135 = vpow2.f32 %v960_v24  ;;  %v964_v42 = vmul.f32 1.442695, %v749_v33  ;;  %v623_v43 = vadd.f32 %v8570_v21, %v456_v39  ;;  %v1603_v24 = vmul.f32 %v7896_v23, %v9003_v36 }
 0x143   :  { %v6118_v45 = vpop.eup %6117  ;;  %v1124_v46 = vadd.f32 1.0, %v6116_v41  ;;  %6137 = vpow2.f32 %v958_v29  ;;  %v962_v47 = vmul.f32 1.442695, %v748_v34  ;;  %v622_v48 = vadd.f32 %v8570_v21, %v454_v40 }
 0x144   :  { %v6120_v49 = vpop.eup %6119  ;;  %v1127_v50 = vadd.f32 1.0, %v6118_v45  ;;  %6139 = vpow2.f32 %v964_v42  ;;  %v751_v51 = vsub.f32 0.0, %v623_v43  ;;  %1758 = vadd.xlane.f32.xlu1 %v1597_v31  ;;  %v7898_v43 = vld [vmem:[%s12936_s0 + $0x148] sm:$0xff] }
 0x145   :  { %1756 = vadd.xlane.f32.xlu0 %v1596_v37  ;;  %v6122_v54 = vpop.eup %6121  ;;  %1506 = vst.msk [vmem:[%s12939_s3 + $0x258] sm:$0xff] %vm1430_vm0, %v6120_v49  ;;  %6141 = vrcp.f32 %v1124_v46  ;;  %v750_v55 = vsub.f32 0.0, %v622_v48  ;;  %v460_v56 = vpop.xlane.xlu1 %459  ;;  %v1605_v1 = vmul.f32 %v7898_v43, %v9003_v36 }
 0x146   :  { %v458_v57 = vpop.xlane.xlu0 %457  ;;  %v6124_v60 = vpop.eup %6123  ;;  %1505 = vst.msk [vmem:[%s12939_s3 + $0x250] sm:$0xff] %vm1430_vm0, %v6122_v54  ;;  %6143 = vrcp.f32 %v1127_v50  ;;  %v968_v61 = vmul.f32 1.442695, %v751_v51  ;;  %v625_v62 = vadd.f32 %v8570_v21, %v460_v56 }
 0x147   :  { %v624_v63 = vadd.f32 %v8570_v21, %v458_v57  ;;  %v6126_v0 = vpop.eup %6125  ;;  %v1126_v2 = vadd.f32 1.0, %v6124_v60  ;;  %6145 = vpow2.f32 %v962_v47  ;;  %v966_v3 = vmul.f32 1.442695, %v750_v55  ;;  %v9400_v60 = vld [vmem:[%s12937_s1 + $0x1] ss:$0 sm:$0xff] }
 0x148   :  { %v6128_v6 = vpop.eup %6127  ;;  %v1129_v7 = vadd.f32 1.0, %v6126_v0  ;;  %6147 = vpow2.f32 %v968_v61  ;;  %v753_v8 = vsub.f32 0.0, %v625_v62  ;;  %1762 = vadd.xlane.f32.xlu1 %v1599_v44  ;;  %v7899_v44 = vld [vmem:[%s12936_s0 + $0x140] sm:$0xff]  ;;  %v7902_v62 = vld [vmem:[%s12936_s0 + $0x150] sm:$0xff] }
 0x149   :  { %v752_v9 = vsub.f32 0.0, %v624_v63  ;;  %1760 = vadd.xlane.f32.xlu0 %v1598_v53  ;;  %v6130_v10 = vpop.eup %6129  ;;  %1508 = vst.msk [vmem:[%s12939_s3 + $0x268] sm:$0xff] %vm1430_vm0, %v6128_v6  ;;  %6149 = vrcp.f32 %v1126_v2  ;;  %v464_v11 = vpop.xlane.xlu1 %463  ;;  %v1604_v45 = vmul.f32 %v7899_v44, %v9003_v36  ;;  %v1606_v63 = vmul.f32 %v7902_v62, %v9400_v60 }
 0x14a   :  { %v462_v12 = vpop.xlane.xlu0 %461  ;;  %v6132_v13 = vpop.eup %6131  ;;  %1507 = vst.msk [vmem:[%s12939_s3 + $0x260] sm:$0xff] %vm1430_vm0, %v6130_v10  ;;  %6151 = vrcp.f32 %v1129_v7  ;;  %v972_v14 = vmul.f32 1.442695, %v753_v8  ;;  %v627_v16 = vadd.f32 %v8570_v21, %v464_v11 }
 0x14b   :  { %v970_v15 = vmul.f32 1.442695, %v752_v9  ;;  %v6134_v17 = vpop.eup %6133  ;;  %v1128_v18 = vadd.f32 1.0, %v6132_v13  ;;  %6153 = vpow2.f32 %v966_v3  ;;  %v626_v19 = vadd.f32 %v8570_v21, %v462_v12  ;;  %v7903_v12 = vld [vmem:[%s12936_s0 + $0x168] sm:$0xff] }
 0x14c   :  { %v6136_v20 = vpop.eup %6135  ;;  %1510 = vst.msk [vmem:[%s12939_s3 + $0x278] sm:$0xff] %vm1430_vm0, %v6134_v17  ;;  %6155 = vpow2.f32 %v972_v14  ;;  %v755_v22 = vsub.f32 0.0, %v627_v16  ;;  %1766 = vadd.xlane.f32.xlu1 %v1601_v59  ;;  %v7900_v59 = vld [vmem:[%s12936_s0 + $0x158] sm:$0xff]  ;;  %v1609_v13 = vmul.f32 %v7903_v12, %v9400_v60  ;;  %v7904_v17 = vld [vmem:[%s12936_s0 + $0x160] sm:$0xff] }
 0x14d   :  { %1764 = vadd.xlane.f32.xlu0 %v1600_v5  ;;  %v6138_v27 = vpop.eup %6137  ;;  %6157 = vrcp.f32 %v1128_v18  ;;  %v1131_v28 = vadd.f32 1.0, %v6136_v20  ;;  %v754_v29 = vsub.f32 0.0, %v626_v19  ;;  %v468_v30 = vpop.xlane.xlu1 %467  ;;  %v1607_v61 = vmul.f32 %v9400_v60, %v7900_v59 }
 0x14e   :  { %v466_v31 = vpop.xlane.xlu0 %465  ;;  %v6140_v32 = vpop.eup %6139  ;;  %v1130_v33 = vadd.f32 1.0, %v6138_v27  ;;  %6159 = vpow2.f32 %v970_v15  ;;  %v976_v34 = vmul.f32 1.442695, %v755_v22  ;;  %v629_v35 = vadd.f32 %v8570_v21, %v468_v30 }
 0x14f   :  { %v6142_v37 = vpop.eup %6141  ;;  %6161 = vrcp.f32 %v1131_v28  ;;  %v1133_v38 = vadd.f32 1.0, %v6140_v32  ;;  %v974_v39 = vmul.f32 1.442695, %v754_v29  ;;  %v628_v40 = vadd.f32 %v8570_v21, %v466_v31  ;;  %v7905_v31 = vld [vmem:[%s12936_s0 + $0x178] sm:$0xff] }
 0x150   :  { %v6144_v41 = vpop.eup %6143  ;;  %1509 = vst.msk [vmem:[%s12939_s3 + $0x270] sm:$0xff] %vm1430_vm0, %v6142_v37  ;;  %6163 = vrcp.f32 %v1130_v33  ;;  %v757_v42 = vsub.f32 0.0, %v629_v35  ;;  %1770 = vadd.xlane.f32.xlu1 %v1603_v24  ;;  %v1608_v18 = vmul.f32 %v7904_v17, %v9400_v60  ;;  %v1611_v32 = vmul.f32 %v7905_v31, %v9400_v60  ;;  %v7906_v37 = vld [vmem:[%s12936_s0 + $0x170] sm:$0xff] }
 0x151   :  { %1768 = vadd.xlane.f32.xlu0 %v1602_v26  ;;  %v6146_v46 = vpop.eup %6145  ;;  %1512 = vst.msk [vmem:[%s12939_s3 + $0x288] sm:$0xff] %vm1430_vm0, %v6144_v41  ;;  %6165 = vrcp.f32 %v1133_v38  ;;  %v756_v47 = vsub.f32 0.0, %v628_v40  ;;  %v472_v48 = vpop.xlane.xlu1 %471  ;;  %v1610_v38 = vmul.f32 %v7906_v37, %v9400_v60 }
 0x152   :  { %v470_v49 = vpop.xlane.xlu0 %469  ;;  %v6148_v50 = vpop.eup %6147  ;;  %v1132_v51 = vadd.f32 1.0, %v6146_v46  ;;  %6167 = vpow2.f32 %v976_v34  ;;  %v980_v52 = vmul.f32 1.442695, %v757_v42  ;;  %v631_v53 = vadd.f32 %v8570_v21, %v472_v48 }
 0x153   :  { %v6150_v54 = vpop.eup %6149  ;;  %v1135_v55 = vadd.f32 1.0, %v6148_v50  ;;  %6169 = vpow2.f32 %v974_v39  ;;  %v978_v36 = vmul.f32 1.442695, %v756_v47  ;;  %v630_v56 = vadd.f32 %v8570_v21, %v470_v49  ;;  %v7907_v50 = vld [vmem:[%s12936_s0 + $0x188] sm:$0xff] }
 0x154   :  { %v6152_v57 = vpop.eup %6151  ;;  %1511 = vst.msk [vmem:[%s12939_s3 + $0x280] sm:$0xff] %vm1430_vm0, %v6150_v54  ;;  %6171 = vrcp.f32 %v1132_v51  ;;  %v759_v58 = vsub.f32 0.0, %v631_v53  ;;  %1774 = vadd.xlane.f32.xlu1 %v1605_v1  ;;  %v1613_v51 = vmul.f32 %v7907_v50, %v9400_v60 }
 0x155   :  { %1772 = vadd.xlane.f32.xlu0 %v1604_v45  ;;  %v6154_v0 = vpop.eup %6153  ;;  %1514 = vst.msk [vmem:[%s12939_s3 + $0x298] sm:$0xff] %vm1430_vm0, %v6152_v57  ;;  %6173 = vrcp.f32 %v1135_v55  ;;  %v758_v2 = vsub.f32 0.0, %v630_v56  ;;  %v476_v3 = vpop.xlane.xlu1 %475 }
 0x156   :  { %v474_v4 = vpop.xlane.xlu0 %473  ;;  %v6156_v5 = vpop.eup %6155  ;;  %v1134_v6 = vadd.f32 1.0, %v6154_v0  ;;  %6175 = vpow2.f32 %v980_v52  ;;  %v984_v7 = vmul.f32 1.442695, %v759_v58  ;;  %v633_v8 = vadd.f32 %v8570_v21, %v476_v3  ;;  %v7908_v52 = vld [vmem:[%s12936_s0 + $0x180] sm:$0xff] }
 0x157   :  { %v6158_v9 = vpop.eup %6157  ;;  %v1137_v10 = vadd.f32 1.0, %v6156_v5  ;;  %6177 = vpow2.f32 %v978_v36  ;;  %v632_v11 = vadd.f32 %v8570_v21, %v474_v4  ;;  %v982_v15 = vmul.f32 1.442695, %v758_v2  ;;  %v7909_v4 = vld [vmem:[%s12936_s0 + $0x198] sm:$0xff] }
 0x158   :  { %v6160_v14 = vpop.eup %6159  ;;  %1513 = vst.msk [vmem:[%s12939_s3 + $0x290] sm:$0xff] %vm1430_vm0, %v6158_v9  ;;  %6179 = vrcp.f32 %v1134_v6  ;;  %v761_v16 = vsub.f32 0.0, %v633_v8  ;;  %1778 = vadd.xlane.f32.xlu1 %v1607_v61  ;;  %v1612_v53 = vmul.f32 %v7908_v52, %v9400_v60  ;;  %v1615_v5 = vmul.f32 %v7909_v4, %v9400_v60  ;;  %v7910_v9 = vld [vmem:[%s12936_s0 + $0x190] sm:$0xff] }
 0x159   :  { %1776 = vadd.xlane.f32.xlu0 %v1606_v63  ;;  %v6162_v19 = vpop.eup %6161  ;;  %6181 = vrcp.f32 %v1137_v10  ;;  %v1136_v20 = vadd.f32 1.0, %v6160_v14  ;;  %v760_v22 = vsub.f32 0.0, %v632_v11  ;;  %v480_v23 = vpop.xlane.xlu1 %479  ;;  %v1614_v10 = vmul.f32 %v7910_v9, %v9400_v60 }
 0x15a   :  { %v478_v24 = vpop.xlane.xlu0 %477  ;;  %v6164_v25 = vpop.eup %6163  ;;  %1516 = vst.msk [vmem:[%s12939_s3 + $0x2a8] sm:$0xff] %vm1430_vm0, %v6162_v19  ;;  %6183 = vpow2.f32 %v984_v7  ;;  %v988_v26 = vmul.f32 1.442695, %v761_v16  ;;  %v635_v27 = vadd.f32 %v8570_v21, %v480_v23 }
 0x15b   :  { %v634_v28 = vadd.f32 %v8570_v21, %v478_v24  ;;  %v6166_v29 = vpop.eup %6165  ;;  %1515 = vst.msk [vmem:[%s12939_s3 + $0x2a0] sm:$0xff] %vm1430_vm0, %v6164_v25  ;;  %6185 = vrcp.f32 %v1136_v20  ;;  %v986_v30 = vmul.f32 1.442695, %v760_v22  ;;  %v7912_v24 = vld [vmem:[%s12936_s0 + $0x1a0] sm:$0xff] }
 0x15c   :  { %v6168_v33 = vpop.eup %6167  ;;  %1518 = vst.msk [vmem:[%s12939_s3 + $0x2b8] sm:$0xff] %vm1430_vm0, %v6166_v29  ;;  %6187 = vpow2.f32 %v982_v15  ;;  %v763_v34 = vsub.f32 0.0, %v635_v27  ;;  %1782 = vadd.xlane.f32.xlu1 %v1609_v13  ;;  %v1616_v25 = vmul.f32 %v7912_v24, %v9400_v60 }
 0x15d   :  { %v762_v35 = vsub.f32 0.0, %v634_v28  ;;  %1780 = vadd.xlane.f32.xlu0 %v1608_v18  ;;  %v6170_v39 = vpop.eup %6169  ;;  %v1139_v40 = vadd.f32 1.0, %v6168_v33  ;;  %6189 = vpow2.f32 %v988_v26  ;;  %v484_v41 = vpop.xlane.xlu1 %483  ;;  %v7911_v18 = vld [vmem:[%s12936_s0 + $0x1a8] sm:$0xff] }
 0x15e   :  { %v482_v42 = vpop.xlane.xlu0 %481  ;;  %v6172_v43 = vpop.eup %6171  ;;  %v1138_v1 = vadd.f32 1.0, %v6170_v39  ;;  %6191 = vpow2.f32 %v986_v30  ;;  %v992_v44 = vmul.f32 1.442695, %v763_v34  ;;  %v637_v47 = vadd.f32 %v8570_v21, %v484_v41 }
 0x15f   :  { %v990_v45 = vmul.f32 1.442695, %v762_v35  ;;  %v6174_v46 = vpop.eup %6173  ;;  %1517 = vst.msk [vmem:[%s12939_s3 + $0x2b0] sm:$0xff] %vm1430_vm0, %v6172_v43  ;;  %6193 = vrcp.f32 %v1139_v40  ;;  %v636_v48 = vadd.f32 %v8570_v21, %v482_v42  ;;  %v1617_v19 = vmul.f32 %v7911_v18, %v9400_v60  ;;  %v7913_v42 = vld [vmem:[%s12936_s0 + $0x1b8] sm:$0xff] }
 0x160   :  { %v6176_v49 = vpop.eup %6175  ;;  %1520 = vst.msk [vmem:[%s12939_s3 + $0x2c8] sm:$0xff] %vm1430_vm0, %v6174_v46  ;;  %6195 = vrcp.f32 %v1138_v1  ;;  %1786 = vadd.xlane.f32.xlu1 %v1611_v32  ;;  %v765_v36 = vsub.f32 0.0, %v637_v47  ;;  %v1619_v43 = vmul.f32 %v7913_v42, %v9400_v60  ;;  %v7914_v1 = vld [vmem:[%s12936_s0 + $0x1b0] sm:$0xff] }
 0x161   :  { %1784 = vadd.xlane.f32.xlu0 %v1610_v38  ;;  %v6178_v54 = vpop.eup %6177  ;;  %v1141_v55 = vadd.f32 1.0, %v6176_v49  ;;  %6197 = vpow2.f32 %v992_v44  ;;  %v764_v56 = vsub.f32 0.0, %v636_v48  ;;  %v488_v57 = vpop.xlane.xlu1 %487  ;;  %v1618_v44 = vmul.f32 %v7914_v1, %v9400_v60 }
 0x162   :  { %v486_v58 = vpop.xlane.xlu0 %485  ;;  %v6180_v59 = vpop.eup %6179  ;;  %v1140_v61 = vadd.f32 1.0, %v6178_v54  ;;  %6199 = vpow2.f32 %v990_v45  ;;  %v639_v62 = vadd.f32 %v8570_v21, %v488_v57  ;;  %v996_v2 = vmul.f32 1.442695, %v765_v36  ;;  %v7915_v57 = vld [vmem:[%s12936_s0 + $0x1c8] sm:$0xff] }
 0x163   :  { %v638_v63 = vadd.f32 %v8570_v21, %v486_v58  ;;  %v6182_v0 = vpop.eup %6181  ;;  %1519 = vst.msk [vmem:[%s12939_s3 + $0x2c0] sm:$0xff] %vm1430_vm0, %v6180_v59  ;;  %6201 = vrcp.f32 %v1141_v55  ;;  %v994_v3 = vmul.f32 1.442695, %v764_v56  ;;  %v1621_v58 = vmul.f32 %v7915_v57, %v9400_v60  ;;  %v7916_v59 = vld [vmem:[%s12936_s0 + $0x1c0] sm:$0xff] }
 0x164   :  { %v6184_v6 = vpop.eup %6183  ;;  %1522 = vst.msk [vmem:[%s12939_s3 + $0x2d8] sm:$0xff] %vm1430_vm0, %v6182_v0  ;;  %6203 = vrcp.f32 %v1140_v61  ;;  %v767_v7 = vsub.f32 0.0, %v639_v62  ;;  %1790 = vadd.xlane.f32.xlu1 %v1613_v51  ;;  %v1620_v61 = vmul.f32 %v7916_v59, %v9400_v60 }
 0x165   :  { %v766_v8 = vsub.f32 0.0, %v638_v63  ;;  %1788 = vadd.xlane.f32.xlu0 %v1612_v53  ;;  %v6186_v11 = vpop.eup %6185  ;;  %v1143_v12 = vadd.f32 1.0, %v6184_v6  ;;  %6205 = vpow2.f32 %v996_v2  ;;  %v492_v13 = vpop.xlane.xlu1 %491 }
 0x166   :  { %v490_v14 = vpop.xlane.xlu0 %489  ;;  %v6188_v15 = vpop.eup %6187  ;;  %1521 = vst.msk [vmem:[%s12939_s3 + $0x2d0] sm:$0xff] %vm1430_vm0, %v6186_v11  ;;  %6207 = vpow2.f32 %v994_v3  ;;  %v1000_v16 = vmul.f32 1.442695, %v767_v7  ;;  %v641_v17 = vadd.f32 %v8570_v21, %v492_v13 }
 0x167   :  { %v6190_v20 = vpop.eup %6189  ;;  %6209 = vrcp.f32 %v1143_v12  ;;  %v1142_v22 = vadd.f32 1.0, %v6188_v15  ;;  %v640_v23 = vadd.f32 %v8570_v21, %v490_v14  ;;  %v998_v28 = vmul.f32 1.442695, %v766_v8  ;;  %v7917_v15 = vld [vmem:[%s12936_s0 + $0x1d8] sm:$0xff] }
 0x168   :  { %v6192_v26 = vpop.eup %6191  ;;  %v1145_v27 = vadd.f32 1.0, %v6190_v20  ;;  %6211 = vpow2.f32 %v1000_v16  ;;  %v769_v29 = vsub.f32 0.0, %v641_v17  ;;  %1794 = vadd.xlane.f32.xlu1 %v1615_v5  ;;  %v1623_v16 = vmul.f32 %v7917_v15, %v9400_v60  ;;  %v7918_v20 = vld [vmem:[%s12936_s0 + $0x1d0] sm:$0xff] }
 0x169   :  { %1792 = vadd.xlane.f32.xlu0 %v1614_v10  ;;  %v6194_v30 = vpop.eup %6193  ;;  %6213 = vrcp.f32 %v1142_v22  ;;  %v1144_v31 = vadd.f32 1.0, %v6192_v26  ;;  %v768_v32 = vsub.f32 0.0, %v640_v23  ;;  %v496_v33 = vpop.xlane.xlu1 %495  ;;  %v1622_v22 = vmul.f32 %v7918_v20, %v9400_v60 }
 0x16a   :  { %v494_v34 = vpop.xlane.xlu0 %493  ;;  %v6196_v35 = vpop.eup %6195  ;;  %1524 = vst.msk [vmem:[%s12939_s3 + $0x2e8] sm:$0xff] %vm1430_vm0, %v6194_v30  ;;  %6215 = vrcp.f32 %v1145_v27  ;;  %v1004_v37 = vmul.f32 1.442695, %v769_v29  ;;  %v643_v38 = vadd.f32 %v8570_v21, %v496_v33  ;;  %v7919_v29 = vld [vmem:[%s12936_s0 + $0x1e8] sm:$0xff] }
 0x16b   :  { %v642_v39 = vadd.f32 %v8570_v21, %v494_v34  ;;  %v6198_v40 = vpop.eup %6197  ;;  %1523 = vst.msk [vmem:[%s12939_s3 + $0x2e0] sm:$0xff] %vm1430_vm0, %v6196_v35  ;;  %6217 = vrcp.f32 %v1144_v31  ;;  %v1002_v41 = vmul.f32 1.442695, %v768_v32  ;;  %v1625_v30 = vmul.f32 %v7919_v29, %v9400_v60 }
 0x16c   :  { %v6200_v45 = vpop.eup %6199  ;;  %v1147_v46 = vadd.f32 1.0, %v6198_v40  ;;  %6219 = vpow2.f32 %v998_v28  ;;  %v771_v47 = vsub.f32 0.0, %v643_v38  ;;  %1798 = vadd.xlane.f32.xlu1 %v1617_v19 }
 0x16d   :  { %v770_v48 = vsub.f32 0.0, %v642_v39  ;;  %1796 = vadd.xlane.f32.xlu0 %v1616_v25  ;;  %v6202_v49 = vpop.eup %6201  ;;  %v1146_v50 = vadd.f32 1.0, %v6200_v45  ;;  %6221 = vpow2.f32 %v1004_v37  ;;  %v500_v51 = vpop.xlane.xlu1 %499  ;;  %v7920_v39 = vld [vmem:[%s12936_s0 + $0x1e0] sm:$0xff] }
 0x16e   :  { %v498_v52 = vpop.xlane.xlu0 %497  ;;  %v6204_v53 = vpop.eup %6203  ;;  %1526 = vst.msk [vmem:[%s12939_s3 + $0x2f8] sm:$0xff] %vm1430_vm0, %v6202_v49  ;;  %6223 = vrcp.f32 %v1147_v46  ;;  %v1008_v54 = vmul.f32 1.442695, %v771_v47  ;;  %v645_v55 = vadd.f32 %v8570_v21, %v500_v51  ;;  %v1624_v40 = vmul.f32 %v7920_v39, %v9400_v60 }
 0x16f   :  { %v6206_v36 = vpop.eup %6205  ;;  %1525 = vst.msk [vmem:[%s12939_s3 + $0x2f0] sm:$0xff] %vm1430_vm0, %v6204_v53  ;;  %6225 = vrcp.f32 %v1146_v50  ;;  %v644_v56 = vadd.f32 %v8570_v21, %v498_v52  ;;  %v1006_v0 = vmul.f32 1.442695, %v770_v48  ;;  %v7922_v53 = vld [vmem:[%s12936_s0 + $0x1f0] sm:$0xff] }
 0x170   :  { %v6208_v62 = vpop.eup %6207  ;;  %v1149_v63 = vadd.f32 1.0, %v6206_v36  ;;  %6227 = vpow2.f32 %v1002_v41  ;;  %v773_v2 = vsub.f32 0.0, %v645_v55  ;;  %1802 = vadd.xlane.f32.xlu1 %v1619_v43 }
 0x171   :  { %1800 = vadd.xlane.f32.xlu0 %v1618_v44  ;;  %v6210_v3 = vpop.eup %6209  ;;  %v1148_v4 = vadd.f32 1.0, %v6208_v62  ;;  %6229 = vpow2.f32 %v1008_v54  ;;  %v772_v5 = vsub.f32 0.0, %v644_v56  ;;  %v504_v6 = vpop.xlane.xlu1 %503  ;;  %v7921_v44 = vld [vmem:[%s12936_s0 + $0x1f8] sm:$0xff]  ;;  %v1626_v54 = vmul.f32 %v7922_v53, %v9400_v60 }
 0x172   :  { %v502_v7 = vpop.xlane.xlu0 %501  ;;  %v6212_v8 = vpop.eup %6211  ;;  %1528 = vst.msk [vmem:[%s12939_s3 + $0x308] sm:$0xff] %vm1430_vm0, %v6210_v3  ;;  %6231 = vrcp.f32 %v1149_v63  ;;  %v1012_v9 = vmul.f32 1.442695, %v773_v2  ;;  %v647_v10 = vadd.f32 %v8570_v21, %v504_v6  ;;  %v1627_v45 = vmul.f32 %v7921_v44, %v9400_v60 }
 0x173   :  { %v646_v11 = vadd.f32 %v8570_v21, %v502_v7  ;;  %v6214_v12 = vpop.eup %6213  ;;  %6233 = vrcp.f32 %v1148_v4  ;;  %v1151_v13 = vadd.f32 1.0, %v6212_v8  ;;  %v1010_v14 = vmul.f32 1.442695, %v772_v5  ;;  %v7923_v8 = vld [vmem:[%s12936_s0 + $0x208] sm:$0xff] }
 0x174   :  { %v6216_v17 = vpop.eup %6215  ;;  %1527 = vst.msk [vmem:[%s12939_s3 + $0x300] sm:$0xff] %vm1430_vm0, %v6214_v12  ;;  %6235 = vpow2.f32 %v1006_v0  ;;  %v775_v18 = vsub.f32 0.0, %v647_v10  ;;  %1806 = vadd.xlane.f32.xlu1 %v1621_v58  ;;  %v7924_v10 = vld [vmem:[%s12936_s0 + $0x200] sm:$0xff] }
 0x175   :  { %v774_v19 = vsub.f32 0.0, %v646_v11  ;;  %1804 = vadd.xlane.f32.xlu0 %v1620_v61  ;;  %v6218_v23 = vpop.eup %6217  ;;  %1530 = vst.msk [vmem:[%s12939_s3 + $0x318] sm:$0xff] %vm1430_vm0, %v6216_v17  ;;  %6237 = vrcp.f32 %v1151_v13  ;;  %v508_v24 = vpop.xlane.xlu1 %507  ;;  %v1628_v11 = vmul.f32 %v7924_v10, %v9400_v60 }
 0x176   :  { %v506_v25 = vpop.xlane.xlu0 %505  ;;  %v6220_v26 = vpop.eup %6219  ;;  %1529 = vst.msk [vmem:[%s12939_s3 + $0x310] sm:$0xff] %vm1430_vm0, %v6218_v23  ;;  %6239 = vpow2.f32 %v1012_v9  ;;  %v1016_v27 = vmul.f32 1.442695, %v775_v18  ;;  %v649_v28 = vadd.f32 %v8570_v21, %v508_v24  ;;  %v1629_v9 = vmul.f32 %v7923_v8, %v9400_v60 }
 0x177   :  { %v6222_v31 = vpop.eup %6221  ;;  %v1150_v32 = vadd.f32 1.0, %v6220_v26  ;;  %6241 = vpow2.f32 %v1010_v14  ;;  %v1014_v33 = vmul.f32 1.442695, %v774_v19  ;;  %v648_v34 = vadd.f32 %v8570_v21, %v506_v25 }
 0x178   :  { %v6224_v35 = vpop.eup %6223  ;;  %v1153_v37 = vadd.f32 1.0, %v6222_v31  ;;  %6243 = vpow2.f32 %v1016_v27  ;;  %v777_v38 = vsub.f32 0.0, %v649_v28  ;;  %1810 = vadd.xlane.f32.xlu1 %v1623_v16  ;;  %v7925_v28 = vld [vmem:[%s12936_s0 + $0x218] sm:$0xff] }
 0x179   :  { %1808 = vadd.xlane.f32.xlu0 %v1622_v22  ;;  %v6226_v41 = vpop.eup %6225  ;;  %1532 = vst.msk [vmem:[%s12939_s3 + $0x328] sm:$0xff] %vm1430_vm0, %v6224_v35  ;;  %6245 = vrcp.f32 %v1150_v32  ;;  %v776_v42 = vsub.f32 0.0, %v648_v34  ;;  %v512_v43 = vpop.xlane.xlu1 %511  ;;  %v1631_v29 = vmul.f32 %v7925_v28, %v9400_v60 }
 0x17a   :  { %v510_v1 = vpop.xlane.xlu0 %509  ;;  %v6228_v46 = vpop.eup %6227  ;;  %1531 = vst.msk [vmem:[%s12939_s3 + $0x320] sm:$0xff] %vm1430_vm0, %v6226_v41  ;;  %6247 = vrcp.f32 %v1153_v37  ;;  %v1020_v47 = vmul.f32 1.442695, %v777_v38  ;;  %v651_v48 = vadd.f32 %v8570_v21, %v512_v43 }
 0x17b   :  { %v650_v49 = vadd.f32 %v8570_v21, %v510_v1  ;;  %v6230_v50 = vpop.eup %6229  ;;  %v1152_v51 = vadd.f32 1.0, %v6228_v46  ;;  %6249 = vpow2.f32 %v1014_v33  ;;  %v1018_v52 = vmul.f32 1.442695, %v776_v42  ;;  %v7927_v46 = vld [vmem:[%s12936_s0 + $0x228] sm:$0xff] }
 0x17c   :  { %v6232_v55 = vpop.eup %6231  ;;  %v1155_v36 = vadd.f32 1.0, %v6230_v50  ;;  %6251 = vpow2.f32 %v1020_v47  ;;  %v779_v56 = vsub.f32 0.0, %v651_v48  ;;  %1814 = vadd.xlane.f32.xlu1 %v1625_v30  ;;  %v7926_v30 = vld [vmem:[%s12936_s0 + $0x210] sm:$0xff]  ;;  %v1633_v47 = vmul.f32 %v7927_v46, %v9400_v60  ;;  %v7928_v48 = vld [vmem:[%s12936_s0 + $0x220] sm:$0xff] }
 0x17d   :  { %v778_v57 = vsub.f32 0.0, %v650_v49  ;;  %1812 = vadd.xlane.f32.xlu0 %v1624_v40  ;;  %v6234_v58 = vpop.eup %6233  ;;  %1534 = vst.msk [vmem:[%s12939_s3 + $0x338] sm:$0xff] %vm1430_vm0, %v6232_v55  ;;  %6253 = vrcp.f32 %v1152_v51  ;;  %v516_v59 = vpop.xlane.xlu1 %515  ;;  %v1630_v31 = vmul.f32 %v7926_v30, %v9400_v60  ;;  %v1632_v49 = vmul.f32 %v7928_v48, %v9400_v60 }
 0x17e   :  { %v514_v61 = vpop.xlane.xlu0 %513  ;;  %v6236_v62 = vpop.eup %6235  ;;  %1533 = vst.msk [vmem:[%s12939_s3 + $0x330] sm:$0xff] %vm1430_vm0, %v6234_v58  ;;  %6255 = vrcp.f32 %v1155_v36  ;;  %v1024_v63 = vmul.f32 1.442695, %v779_v56  ;;  %v653_v2 = vadd.f32 %v8570_v21, %v516_v59 }
 0x17f   :  { %v1022_v0 = vmul.f32 1.442695, %v778_v57  ;;  %v6238_v3 = vpop.eup %6237  ;;  %v1154_v4 = vadd.f32 1.0, %v6236_v62  ;;  %6257 = vpow2.f32 %v1018_v52  ;;  %v652_v5 = vadd.f32 %v8570_v21, %v514_v61  ;;  %v7929_v61 = vld [vmem:[%s12936_s0 + $0x238] sm:$0xff] }
 0x180   :  { %v6240_v6 = vpop.eup %6239  ;;  %1536 = vst.msk [vmem:[%s12939_s3 + $0x348] sm:$0xff] %vm1430_vm0, %v6238_v3  ;;  %6259 = vpow2.f32 %v1024_v63  ;;  %v781_v7 = vsub.f32 0.0, %v653_v2  ;;  %1818 = vadd.xlane.f32.xlu1 %v1627_v45  ;;  %v1635_v62 = vmul.f32 %v7929_v61, %v9400_v60  ;;  %v7930_v3 = vld [vmem:[%s12936_s0 + $0x230] sm:$0xff] }
 0x181   :  { %1816 = vadd.xlane.f32.xlu0 %v1626_v54  ;;  %v6242_v12 = vpop.eup %6241  ;;  %6261 = vrcp.f32 %v1154_v4  ;;  %v1157_v13 = vadd.f32 1.0, %v6240_v6  ;;  %v780_v14 = vsub.f32 0.0, %v652_v5  ;;  %v520_v15 = vpop.xlane.xlu1 %519  ;;  %v1634_v4 = vmul.f32 %v7930_v3, %v9400_v60 }
 0x182   :  { %v518_v16 = vpop.xlane.xlu0 %517  ;;  %v6244_v17 = vpop.eup %6243  ;;  %v1156_v18 = vadd.f32 1.0, %v6242_v12  ;;  %6263 = vpow2.f32 %v1022_v0  ;;  %v1028_v19 = vmul.f32 1.442695, %v781_v7  ;;  %v655_v20 = vadd.f32 %v8570_v21, %v520_v15 }
 0x183   :  { %v6246_v22 = vpop.eup %6245  ;;  %6265 = vrcp.f32 %v1157_v13  ;;  %v1159_v23 = vadd.f32 1.0, %v6244_v17  ;;  %v1026_v24 = vmul.f32 1.442695, %v780_v14  ;;  %v654_v25 = vadd.f32 %v8570_v21, %v518_v16  ;;  %v7931_v16 = vld [vmem:[%s12936_s0 + $0x248] sm:$0xff] }
 0x184   :  { %v6248_v26 = vpop.eup %6247  ;;  %1535 = vst.msk [vmem:[%s12939_s3 + $0x340] sm:$0xff] %vm1430_vm0, %v6246_v22  ;;  %6267 = vrcp.f32 %v1156_v18  ;;  %v783_v27 = vsub.f32 0.0, %v655_v20  ;;  %1822 = vadd.xlane.f32.xlu1 %v1629_v9  ;;  %v1637_v17 = vmul.f32 %v7931_v16, %v9400_v60  ;;  %v7932_v22 = vld [vmem:[%s12936_s0 + $0x240] sm:$0xff] }
 0x185   :  { %1820 = vadd.xlane.f32.xlu0 %v1628_v11  ;;  %v6250_v32 = vpop.eup %6249  ;;  %1538 = vst.msk [vmem:[%s12939_s3 + $0x358] sm:$0xff] %vm1430_vm0, %v6248_v26  ;;  %6269 = vrcp.f32 %v1159_v23  ;;  %v782_v33 = vsub.f32 0.0, %v654_v25  ;;  %v524_v34 = vpop.xlane.xlu1 %523  ;;  %v1636_v23 = vmul.f32 %v7932_v22, %v9400_v60 }
 0x186   :  { %v522_v35 = vpop.xlane.xlu0 %521  ;;  %v6252_v37 = vpop.eup %6251  ;;  %v1158_v38 = vadd.f32 1.0, %v6250_v32  ;;  %6271 = vpow2.f32 %v1028_v19  ;;  %v1032_v39 = vmul.f32 1.442695, %v783_v27  ;;  %v657_v40 = vadd.f32 %v8570_v21, %v524_v34 }
 0x187   :  { %v6254_v41 = vpop.eup %6253  ;;  %v1161_v42 = vadd.f32 1.0, %v6252_v37  ;;  %6273 = vpow2.f32 %v1026_v24  ;;  %v1030_v43 = vmul.f32 1.442695, %v782_v33  ;;  %v656_v1 = vadd.f32 %v8570_v21, %v522_v35  ;;  %v7933_v37 = vld [vmem:[%s12936_s0 + $0x258] sm:$0xff] }
 0x188   :  { %v6256_v44 = vpop.eup %6255  ;;  %1537 = vst.msk [vmem:[%s12939_s3 + $0x350] sm:$0xff] %vm1430_vm0, %v6254_v41  ;;  %6275 = vrcp.f32 %v1158_v38  ;;  %v785_v45 = vsub.f32 0.0, %v657_v40  ;;  %1826 = vadd.xlane.f32.xlu1 %v1631_v29  ;;  %v1639_v38 = vmul.f32 %v7933_v37, %v9400_v60 }
 0x189   :  { %1824 = vadd.xlane.f32.xlu0 %v1630_v31  ;;  %v6258_v50 = vpop.eup %6257  ;;  %1540 = vst.msk [vmem:[%s12939_s3 + $0x368] sm:$0xff] %vm1430_vm0, %v6256_v44  ;;  %6277 = vrcp.f32 %v1161_v42  ;;  %v784_v51 = vsub.f32 0.0, %v656_v1  ;;  %v528_v52 = vpop.xlane.xlu1 %527 }
 0x18a   :  { %v526_v53 = vpop.xlane.xlu0 %525  ;;  %v6260_v54 = vpop.eup %6259  ;;  %v1160_v55 = vadd.f32 1.0, %v6258_v50  ;;  %6279 = vpow2.f32 %v1032_v39  ;;  %v1036_v36 = vmul.f32 1.442695, %v785_v45  ;;  %v659_v56 = vadd.f32 %v8570_v21, %v528_v52  ;;  %v7934_v39 = vld [vmem:[%s12936_s0 + $0x250] sm:$0xff] }
 0x18b   :  { %v6262_v57 = vpop.eup %6261  ;;  %v1163_v58 = vadd.f32 1.0, %v6260_v54  ;;  %6281 = vpow2.f32 %v1030_v43  ;;  %v658_v59 = vadd.f32 %v8570_v21, %v526_v53  ;;  %v1034_v0 = vmul.f32 1.442695, %v784_v51  ;;  %v7935_v53 = vld [vmem:[%s12936_s0 + $0x268] sm:$0xff] }
 0x18c   :  { %v6264_v63 = vpop.eup %6263  ;;  %1539 = vst.msk [vmem:[%s12939_s3 + $0x360] sm:$0xff] %vm1430_vm0, %v6262_v57  ;;  %6283 = vrcp.f32 %v1160_v55  ;;  %v787_v2 = vsub.f32 0.0, %v659_v56  ;;  %1830 = vadd.xlane.f32.xlu1 %v1633_v47  ;;  %v1638_v40 = vmul.f32 %v7934_v39, %v9400_v60  ;;  %v1641_v54 = vmul.f32 %v7935_v53, %v9400_v60  ;;  %v7936_v57 = vld [vmem:[%s12936_s0 + $0x260] sm:$0xff] }
 0x18d   :  { %1828 = vadd.xlane.f32.xlu0 %v1632_v49  ;;  %v6266_v5 = vpop.eup %6265  ;;  %6285 = vrcp.f32 %v1163_v58  ;;  %v1162_v6 = vadd.f32 1.0, %v6264_v63  ;;  %v786_v7 = vsub.f32 0.0, %v658_v59  ;;  %v532_v8 = vpop.xlane.xlu1 %531  ;;  %v1640_v58 = vmul.f32 %v7936_v57, %v9400_v60 }
 0x18e   :  { %v530_v9 = vpop.xlane.xlu0 %529  ;;  %v6268_v10 = vpop.eup %6267  ;;  %1542 = vst.msk [vmem:[%s12939_s3 + $0x378] sm:$0xff] %vm1430_vm0, %v6266_v5  ;;  %6287 = vpow2.f32 %v1036_v36  ;;  %v1040_v11 = vmul.f32 1.442695, %v787_v2  ;;  %v661_v12 = vadd.f32 %v8570_v21, %v532_v8 }
 0x18f   :  { %v660_v13 = vadd.f32 %v8570_v21, %v530_v9  ;;  %v6270_v14 = vpop.eup %6269  ;;  %1541 = vst.msk [vmem:[%s12939_s3 + $0x370] sm:$0xff] %vm1430_vm0, %v6268_v10  ;;  %6289 = vrcp.f32 %v1162_v6  ;;  %v1038_v15 = vmul.f32 1.442695, %v786_v7  ;;  %v7938_v9 = vld [vmem:[%s12936_s0 + $0x270] sm:$0xff] }
 0x190   :  { %v6272_v18 = vpop.eup %6271  ;;  %1544 = vst.msk [vmem:[%s12939_s3 + $0x388] sm:$0xff] %vm1430_vm0, %v6270_v14  ;;  %6291 = vpow2.f32 %v1034_v0  ;;  %v789_v19 = vsub.f32 0.0, %v661_v12  ;;  %1834 = vadd.xlane.f32.xlu1 %v1635_v62  ;;  %v1642_v10 = vmul.f32 %v7938_v9, %v9400_v60 }
 0x191   :  { %v788_v20 = vsub.f32 0.0, %v660_v13  ;;  %1832 = vadd.xlane.f32.xlu0 %v1634_v4  ;;  %v6274_v24 = vpop.eup %6273  ;;  %v1165_v25 = vadd.f32 1.0, %v6272_v18  ;;  %6293 = vpow2.f32 %v1040_v11  ;;  %v1695_v26 = vpop.xlane.xlu1 %1694  ;;  %v7937_v4 = vld [vmem:[%s12936_s0 + $0x278] sm:$0xff] }
 0x192   :  { %v1693_v27 = vpop.xlane.xlu0 %1692  ;;  %v6276_v28 = vpop.eup %6275  ;;  %v1164_v29 = vadd.f32 1.0, %v6274_v24  ;;  %6295 = vpow2.f32 %v1038_v15  ;;  %v1044_v30 = vmul.f32 1.442695, %v789_v19  ;;  %v1949_v33 = vadd.f32 %v1695_v26, %v8570_v21 }
 0x193   :  { %v1042_v31 = vmul.f32 1.442695, %v788_v20  ;;  %v6278_v32 = vpop.eup %6277  ;;  %1543 = vst.msk [vmem:[%s12939_s3 + $0x380] sm:$0xff] %vm1430_vm0, %v6276_v28  ;;  %6297 = vrcp.f32 %v1165_v25  ;;  %v1948_v34 = vadd.f32 %v1693_v27, %v8570_v21  ;;  %v1643_v5 = vmul.f32 %v7937_v4, %v9400_v60  ;;  %v7939_v27 = vld [vmem:[%s12936_s0 + $0x288] sm:$0xff] }
 0x194   :  { %v6280_v35 = vpop.eup %6279  ;;  %1546 = vst.msk [vmem:[%s12939_s3 + $0x398] sm:$0xff] %vm1430_vm0, %v6278_v32  ;;  %6299 = vrcp.f32 %v1164_v29  ;;  %1838 = vadd.xlane.f32.xlu1 %v1637_v17  ;;  %v2077_v43 = vsub.f32 0.0, %v1949_v33  ;;  %v1645_v28 = vmul.f32 %v7939_v27, %v9400_v60  ;;  %v7940_v29 = vld [vmem:[%s12936_s0 + $0x280] sm:$0xff] }
 0x195   :  { %1836 = vadd.xlane.f32.xlu0 %v1636_v23  ;;  %v6282_v41 = vpop.eup %6281  ;;  %v1167_v42 = vadd.f32 1.0, %v6280_v35  ;;  %6301 = vpow2.f32 %v1044_v30  ;;  %v2076_v1 = vsub.f32 0.0, %v1948_v34  ;;  %v1699_v44 = vpop.xlane.xlu1 %1698  ;;  %v1644_v30 = vmul.f32 %v7940_v29, %v9400_v60 }
 0x196   :  { %v1697_v45 = vpop.xlane.xlu0 %1696  ;;  %v6284_v46 = vpop.eup %6283  ;;  %v1166_v47 = vadd.f32 1.0, %v6282_v41  ;;  %6303 = vpow2.f32 %v1042_v31  ;;  %v1951_v48 = vadd.f32 %v1699_v44, %v8570_v21  ;;  %v2206_v51 = vmul.f32 1.442695, %v2077_v43  ;;  %v7941_v44 = vld [vmem:[%s12936_s0 + $0x298] sm:$0xff] }
 0x197   :  { %v1950_v49 = vadd.f32 %v1697_v45, %v8570_v21  ;;  %v6286_v50 = vpop.eup %6285  ;;  %1545 = vst.msk [vmem:[%s12939_s3 + $0x390] sm:$0xff] %vm1430_vm0, %v6284_v46  ;;  %6305 = vrcp.f32 %v1167_v42  ;;  %v2204_v52 = vmul.f32 1.442695, %v2076_v1  ;;  %v1647_v45 = vmul.f32 %v7941_v44, %v9400_v60  ;;  %v7942_v46 = vld [vmem:[%s12936_s0 + $0x290] sm:$0xff] }
 0x198   :  { %v6288_v55 = vpop.eup %6287  ;;  %1548 = vst.msk [vmem:[%s12939_s3 + $0x3a8] sm:$0xff] %vm1430_vm0, %v6286_v50  ;;  %6307 = vrcp.f32 %v1166_v47  ;;  %v2079_v36 = vsub.f32 0.0, %v1951_v48  ;;  %1842 = vadd.xlane.f32.xlu1 %v1639_v38  ;;  %v1646_v47 = vmul.f32 %v7942_v46, %v9400_v60 }
 0x199   :  { %v2078_v56 = vsub.f32 0.0, %v1950_v49  ;;  %1840 = vadd.xlane.f32.xlu0 %v1638_v40  ;;  %v6290_v59 = vpop.eup %6289  ;;  %v1169_v61 = vadd.f32 1.0, %v6288_v55  ;;  %6309 = vpow2.f32 %v2206_v51  ;;  %v1703_v62 = vpop.xlane.xlu1 %1702 }
 0x19a   :  { %v1701_v63 = vpop.xlane.xlu0 %1700  ;;  %v6292_v0 = vpop.eup %6291  ;;  %1547 = vst.msk [vmem:[%s12939_s3 + $0x3a0] sm:$0xff] %vm1430_vm0, %v6290_v59  ;;  %6311 = vpow2.f32 %v2204_v52  ;;  %v2210_v2 = vmul.f32 1.442695, %v2079_v36  ;;  %v1953_v3 = vadd.f32 %v1703_v62, %v8570_v21 }
 0x19b   :  { %v6294_v6 = vpop.eup %6293  ;;  %6313 = vrcp.f32 %v1169_v61  ;;  %v1168_v7 = vadd.f32 1.0, %v6292_v0  ;;  %v1952_v8 = vadd.f32 %v1701_v63, %v8570_v21  ;;  %v2208_v13 = vmul.f32 1.442695, %v2078_v56  ;;  %v7943_v0 = vld [vmem:[%s12936_s0 + $0x2a8] sm:$0xff] }
 0x19c   :  { %v6296_v11 = vpop.eup %6295  ;;  %v1171_v12 = vadd.f32 1.0, %v6294_v6  ;;  %6315 = vpow2.f32 %v2210_v2  ;;  %v2081_v14 = vsub.f32 0.0, %v1953_v3  ;;  %1846 = vadd.xlane.f32.xlu1 %v1641_v54  ;;  %v1649_v2 = vmul.f32 %v7943_v0, %v9400_v60  ;;  %v7944_v6 = vld [vmem:[%s12936_s0 + $0x2a0] sm:$0xff] }
 0x19d   :  { %1844 = vadd.xlane.f32.xlu0 %v1640_v58  ;;  %v6298_v15 = vpop.eup %6297  ;;  %6317 = vrcp.f32 %v1168_v7  ;;  %v1170_v16 = vadd.f32 1.0, %v6296_v11  ;;  %v2080_v17 = vsub.f32 0.0, %v1952_v8  ;;  %v1707_v18 = vpop.xlane.xlu1 %1706  ;;  %v1648_v7 = vmul.f32 %v7944_v6, %v9400_v60  ;;  %v7945_v60 = vld [vmem:[%s12936_s0 + $0x2b8] sm:$0xff] }
 0x19e   :  { %v1705_v19 = vpop.xlane.xlu0 %1704  ;;  %v6300_v20 = vpop.eup %6299  ;;  %1550 = vst.msk [vmem:[%s12939_s3 + $0x3b8] sm:$0xff] %vm1430_vm0, %v6298_v15  ;;  %6319 = vrcp.f32 %v1171_v12  ;;  %v2214_v22 = vmul.f32 1.442695, %v2081_v14  ;;  %v1955_v23 = vadd.f32 %v1707_v18, %v8570_v21  ;;  %v9800_v14 = vld [vmem:[%s12937_s1 + $0x1] ss:$0 sm:$0xff] }
 0x19f   :  { %v1954_v24 = vadd.f32 %v1705_v19, %v8570_v21  ;;  %v6302_v25 = vpop.eup %6301  ;;  %1549 = vst.msk [vmem:[%s12939_s3 + $0x3b0] sm:$0xff] %vm1430_vm0, %v6300_v20  ;;  %6321 = vrcp.f32 %v1170_v16  ;;  %v2212_v26 = vmul.f32 1.442695, %v2080_v17  ;;  %v1651_v15 = vmul.f32 %v9800_v14, %v7945_v60 }
 0x1a0   :  { %v6304_v31 = vpop.eup %6303  ;;  %v1173_v32 = vadd.f32 1.0, %v6302_v25  ;;  %6323 = vpow2.f32 %v2208_v13  ;;  %v2083_v33 = vsub.f32 0.0, %v1955_v23  ;;  %1850 = vadd.xlane.f32.xlu1 %v1643_v5 }
 0x1a1   :  { %v2082_v34 = vsub.f32 0.0, %v1954_v24  ;;  %1848 = vadd.xlane.f32.xlu0 %v1642_v10  ;;  %v6306_v35 = vpop.eup %6305  ;;  %v1172_v37 = vadd.f32 1.0, %v6304_v31  ;;  %6325 = vpow2.f32 %v2214_v22  ;;  %v1711_v38 = vpop.xlane.xlu1 %1710  ;;  %v7947_v24 = vld [vmem:[%s12936_s0 + $0x2b0] sm:$0xff] }
 0x1a2   :  { %v1709_v39 = vpop.xlane.xlu0 %1708  ;;  %v6308_v40 = vpop.eup %6307  ;;  %1552 = vst.msk [vmem:[%s12939_s3 + $0x3c8] sm:$0xff] %vm1430_vm0, %v6306_v35  ;;  %6327 = vrcp.f32 %v1173_v32  ;;  %v2218_v41 = vmul.f32 1.442695, %v2083_v33  ;;  %v1957_v42 = vadd.f32 %v1711_v38, %v8570_v21  ;;  %v1650_v25 = vmul.f32 %v7947_v24, %v9800_v14 }
 0x1a3   :  { %v6310_v43 = vpop.eup %6309  ;;  %1551 = vst.msk [vmem:[%s12939_s3 + $0x3c0] sm:$0xff] %vm1430_vm0, %v6308_v40  ;;  %6329 = vrcp.f32 %v1172_v37  ;;  %v1956_v1 = vadd.f32 %v1709_v39, %v8570_v21  ;;  %v2216_v50 = vmul.f32 1.442695, %v2082_v34  ;;  %v7949_v40 = vld [vmem:[%s12936_s0 + $0x2c0] sm:$0xff] }
 0x1a4   :  { %v6312_v48 = vpop.eup %6311  ;;  %v2461_v49 = vadd.f32 1.0, %v6310_v43  ;;  %6331 = vpow2.f32 %v2212_v26  ;;  %v2085_v51 = vsub.f32 0.0, %v1957_v42  ;;  %1854 = vadd.xlane.f32.xlu1 %v1645_v28 }
 0x1a5   :  { %1852 = vadd.xlane.f32.xlu0 %v1644_v30  ;;  %v6314_v52 = vpop.eup %6313  ;;  %v2460_v53 = vadd.f32 1.0, %v6312_v48  ;;  %6333 = vpow2.f32 %v2218_v41  ;;  %v2084_v54 = vsub.f32 0.0, %v1956_v1  ;;  %v1715_v55 = vpop.xlane.xlu1 %1714  ;;  %v7948_v30 = vld [vmem:[%s12936_s0 + $0x2c8] sm:$0xff]  ;;  %v1652_v41 = vmul.f32 %v7949_v40, %v9800_v14 }
 0x1a6   :  { %v1713_v36 = vpop.xlane.xlu0 %1712  ;;  %v6316_v56 = vpop.eup %6315  ;;  %1554 = vst.msk [vmem:[%s12939_s3 + $0x3d8] sm:$0xff] %vm1430_vm0, %v6314_v52  ;;  %6335 = vrcp.f32 %v2461_v49  ;;  %v2222_v57 = vmul.f32 1.442695, %v2085_v51  ;;  %v1959_v58 = vadd.f32 %v1715_v55, %v8570_v21  ;;  %v1653_v31 = vmul.f32 %v7948_v30, %v9800_v14 }
 0x1a7   :  { %v1958_v59 = vadd.f32 %v1713_v36, %v8570_v21  ;;  %v6318_v61 = vpop.eup %6317  ;;  %6337 = vrcp.f32 %v2460_v53  ;;  %v2463_v62 = vadd.f32 1.0, %v6316_v56  ;;  %v2220_v63 = vmul.f32 1.442695, %v2084_v54  ;;  %v7950_v56 = vld [vmem:[%s12936_s0 + $0x2d8] sm:$0xff] }
 0x1a8   :  { %v6320_v3 = vpop.eup %6319  ;;  %1553 = vst.msk [vmem:[%s12939_s3 + $0x3d0] sm:$0xff] %vm1430_vm0, %v6318_v61  ;;  %6339 = vpow2.f32 %v2216_v50  ;;  %v2087_v4 = vsub.f32 0.0, %v1959_v58  ;;  %1858 = vadd.xlane.f32.xlu1 %v1647_v45  ;;  %v7951_v58 = vld [vmem:[%s12936_s0 + $0x2d0] sm:$0xff] }
 0x1a9   :  { %v2086_v5 = vsub.f32 0.0, %v1958_v59  ;;  %1856 = vadd.xlane.f32.xlu0 %v1646_v47  ;;  %v6322_v8 = vpop.eup %6321  ;;  %1556 = vst.msk [vmem:[%s12939_s3 + $0x3e8] sm:$0xff] %vm1430_vm0, %v6320_v3  ;;  %6341 = vrcp.f32 %v2463_v62  ;;  %v1719_v9 = vpop.xlane.xlu1 %1718  ;;  %v1654_v59 = vmul.f32 %v7951_v58, %v9800_v14 }
 0x1aa   :  { %v1717_v10 = vpop.xlane.xlu0 %1716  ;;  %v6324_v11 = vpop.eup %6323  ;;  %1555 = vst.msk [vmem:[%s12939_s3 + $0x3e0] sm:$0xff] %vm1430_vm0, %v6322_v8  ;;  %6343 = vpow2.f32 %v2222_v57  ;;  %v2226_v12 = vmul.f32 1.442695, %v2087_v4  ;;  %v1961_v13 = vadd.f32 %v1719_v9, %v8570_v21  ;;  %v1655_v57 = vmul.f32 %v7950_v56, %v9800_v14 }
 0x1ab   :  { %v6326_v16 = vpop.eup %6325  ;;  %v2462_v17 = vadd.f32 1.0, %v6324_v11  ;;  %6345 = vpow2.f32 %v2220_v63  ;;  %v2224_v18 = vmul.f32 1.442695, %v2086_v5  ;;  %v1960_v19 = vadd.f32 %v1717_v10, %v8570_v21 }
 0x1ac   :  { %v6328_v20 = vpop.eup %6327  ;;  %v2465_v22 = vadd.f32 1.0, %v6326_v16  ;;  %6347 = vpow2.f32 %v2226_v12  ;;  %v2089_v23 = vsub.f32 0.0, %v1961_v13  ;;  %1862 = vadd.xlane.f32.xlu1 %v1649_v2  ;;  %v7952_v13 = vld [vmem:[%s12936_s0 + $0x2e8] sm:$0xff] }
 0x1ad   :  { %1860 = vadd.xlane.f32.xlu0 %v1648_v7  ;;  %v6330_v26 = vpop.eup %6329  ;;  %1558 = vst.msk [vmem:[%s12939_s3 + $0x3f8] sm:$0xff] %vm1430_vm0, %v6328_v20  ;;  %6349 = vrcp.f32 %v2462_v17  ;;  %v2088_v27 = vsub.f32 0.0, %v1960_v19  ;;  %v1723_v28 = vpop.xlane.xlu1 %1722  ;;  %v1657_v60 = vmul.f32 %v7952_v13, %v9800_v14 }
 0x1ae   :  { %v1721_v29 = vpop.xlane.xlu0 %1720  ;;  %v6332_v32 = vpop.eup %6331  ;;  %1557 = vst.msk [vmem:[%s12939_s3 + $0x3f0] sm:$0xff] %vm1430_vm0, %v6330_v26  ;;  %6351 = vrcp.f32 %v2465_v22  ;;  %v2230_v33 = vmul.f32 1.442695, %v2089_v23  ;;  %v1963_v34 = vadd.f32 %v1723_v28, %v8570_v21 }
 0x1af   :  { %v1962_v35 = vadd.f32 %v1721_v29, %v8570_v21  ;;  %v6334_v37 = vpop.eup %6333  ;;  %v2464_v38 = vadd.f32 1.0, %v6332_v32  ;;  %6353 = vpow2.f32 %v2224_v18  ;;  %v2228_v39 = vmul.f32 1.442695, %v2088_v27  ;;  %v7954_v32 = vld [vmem:[%s12936_s0 + $0x2f8] sm:$0xff] }
 0x1b0   :  { %v6336_v42 = vpop.eup %6335  ;;  %v2467_v43 = vadd.f32 1.0, %v6334_v37  ;;  %6355 = vpow2.f32 %v2230_v33  ;;  %v2091_v1 = vsub.f32 0.0, %v1963_v34  ;;  %1866 = vadd.xlane.f32.xlu1 %v1651_v15  ;;  %v7953_v15 = vld [vmem:[%s12936_s0 + $0x2e0] sm:$0xff]  ;;  %v1659_v33 = vmul.f32 %v7954_v32, %v9800_v14  ;;  %v7955_v34 = vld [vmem:[%s12936_s0 + $0x2f0] sm:$0xff] }
 0x1b1   :  { %v2090_v44 = vsub.f32 0.0, %v1962_v35  ;;  %1864 = vadd.xlane.f32.xlu0 %v1650_v25  ;;  %v6338_v45 = vpop.eup %6337  ;;  %2846 = vst.msk [vmem:[%s12939_s3 + $0x8] sm:$0xff] %vm2844_vm1, %v6336_v42  ;;  %6357 = vrcp.f32 %v2464_v38  ;;  %v1727_v46 = vpop.xlane.xlu1 %1726  ;;  %v1656_v16 = vmul.f32 %v7953_v15, %v9800_v14  ;;  %v1658_v35 = vmul.f32 %v7955_v34, %v9800_v14 }
 0x1b2   :  { %v1725_v47 = vpop.xlane.xlu0 %1724  ;;  %v6340_v48 = vpop.eup %6339  ;;  %2845 = vst.msk [vmem:[%s12939_s3] sm:$0xff] %vm2844_vm1, %v6338_v45  ;;  %6359 = vrcp.f32 %v2467_v43  ;;  %v2234_v49 = vmul.f32 1.442695, %v2091_v1  ;;  %v1965_v51 = vadd.f32 %v1727_v46, %v8570_v21 }
 0x1b3   :  { %v2232_v50 = vmul.f32 1.442695, %v2090_v44  ;;  %v6342_v52 = vpop.eup %6341  ;;  %v2466_v53 = vadd.f32 1.0, %v6340_v48  ;;  %6361 = vpow2.f32 %v2228_v39  ;;  %v1964_v54 = vadd.f32 %v1725_v47, %v8570_v21  ;;  %v7956_v47 = vld [vmem:[%s12936_s0 + $0x308] sm:$0xff] }
 0x1b4   :  { %v6344_v55 = vpop.eup %6343  ;;  %2848 = vst.msk [vmem:[%s12939_s3 + $0x18] sm:$0xff] %vm2844_vm1, %v6342_v52  ;;  %6363 = vpow2.f32 %v2234_v49  ;;  %v2093_v36 = vsub.f32 0.0, %v1965_v51  ;;  %1870 = vadd.xlane.f32.xlu1 %v1653_v31  ;;  %v1661_v48 = vmul.f32 %v7956_v47, %v9800_v14  ;;  %v7957_v52 = vld [vmem:[%s12936_s0 + $0x300] sm:$0xff] }
 0x1b5   :  { %1868 = vadd.xlane.f32.xlu0 %v1652_v41  ;;  %v6346_v61 = vpop.eup %6345  ;;  %6365 = vrcp.f32 %v2466_v53  ;;  %v2469_v62 = vadd.f32 1.0, %v6344_v55  ;;  %v2092_v63 = vsub.f32 0.0, %v1964_v54  ;;  %v1731_v0 = vpop.xlane.xlu1 %1730  ;;  %v1660_v53 = vmul.f32 %v7957_v52, %v9800_v14 }
 0x1b6   :  { %v1729_v2 = vpop.xlane.xlu0 %1728  ;;  %v6348_v3 = vpop.eup %6347  ;;  %v2468_v4 = vadd.f32 1.0, %v6346_v61  ;;  %6367 = vpow2.f32 %v2232_v50  ;;  %v2238_v5 = vmul.f32 1.442695, %v2093_v36  ;;  %v1967_v6 = vadd.f32 %v1731_v0, %v8570_v21 }
 0x1b7   :  { %v6350_v7 = vpop.eup %6349  ;;  %6369 = vrcp.f32 %v2469_v62  ;;  %v2471_v8 = vadd.f32 1.0, %v6348_v3  ;;  %v2236_v9 = vmul.f32 1.442695, %v2092_v63  ;;  %v1966_v10 = vadd.f32 %v1729_v2, %v8570_v21  ;;  %v7958_v2 = vld [vmem:[%s12936_s0 + $0x318] sm:$0xff] }
 0x1b8   :  { %v6352_v11 = vpop.eup %6351  ;;  %2847 = vst.msk [vmem:[%s12939_s3 + $0x10] sm:$0xff] %vm2844_vm1, %v6350_v7  ;;  %6371 = vrcp.f32 %v2468_v4  ;;  %v2095_v12 = vsub.f32 0.0, %v1967_v6  ;;  %1874 = vadd.xlane.f32.xlu1 %v1655_v57  ;;  %v1663_v3 = vmul.f32 %v7958_v2, %v9800_v14  ;;  %v7959_v7 = vld [vmem:[%s12936_s0 + $0x310] sm:$0xff] }
 0x1b9   :  { %1872 = vadd.xlane.f32.xlu0 %v1654_v59  ;;  %v6354_v17 = vpop.eup %6353  ;;  %2850 = vst.msk [vmem:[%s12939_s3 + $0x28] sm:$0xff] %vm2844_vm1, %v6352_v11  ;;  %6373 = vrcp.f32 %v2471_v8  ;;  %v2094_v18 = vsub.f32 0.0, %v1966_v10  ;;  %v1735_v19 = vpop.xlane.xlu1 %1734  ;;  %v1662_v8 = vmul.f32 %v7959_v7, %v9800_v14 }
 0x1ba   :  { %v1733_v20 = vpop.xlane.xlu0 %1732  ;;  %v6356_v22 = vpop.eup %6355  ;;  %v2470_v23 = vadd.f32 1.0, %v6354_v17  ;;  %6375 = vpow2.f32 %v2238_v5  ;;  %v2242_v24 = vmul.f32 1.442695, %v2095_v12  ;;  %v1969_v25 = vadd.f32 %v1735_v19, %v8570_v21 }
 0x1bb   :  { %v6358_v26 = vpop.eup %6357  ;;  %v2473_v27 = vadd.f32 1.0, %v6356_v22  ;;  %6377 = vpow2.f32 %v2236_v9  ;;  %v2240_v28 = vmul.f32 1.442695, %v2094_v18  ;;  %v1968_v29 = vadd.f32 %v1733_v20, %v8570_v21  ;;  %v7960_v22 = vld [vmem:[%s12936_s0 + $0x328] sm:$0xff] }
 0x1bc   :  { %v6360_v30 = vpop.eup %6359  ;;  %2849 = vst.msk [vmem:[%s12939_s3 + $0x20] sm:$0xff] %vm2844_vm1, %v6358_v26  ;;  %6379 = vrcp.f32 %v2470_v23  ;;  %v2097_v31 = vsub.f32 0.0, %v1969_v25  ;;  %1878 = vadd.xlane.f32.xlu1 %v1657_v60  ;;  %v1665_v23 = vmul.f32 %v7960_v22, %v9800_v14 }
 0x1bd   :  { %1876 = vadd.xlane.f32.xlu0 %v1656_v16  ;;  %v6362_v37 = vpop.eup %6361  ;;  %2852 = vst.msk [vmem:[%s12939_s3 + $0x38] sm:$0xff] %vm2844_vm1, %v6360_v30  ;;  %6381 = vrcp.f32 %v2473_v27  ;;  %v2096_v38 = vsub.f32 0.0, %v1968_v29  ;;  %v1739_v39 = vpop.xlane.xlu1 %1738 }
 0x1be   :  { %v1737_v40 = vpop.xlane.xlu0 %1736  ;;  %v6364_v41 = vpop.eup %6363  ;;  %v2472_v42 = vadd.f32 1.0, %v6362_v37  ;;  %6383 = vpow2.f32 %v2242_v24  ;;  %v2246_v43 = vmul.f32 1.442695, %v2097_v31  ;;  %v1971_v1 = vadd.f32 %v1739_v39, %v8570_v21  ;;  %v7961_v24 = vld [vmem:[%s12936_s0 + $0x320] sm:$0xff] }
 0x1bf   :  { %v6366_v44 = vpop.eup %6365  ;;  %v2475_v45 = vadd.f32 1.0, %v6364_v41  ;;  %6385 = vpow2.f32 %v2240_v28  ;;  %v1970_v46 = vadd.f32 %v1737_v40, %v8570_v21  ;;  %v2244_v50 = vmul.f32 1.442695, %v2096_v38  ;;  %v7962_v40 = vld [vmem:[%s12936_s0 + $0x338] sm:$0xff] }
 0x1c0   :  { %v6368_v49 = vpop.eup %6367  ;;  %2851 = vst.msk [vmem:[%s12939_s3 + $0x30] sm:$0xff] %vm2844_vm1, %v6366_v44  ;;  %6387 = vrcp.f32 %v2472_v42  ;;  %v2099_v51 = vsub.f32 0.0, %v1971_v1  ;;  %1882 = vadd.xlane.f32.xlu1 %v1659_v33  ;;  %v1664_v25 = vmul.f32 %v7961_v24, %v9800_v14  ;;  %v1667_v41 = vmul.f32 %v7962_v40, %v9800_v14  ;;  %v7963_v44 = vld [vmem:[%s12936_s0 + $0x330] sm:$0xff] }
 0x1c1   :  { %1880 = vadd.xlane.f32.xlu0 %v1658_v35  ;;  %v6370_v54 = vpop.eup %6369  ;;  %6389 = vrcp.f32 %v2475_v45  ;;  %v2474_v55 = vadd.f32 1.0, %v6368_v49  ;;  %v2098_v36 = vsub.f32 0.0, %v1970_v46  ;;  %v1743_v56 = vpop.xlane.xlu1 %1742  ;;  %v1666_v45 = vmul.f32 %v7963_v44, %v9800_v14 }
 0x1c2   :  { %v1741_v57 = vpop.xlane.xlu0 %1740  ;;  %v6372_v58 = vpop.eup %6371  ;;  %2854 = vst.msk [vmem:[%s12939_s3 + $0x48] sm:$0xff] %vm2844_vm1, %v6370_v54  ;;  %6391 = vpow2.f32 %v2246_v43  ;;  %v2250_v59 = vmul.f32 1.442695, %v2099_v51  ;;  %v1973_v61 = vadd.f32 %v1743_v56, %v8570_v21 }
 0x1c3   :  { %v1972_v62 = vadd.f32 %v1741_v57, %v8570_v21  ;;  %v6374_v63 = vpop.eup %6373  ;;  %2853 = vst.msk [vmem:[%s12939_s3 + $0x40] sm:$0xff] %vm2844_vm1, %v6372_v58  ;;  %6393 = vrcp.f32 %v2474_v55  ;;  %v2248_v0 = vmul.f32 1.442695, %v2098_v36  ;;  %v7965_v57 = vld [vmem:[%s12936_s0 + $0x340] sm:$0xff] }
 0x1c4   :  { %v6376_v4 = vpop.eup %6375  ;;  %2856 = vst.msk [vmem:[%s12939_s3 + $0x58] sm:$0xff] %vm2844_vm1, %v6374_v63  ;;  %6395 = vpow2.f32 %v2244_v50  ;;  %v2101_v5 = vsub.f32 0.0, %v1973_v61  ;;  %1886 = vadd.xlane.f32.xlu1 %v1661_v48  ;;  %v1668_v58 = vmul.f32 %v7965_v57, %v9800_v14 }
 0x1c5   :  { %v2100_v6 = vsub.f32 0.0, %v1972_v62  ;;  %1884 = vadd.xlane.f32.xlu0 %v1660_v53  ;;  %v6378_v9 = vpop.eup %6377  ;;  %v2477_v10 = vadd.f32 1.0, %v6376_v4  ;;  %6397 = vpow2.f32 %v2250_v59  ;;  %v1747_v11 = vpop.xlane.xlu1 %1746  ;;  %v7964_v53 = vld [vmem:[%s12936_s0 + $0x348] sm:$0xff] }
 0x1c6   :  { %v1745_v12 = vpop.xlane.xlu0 %1744  ;;  %v6380_v13 = vpop.eup %6379  ;;  %v2476_v60 = vadd.f32 1.0, %v6378_v9  ;;  %6399 = vpow2.f32 %v2248_v0  ;;  %v2254_v15 = vmul.f32 1.442695, %v2101_v5  ;;  %v1975_v18 = vadd.f32 %v1747_v11, %v8570_v21 }
 0x1c7   :  { %v2252_v16 = vmul.f32 1.442695, %v2100_v6  ;;  %v6382_v17 = vpop.eup %6381  ;;  %2855 = vst.msk [vmem:[%s12939_s3 + $0x50] sm:$0xff] %vm2844_vm1, %v6380_v13  ;;  %6401 = vrcp.f32 %v2477_v10  ;;  %v1974_v19 = vadd.f32 %v1745_v12, %v8570_v21  ;;  %v1669_v54 = vmul.f32 %v7964_v53, %v9800_v14  ;;  %v7966_v12 = vld [vmem:[%s12936_s0 + $0x358] sm:$0xff] }
 0x1c8   :  { %v6384_v20 = vpop.eup %6383  ;;  %2858 = vst.msk [vmem:[%s12939_s3 + $0x68] sm:$0xff] %vm2844_vm1, %v6382_v17  ;;  %6403 = vrcp.f32 %v2476_v60  ;;  %1890 = vadd.xlane.f32.xlu1 %v1663_v3  ;;  %v2103_v28 = vsub.f32 0.0, %v1975_v18  ;;  %v1671_v13 = vmul.f32 %v7966_v12, %v9800_v14  ;;  %v7967_v60 = vld [vmem:[%s12936_s0 + $0x350] sm:$0xff] }
 0x1c9   :  { %1888 = vadd.xlane.f32.xlu0 %v1662_v8  ;;  %v6386_v26 = vpop.eup %6385  ;;  %v2479_v27 = vadd.f32 1.0, %v6384_v20  ;;  %6405 = vpow2.f32 %v2254_v15  ;;  %v2102_v29 = vsub.f32 0.0, %v1974_v19  ;;  %v1751_v30 = vpop.xlane.xlu1 %1750  ;;  %v1670_v15 = vmul.f32 %v7967_v60, %v9800_v14 }
 0x1ca   :  { %v1749_v31 = vpop.xlane.xlu0 %1748  ;;  %v6388_v32 = vpop.eup %6387  ;;  %v2478_v33 = vadd.f32 1.0, %v6386_v26  ;;  %6407 = vpow2.f32 %v2252_v16  ;;  %v1977_v34 = vadd.f32 %v1751_v30, %v8570_v21  ;;  %v2258_v38 = vmul.f32 1.442695, %v2103_v28  ;;  %v7968_v30 = vld [vmem:[%s12936_s0 + $0x368] sm:$0xff] }
 0x1cb   :  { %v1976_v35 = vadd.f32 %v1749_v31, %v8570_v21  ;;  %v6390_v37 = vpop.eup %6389  ;;  %2857 = vst.msk [vmem:[%s12939_s3 + $0x60] sm:$0xff] %vm2844_vm1, %v6388_v32  ;;  %6409 = vrcp.f32 %v2479_v27  ;;  %v2256_v39 = vmul.f32 1.442695, %v2102_v29  ;;  %v1673_v31 = vmul.f32 %v7968_v30, %v9800_v14  ;;  %v7969_v32 = vld [vmem:[%s12936_s0 + $0x360] sm:$0xff] }
 0x1cc   :  { %v6392_v42 = vpop.eup %6391  ;;  %2860 = vst.msk [vmem:[%s12939_s3 + $0x78] sm:$0xff] %vm2844_vm1, %v6390_v37  ;;  %6411 = vrcp.f32 %v2478_v33  ;;  %v2105_v43 = vsub.f32 0.0, %v1977_v34  ;;  %1894 = vadd.xlane.f32.xlu1 %v1665_v23  ;;  %v1672_v33 = vmul.f32 %v7969_v32, %v9800_v14 }
 0x1cd   :  { %v2104_v1 = vsub.f32 0.0, %v1976_v35  ;;  %1892 = vadd.xlane.f32.xlu0 %v1664_v25  ;;  %v6394_v46 = vpop.eup %6393  ;;  %v2481_v47 = vadd.f32 1.0, %v6392_v42  ;;  %6413 = vpow2.f32 %v2258_v38  ;;  %v1755_v48 = vpop.xlane.xlu1 %1754 }
 0x1ce   :  { %v1753_v49 = vpop.xlane.xlu0 %1752  ;;  %v6396_v50 = vpop.eup %6395  ;;  %2859 = vst.msk [vmem:[%s12939_s3 + $0x70] sm:$0xff] %vm2844_vm1, %v6394_v46  ;;  %6415 = vpow2.f32 %v2256_v39  ;;  %v2262_v51 = vmul.f32 1.442695, %v2105_v43  ;;  %v1979_v52 = vadd.f32 %v1755_v48, %v8570_v21 }
 0x1cf   :  { %v6398_v55 = vpop.eup %6397  ;;  %6417 = vrcp.f32 %v2481_v47  ;;  %v2480_v36 = vadd.f32 1.0, %v6396_v50  ;;  %v1978_v56 = vadd.f32 %v1753_v49, %v8570_v21  ;;  %v2260_v62 = vmul.f32 1.442695, %v2104_v1  ;;  %v7970_v50 = vld [vmem:[%s12936_s0 + $0x378] sm:$0xff] }
 0x1d0   :  { %v6400_v59 = vpop.eup %6399  ;;  %v2483_v61 = vadd.f32 1.0, %v6398_v55  ;;  %6419 = vpow2.f32 %v2262_v51  ;;  %v2107_v63 = vsub.f32 0.0, %v1979_v52  ;;  %1898 = vadd.xlane.f32.xlu1 %v1667_v41  ;;  %v1675_v51 = vmul.f32 %v7970_v50, %v9800_v14  ;;  %v7971_v55 = vld [vmem:[%s12936_s0 + $0x370] sm:$0xff] }
 0x1d1   :  { %1896 = vadd.xlane.f32.xlu0 %v1666_v45  ;;  %v6402_v0 = vpop.eup %6401  ;;  %6421 = vrcp.f32 %v2480_v36  ;;  %v2482_v2 = vadd.f32 1.0, %v6400_v59  ;;  %v2106_v3 = vsub.f32 0.0, %v1978_v56  ;;  %v1759_v4 = vpop.xlane.xlu1 %1758  ;;  %v1674_v36 = vmul.f32 %v7971_v55, %v9800_v14 }
 0x1d2   :  { %v1757_v5 = vpop.xlane.xlu0 %1756  ;;  %v6404_v6 = vpop.eup %6403  ;;  %2862 = vst.msk [vmem:[%s12939_s3 + $0x88] sm:$0xff] %vm2844_vm1, %v6402_v0  ;;  %6423 = vrcp.f32 %v2483_v61  ;;  %v2266_v7 = vmul.f32 1.442695, %v2107_v63  ;;  %v1981_v8 = vadd.f32 %v1759_v4, %v8570_v21  ;;  %v7972_v63 = vld [vmem:[%s12936_s0 + $0x388] sm:$0xff] }
 0x1d3   :  { %v1980_v9 = vadd.f32 %v1757_v5, %v8570_v21  ;;  %v6406_v10 = vpop.eup %6405  ;;  %2861 = vst.msk [vmem:[%s12939_s3 + $0x80] sm:$0xff] %vm2844_vm1, %v6404_v6  ;;  %6425 = vrcp.f32 %v2482_v2  ;;  %v2264_v11 = vmul.f32 1.442695, %v2106_v3  ;;  %v1677_v0 = vmul.f32 %v7972_v63, %v9800_v14 }
 0x1d4   :  { %v6408_v16 = vpop.eup %6407  ;;  %v2485_v17 = vadd.f32 1.0, %v6406_v10  ;;  %6427 = vpow2.f32 %v2260_v62  ;;  %v2109_v18 = vsub.f32 0.0, %v1981_v8  ;;  %1902 = vadd.xlane.f32.xlu1 %v1669_v54 }
 0x1d5   :  { %v2108_v19 = vsub.f32 0.0, %v1980_v9  ;;  %1900 = vadd.xlane.f32.xlu0 %v1668_v58  ;;  %v6410_v20 = vpop.eup %6409  ;;  %v2484_v22 = vadd.f32 1.0, %v6408_v16  ;;  %6429 = vpow2.f32 %v2266_v7  ;;  %v1763_v23 = vpop.xlane.xlu1 %1762  ;;  %v7973_v9 = vld [vmem:[%s12936_s0 + $0x380] sm:$0xff] }
 0x1d6   :  { %v1761_v24 = vpop.xlane.xlu0 %1760  ;;  %v6412_v25 = vpop.eup %6411  ;;  %2864 = vst.msk [vmem:[%s12939_s3 + $0x98] sm:$0xff] %vm2844_vm1, %v6410_v20  ;;  %6431 = vrcp.f32 %v2485_v17  ;;  %v2270_v26 = vmul.f32 1.442695, %v2109_v18  ;;  %v1983_v27 = vadd.f32 %v1763_v23, %v8570_v21  ;;  %v1676_v10 = vmul.f32 %v7973_v9, %v9800_v14 }
 0x1d7   :  { %v6414_v28 = vpop.eup %6413  ;;  %2863 = vst.msk [vmem:[%s12939_s3 + $0x90] sm:$0xff] %vm2844_vm1, %v6412_v25  ;;  %6433 = vrcp.f32 %v2484_v22  ;;  %v1982_v29 = vadd.f32 %v1761_v24, %v8570_v21  ;;  %v2268_v37 = vmul.f32 1.442695, %v2108_v19  ;;  %v7975_v25 = vld [vmem:[%s12936_s0 + $0x390] sm:$0xff] }
 0x1d8   :  { %v6416_v34 = vpop.eup %6415  ;;  %v2487_v35 = vadd.f32 1.0, %v6414_v28  ;;  %6435 = vpow2.f32 %v2264_v11  ;;  %v2111_v38 = vsub.f32 0.0, %v1983_v27  ;;  %1906 = vadd.xlane.f32.xlu1 %v1671_v13 }
 0x1d9   :  { %1904 = vadd.xlane.f32.xlu0 %v1670_v15  ;;  %v6418_v39 = vpop.eup %6417  ;;  %v2486_v40 = vadd.f32 1.0, %v6416_v34  ;;  %6437 = vpow2.f32 %v2270_v26  ;;  %v2110_v41 = vsub.f32 0.0, %v1982_v29  ;;  %v1767_v42 = vpop.xlane.xlu1 %1766  ;;  %v7974_v15 = vld [vmem:[%s12936_s0 + $0x398] sm:$0xff]  ;;  %v1678_v26 = vmul.f32 %v7975_v25, %v9800_v14 }
 0x1da   :  { %v1765_v43 = vpop.xlane.xlu0 %1764  ;;  %v6420_v1 = vpop.eup %6419  ;;  %2866 = vst.msk [vmem:[%s12939_s3 + $0xa8] sm:$0xff] %vm2844_vm1, %v6418_v39  ;;  %6439 = vrcp.f32 %v2487_v35  ;;  %v2274_v44 = vmul.f32 1.442695, %v2111_v38  ;;  %v1985_v45 = vadd.f32 %v1767_v42, %v8570_v21  ;;  %v1679_v16 = vmul.f32 %v7974_v15, %v9800_v14 }
 0x1db   :  { %v1984_v46 = vadd.f32 %v1765_v43, %v8570_v21  ;;  %v6422_v47 = vpop.eup %6421  ;;  %6441 = vrcp.f32 %v2486_v40  ;;  %v2489_v48 = vadd.f32 1.0, %v6420_v1  ;;  %v2272_v49 = vmul.f32 1.442695, %v2110_v41  ;;  %v7976_v1 = vld [vmem:[%s12936_s0 + $0x3a8] sm:$0xff] }
 0x1dc   :  { %v6424_v52 = vpop.eup %6423  ;;  %2865 = vst.msk [vmem:[%s12939_s3 + $0xa0] sm:$0xff] %vm2844_vm1, %v6422_v47  ;;  %6443 = vpow2.f32 %v2268_v37  ;;  %v2113_v53 = vsub.f32 0.0, %v1985_v45  ;;  %1910 = vadd.xlane.f32.xlu1 %v1673_v31  ;;  %v7977_v45 = vld [vmem:[%s12936_s0 + $0x3a0] sm:$0xff] }
 0x1dd   :  { %v2112_v54 = vsub.f32 0.0, %v1984_v46  ;;  %1908 = vadd.xlane.f32.xlu0 %v1672_v33  ;;  %v6426_v56 = vpop.eup %6425  ;;  %2868 = vst.msk [vmem:[%s12939_s3 + $0xb8] sm:$0xff] %vm2844_vm1, %v6424_v52  ;;  %6445 = vrcp.f32 %v2489_v48  ;;  %v1771_v57 = vpop.xlane.xlu1 %1770  ;;  %v1680_v46 = vmul.f32 %v7977_v45, %v9800_v14 }
 0x1de   :  { %v1769_v58 = vpop.xlane.xlu0 %1768  ;;  %v6428_v59 = vpop.eup %6427  ;;  %2867 = vst.msk [vmem:[%s12939_s3 + $0xb0] sm:$0xff] %vm2844_vm1, %v6426_v56  ;;  %6447 = vpow2.f32 %v2274_v44  ;;  %v2278_v61 = vmul.f32 1.442695, %v2113_v53  ;;  %v1987_v62 = vadd.f32 %v1771_v57, %v8570_v21  ;;  %v1681_v44 = vmul.f32 %v7976_v1, %v9800_v14 }
 0x1df   :  { %v6430_v2 = vpop.eup %6429  ;;  %v2488_v3 = vadd.f32 1.0, %v6428_v59  ;;  %6449 = vpow2.f32 %v2272_v49  ;;  %v2276_v4 = vmul.f32 1.442695, %v2112_v54  ;;  %v1986_v5 = vadd.f32 %v1769_v58, %v8570_v21 }
 0x1e0   :  { %v6432_v6 = vpop.eup %6431  ;;  %v2491_v7 = vadd.f32 1.0, %v6430_v2  ;;  %6451 = vpow2.f32 %v2278_v61  ;;  %v2115_v8 = vsub.f32 0.0, %v1987_v62  ;;  %1914 = vadd.xlane.f32.xlu1 %v1675_v51  ;;  %v7978_v62 = vld [vmem:[%s12936_s0 + $0x3b8] sm:$0xff] }
 0x1e1   :  { %1912 = vadd.xlane.f32.xlu0 %v1674_v36  ;;  %v6434_v11 = vpop.eup %6433  ;;  %2870 = vst.msk [vmem:[%s12939_s3 + $0xc8] sm:$0xff] %vm2844_vm1, %v6432_v6  ;;  %6453 = vrcp.f32 %v2488_v3  ;;  %v2114_v12 = vsub.f32 0.0, %v1986_v5  ;;  %v1775_v13 = vpop.xlane.xlu1 %1774  ;;  %v1683_v63 = vmul.f32 %v7978_v62, %v9800_v14 }
 0x1e2   :  { %v1773_v60 = vpop.xlane.xlu0 %1772  ;;  %v6436_v17 = vpop.eup %6435  ;;  %2869 = vst.msk [vmem:[%s12939_s3 + $0xc0] sm:$0xff] %vm2844_vm1, %v6434_v11  ;;  %6455 = vrcp.f32 %v2491_v7  ;;  %v2282_v18 = vmul.f32 1.442695, %v2115_v8  ;;  %v1989_v19 = vadd.f32 %v1775_v13, %v8570_v21 }
 0x1e3   :  { %v1988_v20 = vadd.f32 %v1773_v60, %v8570_v21  ;;  %v6438_v22 = vpop.eup %6437  ;;  %v2490_v23 = vadd.f32 1.0, %v6436_v17  ;;  %6457 = vpow2.f32 %v2276_v4  ;;  %v2280_v24 = vmul.f32 1.442695, %v2114_v12  ;;  %v7980_v17 = vld [vmem:[%s12936_s0 + $0x3c8] sm:$0xff] }
 0x1e4   :  { %v6440_v27 = vpop.eup %6439  ;;  %v2493_v28 = vadd.f32 1.0, %v6438_v22  ;;  %6459 = vpow2.f32 %v2282_v18  ;;  %v2117_v29 = vsub.f32 0.0, %v1989_v19  ;;  %1918 = vadd.xlane.f32.xlu1 %v1677_v0  ;;  %v7979_v0 = vld [vmem:[%s12936_s0 + $0x3b0] sm:$0xff]  ;;  %v1685_v18 = vmul.f32 %v7980_v17, %v9800_v14  ;;  %v7981_v19 = vld [vmem:[%s12936_s0 + $0x3c0] sm:$0xff] }
 0x1e5   :  { %v2116_v30 = vsub.f32 0.0, %v1988_v20  ;;  %1916 = vadd.xlane.f32.xlu0 %v1676_v10  ;;  %v6442_v31 = vpop.eup %6441  ;;  %2872 = vst.msk [vmem:[%s12939_s3 + $0xd8] sm:$0xff] %vm2844_vm1, %v6440_v27  ;;  %6461 = vrcp.f32 %v2490_v23  ;;  %v1779_v32 = vpop.xlane.xlu1 %1778  ;;  %v1682_v2 = vmul.f32 %v7979_v0, %v9800_v14  ;;  %v1684_v20 = vmul.f32 %v7981_v19, %v9800_v14 }
 0x1e6   :  { %v1777_v33 = vpop.xlane.xlu0 %1776  ;;  %v6444_v34 = vpop.eup %6443  ;;  %2871 = vst.msk [vmem:[%s12939_s3 + $0xd0] sm:$0xff] %vm2844_vm1, %v6442_v31  ;;  %6463 = vrcp.f32 %v2493_v28  ;;  %v2286_v35 = vmul.f32 1.442695, %v2117_v29  ;;  %v1991_v38 = vadd.f32 %v1779_v32, %v8570_v21 }
 0x1e7   :  { %v2284_v37 = vmul.f32 1.442695, %v2116_v30  ;;  %v6446_v39 = vpop.eup %6445  ;;  %v2492_v40 = vadd.f32 1.0, %v6444_v34  ;;  %6465 = vpow2.f32 %v2280_v24  ;;  %v1990_v41 = vadd.f32 %v1777_v33, %v8570_v21  ;;  %v7982_v33 = vld [vmem:[%s12936_s0 + $0x3d8] sm:$0xff] }
 0x1e8   :  { %v6448_v42 = vpop.eup %6447  ;;  %2874 = vst.msk [vmem:[%s12939_s3 + $0xe8] sm:$0xff] %vm2844_vm1, %v6446_v39  ;;  %6467 = vpow2.f32 %v2286_v35  ;;  %v2119_v43 = vsub.f32 0.0, %v1991_v38  ;;  %1922 = vadd.xlane.f32.xlu1 %v1679_v16  ;;  %v1687_v34 = vmul.f32 %v7982_v33, %v9800_v14  ;;  %v7983_v39 = vld [vmem:[%s12936_s0 + $0x3d0] sm:$0xff] }
 0x1e9   :  { %1920 = vadd.xlane.f32.xlu0 %v1678_v26  ;;  %v6450_v47 = vpop.eup %6449  ;;  %6469 = vrcp.f32 %v2492_v40  ;;  %v2495_v48 = vadd.f32 1.0, %v6448_v42  ;;  %v2118_v49 = vsub.f32 0.0, %v1990_v41  ;;  %v1783_v50 = vpop.xlane.xlu1 %1782  ;;  %v1686_v40 = vmul.f32 %v7983_v39, %v9800_v14 }
 0x1ea   :  { %v1781_v51 = vpop.xlane.xlu0 %1780  ;;  %v6452_v52 = vpop.eup %6451  ;;  %v2494_v53 = vadd.f32 1.0, %v6450_v47  ;;  %6471 = vpow2.f32 %v2284_v37  ;;  %v2290_v54 = vmul.f32 1.442695, %v2119_v43  ;;  %v1993_v55 = vadd.f32 %v1783_v50, %v8570_v21 }
 0x1eb   :  { %v6454_v36 = vpop.eup %6453  ;;  %6473 = vrcp.f32 %v2495_v48  ;;  %v2497_v56 = vadd.f32 1.0, %v6452_v52  ;;  %v2288_v57 = vmul.f32 1.442695, %v2118_v49  ;;  %v1992_v58 = vadd.f32 %v1781_v51, %v8570_v21  ;;  %v7984_v51 = vld [vmem:[%s12936_s0 + $0x3e8] sm:$0xff] }
 0x1ec   :  { %v6456_v59 = vpop.eup %6455  ;;  %2873 = vst.msk [vmem:[%s12939_s3 + $0xe0] sm:$0xff] %vm2844_vm1, %v6454_v36  ;;  %6475 = vrcp.f32 %v2494_v53  ;;  %v2121_v61 = vsub.f32 0.0, %v1993_v55  ;;  %1926 = vadd.xlane.f32.xlu1 %v1681_v44  ;;  %v1689_v52 = vmul.f32 %v7984_v51, %v9800_v14  ;;  %v7985_v36 = vld [vmem:[%s12936_s0 + $0x3e0] sm:$0xff] }
 0x1ed   :  { %1924 = vadd.xlane.f32.xlu0 %v1680_v46  ;;  %v6458_v3 = vpop.eup %6457  ;;  %2876 = vst.msk [vmem:[%s12939_s3 + $0xf8] sm:$0xff] %vm2844_vm1, %v6456_v59  ;;  %6477 = vrcp.f32 %v2497_v56  ;;  %v2120_v4 = vsub.f32 0.0, %v1992_v58  ;;  %v1787_v5 = vpop.xlane.xlu1 %1786  ;;  %v1688_v56 = vmul.f32 %v7985_v36, %v9800_v14 }
 0x1ee   :  { %v1785_v6 = vpop.xlane.xlu0 %1784  ;;  %v6460_v7 = vpop.eup %6459  ;;  %v2496_v8 = vadd.f32 1.0, %v6458_v3  ;;  %6479 = vpow2.f32 %v2290_v54  ;;  %v2294_v9 = vmul.f32 1.442695, %v2121_v61  ;;  %v1995_v10 = vadd.f32 %v1787_v5, %v8570_v21 }
 0x1ef   :  { %v6462_v11 = vpop.eup %6461  ;;  %v2499_v12 = vadd.f32 1.0, %v6460_v7  ;;  %6481 = vpow2.f32 %v2288_v57  ;;  %v2292_v13 = vmul.f32 1.442695, %v2120_v4  ;;  %v1994_v60 = vadd.f32 %v1785_v6, %v8570_v21  ;;  %v7986_v7 = vld [vmem:[%s12936_s0 + $0x3f8] sm:$0xff] }
 0x1f0   :  { %v6464_v15 = vpop.eup %6463  ;;  %2875 = vst.msk [vmem:[%s12939_s3 + $0xf0] sm:$0xff] %vm2844_vm1, %v6462_v11  ;;  %6483 = vrcp.f32 %v2496_v8  ;;  %v2123_v16 = vsub.f32 0.0, %v1995_v10  ;;  %1930 = vadd.xlane.f32.xlu1 %v1683_v63  ;;  %v1691_v8 = vmul.f32 %v7986_v7, %v9800_v14  ;;  %v10175_v11 = vld [vmem:[%s12937_s1 + $0x2] ss:$0 sm:$0xff] }
 0x1f1   :  { %1928 = vadd.xlane.f32.xlu0 %v1682_v2  ;;  %v6466_v22 = vpop.eup %6465  ;;  %2878 = vst.msk [vmem:[%s12939_s3 + $0x108] sm:$0xff] %vm2844_vm1, %v6464_v15  ;;  %6485 = vrcp.f32 %v2499_v12  ;;  %v2122_v23 = vsub.f32 0.0, %v1994_v60  ;;  %v1791_v24 = vpop.xlane.xlu1 %1790 }
 0x1f2   :  { %v1789_v25 = vpop.xlane.xlu0 %1788  ;;  %v6468_v26 = vpop.eup %6467  ;;  %v2498_v27 = vadd.f32 1.0, %v6466_v22  ;;  %6487 = vpow2.f32 %v2294_v9  ;;  %v2298_v28 = vmul.f32 1.442695, %v2123_v16  ;;  %v1997_v29 = vadd.f32 %v1791_v24, %v8570_v21  ;;  %v7987_v9 = vld [vmem:[%s12936_s0 + $0x3f0] sm:$0xff] }
 0x1f3   :  { %v6470_v30 = vpop.eup %6469  ;;  %v2501_v31 = vadd.f32 1.0, %v6468_v26  ;;  %6489 = vpow2.f32 %v2292_v13  ;;  %v1996_v32 = vadd.f32 %v1789_v25, %v8570_v21  ;;  %v2296_v37 = vmul.f32 1.442695, %v2122_v23  ;;  %v7988_v25 = vld [vmem:[%s12936_s0 + $0x8] sm:$0xff] }
 0x1f4   :  { %v6472_v35 = vpop.eup %6471  ;;  %2877 = vst.msk [vmem:[%s12939_s3 + $0x100] sm:$0xff] %vm2844_vm1, %v6470_v30  ;;  %6491 = vrcp.f32 %v2498_v27  ;;  %v2125_v38 = vsub.f32 0.0, %v1997_v29  ;;  %1934 = vadd.xlane.f32.xlu1 %v1685_v18  ;;  %v1690_v10 = vmul.f32 %v7987_v9, %v9800_v14  ;;  %v2979_v26 = vmul.f32 %v7988_v25, %v10175_v11  ;;  %v7989_v30 = vld [vmem:[%s12936_s0] sm:$0xff] }
 0x1f5   :  { %1932 = vadd.xlane.f32.xlu0 %v1684_v20  ;;  %v6474_v41 = vpop.eup %6473  ;;  %6493 = vrcp.f32 %v2501_v31  ;;  %v2500_v42 = vadd.f32 1.0, %v6472_v35  ;;  %v2124_v43 = vsub.f32 0.0, %v1996_v32  ;;  %v1795_v1 = vpop.xlane.xlu1 %1794  ;;  %v2978_v31 = vmul.f32 %v7989_v30, %v10175_v11 }
 0x1f6   :  { %v1793_v44 = vpop.xlane.xlu0 %1792  ;;  %v6476_v45 = vpop.eup %6475  ;;  %2880 = vst.msk [vmem:[%s12939_s3 + $0x118] sm:$0xff] %vm2844_vm1, %v6474_v41  ;;  %6495 = vpow2.f32 %v2298_v28  ;;  %v2302_v46 = vmul.f32 1.442695, %v2125_v38  ;;  %v1999_v47 = vadd.f32 %v1795_v1, %v8570_v21 }
 0x1f7   :  { %v1998_v48 = vadd.f32 %v1793_v44, %v8570_v21  ;;  %v6478_v49 = vpop.eup %6477  ;;  %2879 = vst.msk [vmem:[%s12939_s3 + $0x110] sm:$0xff] %vm2844_vm1, %v6476_v45  ;;  %6497 = vrcp.f32 %v2500_v42  ;;  %v2300_v50 = vmul.f32 1.442695, %v2124_v43  ;;  %v7991_v44 = vld [vmem:[%s12936_s0 + $0x10] sm:$0xff] }
 0x1f8   :  { %v6480_v53 = vpop.eup %6479  ;;  %2882 = vst.msk [vmem:[%s12939_s3 + $0x128] sm:$0xff] %vm2844_vm1, %v6478_v49  ;;  %6499 = vpow2.f32 %v2296_v37  ;;  %v2127_v54 = vsub.f32 0.0, %v1999_v47  ;;  %1938 = vadd.xlane.f32.xlu1 %v1687_v34  ;;  %v2980_v45 = vmul.f32 %v7991_v44, %v10175_v11 }
 0x1f9   :  { %v2126_v55 = vsub.f32 0.0, %v1998_v48  ;;  %1936 = vadd.xlane.f32.xlu0 %v1686_v40  ;;  %v6482_v57 = vpop.eup %6481  ;;  %v2503_v58 = vadd.f32 1.0, %v6480_v53  ;;  %6501 = vpow2.f32 %v2302_v46  ;;  %v1799_v59 = vpop.xlane.xlu1 %1798  ;;  %v7990_v40 = vld [vmem:[%s12936_s0 + $0x18] sm:$0xff] }
 0x1fa   :  { %v1797_v61 = vpop.xlane.xlu0 %1796  ;;  %v6484_v62 = vpop.eup %6483  ;;  %v2502_v63 = vadd.f32 1.0, %v6482_v57  ;;  %6503 = vpow2.f32 %v2300_v50  ;;  %v2306_v0 = vmul.f32 1.442695, %v2127_v54  ;;  %v2001_v4 = vadd.f32 %v1799_v59, %v8570_v21 }
 0x1fb   :  { %v2304_v2 = vmul.f32 1.442695, %v2126_v55  ;;  %v6486_v3 = vpop.eup %6485  ;;  %2881 = vst.msk [vmem:[%s12939_s3 + $0x120] sm:$0xff] %vm2844_vm1, %v6484_v62  ;;  %6505 = vrcp.f32 %v2503_v58  ;;  %v2000_v5 = vadd.f32 %v1797_v61, %v8570_v21  ;;  %v2981_v41 = vmul.f32 %v7990_v40, %v10175_v11  ;;  %v7992_v61 = vld [vmem:[%s12936_s0 + $0x28] sm:$0xff] }
 0x1fc   :  { %v6488_v6 = vpop.eup %6487  ;;  %2884 = vst.msk [vmem:[%s12939_s3 + $0x138] sm:$0xff] %vm2844_vm1, %v6486_v3  ;;  %6507 = vrcp.f32 %v2502_v63  ;;  %1942 = vadd.xlane.f32.xlu1 %v1689_v52  ;;  %v2129_v60 = vsub.f32 0.0, %v2001_v4  ;;  %v2983_v62 = vmul.f32 %v7992_v61, %v10175_v11  ;;  %v7993_v63 = vld [vmem:[%s12936_s0 + $0x20] sm:$0xff] }
 0x1fd   :  { %1940 = vadd.xlane.f32.xlu0 %v1688_v56  ;;  %v6490_v12 = vpop.eup %6489  ;;  %v2505_v13 = vadd.f32 1.0, %v6488_v6  ;;  %6509 = vpow2.f32 %v2306_v0  ;;  %v2128_v15 = vsub.f32 0.0, %v2000_v5  ;;  %v1803_v16 = vpop.xlane.xlu1 %1802  ;;  %v2982_v0 = vmul.f32 %v7993_v63, %v10175_v11 }
 0x1fe   :  { %v1801_v17 = vpop.xlane.xlu0 %1800  ;;  %v6492_v18 = vpop.eup %6491  ;;  %v2504_v19 = vadd.f32 1.0, %v6490_v12  ;;  %6511 = vpow2.f32 %v2304_v2  ;;  %v2003_v20 = vadd.f32 %v1803_v16, %v8570_v21  ;;  %v2310_v23 = vmul.f32 1.442695, %v2129_v60  ;;  %v7994_v16 = vld [vmem:[%s12936_s0 + $0x38] sm:$0xff] }
 0x1ff   :  { %v2002_v22 = vadd.f32 %v1801_v17, %v8570_v21  ;;  %v6494_v14 = vpop.eup %6493  ;;  %2883 = vst.msk [vmem:[%s12939_s3 + $0x130] sm:$0xff] %vm2844_vm1, %v6492_v18  ;;  %6513 = vrcp.f32 %v2505_v13  ;;  %v2308_v24 = vmul.f32 1.442695, %v2128_v15  ;;  %v2985_v17 = vmul.f32 %v7994_v16, %v10175_v11  ;;  %v7995_v18 = vld [vmem:[%s12936_s0 + $0x30] sm:$0xff] }
 0x200   :  { %v6496_v27 = vpop.eup %6495  ;;  %2886 = vst.msk [vmem:[%s12939_s3 + $0x148] sm:$0xff] %vm2844_vm1, %v6494_v14  ;;  %6515 = vrcp.f32 %v2504_v19  ;;  %v2131_v28 = vsub.f32 0.0, %v2003_v20  ;;  %1946 = vadd.xlane.f32.xlu1 %v1691_v8  ;;  %v2984_v19 = vmul.f32 %v7995_v18, %v10175_v11 }
 0x201   :  { %v2130_v29 = vsub.f32 0.0, %v2002_v22  ;;  %1944 = vadd.xlane.f32.xlu0 %v1690_v10  ;;  %v6498_v32 = vpop.eup %6497  ;;  %v2507_v33 = vadd.f32 1.0, %v6496_v27  ;;  %6517 = vpow2.f32 %v2310_v23  ;;  %v1807_v34 = vpop.xlane.xlu1 %1806 }
 0x202   :  { %v1805_v35 = vpop.xlane.xlu0 %1804  ;;  %v6500_v37 = vpop.eup %6499  ;;  %2885 = vst.msk [vmem:[%s12939_s3 + $0x140] sm:$0xff] %vm2844_vm1, %v6498_v32  ;;  %6519 = vpow2.f32 %v2308_v24  ;;  %v2314_v38 = vmul.f32 1.442695, %v2131_v28  ;;  %v2005_v39 = vadd.f32 %v1807_v34, %v8570_v21 }
 0x203   :  { %v6502_v42 = vpop.eup %6501  ;;  %6521 = vrcp.f32 %v2507_v33  ;;  %v2506_v43 = vadd.f32 1.0, %v6500_v37  ;;  %v2004_v1 = vadd.f32 %v1805_v35, %v8570_v21  ;;  %v2312_v48 = vmul.f32 1.442695, %v2130_v29  ;;  %v7996_v37 = vld [vmem:[%s12936_s0 + $0x48] sm:$0xff] }
 0x204   :  { %v6504_v46 = vpop.eup %6503  ;;  %v2509_v47 = vadd.f32 1.0, %v6502_v42  ;;  %6523 = vpow2.f32 %v2314_v38  ;;  %v2133_v49 = vsub.f32 0.0, %v2005_v39  ;;  %3108 = vadd.xlane.f32.xlu1 %v2979_v26  ;;  %v2987_v38 = vmul.f32 %v7996_v37, %v10175_v11  ;;  %v7997_v42 = vld [vmem:[%s12936_s0 + $0x40] sm:$0xff] }
 0x205   :  { %3106 = vadd.xlane.f32.xlu0 %v2978_v31  ;;  %v6506_v50 = vpop.eup %6505  ;;  %6525 = vrcp.f32 %v2506_v43  ;;  %v2508_v51 = vadd.f32 1.0, %v6504_v46  ;;  %v2132_v52 = vsub.f32 0.0, %v2004_v1  ;;  %v1811_v53 = vpop.xlane.xlu1 %1810  ;;  %v2986_v43 = vmul.f32 %v7997_v42, %v10175_v11 }
 0x206   :  { %v1809_v54 = vpop.xlane.xlu0 %1808  ;;  %v6508_v55 = vpop.eup %6507  ;;  %2888 = vst.msk [vmem:[%s12939_s3 + $0x158] sm:$0xff] %vm2844_vm1, %v6506_v50  ;;  %6527 = vrcp.f32 %v2509_v47  ;;  %v2318_v36 = vmul.f32 1.442695, %v2133_v49  ;;  %v2007_v56 = vadd.f32 %v1811_v53, %v8570_v21  ;;  %v7998_v49 = vld [vmem:[%s12936_s0 + $0x58] sm:$0xff] }
 0x207   :  { %v2006_v57 = vadd.f32 %v1809_v54, %v8570_v21  ;;  %v6510_v58 = vpop.eup %6509  ;;  %2887 = vst.msk [vmem:[%s12939_s3 + $0x150] sm:$0xff] %vm2844_vm1, %v6508_v55  ;;  %6529 = vrcp.f32 %v2508_v51  ;;  %v2316_v59 = vmul.f32 1.442695, %v2132_v52  ;;  %v2989_v50 = vmul.f32 %v7998_v49, %v10175_v11 }
 0x208   :  { %v6512_v2 = vpop.eup %6511  ;;  %v2511_v3 = vadd.f32 1.0, %v6510_v58  ;;  %6531 = vpow2.f32 %v2312_v48  ;;  %v2135_v4 = vsub.f32 0.0, %v2007_v56  ;;  %3112 = vadd.xlane.f32.xlu1 %v2981_v41 }
 0x209   :  { %v2134_v5 = vsub.f32 0.0, %v2006_v57  ;;  %3110 = vadd.xlane.f32.xlu0 %v2980_v45  ;;  %v6514_v6 = vpop.eup %6513  ;;  %v2510_v7 = vadd.f32 1.0, %v6512_v2  ;;  %6533 = vpow2.f32 %v2318_v36  ;;  %v1815_v8 = vpop.xlane.xlu1 %1814  ;;  %v7999_v57 = vld [vmem:[%s12936_s0 + $0x50] sm:$0xff] }
 0x20a   :  { %v1813_v9 = vpop.xlane.xlu0 %1812  ;;  %v6516_v10 = vpop.eup %6515  ;;  %2890 = vst.msk [vmem:[%s12939_s3 + $0x168] sm:$0xff] %vm2844_vm1, %v6514_v6  ;;  %6535 = vrcp.f32 %v2511_v3  ;;  %v2322_v12 = vmul.f32 1.442695, %v2135_v4  ;;  %v2009_v13 = vadd.f32 %v1815_v8, %v8570_v21  ;;  %v2988_v58 = vmul.f32 %v7999_v57, %v10175_v11 }
 0x20b   :  { %v6518_v60 = vpop.eup %6517  ;;  %2889 = vst.msk [vmem:[%s12939_s3 + $0x160] sm:$0xff] %vm2844_vm1, %v6516_v10  ;;  %6537 = vrcp.f32 %v2510_v7  ;;  %v2008_v15 = vadd.f32 %v1813_v9, %v8570_v21  ;;  %v2320_v14 = vmul.f32 1.442695, %v2134_v5  ;;  %v8001_v10 = vld [vmem:[%s12936_s0 + $0x60] sm:$0xff] }
 0x20c   :  { %v6520_v20 = vpop.eup %6519  ;;  %v2513_v22 = vadd.f32 1.0, %v6518_v60  ;;  %6539 = vpow2.f32 %v2316_v59  ;;  %v2137_v23 = vsub.f32 0.0, %v2009_v13  ;;  %3116 = vadd.xlane.f32.xlu1 %v2983_v62 }
 0x20d   :  { %3114 = vadd.xlane.f32.xlu0 %v2982_v0  ;;  %v6522_v24 = vpop.eup %6521  ;;  %v2512_v25 = vadd.f32 1.0, %v6520_v20  ;;  %6541 = vpow2.f32 %v2322_v12  ;;  %v2136_v26 = vsub.f32 0.0, %v2008_v15  ;;  %v1819_v27 = vpop.xlane.xlu1 %1818  ;;  %v8000_v0 = vld [vmem:[%s12936_s0 + $0x68] sm:$0xff]  ;;  %v2990_v12 = vmul.f32 %v8001_v10, %v10175_v11 }
 0x20e   :  { %v1817_v28 = vpop.xlane.xlu0 %1816  ;;  %v6524_v29 = vpop.eup %6523  ;;  %2892 = vst.msk [vmem:[%s12939_s3 + $0x178] sm:$0xff] %vm2844_vm1, %v6522_v24  ;;  %6543 = vrcp.f32 %v2513_v22  ;;  %v2326_v30 = vmul.f32 1.442695, %v2137_v23  ;;  %v2011_v31 = vadd.f32 %v1819_v27, %v8570_v21  ;;  %v2991_v2 = vmul.f32 %v8000_v0, %v10175_v11 }
 0x20f   :  { %v2010_v32 = vadd.f32 %v1817_v28, %v8570_v21  ;;  %v6526_v33 = vpop.eup %6525  ;;  %6545 = vrcp.f32 %v2512_v25  ;;  %v2515_v34 = vadd.f32 1.0, %v6524_v29  ;;  %v2324_v35 = vmul.f32 1.442695, %v2136_v26  ;;  %v8002_v29 = vld [vmem:[%s12936_s0 + $0x78] sm:$0xff] }
 0x210   :  { %v6528_v39 = vpop.eup %6527  ;;  %2891 = vst.msk [vmem:[%s12939_s3 + $0x170] sm:$0xff] %vm2844_vm1, %v6526_v33  ;;  %6547 = vpow2.f32 %v2320_v14  ;;  %v2139_v40 = vsub.f32 0.0, %v2011_v31  ;;  %3120 = vadd.xlane.f32.xlu1 %v2985_v17  ;;  %v8003_v31 = vld [vmem:[%s12936_s0 + $0x70] sm:$0xff] }
 0x211   :  { %v2138_v41 = vsub.f32 0.0, %v2010_v32  ;;  %3118 = vadd.xlane.f32.xlu0 %v2984_v19  ;;  %v6530_v1 = vpop.eup %6529  ;;  %2894 = vst.msk [vmem:[%s12939_s3 + $0x188] sm:$0xff] %vm2844_vm1, %v6528_v39  ;;  %6549 = vrcp.f32 %v2515_v34  ;;  %v1823_v44 = vpop.xlane.xlu1 %1822  ;;  %v2992_v32 = vmul.f32 %v8003_v31, %v10175_v11 }
 0x212   :  { %v1821_v45 = vpop.xlane.xlu0 %1820  ;;  %v6532_v46 = vpop.eup %6531  ;;  %2893 = vst.msk [vmem:[%s12939_s3 + $0x180] sm:$0xff] %vm2844_vm1, %v6530_v1  ;;  %6551 = vpow2.f32 %v2326_v30  ;;  %v2330_v47 = vmul.f32 1.442695, %v2139_v40  ;;  %v2013_v48 = vadd.f32 %v1823_v44, %v8570_v21  ;;  %v2993_v30 = vmul.f32 %v8002_v29, %v10175_v11 }
 0x213   :  { %v6534_v51 = vpop.eup %6533  ;;  %v2514_v52 = vadd.f32 1.0, %v6532_v46  ;;  %6553 = vpow2.f32 %v2324_v35  ;;  %v2328_v53 = vmul.f32 1.442695, %v2138_v41  ;;  %v2012_v54 = vadd.f32 %v1821_v45, %v8570_v21 }
 0x214   :  { %v6536_v55 = vpop.eup %6535  ;;  %v2517_v36 = vadd.f32 1.0, %v6534_v51  ;;  %6555 = vpow2.f32 %v2330_v47  ;;  %v2141_v56 = vsub.f32 0.0, %v2013_v48  ;;  %3124 = vadd.xlane.f32.xlu1 %v2987_v38  ;;  %v8004_v48 = vld [vmem:[%s12936_s0 + $0x88] sm:$0xff] }
 0x215   :  { %3122 = vadd.xlane.f32.xlu0 %v2986_v43  ;;  %v6538_v59 = vpop.eup %6537  ;;  %2896 = vst.msk [vmem:[%s12939_s3 + $0x198] sm:$0xff] %vm2844_vm1, %v6536_v55  ;;  %6557 = vrcp.f32 %v2514_v52  ;;  %v2140_v61 = vsub.f32 0.0, %v2012_v54  ;;  %v1827_v62 = vpop.xlane.xlu1 %1826  ;;  %v2995_v49 = vmul.f32 %v8004_v48, %v10175_v11 }
 0x216   :  { %v1825_v63 = vpop.xlane.xlu0 %1824  ;;  %v6540_v3 = vpop.eup %6539  ;;  %2895 = vst.msk [vmem:[%s12939_s3 + $0x190] sm:$0xff] %vm2844_vm1, %v6538_v59  ;;  %6559 = vrcp.f32 %v2517_v36  ;;  %v2334_v4 = vmul.f32 1.442695, %v2141_v56  ;;  %v2015_v5 = vadd.f32 %v1827_v62, %v8570_v21 }
 0x217   :  { %v2014_v6 = vadd.f32 %v1825_v63, %v8570_v21  ;;  %v6542_v7 = vpop.eup %6541  ;;  %v2516_v8 = vadd.f32 1.0, %v6540_v3  ;;  %6561 = vpow2.f32 %v2328_v53  ;;  %v2332_v9 = vmul.f32 1.442695, %v2140_v61  ;;  %v8006_v3 = vld [vmem:[%s12936_s0 + $0x98] sm:$0xff] }
 0x218   :  { %v6544_v13 = vpop.eup %6543  ;;  %v2519_v60 = vadd.f32 1.0, %v6542_v7  ;;  %6563 = vpow2.f32 %v2334_v4  ;;  %v2143_v15 = vsub.f32 0.0, %v2015_v5  ;;  %3128 = vadd.xlane.f32.xlu1 %v2989_v50  ;;  %v8005_v50 = vld [vmem:[%s12936_s0 + $0x80] sm:$0xff]  ;;  %v2997_v4 = vmul.f32 %v8006_v3, %v10175_v11  ;;  %v8007_v5 = vld [vmem:[%s12936_s0 + $0x90] sm:$0xff] }
 0x219   :  { %v2142_v16 = vsub.f32 0.0, %v2014_v6  ;;  %3126 = vadd.xlane.f32.xlu0 %v2988_v58  ;;  %v6546_v17 = vpop.eup %6545  ;;  %2898 = vst.msk [vmem:[%s12939_s3 + $0x1a8] sm:$0xff] %vm2844_vm1, %v6544_v13  ;;  %6565 = vrcp.f32 %v2516_v8  ;;  %v1831_v18 = vpop.xlane.xlu1 %1830  ;;  %v2994_v51 = vmul.f32 %v8005_v50, %v10175_v11  ;;  %v2996_v6 = vmul.f32 %v8007_v5, %v10175_v11 }
 0x21a   :  { %v1829_v19 = vpop.xlane.xlu0 %1828  ;;  %v6548_v20 = vpop.eup %6547  ;;  %2897 = vst.msk [vmem:[%s12939_s3 + $0x1a0] sm:$0xff] %vm2844_vm1, %v6546_v17  ;;  %6567 = vrcp.f32 %v2519_v60  ;;  %v2338_v22 = vmul.f32 1.442695, %v2143_v15  ;;  %v2017_v23 = vadd.f32 %v1831_v18, %v8570_v21 }
 0x21b   :  { %v2336_v14 = vmul.f32 1.442695, %v2142_v16  ;;  %v6550_v24 = vpop.eup %6549  ;;  %v2518_v25 = vadd.f32 1.0, %v6548_v20  ;;  %6569 = vpow2.f32 %v2332_v9  ;;  %v2016_v26 = vadd.f32 %v1829_v19, %v8570_v21  ;;  %v8008_v19 = vld [vmem:[%s12936_s0 + $0xa8] sm:$0xff] }
 0x21c   :  { %v6552_v27 = vpop.eup %6551  ;;  %2900 = vst.msk [vmem:[%s12939_s3 + $0x1b8] sm:$0xff] %vm2844_vm1, %v6550_v24  ;;  %6571 = vpow2.f32 %v2338_v22  ;;  %v2145_v28 = vsub.f32 0.0, %v2017_v23  ;;  %3132 = vadd.xlane.f32.xlu1 %v2991_v2  ;;  %v2999_v20 = vmul.f32 %v8008_v19, %v10175_v11  ;;  %v8009_v24 = vld [vmem:[%s12936_s0 + $0xa0] sm:$0xff] }
 0x21d   :  { %3130 = vadd.xlane.f32.xlu0 %v2990_v12  ;;  %v6554_v33 = vpop.eup %6553  ;;  %6573 = vrcp.f32 %v2518_v25  ;;  %v2521_v34 = vadd.f32 1.0, %v6552_v27  ;;  %v2144_v35 = vsub.f32 0.0, %v2016_v26  ;;  %v1835_v37 = vpop.xlane.xlu1 %1834  ;;  %v2998_v25 = vmul.f32 %v8009_v24, %v10175_v11 }
 0x21e   :  { %v1833_v38 = vpop.xlane.xlu0 %1832  ;;  %v6556_v39 = vpop.eup %6555  ;;  %v2520_v40 = vadd.f32 1.0, %v6554_v33  ;;  %6575 = vpow2.f32 %v2336_v14  ;;  %v2342_v41 = vmul.f32 1.442695, %v2145_v28  ;;  %v2019_v42 = vadd.f32 %v1835_v37, %v8570_v21 }
 0x21f   :  { %v6558_v43 = vpop.eup %6557  ;;  %6577 = vrcp.f32 %v2521_v34  ;;  %v2523_v1 = vadd.f32 1.0, %v6556_v39  ;;  %v2340_v44 = vmul.f32 1.442695, %v2144_v35  ;;  %v2018_v45 = vadd.f32 %v1833_v38, %v8570_v21  ;;  %v8010_v38 = vld [vmem:[%s12936_s0 + $0xb8] sm:$0xff] }
 0x220   :  { %v6560_v46 = vpop.eup %6559  ;;  %2899 = vst.msk [vmem:[%s12939_s3 + $0x1b0] sm:$0xff] %vm2844_vm1, %v6558_v43  ;;  %6579 = vrcp.f32 %v2520_v40  ;;  %v2147_v47 = vsub.f32 0.0, %v2019_v42  ;;  %3136 = vadd.xlane.f32.xlu1 %v2993_v30  ;;  %v3001_v39 = vmul.f32 %v8010_v38, %v10175_v11  ;;  %v8011_v43 = vld [vmem:[%s12936_s0 + $0xb0] sm:$0xff] }
 0x221   :  { %3134 = vadd.xlane.f32.xlu0 %v2992_v32  ;;  %v6562_v52 = vpop.eup %6561  ;;  %2902 = vst.msk [vmem:[%s12939_s3 + $0x1c8] sm:$0xff] %vm2844_vm1, %v6560_v46  ;;  %6581 = vrcp.f32 %v2523_v1  ;;  %v2146_v53 = vsub.f32 0.0, %v2018_v45  ;;  %v1839_v54 = vpop.xlane.xlu1 %1838  ;;  %v3000_v1 = vmul.f32 %v8011_v43, %v10175_v11 }
 0x222   :  { %v1837_v55 = vpop.xlane.xlu0 %1836  ;;  %v6564_v36 = vpop.eup %6563  ;;  %v2522_v56 = vadd.f32 1.0, %v6562_v52  ;;  %6583 = vpow2.f32 %v2342_v41  ;;  %v2346_v57 = vmul.f32 1.442695, %v2147_v47  ;;  %v2021_v58 = vadd.f32 %v1839_v54, %v8570_v21 }
 0x223   :  { %v6566_v59 = vpop.eup %6565  ;;  %v2525_v61 = vadd.f32 1.0, %v6564_v36  ;;  %6585 = vpow2.f32 %v2340_v44  ;;  %v2344_v62 = vmul.f32 1.442695, %v2146_v53  ;;  %v2020_v63 = vadd.f32 %v1837_v55, %v8570_v21  ;;  %v8012_v36 = vld [vmem:[%s12936_s0 + $0xc8] sm:$0xff] }
 0x224   :  { %v6568_v0 = vpop.eup %6567  ;;  %2901 = vst.msk [vmem:[%s12939_s3 + $0x1c0] sm:$0xff] %vm2844_vm1, %v6566_v59  ;;  %6587 = vrcp.f32 %v2522_v56  ;;  %v2149_v2 = vsub.f32 0.0, %v2021_v58  ;;  %3140 = vadd.xlane.f32.xlu1 %v2995_v49  ;;  %v3003_v56 = vmul.f32 %v8012_v36, %v10175_v11 }
 0x225   :  { %3138 = vadd.xlane.f32.xlu0 %v2994_v51  ;;  %v6570_v7 = vpop.eup %6569  ;;  %2904 = vst.msk [vmem:[%s12939_s3 + $0x1d8] sm:$0xff] %vm2844_vm1, %v6568_v0  ;;  %6589 = vrcp.f32 %v2525_v61  ;;  %v2148_v8 = vsub.f32 0.0, %v2020_v63  ;;  %v1843_v9 = vpop.xlane.xlu1 %1842 }
 0x226   :  { %v1841_v10 = vpop.xlane.xlu0 %1840  ;;  %v6572_v12 = vpop.eup %6571  ;;  %v2524_v13 = vadd.f32 1.0, %v6570_v7  ;;  %6591 = vpow2.f32 %v2346_v57  ;;  %v2350_v60 = vmul.f32 1.442695, %v2149_v2  ;;  %v2023_v15 = vadd.f32 %v1843_v9, %v8570_v21  ;;  %v8013_v57 = vld [vmem:[%s12936_s0 + $0xc0] sm:$0xff] }
 0x227   :  { %v6574_v16 = vpop.eup %6573  ;;  %v2527_v17 = vadd.f32 1.0, %v6572_v12  ;;  %6593 = vpow2.f32 %v2344_v62  ;;  %v2022_v18 = vadd.f32 %v1841_v10, %v8570_v21  ;;  %v2348_v14 = vmul.f32 1.442695, %v2148_v8  ;;  %v8014_v10 = vld [vmem:[%s12936_s0 + $0xd8] sm:$0xff] }
 0x228   :  { %v6576_v22 = vpop.eup %6575  ;;  %2903 = vst.msk [vmem:[%s12939_s3 + $0x1d0] sm:$0xff] %vm2844_vm1, %v6574_v16  ;;  %6595 = vrcp.f32 %v2524_v13  ;;  %v2151_v23 = vsub.f32 0.0, %v2023_v15  ;;  %3144 = vadd.xlane.f32.xlu1 %v2997_v4  ;;  %v3002_v58 = vmul.f32 %v8013_v57, %v10175_v11  ;;  %v3005_v12 = vmul.f32 %v8014_v10, %v10175_v11  ;;  %v8015_v16 = vld [vmem:[%s12936_s0 + $0xd0] sm:$0xff] }
 0x229   :  { %3142 = vadd.xlane.f32.xlu0 %v2996_v6  ;;  %v6578_v26 = vpop.eup %6577  ;;  %6597 = vrcp.f32 %v2527_v17  ;;  %v2526_v27 = vadd.f32 1.0, %v6576_v22  ;;  %v2150_v28 = vsub.f32 0.0, %v2022_v18  ;;  %v1847_v29 = vpop.xlane.xlu1 %1846  ;;  %v3004_v17 = vmul.f32 %v8015_v16, %v10175_v11 }
 0x22a   :  { %v1845_v30 = vpop.xlane.xlu0 %1844  ;;  %v6580_v31 = vpop.eup %6579  ;;  %2906 = vst.msk [vmem:[%s12939_s3 + $0x1e8] sm:$0xff] %vm2844_vm1, %v6578_v26  ;;  %6599 = vpow2.f32 %v2350_v60  ;;  %v2354_v32 = vmul.f32 1.442695, %v2151_v23  ;;  %v2025_v33 = vadd.f32 %v1847_v29, %v8570_v21 }
 0x22b   :  { %v2024_v34 = vadd.f32 %v1845_v30, %v8570_v21  ;;  %v6582_v35 = vpop.eup %6581  ;;  %2905 = vst.msk [vmem:[%s12939_s3 + $0x1e0] sm:$0xff] %vm2844_vm1, %v6580_v31  ;;  %6601 = vrcp.f32 %v2526_v27  ;;  %v2352_v37 = vmul.f32 1.442695, %v2150_v28  ;;  %v8017_v30 = vld [vmem:[%s12936_s0 + $0xe0] sm:$0xff] }
 0x22c   :  { %v6584_v40 = vpop.eup %6583  ;;  %2908 = vst.msk [vmem:[%s12939_s3 + $0x1f8] sm:$0xff] %vm2844_vm1, %v6582_v35  ;;  %6603 = vpow2.f32 %v2348_v14  ;;  %v2153_v41 = vsub.f32 0.0, %v2025_v33  ;;  %3148 = vadd.xlane.f32.xlu1 %v2999_v20  ;;  %v3006_v31 = vmul.f32 %v8017_v30, %v10175_v11 }
 0x22d   :  { %v2152_v42 = vsub.f32 0.0, %v2024_v34  ;;  %3146 = vadd.xlane.f32.xlu0 %v2998_v25  ;;  %v6586_v44 = vpop.eup %6585  ;;  %v2529_v45 = vadd.f32 1.0, %v6584_v40  ;;  %6605 = vpow2.f32 %v2354_v32  ;;  %v1851_v46 = vpop.xlane.xlu1 %1850  ;;  %v8016_v25 = vld [vmem:[%s12936_s0 + $0xe8] sm:$0xff] }
 0x22e   :  { %v1849_v47 = vpop.xlane.xlu0 %1848  ;;  %v6588_v48 = vpop.eup %6587  ;;  %v2528_v49 = vadd.f32 1.0, %v6586_v44  ;;  %6607 = vpow2.f32 %v2352_v37  ;;  %v2358_v50 = vmul.f32 1.442695, %v2153_v41  ;;  %v2027_v53 = vadd.f32 %v1851_v46, %v8570_v21 }
 0x22f   :  { %v2356_v51 = vmul.f32 1.442695, %v2152_v42  ;;  %v6590_v52 = vpop.eup %6589  ;;  %2907 = vst.msk [vmem:[%s12939_s3 + $0x1f0] sm:$0xff] %vm2844_vm1, %v6588_v48  ;;  %6609 = vrcp.f32 %v2529_v45  ;;  %v2026_v54 = vadd.f32 %v1849_v47, %v8570_v21  ;;  %v3007_v26 = vmul.f32 %v8016_v25, %v10175_v11  ;;  %v8018_v47 = vld [vmem:[%s12936_s0 + $0xf8] sm:$0xff] }
 0x230   :  { %v6592_v55 = vpop.eup %6591  ;;  %2910 = vst.msk [vmem:[%s12939_s3 + $0x208] sm:$0xff] %vm2844_vm1, %v6590_v52  ;;  %6611 = vrcp.f32 %v2528_v49  ;;  %3152 = vadd.xlane.f32.xlu1 %v3001_v39  ;;  %v2155_v62 = vsub.f32 0.0, %v2027_v53  ;;  %v3009_v48 = vmul.f32 %v8018_v47, %v10175_v11  ;;  %v8019_v49 = vld [vmem:[%s12936_s0 + $0xf0] sm:$0xff] }
 0x231   :  { %3150 = vadd.xlane.f32.xlu0 %v3000_v1  ;;  %v6594_v59 = vpop.eup %6593  ;;  %v2531_v61 = vadd.f32 1.0, %v6592_v55  ;;  %6613 = vpow2.f32 %v2358_v50  ;;  %v2154_v63 = vsub.f32 0.0, %v2026_v54  ;;  %v1855_v0 = vpop.xlane.xlu1 %1854  ;;  %v3008_v50 = vmul.f32 %v8019_v49, %v10175_v11 }
 0x232   :  { %v1853_v2 = vpop.xlane.xlu0 %1852  ;;  %v6596_v3 = vpop.eup %6595  ;;  %v2530_v4 = vadd.f32 1.0, %v6594_v59  ;;  %6615 = vpow2.f32 %v2356_v51  ;;  %v2029_v5 = vadd.f32 %v1855_v0, %v8570_v21  ;;  %v2362_v8 = vmul.f32 1.442695, %v2155_v62  ;;  %v8020_v0 = vld [vmem:[%s12936_s0 + $0x108] sm:$0xff] }
 0x233   :  { %v2028_v6 = vadd.f32 %v1853_v2, %v8570_v21  ;;  %v6598_v7 = vpop.eup %6597  ;;  %2909 = vst.msk [vmem:[%s12939_s3 + $0x200] sm:$0xff] %vm2844_vm1, %v6596_v3  ;;  %6617 = vrcp.f32 %v2531_v61  ;;  %v2360_v9 = vmul.f32 1.442695, %v2154_v63  ;;  %v3011_v2 = vmul.f32 %v8020_v0, %v10175_v11  ;;  %v8021_v3 = vld [vmem:[%s12936_s0 + $0x100] sm:$0xff] }
 0x234   :  { %v6600_v13 = vpop.eup %6599  ;;  %2912 = vst.msk [vmem:[%s12939_s3 + $0x218] sm:$0xff] %vm2844_vm1, %v6598_v7  ;;  %6619 = vrcp.f32 %v2530_v4  ;;  %v2157_v60 = vsub.f32 0.0, %v2029_v5  ;;  %3156 = vadd.xlane.f32.xlu1 %v3003_v56  ;;  %v3010_v4 = vmul.f32 %v8021_v3, %v10175_v11 }
 0x235   :  { %v2156_v15 = vsub.f32 0.0, %v2028_v6  ;;  %3154 = vadd.xlane.f32.xlu0 %v3002_v58  ;;  %v6602_v18 = vpop.eup %6601  ;;  %v2533_v19 = vadd.f32 1.0, %v6600_v13  ;;  %6621 = vpow2.f32 %v2362_v8  ;;  %v1859_v20 = vpop.xlane.xlu1 %1858 }
 0x236   :  { %v1857_v22 = vpop.xlane.xlu0 %1856  ;;  %v6604_v14 = vpop.eup %6603  ;;  %2911 = vst.msk [vmem:[%s12939_s3 + $0x210] sm:$0xff] %vm2844_vm1, %v6602_v18  ;;  %6623 = vpow2.f32 %v2360_v9  ;;  %v2366_v23 = vmul.f32 1.442695, %v2157_v60  ;;  %v2031_v24 = vadd.f32 %v1859_v20, %v8570_v21 }
 0x237   :  { %v6606_v27 = vpop.eup %6605  ;;  %6625 = vrcp.f32 %v2533_v19  ;;  %v2532_v28 = vadd.f32 1.0, %v6604_v14  ;;  %v2030_v29 = vadd.f32 %v1857_v22, %v8570_v21  ;;  %v2364_v34 = vmul.f32 1.442695, %v2156_v15  ;;  %v8022_v14 = vld [vmem:[%s12936_s0 + $0x118] sm:$0xff] }
 0x238   :  { %v6608_v32 = vpop.eup %6607  ;;  %v2535_v33 = vadd.f32 1.0, %v6606_v27  ;;  %6627 = vpow2.f32 %v2366_v23  ;;  %v2159_v35 = vsub.f32 0.0, %v2031_v24  ;;  %3160 = vadd.xlane.f32.xlu1 %v3005_v12  ;;  %v3013_v23 = vmul.f32 %v8022_v14, %v10175_v11  ;;  %v8023_v27 = vld [vmem:[%s12936_s0 + $0x110] sm:$0xff] }
 0x239   :  { %3158 = vadd.xlane.f32.xlu0 %v3004_v17  ;;  %v6610_v37 = vpop.eup %6609  ;;  %6629 = vrcp.f32 %v2532_v28  ;;  %v2534_v38 = vadd.f32 1.0, %v6608_v32  ;;  %v2158_v39 = vsub.f32 0.0, %v2030_v29  ;;  %v1863_v40 = vpop.xlane.xlu1 %1862  ;;  %v3012_v28 = vmul.f32 %v8023_v27, %v10175_v11 }
 0x23a   :  { %v1861_v41 = vpop.xlane.xlu0 %1860  ;;  %v6612_v42 = vpop.eup %6611  ;;  %2914 = vst.msk [vmem:[%s12939_s3 + $0x228] sm:$0xff] %vm2844_vm1, %v6610_v37  ;;  %6631 = vrcp.f32 %v2535_v33  ;;  %v2370_v43 = vmul.f32 1.442695, %v2159_v35  ;;  %v2033_v1 = vadd.f32 %v1863_v40, %v8570_v21  ;;  %v8024_v35 = vld [vmem:[%s12936_s0 + $0x128] sm:$0xff] }
 0x23b   :  { %v2032_v44 = vadd.f32 %v1861_v41, %v8570_v21  ;;  %v6614_v45 = vpop.eup %6613  ;;  %2913 = vst.msk [vmem:[%s12939_s3 + $0x220] sm:$0xff] %vm2844_vm1, %v6612_v42  ;;  %6633 = vrcp.f32 %v2534_v38  ;;  %v2368_v46 = vmul.f32 1.442695, %v2158_v39  ;;  %v3015_v37 = vmul.f32 %v8024_v35, %v10175_v11 }
 0x23c   :  { %v6616_v51 = vpop.eup %6615  ;;  %v2537_v52 = vadd.f32 1.0, %v6614_v45  ;;  %6635 = vpow2.f32 %v2364_v34  ;;  %v2161_v53 = vsub.f32 0.0, %v2033_v1  ;;  %3164 = vadd.xlane.f32.xlu1 %v3007_v26 }
 0x23d   :  { %v2160_v54 = vsub.f32 0.0, %v2032_v44  ;;  %3162 = vadd.xlane.f32.xlu0 %v3006_v31  ;;  %v6618_v55 = vpop.eup %6617  ;;  %v2536_v36 = vadd.f32 1.0, %v6616_v51  ;;  %6637 = vpow2.f32 %v2370_v43  ;;  %v1867_v56 = vpop.xlane.xlu1 %1866  ;;  %v8025_v44 = vld [vmem:[%s12936_s0 + $0x120] sm:$0xff] }
 0x23e   :  { %v1865_v57 = vpop.xlane.xlu0 %1864  ;;  %v6620_v58 = vpop.eup %6619  ;;  %2916 = vst.msk [vmem:[%s12939_s3 + $0x238] sm:$0xff] %vm2844_vm1, %v6618_v55  ;;  %6639 = vrcp.f32 %v2537_v52  ;;  %v2374_v59 = vmul.f32 1.442695, %v2161_v53  ;;  %v2035_v61 = vadd.f32 %v1867_v56, %v8570_v21  ;;  %v3014_v45 = vmul.f32 %v8025_v44, %v10175_v11 }
 0x23f   :  { %v6622_v62 = vpop.eup %6621  ;;  %2915 = vst.msk [vmem:[%s12939_s3 + $0x230] sm:$0xff] %vm2844_vm1, %v6620_v58  ;;  %6641 = vrcp.f32 %v2536_v36  ;;  %v2034_v63 = vadd.f32 %v1865_v57, %v8570_v21  ;;  %v2372_v7 = vmul.f32 1.442695, %v2160_v54  ;;  %v8027_v58 = vld [vmem:[%s12936_s0 + $0x130] sm:$0xff] }
 0x240   :  { %v6624_v5 = vpop.eup %6623  ;;  %v2539_v6 = vadd.f32 1.0, %v6622_v62  ;;  %6643 = vpow2.f32 %v2368_v46  ;;  %v2163_v8 = vsub.f32 0.0, %v2035_v61  ;;  %3168 = vadd.xlane.f32.xlu1 %v3009_v48 }
 0x241   :  { %3166 = vadd.xlane.f32.xlu0 %v3008_v50  ;;  %v6626_v9 = vpop.eup %6625  ;;  %v2538_v10 = vadd.f32 1.0, %v6624_v5  ;;  %6645 = vpow2.f32 %v2374_v59  ;;  %v2162_v12 = vsub.f32 0.0, %v2034_v63  ;;  %v1871_v13 = vpop.xlane.xlu1 %1870  ;;  %v8026_v50 = vld [vmem:[%s12936_s0 + $0x138] sm:$0xff]  ;;  %v3016_v59 = vmul.f32 %v8027_v58, %v10175_v11 }
 0x242   :  { %v1869_v60 = vpop.xlane.xlu0 %1868  ;;  %v6628_v15 = vpop.eup %6627  ;;  %2918 = vst.msk [vmem:[%s12939_s3 + $0x248] sm:$0xff] %vm2844_vm1, %v6626_v9  ;;  %6647 = vrcp.f32 %v2539_v6  ;;  %v2378_v16 = vmul.f32 1.442695, %v2163_v8  ;;  %v2037_v17 = vadd.f32 %v1871_v13, %v8570_v21  ;;  %v3017_v51 = vmul.f32 %v8026_v50, %v10175_v11 }
 0x243   :  { %v2036_v18 = vadd.f32 %v1869_v60, %v8570_v21  ;;  %v6630_v19 = vpop.eup %6629  ;;  %6649 = vrcp.f32 %v2538_v10  ;;  %v2541_v20 = vadd.f32 1.0, %v6628_v15  ;;  %v2376_v22 = vmul.f32 1.442695, %v2162_v12  ;;  %v8028_v15 = vld [vmem:[%s12936_s0 + $0x148] sm:$0xff] }
 0x244   :  { %v6632_v24 = vpop.eup %6631  ;;  %2917 = vst.msk [vmem:[%s12939_s3 + $0x240] sm:$0xff] %vm2844_vm1, %v6630_v19  ;;  %6651 = vpow2.f32 %v2372_v7  ;;  %v2165_v25 = vsub.f32 0.0, %v2037_v17  ;;  %3172 = vadd.xlane.f32.xlu1 %v3011_v2  ;;  %v8029_v17 = vld [vmem:[%s12936_s0 + $0x140] sm:$0xff] }
 0x245   :  { %v2164_v26 = vsub.f32 0.0, %v2036_v18  ;;  %3170 = vadd.xlane.f32.xlu0 %v3010_v4  ;;  %v6634_v29 = vpop.eup %6633  ;;  %2920 = vst.msk [vmem:[%s12939_s3 + $0x258] sm:$0xff] %vm2844_vm1, %v6632_v24  ;;  %6653 = vrcp.f32 %v2541_v20  ;;  %v1875_v30 = vpop.xlane.xlu1 %1874  ;;  %v3018_v18 = vmul.f32 %v8029_v17, %v10175_v11 }
 0x246   :  { %v1873_v31 = vpop.xlane.xlu0 %1872  ;;  %v6636_v32 = vpop.eup %6635  ;;  %2919 = vst.msk [vmem:[%s12939_s3 + $0x250] sm:$0xff] %vm2844_vm1, %v6634_v29  ;;  %6655 = vpow2.f32 %v2378_v16  ;;  %v2382_v33 = vmul.f32 1.442695, %v2165_v25  ;;  %v2039_v34 = vadd.f32 %v1875_v30, %v8570_v21  ;;  %v3019_v16 = vmul.f32 %v8028_v15, %v10175_v11 }
 0x247   :  { %v6638_v38 = vpop.eup %6637  ;;  %v2540_v39 = vadd.f32 1.0, %v6636_v32  ;;  %6657 = vpow2.f32 %v2376_v22  ;;  %v2380_v40 = vmul.f32 1.442695, %v2164_v26  ;;  %v2038_v41 = vadd.f32 %v1873_v31, %v8570_v21 }
 0x248   :  { %v6640_v42 = vpop.eup %6639  ;;  %v2543_v43 = vadd.f32 1.0, %v6638_v38  ;;  %6659 = vpow2.f32 %v2382_v33  ;;  %v2167_v1 = vsub.f32 0.0, %v2039_v34  ;;  %3176 = vadd.xlane.f32.xlu1 %v3013_v23  ;;  %v8030_v33 = vld [vmem:[%s12936_s0 + $0x158] sm:$0xff]  ;;  %v10567_v34 = vld [vmem:[%s12937_s1 + $0x2] ss:$0 sm:$0xff] }
 0x249   :  { %3174 = vadd.xlane.f32.xlu0 %v3012_v28  ;;  %v6642_v46 = vpop.eup %6641  ;;  %2922 = vst.msk [vmem:[%s12939_s3 + $0x268] sm:$0xff] %vm2844_vm1, %v6640_v42  ;;  %6661 = vrcp.f32 %v2540_v39  ;;  %v2166_v47 = vsub.f32 0.0, %v2038_v41  ;;  %v1879_v48 = vpop.xlane.xlu1 %1878  ;;  %v3021_v35 = vmul.f32 %v10567_v34, %v8030_v33 }
 0x24a   :  { %v1877_v49 = vpop.xlane.xlu0 %1876  ;;  %v6644_v52 = vpop.eup %6643  ;;  %2921 = vst.msk [vmem:[%s12939_s3 + $0x260] sm:$0xff] %vm2844_vm1, %v6642_v46  ;;  %6663 = vrcp.f32 %v2543_v43  ;;  %v2386_v53 = vmul.f32 1.442695, %v2167_v1  ;;  %v2041_v54 = vadd.f32 %v1879_v48, %v8570_v21 }
 0x24b   :  { %v2040_v55 = vadd.f32 %v1877_v49, %v8570_v21  ;;  %v6646_v36 = vpop.eup %6645  ;;  %v2542_v56 = vadd.f32 1.0, %v6644_v52  ;;  %6665 = vpow2.f32 %v2380_v40  ;;  %v2384_v57 = vmul.f32 1.442695, %v2166_v47  ;;  %v8033_v52 = vld [vmem:[%s12936_s0 + $0x168] sm:$0xff] }
 0x24c   :  { %v6648_v61 = vpop.eup %6647  ;;  %v2545_v62 = vadd.f32 1.0, %v6646_v36  ;;  %6667 = vpow2.f32 %v2386_v53  ;;  %v2169_v63 = vsub.f32 0.0, %v2041_v54  ;;  %3180 = vadd.xlane.f32.xlu1 %v3015_v37  ;;  %v8032_v37 = vld [vmem:[%s12936_s0 + $0x150] sm:$0xff]  ;;  %v3023_v53 = vmul.f32 %v8033_v52, %v10567_v34  ;;  %v8034_v54 = vld [vmem:[%s12936_s0 + $0x160] sm:$0xff] }
 0x24d   :  { %v2168_v0 = vsub.f32 0.0, %v2040_v55  ;;  %3178 = vadd.xlane.f32.xlu0 %v3014_v45  ;;  %v6650_v2 = vpop.eup %6649  ;;  %2924 = vst.msk [vmem:[%s12939_s3 + $0x278] sm:$0xff] %vm2844_vm1, %v6648_v61  ;;  %6669 = vrcp.f32 %v2542_v56  ;;  %v1883_v3 = vpop.xlane.xlu1 %1882  ;;  %v3020_v38 = vmul.f32 %v8032_v37, %v10567_v34  ;;  %v3022_v55 = vmul.f32 %v8034_v54, %v10567_v34 }
 0x24e   :  { %v1881_v4 = vpop.xlane.xlu0 %1880  ;;  %v6652_v5 = vpop.eup %6651  ;;  %2923 = vst.msk [vmem:[%s12939_s3 + $0x270] sm:$0xff] %vm2844_vm1, %v6650_v2  ;;  %6671 = vrcp.f32 %v2545_v62  ;;  %v2390_v6 = vmul.f32 1.442695, %v2169_v63  ;;  %v2043_v8 = vadd.f32 %v1883_v3, %v8570_v21 }
 0x24f   :  { %v2388_v7 = vmul.f32 1.442695, %v2168_v0  ;;  %v6654_v9 = vpop.eup %6653  ;;  %v2544_v10 = vadd.f32 1.0, %v6652_v5  ;;  %6673 = vpow2.f32 %v2384_v57  ;;  %v2042_v12 = vadd.f32 %v1881_v4, %v8570_v21  ;;  %v8035_v4 = vld [vmem:[%s12936_s0 + $0x178] sm:$0xff] }
 0x250   :  { %v6656_v13 = vpop.eup %6655  ;;  %2926 = vst.msk [vmem:[%s12939_s3 + $0x288] sm:$0xff] %vm2844_vm1, %v6654_v9  ;;  %6675 = vpow2.f32 %v2390_v6  ;;  %v2171_v60 = vsub.f32 0.0, %v2043_v8  ;;  %3184 = vadd.xlane.f32.xlu1 %v3017_v51  ;;  %v3025_v5 = vmul.f32 %v8035_v4, %v10567_v34  ;;  %v8036_v9 = vld [vmem:[%s12936_s0 + $0x170] sm:$0xff] }
 0x251   :  { %3182 = vadd.xlane.f32.xlu0 %v3016_v59  ;;  %v6658_v19 = vpop.eup %6657  ;;  %6677 = vrcp.f32 %v2544_v10  ;;  %v2547_v20 = vadd.f32 1.0, %v6656_v13  ;;  %v2170_v22 = vsub.f32 0.0, %v2042_v12  ;;  %v1887_v14 = vpop.xlane.xlu1 %1886  ;;  %v3024_v10 = vmul.f32 %v8036_v9, %v10567_v34 }
 0x252   :  { %v1885_v23 = vpop.xlane.xlu0 %1884  ;;  %v6660_v24 = vpop.eup %6659  ;;  %v2546_v25 = vadd.f32 1.0, %v6658_v19  ;;  %6679 = vpow2.f32 %v2388_v7  ;;  %v2394_v26 = vmul.f32 1.442695, %v2171_v60  ;;  %v2045_v27 = vadd.f32 %v1887_v14, %v8570_v21 }
 0x253   :  { %v6662_v28 = vpop.eup %6661  ;;  %6681 = vrcp.f32 %v2547_v20  ;;  %v2549_v29 = vadd.f32 1.0, %v6660_v24  ;;  %v2392_v30 = vmul.f32 1.442695, %v2170_v22  ;;  %v2044_v31 = vadd.f32 %v1885_v23, %v8570_v21  ;;  %v8037_v23 = vld [vmem:[%s12936_s0 + $0x188] sm:$0xff] }
 0x254   :  { %v6664_v32 = vpop.eup %6663  ;;  %2925 = vst.msk [vmem:[%s12939_s3 + $0x280] sm:$0xff] %vm2844_vm1, %v6662_v28  ;;  %6683 = vrcp.f32 %v2546_v25  ;;  %v2173_v11 = vsub.f32 0.0, %v2045_v27  ;;  %3188 = vadd.xlane.f32.xlu1 %v3019_v16  ;;  %v3027_v24 = vmul.f32 %v8037_v23, %v10567_v34  ;;  %v8038_v28 = vld [vmem:[%s12936_s0 + $0x180] sm:$0xff] }
 0x255   :  { %3186 = vadd.xlane.f32.xlu0 %v3018_v18  ;;  %v6666_v39 = vpop.eup %6665  ;;  %2928 = vst.msk [vmem:[%s12939_s3 + $0x298] sm:$0xff] %vm2844_vm1, %v6664_v32  ;;  %6685 = vrcp.f32 %v2549_v29  ;;  %v2172_v40 = vsub.f32 0.0, %v2044_v31  ;;  %v1891_v41 = vpop.xlane.xlu1 %1890  ;;  %v3026_v29 = vmul.f32 %v8038_v28, %v10567_v34 }
 0x256   :  { %v1889_v42 = vpop.xlane.xlu0 %1888  ;;  %v6668_v43 = vpop.eup %6667  ;;  %v2548_v1 = vadd.f32 1.0, %v6666_v39  ;;  %6687 = vpow2.f32 %v2394_v26  ;;  %v2398_v44 = vmul.f32 1.442695, %v2173_v11  ;;  %v2047_v45 = vadd.f32 %v1891_v41, %v8570_v21 }
 0x257   :  { %v6670_v46 = vpop.eup %6669  ;;  %v2551_v47 = vadd.f32 1.0, %v6668_v43  ;;  %6689 = vpow2.f32 %v2392_v30  ;;  %v2396_v48 = vmul.f32 1.442695, %v2172_v40  ;;  %v2046_v49 = vadd.f32 %v1889_v42, %v8570_v21  ;;  %v8039_v43 = vld [vmem:[%s12936_s0 + $0x198] sm:$0xff] }
 0x258   :  { %v6672_v50 = vpop.eup %6671  ;;  %2927 = vst.msk [vmem:[%s12939_s3 + $0x290] sm:$0xff] %vm2844_vm1, %v6670_v46  ;;  %6691 = vrcp.f32 %v2548_v1  ;;  %v2175_v51 = vsub.f32 0.0, %v2047_v45  ;;  %3192 = vadd.xlane.f32.xlu1 %v3021_v35  ;;  %v3029_v1 = vmul.f32 %v8039_v43, %v10567_v34 }
 0x259   :  { %3190 = vadd.xlane.f32.xlu0 %v3020_v38  ;;  %v6674_v36 = vpop.eup %6673  ;;  %2930 = vst.msk [vmem:[%s12939_s3 + $0x2a8] sm:$0xff] %vm2844_vm1, %v6672_v50  ;;  %6693 = vrcp.f32 %v2551_v47  ;;  %v2174_v56 = vsub.f32 0.0, %v2046_v49  ;;  %v1895_v57 = vpop.xlane.xlu1 %1894 }
 0x25a   :  { %v1893_v58 = vpop.xlane.xlu0 %1892  ;;  %v6676_v59 = vpop.eup %6675  ;;  %v2550_v61 = vadd.f32 1.0, %v6674_v36  ;;  %6695 = vpow2.f32 %v2398_v44  ;;  %v2402_v62 = vmul.f32 1.442695, %v2175_v51  ;;  %v2049_v63 = vadd.f32 %v1895_v57, %v8570_v21  ;;  %v8040_v44 = vld [vmem:[%s12936_s0 + $0x190] sm:$0xff] }
 0x25b   :  { %v6678_v0 = vpop.eup %6677  ;;  %v2553_v2 = vadd.f32 1.0, %v6676_v59  ;;  %6697 = vpow2.f32 %v2396_v48  ;;  %v2048_v3 = vadd.f32 %v1893_v58, %v8570_v21  ;;  %v2400_v7 = vmul.f32 1.442695, %v2174_v56  ;;  %v8041_v58 = vld [vmem:[%s12936_s0 + $0x1a8] sm:$0xff] }
 0x25c   :  { %v6680_v6 = vpop.eup %6679  ;;  %2929 = vst.msk [vmem:[%s12939_s3 + $0x2a0] sm:$0xff] %vm2844_vm1, %v6678_v0  ;;  %6699 = vrcp.f32 %v2550_v61  ;;  %v2177_v8 = vsub.f32 0.0, %v2049_v63  ;;  %3196 = vadd.xlane.f32.xlu1 %v3023_v53  ;;  %v3028_v45 = vmul.f32 %v8040_v44, %v10567_v34  ;;  %v3031_v59 = vmul.f32 %v8041_v58, %v10567_v34  ;;  %v8042_v0 = vld [vmem:[%s12936_s0 + $0x1a0] sm:$0xff] }
 0x25d   :  { %3194 = vadd.xlane.f32.xlu0 %v3022_v55  ;;  %v6682_v12 = vpop.eup %6681  ;;  %6701 = vrcp.f32 %v2553_v2  ;;  %v2552_v13 = vadd.f32 1.0, %v6680_v6  ;;  %v2176_v60 = vsub.f32 0.0, %v2048_v3  ;;  %v1899_v15 = vpop.xlane.xlu1 %1898  ;;  %v3030_v2 = vmul.f32 %v8042_v0, %v10567_v34 }
 0x25e   :  { %v1897_v16 = vpop.xlane.xlu0 %1896  ;;  %v6684_v17 = vpop.eup %6683  ;;  %2932 = vst.msk [vmem:[%s12939_s3 + $0x2b8] sm:$0xff] %vm2844_vm1, %v6682_v12  ;;  %6703 = vpow2.f32 %v2402_v62  ;;  %v2406_v18 = vmul.f32 1.442695, %v2177_v8  ;;  %v2051_v19 = vadd.f32 %v1899_v15, %v8570_v21 }
 0x25f   :  { %v2050_v20 = vadd.f32 %v1897_v16, %v8570_v21  ;;  %v6686_v22 = vpop.eup %6685  ;;  %2931 = vst.msk [vmem:[%s12939_s3 + $0x2b0] sm:$0xff] %vm2844_vm1, %v6684_v17  ;;  %6705 = vrcp.f32 %v2552_v13  ;;  %v2404_v14 = vmul.f32 1.442695, %v2176_v60  ;;  %v8044_v16 = vld [vmem:[%s12936_s0 + $0x1b0] sm:$0xff] }
 0x260   :  { %v6688_v25 = vpop.eup %6687  ;;  %2934 = vst.msk [vmem:[%s12939_s3 + $0x2c8] sm:$0xff] %vm2844_vm1, %v6686_v22  ;;  %6707 = vpow2.f32 %v2400_v7  ;;  %v2179_v26 = vsub.f32 0.0, %v2051_v19  ;;  %3200 = vadd.xlane.f32.xlu1 %v3025_v5  ;;  %v3032_v17 = vmul.f32 %v8044_v16, %v10567_v34 }
 0x261   :  { %v2178_v27 = vsub.f32 0.0, %v2050_v20  ;;  %3198 = vadd.xlane.f32.xlu0 %v3024_v10  ;;  %v6690_v30 = vpop.eup %6689  ;;  %v2555_v31 = vadd.f32 1.0, %v6688_v25  ;;  %6709 = vpow2.f32 %v2406_v18  ;;  %v1903_v32 = vpop.xlane.xlu1 %1902  ;;  %v8043_v10 = vld [vmem:[%s12936_s0 + $0x1b8] sm:$0xff] }
 0x262   :  { %v1901_v11 = vpop.xlane.xlu0 %1900  ;;  %v6692_v33 = vpop.eup %6691  ;;  %v2554_v35 = vadd.f32 1.0, %v6690_v30  ;;  %6711 = vpow2.f32 %v2404_v14  ;;  %v2410_v37 = vmul.f32 1.442695, %v2179_v26  ;;  %v2053_v40 = vadd.f32 %v1903_v32, %v8570_v21 }
 0x263   :  { %v2408_v38 = vmul.f32 1.442695, %v2178_v27  ;;  %v6694_v39 = vpop.eup %6693  ;;  %2933 = vst.msk [vmem:[%s12939_s3 + $0x2c0] sm:$0xff] %vm2844_vm1, %v6692_v33  ;;  %6713 = vrcp.f32 %v2555_v31  ;;  %v2052_v41 = vadd.f32 %v1901_v11, %v8570_v21  ;;  %v3033_v12 = vmul.f32 %v8043_v10, %v10567_v34  ;;  %v8045_v11 = vld [vmem:[%s12936_s0 + $0x1c8] sm:$0xff] }
 0x264   :  { %v6696_v42 = vpop.eup %6695  ;;  %2936 = vst.msk [vmem:[%s12939_s3 + $0x2d8] sm:$0xff] %vm2844_vm1, %v6694_v39  ;;  %6715 = vrcp.f32 %v2554_v35  ;;  %3204 = vadd.xlane.f32.xlu1 %v3027_v24  ;;  %v2181_v48 = vsub.f32 0.0, %v2053_v40  ;;  %v3035_v33 = vmul.f32 %v8045_v11, %v10567_v34  ;;  %v8046_v35 = vld [vmem:[%s12936_s0 + $0x1c0] sm:$0xff] }
 0x265   :  { %3202 = vadd.xlane.f32.xlu0 %v3026_v29  ;;  %v6698_v46 = vpop.eup %6697  ;;  %v2557_v47 = vadd.f32 1.0, %v6696_v42  ;;  %6717 = vpow2.f32 %v2410_v37  ;;  %v2180_v49 = vsub.f32 0.0, %v2052_v41  ;;  %v1907_v50 = vpop.xlane.xlu1 %1906  ;;  %v3034_v37 = vmul.f32 %v8046_v35, %v10567_v34 }
 0x266   :  { %v1905_v51 = vpop.xlane.xlu0 %1904  ;;  %v6700_v52 = vpop.eup %6699  ;;  %v2556_v53 = vadd.f32 1.0, %v6698_v46  ;;  %6719 = vpow2.f32 %v2408_v38  ;;  %v2055_v54 = vadd.f32 %v1907_v50, %v8570_v21  ;;  %v2414_v56 = vmul.f32 1.442695, %v2181_v48  ;;  %v8047_v50 = vld [vmem:[%s12936_s0 + $0x1d8] sm:$0xff] }
 0x267   :  { %v2054_v55 = vadd.f32 %v1905_v51, %v8570_v21  ;;  %v6702_v36 = vpop.eup %6701  ;;  %2935 = vst.msk [vmem:[%s12939_s3 + $0x2d0] sm:$0xff] %vm2844_vm1, %v6700_v52  ;;  %6721 = vrcp.f32 %v2557_v47  ;;  %v2412_v57 = vmul.f32 1.442695, %v2180_v49  ;;  %v3037_v51 = vmul.f32 %v8047_v50, %v10567_v34  ;;  %v8048_v52 = vld [vmem:[%s12936_s0 + $0x1d0] sm:$0xff] }
 0x268   :  { %v6704_v61 = vpop.eup %6703  ;;  %2938 = vst.msk [vmem:[%s12939_s3 + $0x2e8] sm:$0xff] %vm2844_vm1, %v6702_v36  ;;  %6723 = vrcp.f32 %v2556_v53  ;;  %v2183_v62 = vsub.f32 0.0, %v2055_v54  ;;  %3208 = vadd.xlane.f32.xlu1 %v3029_v1  ;;  %v3036_v53 = vmul.f32 %v8048_v52, %v10567_v34 }
 0x269   :  { %v2182_v63 = vsub.f32 0.0, %v2054_v55  ;;  %3206 = vadd.xlane.f32.xlu0 %v3028_v45  ;;  %v6706_v3 = vpop.eup %6705  ;;  %v2559_v4 = vadd.f32 1.0, %v6704_v61  ;;  %6725 = vpow2.f32 %v2414_v56  ;;  %v1911_v5 = vpop.xlane.xlu1 %1910 }
 0x26a   :  { %v1909_v6 = vpop.xlane.xlu0 %1908  ;;  %v6708_v7 = vpop.eup %6707  ;;  %2937 = vst.msk [vmem:[%s12939_s3 + $0x2e0] sm:$0xff] %vm2844_vm1, %v6706_v3  ;;  %6727 = vpow2.f32 %v2412_v57  ;;  %v2418_v8 = vmul.f32 1.442695, %v2183_v62  ;;  %v2057_v9 = vadd.f32 %v1911_v5, %v8570_v21 }
 0x26b   :  { %v6710_v13 = vpop.eup %6709  ;;  %6729 = vrcp.f32 %v2559_v4  ;;  %v2558_v60 = vadd.f32 1.0, %v6708_v7  ;;  %v2056_v15 = vadd.f32 %v1909_v6, %v8570_v21  ;;  %v2416_v20 = vmul.f32 1.442695, %v2182_v63  ;;  %v8049_v7 = vld [vmem:[%s12936_s0 + $0x1e8] sm:$0xff] }
 0x26c   :  { %v6712_v18 = vpop.eup %6711  ;;  %v2561_v19 = vadd.f32 1.0, %v6710_v13  ;;  %6731 = vpow2.f32 %v2418_v8  ;;  %v2185_v22 = vsub.f32 0.0, %v2057_v9  ;;  %3212 = vadd.xlane.f32.xlu1 %v3031_v59  ;;  %v3039_v8 = vmul.f32 %v8049_v7, %v10567_v34  ;;  %v8050_v13 = vld [vmem:[%s12936_s0 + $0x1e0] sm:$0xff] }
 0x26d   :  { %3210 = vadd.xlane.f32.xlu0 %v3030_v2  ;;  %v6714_v14 = vpop.eup %6713  ;;  %6733 = vrcp.f32 %v2558_v60  ;;  %v2560_v23 = vadd.f32 1.0, %v6712_v18  ;;  %v2184_v24 = vsub.f32 0.0, %v2056_v15  ;;  %v1915_v25 = vpop.xlane.xlu1 %1914  ;;  %v3038_v60 = vmul.f32 %v8050_v13, %v10567_v34 }
 0x26e   :  { %v1913_v26 = vpop.xlane.xlu0 %1912  ;;  %v6716_v27 = vpop.eup %6715  ;;  %2940 = vst.msk [vmem:[%s12939_s3 + $0x2f8] sm:$0xff] %vm2844_vm1, %v6714_v14  ;;  %6735 = vrcp.f32 %v2561_v19  ;;  %v2422_v28 = vmul.f32 1.442695, %v2185_v22  ;;  %v2059_v29 = vadd.f32 %v1915_v25, %v8570_v21  ;;  %v8051_v22 = vld [vmem:[%s12936_s0 + $0x1f8] sm:$0xff] }
 0x26f   :  { %v2058_v30 = vadd.f32 %v1913_v26, %v8570_v21  ;;  %v6718_v31 = vpop.eup %6717  ;;  %2939 = vst.msk [vmem:[%s12939_s3 + $0x2f0] sm:$0xff] %vm2844_vm1, %v6716_v27  ;;  %6737 = vrcp.f32 %v2560_v23  ;;  %v2420_v32 = vmul.f32 1.442695, %v2184_v24  ;;  %v3041_v14 = vmul.f32 %v8051_v22, %v10567_v34 }
 0x270   :  { %v6720_v38 = vpop.eup %6719  ;;  %v2563_v39 = vadd.f32 1.0, %v6718_v31  ;;  %6739 = vpow2.f32 %v2416_v20  ;;  %v2187_v40 = vsub.f32 0.0, %v2059_v29  ;;  %3216 = vadd.xlane.f32.xlu1 %v3033_v12 }
 0x271   :  { %v2186_v41 = vsub.f32 0.0, %v2058_v30  ;;  %3214 = vadd.xlane.f32.xlu0 %v3032_v17  ;;  %v6722_v42 = vpop.eup %6721  ;;  %v2562_v43 = vadd.f32 1.0, %v6720_v38  ;;  %6741 = vpow2.f32 %v2422_v28  ;;  %v1919_v1 = vpop.xlane.xlu1 %1918  ;;  %v8052_v30 = vld [vmem:[%s12936_s0 + $0x1f0] sm:$0xff] }
 0x272   :  { %v1917_v44 = vpop.xlane.xlu0 %1916  ;;  %v6724_v45 = vpop.eup %6723  ;;  %2942 = vst.msk [vmem:[%s12939_s3 + $0x308] sm:$0xff] %vm2844_vm1, %v6722_v42  ;;  %6743 = vrcp.f32 %v2563_v39  ;;  %v2426_v46 = vmul.f32 1.442695, %v2187_v40  ;;  %v2061_v47 = vadd.f32 %v1919_v1, %v8570_v21  ;;  %v3040_v31 = vmul.f32 %v8052_v30, %v10567_v34 }
 0x273   :  { %v6726_v48 = vpop.eup %6725  ;;  %2941 = vst.msk [vmem:[%s12939_s3 + $0x300] sm:$0xff] %vm2844_vm1, %v6724_v45  ;;  %6745 = vrcp.f32 %v2562_v43  ;;  %v2060_v49 = vadd.f32 %v1917_v44, %v8570_v21  ;;  %v2424_v36 = vmul.f32 1.442695, %v2186_v41  ;;  %v8054_v45 = vld [vmem:[%s12936_s0 + $0x200] sm:$0xff] }
 0x274   :  { %v6728_v54 = vpop.eup %6727  ;;  %v2565_v55 = vadd.f32 1.0, %v6726_v48  ;;  %6747 = vpow2.f32 %v2420_v32  ;;  %v2189_v56 = vsub.f32 0.0, %v2061_v47  ;;  %3220 = vadd.xlane.f32.xlu1 %v3035_v33 }
 0x275   :  { %3218 = vadd.xlane.f32.xlu0 %v3034_v37  ;;  %v6730_v57 = vpop.eup %6729  ;;  %v2564_v58 = vadd.f32 1.0, %v6728_v54  ;;  %6749 = vpow2.f32 %v2426_v46  ;;  %v2188_v59 = vsub.f32 0.0, %v2060_v49  ;;  %v1923_v61 = vpop.xlane.xlu1 %1922  ;;  %v8053_v37 = vld [vmem:[%s12936_s0 + $0x208] sm:$0xff]  ;;  %v3042_v46 = vmul.f32 %v8054_v45, %v10567_v34 }
 0x276   :  { %v1921_v62 = vpop.xlane.xlu0 %1920  ;;  %v6732_v63 = vpop.eup %6731  ;;  %2944 = vst.msk [vmem:[%s12939_s3 + $0x318] sm:$0xff] %vm2844_vm1, %v6730_v57  ;;  %6751 = vrcp.f32 %v2565_v55  ;;  %v2430_v0 = vmul.f32 1.442695, %v2189_v56  ;;  %v2063_v2 = vadd.f32 %v1923_v61, %v8570_v21  ;;  %v3043_v38 = vmul.f32 %v8053_v37, %v10567_v34 }
 0x277   :  { %v2062_v3 = vadd.f32 %v1921_v62, %v8570_v21  ;;  %v6734_v4 = vpop.eup %6733  ;;  %6753 = vrcp.f32 %v2564_v58  ;;  %v2567_v5 = vadd.f32 1.0, %v6732_v63  ;;  %v2428_v6 = vmul.f32 1.442695, %v2188_v59  ;;  %v8055_v63 = vld [vmem:[%s12936_s0 + $0x218] sm:$0xff] }
 0x278   :  { %v6736_v9 = vpop.eup %6735  ;;  %2943 = vst.msk [vmem:[%s12939_s3 + $0x310] sm:$0xff] %vm2844_vm1, %v6734_v4  ;;  %6755 = vpow2.f32 %v2424_v36  ;;  %v2191_v10 = vsub.f32 0.0, %v2063_v2  ;;  %3224 = vadd.xlane.f32.xlu1 %v3037_v51  ;;  %v8056_v2 = vld [vmem:[%s12936_s0 + $0x210] sm:$0xff] }
 0x279   :  { %v2190_v12 = vsub.f32 0.0, %v2062_v3  ;;  %3222 = vadd.xlane.f32.xlu0 %v3036_v53  ;;  %v6738_v15 = vpop.eup %6737  ;;  %2946 = vst.msk [vmem:[%s12939_s3 + $0x328] sm:$0xff] %vm2844_vm1, %v6736_v9  ;;  %6757 = vrcp.f32 %v2567_v5  ;;  %v1927_v16 = vpop.xlane.xlu1 %1926  ;;  %v3044_v3 = vmul.f32 %v8056_v2, %v10567_v34 }
 0x27a   :  { %v1925_v17 = vpop.xlane.xlu0 %1924  ;;  %v6740_v18 = vpop.eup %6739  ;;  %2945 = vst.msk [vmem:[%s12939_s3 + $0x320] sm:$0xff] %vm2844_vm1, %v6738_v15  ;;  %6759 = vpow2.f32 %v2430_v0  ;;  %v2434_v19 = vmul.f32 1.442695, %v2191_v10  ;;  %v2065_v20 = vadd.f32 %v1927_v16, %v8570_v21  ;;  %v3045_v0 = vmul.f32 %v8055_v63, %v10567_v34 }
 0x27b   :  { %v6742_v23 = vpop.eup %6741  ;;  %v2566_v24 = vadd.f32 1.0, %v6740_v18  ;;  %6761 = vpow2.f32 %v2428_v6  ;;  %v2432_v25 = vmul.f32 1.442695, %v2190_v12  ;;  %v2064_v26 = vadd.f32 %v1925_v17, %v8570_v21 }
 0x27c   :  { %v6744_v27 = vpop.eup %6743  ;;  %v2569_v28 = vadd.f32 1.0, %v6742_v23  ;;  %6763 = vpow2.f32 %v2434_v19  ;;  %v2193_v29 = vsub.f32 0.0, %v2065_v20  ;;  %3228 = vadd.xlane.f32.xlu1 %v3039_v8  ;;  %v8057_v20 = vld [vmem:[%s12936_s0 + $0x228] sm:$0xff] }
 0x27d   :  { %3226 = vadd.xlane.f32.xlu0 %v3038_v60  ;;  %v6746_v32 = vpop.eup %6745  ;;  %2948 = vst.msk [vmem:[%s12939_s3 + $0x338] sm:$0xff] %vm2844_vm1, %v6744_v27  ;;  %6765 = vrcp.f32 %v2566_v24  ;;  %v2192_v11 = vsub.f32 0.0, %v2064_v26  ;;  %v1931_v33 = vpop.xlane.xlu1 %1930  ;;  %v3047_v22 = vmul.f32 %v8057_v20, %v10567_v34 }
 0x27e   :  { %v1929_v35 = vpop.xlane.xlu0 %1928  ;;  %v6748_v39 = vpop.eup %6747  ;;  %2947 = vst.msk [vmem:[%s12939_s3 + $0x330] sm:$0xff] %vm2844_vm1, %v6746_v32  ;;  %6767 = vrcp.f32 %v2569_v28  ;;  %v2438_v40 = vmul.f32 1.442695, %v2193_v29  ;;  %v2067_v41 = vadd.f32 %v1931_v33, %v8570_v21 }
 0x27f   :  { %v2066_v42 = vadd.f32 %v1929_v35, %v8570_v21  ;;  %v6750_v43 = vpop.eup %6749  ;;  %v2568_v1 = vadd.f32 1.0, %v6748_v39  ;;  %6769 = vpow2.f32 %v2432_v25  ;;  %v2436_v44 = vmul.f32 1.442695, %v2192_v11  ;;  %v8059_v39 = vld [vmem:[%s12936_s0 + $0x238] sm:$0xff] }
 0x280   :  { %v6752_v47 = vpop.eup %6751  ;;  %v2571_v48 = vadd.f32 1.0, %v6750_v43  ;;  %6771 = vpow2.f32 %v2438_v40  ;;  %v2195_v49 = vsub.f32 0.0, %v2067_v41  ;;  %3232 = vadd.xlane.f32.xlu1 %v3041_v14  ;;  %v8058_v14 = vld [vmem:[%s12936_s0 + $0x220] sm:$0xff]  ;;  %v3049_v40 = vmul.f32 %v8059_v39, %v10567_v34  ;;  %v8060_v41 = vld [vmem:[%s12936_s0 + $0x230] sm:$0xff] }
 0x281   :  { %v2194_v50 = vsub.f32 0.0, %v2066_v42  ;;  %3230 = vadd.xlane.f32.xlu0 %v3040_v31  ;;  %v6754_v51 = vpop.eup %6753  ;;  %2950 = vst.msk [vmem:[%s12939_s3 + $0x348] sm:$0xff] %vm2844_vm1, %v6752_v47  ;;  %6773 = vrcp.f32 %v2568_v1  ;;  %v1935_v52 = vpop.xlane.xlu1 %1934  ;;  %v3046_v23 = vmul.f32 %v8058_v14, %v10567_v34  ;;  %v3048_v42 = vmul.f32 %v8060_v41, %v10567_v34 }
 0x282   :  { %v1933_v53 = vpop.xlane.xlu0 %1932  ;;  %v6756_v54 = vpop.eup %6755  ;;  %2949 = vst.msk [vmem:[%s12939_s3 + $0x340] sm:$0xff] %vm2844_vm1, %v6754_v51  ;;  %6775 = vrcp.f32 %v2571_v48  ;;  %v2442_v55 = vmul.f32 1.442695, %v2195_v49  ;;  %v2069_v56 = vadd.f32 %v1935_v52, %v8570_v21 }
 0x283   :  { %v2440_v36 = vmul.f32 1.442695, %v2194_v50  ;;  %v6758_v57 = vpop.eup %6757  ;;  %v2570_v58 = vadd.f32 1.0, %v6756_v54  ;;  %6777 = vpow2.f32 %v2436_v44  ;;  %v2068_v59 = vadd.f32 %v1933_v53, %v8570_v21  ;;  %v8061_v53 = vld [vmem:[%s12936_s0 + $0x248] sm:$0xff] }
 0x284   :  { %v6760_v61 = vpop.eup %6759  ;;  %2952 = vst.msk [vmem:[%s12939_s3 + $0x358] sm:$0xff] %vm2844_vm1, %v6758_v57  ;;  %6779 = vpow2.f32 %v2442_v55  ;;  %v2197_v62 = vsub.f32 0.0, %v2069_v56  ;;  %3236 = vadd.xlane.f32.xlu1 %v3043_v38  ;;  %v3051_v54 = vmul.f32 %v8061_v53, %v10567_v34  ;;  %v8062_v57 = vld [vmem:[%s12936_s0 + $0x240] sm:$0xff] }
 0x285   :  { %3234 = vadd.xlane.f32.xlu0 %v3042_v46  ;;  %v6762_v4 = vpop.eup %6761  ;;  %6781 = vrcp.f32 %v2570_v58  ;;  %v2573_v5 = vadd.f32 1.0, %v6760_v61  ;;  %v2196_v6 = vsub.f32 0.0, %v2068_v59  ;;  %v1939_v7 = vpop.xlane.xlu1 %1938  ;;  %v3050_v58 = vmul.f32 %v8062_v57, %v10567_v34 }
 0x286   :  { %v1937_v8 = vpop.xlane.xlu0 %1936  ;;  %v6764_v9 = vpop.eup %6763  ;;  %v2572_v10 = vadd.f32 1.0, %v6762_v4  ;;  %6783 = vpow2.f32 %v2440_v36  ;;  %v2446_v12 = vmul.f32 1.442695, %v2197_v62  ;;  %v2071_v13 = vadd.f32 %v1939_v7, %v8570_v21 }
 0x287   :  { %v6766_v60 = vpop.eup %6765  ;;  %6785 = vrcp.f32 %v2573_v5  ;;  %v2575_v15 = vadd.f32 1.0, %v6764_v9  ;;  %v2444_v16 = vmul.f32 1.442695, %v2196_v6  ;;  %v2070_v17 = vadd.f32 %v1937_v8, %v8570_v21  ;;  %v8063_v8 = vld [vmem:[%s12936_s0 + $0x258] sm:$0xff] }
 0x288   :  { %v6768_v18 = vpop.eup %6767  ;;  %2951 = vst.msk [vmem:[%s12939_s3 + $0x350] sm:$0xff] %vm2844_vm1, %v6766_v60  ;;  %6787 = vrcp.f32 %v2572_v10  ;;  %v2199_v19 = vsub.f32 0.0, %v2071_v13  ;;  %3240 = vadd.xlane.f32.xlu1 %v3045_v0  ;;  %v3053_v9 = vmul.f32 %v8063_v8, %v10567_v34  ;;  %v8064_v60 = vld [vmem:[%s12936_s0 + $0x250] sm:$0xff] }
 0x289   :  { %3238 = vadd.xlane.f32.xlu0 %v3044_v3  ;;  %v6770_v24 = vpop.eup %6769  ;;  %2954 = vst.msk [vmem:[%s12939_s3 + $0x368] sm:$0xff] %vm2844_vm1, %v6768_v18  ;;  %6789 = vrcp.f32 %v2575_v15  ;;  %v2198_v25 = vsub.f32 0.0, %v2070_v17  ;;  %v1943_v26 = vpop.xlane.xlu1 %1942  ;;  %v3052_v15 = vmul.f32 %v8064_v60, %v10567_v34 }
 0x28a   :  { %v1941_v27 = vpop.xlane.xlu0 %1940  ;;  %v6772_v28 = vpop.eup %6771  ;;  %v2574_v29 = vadd.f32 1.0, %v6770_v24  ;;  %6791 = vpow2.f32 %v2446_v12  ;;  %v2450_v30 = vmul.f32 1.442695, %v2199_v19  ;;  %v2073_v31 = vadd.f32 %v1943_v26, %v8570_v21 }
 0x28b   :  { %v6774_v32 = vpop.eup %6773  ;;  %v2577_v11 = vadd.f32 1.0, %v6772_v28  ;;  %6793 = vpow2.f32 %v2444_v16  ;;  %v2448_v33 = vmul.f32 1.442695, %v2198_v25  ;;  %v2072_v35 = vadd.f32 %v1941_v27, %v8570_v21  ;;  %v8065_v28 = vld [vmem:[%s12936_s0 + $0x268] sm:$0xff] }
 0x28c   :  { %v6776_v37 = vpop.eup %6775  ;;  %2953 = vst.msk [vmem:[%s12939_s3 + $0x360] sm:$0xff] %vm2844_vm1, %v6774_v32  ;;  %6795 = vrcp.f32 %v2574_v29  ;;  %v2201_v38 = vsub.f32 0.0, %v2073_v31  ;;  %3244 = vadd.xlane.f32.xlu1 %v3047_v22  ;;  %v3055_v29 = vmul.f32 %v8065_v28, %v10567_v34 }
 0x28d   :  { %3242 = vadd.xlane.f32.xlu0 %v3046_v23  ;;  %v6778_v43 = vpop.eup %6777  ;;  %2956 = vst.msk [vmem:[%s12939_s3 + $0x378] sm:$0xff] %vm2844_vm1, %v6776_v37  ;;  %6797 = vrcp.f32 %v2577_v11  ;;  %v2200_v1 = vsub.f32 0.0, %v2072_v35  ;;  %v1947_v44 = vpop.xlane.xlu1 %1946 }
 0x28e   :  { %v1945_v45 = vpop.xlane.xlu0 %1944  ;;  %v6780_v46 = vpop.eup %6779  ;;  %v2576_v47 = vadd.f32 1.0, %v6778_v43  ;;  %6799 = vpow2.f32 %v2450_v30  ;;  %v2454_v48 = vmul.f32 1.442695, %v2201_v38  ;;  %v2075_v49 = vadd.f32 %v1947_v44, %v8570_v21  ;;  %v8066_v30 = vld [vmem:[%s12936_s0 + $0x260] sm:$0xff] }
 0x28f   :  { %v6782_v50 = vpop.eup %6781  ;;  %v2579_v51 = vadd.f32 1.0, %v6780_v46  ;;  %6801 = vpow2.f32 %v2448_v33  ;;  %v2074_v52 = vadd.f32 %v1945_v45, %v8570_v21  ;;  %v2452_v36 = vmul.f32 1.442695, %v2200_v1  ;;  %v8067_v45 = vld [vmem:[%s12936_s0 + $0x278] sm:$0xff] }
 0x290   :  { %v6784_v55 = vpop.eup %6783  ;;  %2955 = vst.msk [vmem:[%s12939_s3 + $0x370] sm:$0xff] %vm2844_vm1, %v6782_v50  ;;  %6803 = vrcp.f32 %v2576_v47  ;;  %v2203_v56 = vsub.f32 0.0, %v2075_v49  ;;  %3248 = vadd.xlane.f32.xlu1 %v3049_v40  ;;  %v3054_v31 = vmul.f32 %v8066_v30, %v10567_v34  ;;  %v3057_v46 = vmul.f32 %v8067_v45, %v10567_v34  ;;  %v8068_v50 = vld [vmem:[%s12936_s0 + $0x270] sm:$0xff] }
 0x291   :  { %3246 = vadd.xlane.f32.xlu0 %v3048_v42  ;;  %v6786_v59 = vpop.eup %6785  ;;  %6805 = vrcp.f32 %v2579_v51  ;;  %v2578_v61 = vadd.f32 1.0, %v6784_v55  ;;  %v2202_v62 = vsub.f32 0.0, %v2074_v52  ;;  %v3109_v63 = vpop.xlane.xlu1 %3108  ;;  %v3056_v51 = vmul.f32 %v8068_v50, %v10567_v34 }
 0x292   :  { %v3107_v0 = vpop.xlane.xlu0 %3106  ;;  %v6788_v2 = vpop.eup %6787  ;;  %2958 = vst.msk [vmem:[%s12939_s3 + $0x388] sm:$0xff] %vm2844_vm1, %v6786_v59  ;;  %6807 = vpow2.f32 %v2454_v48  ;;  %v2458_v3 = vmul.f32 1.442695, %v2203_v56  ;;  %v3363_v4 = vadd.f32 %v3109_v63, %v8570_v21 }
 0x293   :  { %v3362_v5 = vadd.f32 %v3107_v0, %v8570_v21  ;;  %v6790_v6 = vpop.eup %6789  ;;  %2957 = vst.msk [vmem:[%s12939_s3 + $0x380] sm:$0xff] %vm2844_vm1, %v6788_v2  ;;  %6809 = vrcp.f32 %v2578_v61  ;;  %v2456_v7 = vmul.f32 1.442695, %v2202_v62  ;;  %v8070_v0 = vld [vmem:[%s12936_s0 + $0x280] sm:$0xff] }
 0x294   :  { %v6792_v10 = vpop.eup %6791  ;;  %2960 = vst.msk [vmem:[%s12939_s3 + $0x398] sm:$0xff] %vm2844_vm1, %v6790_v6  ;;  %6811 = vpow2.f32 %v2452_v36  ;;  %v3491_v12 = vsub.f32 0.0, %v3363_v4  ;;  %3252 = vadd.xlane.f32.xlu1 %v3051_v54  ;;  %v3058_v2 = vmul.f32 %v8070_v0, %v10567_v34 }
 0x295   :  { %v3490_v13 = vsub.f32 0.0, %v3362_v5  ;;  %3250 = vadd.xlane.f32.xlu0 %v3050_v58  ;;  %v6794_v16 = vpop.eup %6793  ;;  %v2581_v17 = vadd.f32 1.0, %v6792_v10  ;;  %6813 = vpow2.f32 %v2458_v3  ;;  %v3113_v18 = vpop.xlane.xlu1 %3112  ;;  %v8069_v58 = vld [vmem:[%s12936_s0 + $0x288] sm:$0xff] }
 0x296   :  { %v3111_v19 = vpop.xlane.xlu0 %3110  ;;  %v6796_v20 = vpop.eup %6795  ;;  %v2580_v22 = vadd.f32 1.0, %v6794_v16  ;;  %6815 = vpow2.f32 %v2456_v7  ;;  %v3620_v14 = vmul.f32 1.442695, %v3491_v12  ;;  %v3365_v25 = vadd.f32 %v3113_v18, %v8570_v21 }
 0x297   :  { %v3618_v23 = vmul.f32 1.442695, %v3490_v13  ;;  %v6798_v24 = vpop.eup %6797  ;;  %2959 = vst.msk [vmem:[%s12939_s3 + $0x390] sm:$0xff] %vm2844_vm1, %v6796_v20  ;;  %6817 = vrcp.f32 %v2581_v17  ;;  %v3364_v26 = vadd.f32 %v3111_v19, %v8570_v21  ;;  %v3059_v59 = vmul.f32 %v8069_v58, %v10567_v34  ;;  %v8071_v19 = vld [vmem:[%s12936_s0 + $0x298] sm:$0xff] }
 0x298   :  { %v6800_v27 = vpop.eup %6799  ;;  %2962 = vst.msk [vmem:[%s12939_s3 + $0x3a8] sm:$0xff] %vm2844_vm1, %v6798_v24  ;;  %6819 = vrcp.f32 %v2580_v22  ;;  %3256 = vadd.xlane.f32.xlu1 %v3053_v9  ;;  %v3493_v33 = vsub.f32 0.0, %v3365_v25  ;;  %v3061_v20 = vmul.f32 %v8071_v19, %v10567_v34  ;;  %v8072_v22 = vld [vmem:[%s12936_s0 + $0x290] sm:$0xff] }
 0x299   :  { %3254 = vadd.xlane.f32.xlu0 %v3052_v15  ;;  %v6802_v32 = vpop.eup %6801  ;;  %v2583_v11 = vadd.f32 1.0, %v6800_v27  ;;  %6821 = vpow2.f32 %v3620_v14  ;;  %v3492_v35 = vsub.f32 0.0, %v3364_v26  ;;  %v3117_v37 = vpop.xlane.xlu1 %3116  ;;  %v3060_v14 = vmul.f32 %v8072_v22, %v10567_v34 }
 0x29a   :  { %v3115_v38 = vpop.xlane.xlu0 %3114  ;;  %v6804_v39 = vpop.eup %6803  ;;  %v2582_v40 = vadd.f32 1.0, %v6802_v32  ;;  %6823 = vpow2.f32 %v3618_v23  ;;  %v3367_v41 = vadd.f32 %v3117_v37, %v8570_v21  ;;  %v3624_v1 = vmul.f32 1.442695, %v3493_v33  ;;  %v8073_v37 = vld [vmem:[%s12936_s0 + $0x2a8] sm:$0xff] }
 0x29b   :  { %v3366_v42 = vadd.f32 %v3115_v38, %v8570_v21  ;;  %v6806_v43 = vpop.eup %6805  ;;  %2961 = vst.msk [vmem:[%s12939_s3 + $0x3a0] sm:$0xff] %vm2844_vm1, %v6804_v39  ;;  %6825 = vrcp.f32 %v2583_v11  ;;  %v3622_v44 = vmul.f32 1.442695, %v3492_v35  ;;  %v3063_v38 = vmul.f32 %v8073_v37, %v10567_v34  ;;  %v8074_v39 = vld [vmem:[%s12936_s0 + $0x2a0] sm:$0xff] }
 0x29c   :  { %v6808_v47 = vpop.eup %6807  ;;  %2964 = vst.msk [vmem:[%s12939_s3 + $0x3b8] sm:$0xff] %vm2844_vm1, %v6806_v43  ;;  %6827 = vrcp.f32 %v2582_v40  ;;  %v3495_v48 = vsub.f32 0.0, %v3367_v41  ;;  %3260 = vadd.xlane.f32.xlu1 %v3055_v29  ;;  %v3062_v40 = vmul.f32 %v8074_v39, %v10567_v34 }
 0x29d   :  { %v3494_v49 = vsub.f32 0.0, %v3366_v42  ;;  %3258 = vadd.xlane.f32.xlu0 %v3054_v31  ;;  %v6810_v52 = vpop.eup %6809  ;;  %v2585_v53 = vadd.f32 1.0, %v6808_v47  ;;  %6829 = vpow2.f32 %v3624_v1  ;;  %v3121_v54 = vpop.xlane.xlu1 %3120 }
 0x29e   :  { %v3119_v55 = vpop.xlane.xlu0 %3118  ;;  %v6812_v36 = vpop.eup %6811  ;;  %2963 = vst.msk [vmem:[%s12939_s3 + $0x3b0] sm:$0xff] %vm2844_vm1, %v6810_v52  ;;  %6831 = vpow2.f32 %v3622_v44  ;;  %v3628_v56 = vmul.f32 1.442695, %v3495_v48  ;;  %v3369_v57 = vadd.f32 %v3121_v54, %v8570_v21 }
 0x29f   :  { %v6814_v61 = vpop.eup %6813  ;;  %6833 = vrcp.f32 %v2585_v53  ;;  %v2584_v62 = vadd.f32 1.0, %v6812_v36  ;;  %v3368_v63 = vadd.f32 %v3119_v55, %v8570_v21  ;;  %v3626_v5 = vmul.f32 1.442695, %v3494_v49  ;;  %v8075_v55 = vld [vmem:[%s12936_s0 + $0x2b8] sm:$0xff]  ;;  %v10964_v36 = vld [vmem:[%s12937_s1 + $0x2] ss:$0 sm:$0xff] }
 0x2a0   :  { %v6816_v3 = vpop.eup %6815  ;;  %v2587_v4 = vadd.f32 1.0, %v6814_v61  ;;  %6835 = vpow2.f32 %v3628_v56  ;;  %v3497_v6 = vsub.f32 0.0, %v3369_v57  ;;  %3264 = vadd.xlane.f32.xlu1 %v3057_v46  ;;  %v3065_v56 = vmul.f32 %v10964_v36, %v8075_v55  ;;  %v8077_v61 = vld [vmem:[%s12936_s0 + $0x2b0] sm:$0xff] }
 0x2a1   :  { %3262 = vadd.xlane.f32.xlu0 %v3056_v51  ;;  %v6818_v7 = vpop.eup %6817  ;;  %6837 = vrcp.f32 %v2584_v62  ;;  %v2586_v8 = vadd.f32 1.0, %v6816_v3  ;;  %v3496_v9 = vsub.f32 0.0, %v3368_v63  ;;  %v3125_v10 = vpop.xlane.xlu1 %3124  ;;  %v3064_v62 = vmul.f32 %v8077_v61, %v10964_v36 }
 0x2a2   :  { %v3123_v12 = vpop.xlane.xlu0 %3122  ;;  %v6820_v13 = vpop.eup %6819  ;;  %2966 = vst.msk [vmem:[%s12939_s3 + $0x3c8] sm:$0xff] %vm2844_vm1, %v6818_v7  ;;  %6839 = vrcp.f32 %v2587_v4  ;;  %v3632_v60 = vmul.f32 1.442695, %v3497_v6  ;;  %v3371_v15 = vadd.f32 %v3125_v10, %v8570_v21  ;;  %v8078_v6 = vld [vmem:[%s12936_s0 + $0x2c8] sm:$0xff] }
 0x2a3   :  { %v3370_v16 = vadd.f32 %v3123_v12, %v8570_v21  ;;  %v6822_v17 = vpop.eup %6821  ;;  %2965 = vst.msk [vmem:[%s12939_s3 + $0x3c0] sm:$0xff] %vm2844_vm1, %v6820_v13  ;;  %6841 = vrcp.f32 %v2586_v8  ;;  %v3630_v18 = vmul.f32 1.442695, %v3496_v9  ;;  %v3067_v7 = vmul.f32 %v8078_v6, %v10964_v36 }
 0x2a4   :  { %v6824_v23 = vpop.eup %6823  ;;  %v3875_v24 = vadd.f32 1.0, %v6822_v17  ;;  %6843 = vpow2.f32 %v3626_v5  ;;  %v3499_v25 = vsub.f32 0.0, %v3371_v15  ;;  %3268 = vadd.xlane.f32.xlu1 %v3059_v59 }
 0x2a5   :  { %v3498_v26 = vsub.f32 0.0, %v3370_v16  ;;  %3266 = vadd.xlane.f32.xlu0 %v3058_v2  ;;  %v6826_v27 = vpop.eup %6825  ;;  %v3874_v28 = vadd.f32 1.0, %v6824_v23  ;;  %6845 = vpow2.f32 %v3632_v60  ;;  %v3129_v29 = vpop.xlane.xlu1 %3128  ;;  %v8079_v16 = vld [vmem:[%s12936_s0 + $0x2c0] sm:$0xff] }
 0x2a6   :  { %v3127_v30 = vpop.xlane.xlu0 %3126  ;;  %v6828_v31 = vpop.eup %6827  ;;  %2968 = vst.msk [vmem:[%s12939_s3 + $0x3d8] sm:$0xff] %vm2844_vm1, %v6826_v27  ;;  %6847 = vrcp.f32 %v3875_v24  ;;  %v3636_v32 = vmul.f32 1.442695, %v3499_v25  ;;  %v3373_v11 = vadd.f32 %v3129_v29, %v8570_v21  ;;  %v3066_v17 = vmul.f32 %v8079_v16, %v10964_v36 }
 0x2a7   :  { %v6830_v33 = vpop.eup %6829  ;;  %2967 = vst.msk [vmem:[%s12939_s3 + $0x3d0] sm:$0xff] %vm2844_vm1, %v6828_v31  ;;  %6849 = vrcp.f32 %v3874_v28  ;;  %v3372_v35 = vadd.f32 %v3127_v30, %v8570_v21  ;;  %v3634_v43 = vmul.f32 1.442695, %v3498_v26  ;;  %v8081_v31 = vld [vmem:[%s12936_s0 + $0x2d0] sm:$0xff] }
 0x2a8   :  { %v6832_v41 = vpop.eup %6831  ;;  %v3877_v42 = vadd.f32 1.0, %v6830_v33  ;;  %6851 = vpow2.f32 %v3630_v18  ;;  %v3501_v1 = vsub.f32 0.0, %v3373_v11  ;;  %3272 = vadd.xlane.f32.xlu1 %v3061_v20 }
 0x2a9   :  { %3270 = vadd.xlane.f32.xlu0 %v3060_v14  ;;  %v6834_v44 = vpop.eup %6833  ;;  %v3876_v45 = vadd.f32 1.0, %v6832_v41  ;;  %6853 = vpow2.f32 %v3636_v32  ;;  %v3500_v46 = vsub.f32 0.0, %v3372_v35  ;;  %v3133_v47 = vpop.xlane.xlu1 %3132  ;;  %v8080_v14 = vld [vmem:[%s12936_s0 + $0x2d8] sm:$0xff]  ;;  %v3068_v32 = vmul.f32 %v8081_v31, %v10964_v36 }
 0x2aa   :  { %v3131_v48 = vpop.xlane.xlu0 %3130  ;;  %v6836_v49 = vpop.eup %6835  ;;  %2970 = vst.msk [vmem:[%s12939_s3 + $0x3e8] sm:$0xff] %vm2844_vm1, %v6834_v44  ;;  %6855 = vrcp.f32 %v3877_v42  ;;  %v3640_v34 = vmul.f32 1.442695, %v3501_v1  ;;  %v3375_v50 = vadd.f32 %v3133_v47, %v8570_v21  ;;  %v3069_v23 = vmul.f32 %v8080_v14, %v10964_v36 }
 0x2ab   :  { %v3374_v51 = vadd.f32 %v3131_v48, %v8570_v21  ;;  %v6838_v52 = vpop.eup %6837  ;;  %6857 = vrcp.f32 %v3876_v45  ;;  %v3879_v53 = vadd.f32 1.0, %v6836_v49  ;;  %v3638_v54 = vmul.f32 1.442695, %v3500_v46  ;;  %v8082_v49 = vld [vmem:[%s12936_s0 + $0x2e8] sm:$0xff] }
 0x2ac   :  { %v6840_v57 = vpop.eup %6839  ;;  %2969 = vst.msk [vmem:[%s12939_s3 + $0x3e0] sm:$0xff] %vm2844_vm1, %v6838_v52  ;;  %6859 = vpow2.f32 %v3634_v43  ;;  %v3503_v58 = vsub.f32 0.0, %v3375_v50  ;;  %3276 = vadd.xlane.f32.xlu1 %v3063_v38  ;;  %v8083_v50 = vld [vmem:[%s12936_s0 + $0x2e0] sm:$0xff] }
 0x2ad   :  { %v3502_v59 = vsub.f32 0.0, %v3374_v51  ;;  %3274 = vadd.xlane.f32.xlu0 %v3062_v40  ;;  %v6842_v63 = vpop.eup %6841  ;;  %2972 = vst.msk [vmem:[%s12939_s3 + $0x3f8] sm:$0xff] %vm2844_vm1, %v6840_v57  ;;  %6861 = vrcp.f32 %v3879_v53  ;;  %v3137_v0 = vpop.xlane.xlu1 %3136  ;;  %v3070_v51 = vmul.f32 %v8083_v50, %v10964_v36 }
 0x2ae   :  { %v3135_v2 = vpop.xlane.xlu0 %3134  ;;  %v6844_v3 = vpop.eup %6843  ;;  %2971 = vst.msk [vmem:[%s12939_s3 + $0x3f0] sm:$0xff] %vm2844_vm1, %v6842_v63  ;;  %6863 = vpow2.f32 %v3640_v34  ;;  %v3644_v4 = vmul.f32 1.442695, %v3503_v58  ;;  %v3377_v5 = vadd.f32 %v3137_v0, %v8570_v21  ;;  %v3071_v34 = vmul.f32 %v8082_v49, %v10964_v36 }
 0x2af   :  { %v6846_v8 = vpop.eup %6845  ;;  %v3878_v9 = vadd.f32 1.0, %v6844_v3  ;;  %6865 = vpow2.f32 %v3638_v54  ;;  %v3642_v10 = vmul.f32 1.442695, %v3502_v59  ;;  %v3376_v12 = vadd.f32 %v3135_v2, %v8570_v21 }
 0x2b0   :  { %v6848_v13 = vpop.eup %6847  ;;  %v3881_v60 = vadd.f32 1.0, %v6846_v8  ;;  %6867 = vpow2.f32 %v3644_v4  ;;  %v3505_v15 = vsub.f32 0.0, %v3377_v5  ;;  %3280 = vadd.xlane.f32.xlu1 %v3065_v56  ;;  %v8084_v5 = vld [vmem:[%s12936_s0 + $0x2f8] sm:$0xff] }
 0x2b1   :  { %3278 = vadd.xlane.f32.xlu0 %v3064_v62  ;;  %v6850_v18 = vpop.eup %6849  ;;  %4260 = vst.msk [vmem:[%s12939_s3 + $0x8] sm:$0xff] %vm4258_vm2, %v6848_v13  ;;  %6869 = vrcp.f32 %v3878_v9  ;;  %v3504_v19 = vsub.f32 0.0, %v3376_v12  ;;  %v3141_v20 = vpop.xlane.xlu1 %3140  ;;  %v3073_v6 = vmul.f32 %v8084_v5, %v10964_v36 }
 0x2b2   :  { %v3139_v22 = vpop.xlane.xlu0 %3138  ;;  %v6852_v24 = vpop.eup %6851  ;;  %4259 = vst.msk [vmem:[%s12939_s3] sm:$0xff] %vm4258_vm2, %v6850_v18  ;;  %6871 = vrcp.f32 %v3881_v60  ;;  %v3648_v25 = vmul.f32 1.442695, %v3505_v15  ;;  %v3379_v26 = vadd.f32 %v3141_v20, %v8570_v21 }
 0x2b3   :  { %v3378_v27 = vadd.f32 %v3139_v22, %v8570_v21  ;;  %v6854_v28 = vpop.eup %6853  ;;  %v3880_v29 = vadd.f32 1.0, %v6852_v24  ;;  %6873 = vpow2.f32 %v3642_v10  ;;  %v3646_v30 = vmul.f32 1.442695, %v3504_v19  ;;  %v8086_v24 = vld [vmem:[%s12936_s0 + $0x308] sm:$0xff] }
 0x2b4   :  { %v6856_v11 = vpop.eup %6855  ;;  %v3883_v33 = vadd.f32 1.0, %v6854_v28  ;;  %6875 = vpow2.f32 %v3648_v25  ;;  %v3507_v35 = vsub.f32 0.0, %v3379_v26  ;;  %3284 = vadd.xlane.f32.xlu1 %v3067_v7  ;;  %v8085_v7 = vld [vmem:[%s12936_s0 + $0x2f0] sm:$0xff]  ;;  %v3075_v25 = vmul.f32 %v8086_v24, %v10964_v36  ;;  %v8087_v26 = vld [vmem:[%s12936_s0 + $0x300] sm:$0xff] }
 0x2b5   :  { %v3506_v37 = vsub.f32 0.0, %v3378_v27  ;;  %3282 = vadd.xlane.f32.xlu0 %v3066_v17  ;;  %v6858_v38 = vpop.eup %6857  ;;  %4262 = vst.msk [vmem:[%s12939_s3 + $0x18] sm:$0xff] %vm4258_vm2, %v6856_v11  ;;  %6877 = vrcp.f32 %v3880_v29  ;;  %v3145_v39 = vpop.xlane.xlu1 %3144  ;;  %v3072_v8 = vmul.f32 %v8085_v7, %v10964_v36  ;;  %v3074_v27 = vmul.f32 %v8087_v26, %v10964_v36 }
 0x2b6   :  { %v3143_v40 = vpop.xlane.xlu0 %3142  ;;  %v6860_v41 = vpop.eup %6859  ;;  %4261 = vst.msk [vmem:[%s12939_s3 + $0x10] sm:$0xff] %vm4258_vm2, %v6858_v38  ;;  %6879 = vrcp.f32 %v3883_v33  ;;  %v3652_v42 = vmul.f32 1.442695, %v3507_v35  ;;  %v3381_v1 = vadd.f32 %v3145_v39, %v8570_v21 }
 0x2b7   :  { %v3650_v43 = vmul.f32 1.442695, %v3506_v37  ;;  %v6862_v44 = vpop.eup %6861  ;;  %v3882_v45 = vadd.f32 1.0, %v6860_v41  ;;  %6881 = vpow2.f32 %v3646_v30  ;;  %v3380_v46 = vadd.f32 %v3143_v40, %v8570_v21  ;;  %v8088_v40 = vld [vmem:[%s12936_s0 + $0x318] sm:$0xff] }
 0x2b8   :  { %v6864_v47 = vpop.eup %6863  ;;  %4264 = vst.msk [vmem:[%s12939_s3 + $0x28] sm:$0xff] %vm4258_vm2, %v6862_v44  ;;  %6883 = vpow2.f32 %v3652_v42  ;;  %v3509_v48 = vsub.f32 0.0, %v3381_v1  ;;  %3288 = vadd.xlane.f32.xlu1 %v3069_v23  ;;  %v3077_v41 = vmul.f32 %v8088_v40, %v10964_v36  ;;  %v8089_v44 = vld [vmem:[%s12936_s0 + $0x310] sm:$0xff] }
 0x2b9   :  { %3286 = vadd.xlane.f32.xlu0 %v3068_v32  ;;  %v6866_v52 = vpop.eup %6865  ;;  %6885 = vrcp.f32 %v3882_v45  ;;  %v3885_v53 = vadd.f32 1.0, %v6864_v47  ;;  %v3508_v54 = vsub.f32 0.0, %v3380_v46  ;;  %v3149_v55 = vpop.xlane.xlu1 %3148  ;;  %v3076_v45 = vmul.f32 %v8089_v44, %v10964_v36 }
 0x2ba   :  { %v3147_v56 = vpop.xlane.xlu0 %3146  ;;  %v6868_v57 = vpop.eup %6867  ;;  %v3884_v58 = vadd.f32 1.0, %v6866_v52  ;;  %6887 = vpow2.f32 %v3650_v43  ;;  %v3656_v59 = vmul.f32 1.442695, %v3509_v48  ;;  %v3383_v61 = vadd.f32 %v3149_v55, %v8570_v21 }
 0x2bb   :  { %v6870_v62 = vpop.eup %6869  ;;  %6889 = vrcp.f32 %v3885_v53  ;;  %v3887_v63 = vadd.f32 1.0, %v6868_v57  ;;  %v3654_v0 = vmul.f32 1.442695, %v3508_v54  ;;  %v3382_v2 = vadd.f32 %v3147_v56, %v8570_v21  ;;  %v8090_v56 = vld [vmem:[%s12936_s0 + $0x328] sm:$0xff] }
 0x2bc   :  { %v6872_v3 = vpop.eup %6871  ;;  %4263 = vst.msk [vmem:[%s12939_s3 + $0x20] sm:$0xff] %vm4258_vm2, %v6870_v62  ;;  %6891 = vrcp.f32 %v3884_v58  ;;  %v3511_v4 = vsub.f32 0.0, %v3383_v61  ;;  %3292 = vadd.xlane.f32.xlu1 %v3071_v34  ;;  %v3079_v57 = vmul.f32 %v8090_v56, %v10964_v36  ;;  %v8091_v62 = vld [vmem:[%s12936_s0 + $0x320] sm:$0xff] }
 0x2bd   :  { %3290 = vadd.xlane.f32.xlu0 %v3070_v51  ;;  %v6874_v9 = vpop.eup %6873  ;;  %4266 = vst.msk [vmem:[%s12939_s3 + $0x38] sm:$0xff] %vm4258_vm2, %v6872_v3  ;;  %6893 = vrcp.f32 %v3887_v63  ;;  %v3510_v10 = vsub.f32 0.0, %v3382_v2  ;;  %v3153_v12 = vpop.xlane.xlu1 %3152  ;;  %v3078_v63 = vmul.f32 %v8091_v62, %v10964_v36 }
 0x2be   :  { %v3151_v13 = vpop.xlane.xlu0 %3150  ;;  %v6876_v60 = vpop.eup %6875  ;;  %v3886_v15 = vadd.f32 1.0, %v6874_v9  ;;  %6895 = vpow2.f32 %v3656_v59  ;;  %v3660_v16 = vmul.f32 1.442695, %v3511_v4  ;;  %v3385_v17 = vadd.f32 %v3153_v12, %v8570_v21 }
 0x2bf   :  { %v6878_v18 = vpop.eup %6877  ;;  %v3889_v19 = vadd.f32 1.0, %v6876_v60  ;;  %6897 = vpow2.f32 %v3654_v0  ;;  %v3658_v20 = vmul.f32 1.442695, %v3510_v10  ;;  %v3384_v22 = vadd.f32 %v3151_v13, %v8570_v21  ;;  %v8092_v60 = vld [vmem:[%s12936_s0 + $0x338] sm:$0xff] }
 0x2c0   :  { %v6880_v14 = vpop.eup %6879  ;;  %4265 = vst.msk [vmem:[%s12939_s3 + $0x30] sm:$0xff] %vm4258_vm2, %v6878_v18  ;;  %6899 = vrcp.f32 %v3886_v15  ;;  %v3513_v23 = vsub.f32 0.0, %v3385_v17  ;;  %3296 = vadd.xlane.f32.xlu1 %v3073_v6  ;;  %v3081_v15 = vmul.f32 %v8092_v60, %v10964_v36 }
 0x2c1   :  { %3294 = vadd.xlane.f32.xlu0 %v3072_v8  ;;  %v6882_v28 = vpop.eup %6881  ;;  %4268 = vst.msk [vmem:[%s12939_s3 + $0x48] sm:$0xff] %vm4258_vm2, %v6880_v14  ;;  %6901 = vrcp.f32 %v3889_v19  ;;  %v3512_v29 = vsub.f32 0.0, %v3384_v22  ;;  %v3157_v30 = vpop.xlane.xlu1 %3156 }
 0x2c2   :  { %v3155_v31 = vpop.xlane.xlu0 %3154  ;;  %v6884_v32 = vpop.eup %6883  ;;  %v3888_v11 = vadd.f32 1.0, %v6882_v28  ;;  %6903 = vpow2.f32 %v3660_v16  ;;  %v3664_v33 = vmul.f32 1.442695, %v3513_v23  ;;  %v3387_v35 = vadd.f32 %v3157_v30, %v8570_v21  ;;  %v8093_v16 = vld [vmem:[%s12936_s0 + $0x330] sm:$0xff] }
 0x2c3   :  { %v6886_v37 = vpop.eup %6885  ;;  %v3891_v38 = vadd.f32 1.0, %v6884_v32  ;;  %6905 = vpow2.f32 %v3658_v20  ;;  %v3386_v39 = vadd.f32 %v3155_v31, %v8570_v21  ;;  %v3662_v43 = vmul.f32 1.442695, %v3512_v29  ;;  %v8094_v31 = vld [vmem:[%s12936_s0 + $0x348] sm:$0xff] }
 0x2c4   :  { %v6888_v42 = vpop.eup %6887  ;;  %4267 = vst.msk [vmem:[%s12939_s3 + $0x40] sm:$0xff] %vm4258_vm2, %v6886_v37  ;;  %6907 = vrcp.f32 %v3888_v11  ;;  %v3515_v1 = vsub.f32 0.0, %v3387_v35  ;;  %3300 = vadd.xlane.f32.xlu1 %v3075_v25  ;;  %v3080_v17 = vmul.f32 %v8093_v16, %v10964_v36  ;;  %v3083_v32 = vmul.f32 %v8094_v31, %v10964_v36  ;;  %v8095_v37 = vld [vmem:[%s12936_s0 + $0x340] sm:$0xff] }
 0x2c5   :  { %3298 = vadd.xlane.f32.xlu0 %v3074_v27  ;;  %v6890_v46 = vpop.eup %6889  ;;  %6909 = vrcp.f32 %v3891_v38  ;;  %v3890_v47 = vadd.f32 1.0, %v6888_v42  ;;  %v3514_v48 = vsub.f32 0.0, %v3386_v39  ;;  %v3161_v49 = vpop.xlane.xlu1 %3160  ;;  %v3082_v38 = vmul.f32 %v8095_v37, %v10964_v36 }
 0x2c6   :  { %v3159_v34 = vpop.xlane.xlu0 %3158  ;;  %v6892_v50 = vpop.eup %6891  ;;  %4270 = vst.msk [vmem:[%s12939_s3 + $0x58] sm:$0xff] %vm4258_vm2, %v6890_v46  ;;  %6911 = vpow2.f32 %v3664_v33  ;;  %v3668_v51 = vmul.f32 1.442695, %v3515_v1  ;;  %v3389_v52 = vadd.f32 %v3161_v49, %v8570_v21 }
 0x2c7   :  { %v3388_v53 = vadd.f32 %v3159_v34, %v8570_v21  ;;  %v6894_v54 = vpop.eup %6893  ;;  %4269 = vst.msk [vmem:[%s12939_s3 + $0x50] sm:$0xff] %vm4258_vm2, %v6892_v50  ;;  %6913 = vrcp.f32 %v3890_v47  ;;  %v3666_v55 = vmul.f32 1.442695, %v3514_v48  ;;  %v8097_v34 = vld [vmem:[%s12936_s0 + $0x350] sm:$0xff] }
 0x2c8   :  { %v6896_v58 = vpop.eup %6895  ;;  %4272 = vst.msk [vmem:[%s12939_s3 + $0x68] sm:$0xff] %vm4258_vm2, %v6894_v54  ;;  %6915 = vpow2.f32 %v3662_v43  ;;  %v3517_v59 = vsub.f32 0.0, %v3389_v52  ;;  %3304 = vadd.xlane.f32.xlu1 %v3077_v41  ;;  %v3084_v50 = vmul.f32 %v8097_v34, %v10964_v36 }
 0x2c9   :  { %v3516_v61 = vsub.f32 0.0, %v3388_v53  ;;  %3302 = vadd.xlane.f32.xlu0 %v3076_v45  ;;  %v6898_v0 = vpop.eup %6897  ;;  %v3893_v2 = vadd.f32 1.0, %v6896_v58  ;;  %6917 = vpow2.f32 %v3668_v51  ;;  %v3165_v3 = vpop.xlane.xlu1 %3164  ;;  %v8096_v45 = vld [vmem:[%s12936_s0 + $0x358] sm:$0xff] }
 0x2ca   :  { %v3163_v4 = vpop.xlane.xlu0 %3162  ;;  %v6900_v5 = vpop.eup %6899  ;;  %v3892_v6 = vadd.f32 1.0, %v6898_v0  ;;  %6919 = vpow2.f32 %v3666_v55  ;;  %v3672_v7 = vmul.f32 1.442695, %v3517_v59  ;;  %v3391_v10 = vadd.f32 %v3165_v3, %v8570_v21 }
 0x2cb   :  { %v3670_v8 = vmul.f32 1.442695, %v3516_v61  ;;  %v6902_v9 = vpop.eup %6901  ;;  %4271 = vst.msk [vmem:[%s12939_s3 + $0x60] sm:$0xff] %vm4258_vm2, %v6900_v5  ;;  %6921 = vrcp.f32 %v3893_v2  ;;  %v3390_v12 = vadd.f32 %v3163_v4, %v8570_v21  ;;  %v3085_v46 = vmul.f32 %v8096_v45, %v10964_v36  ;;  %v8098_v4 = vld [vmem:[%s12936_s0 + $0x368] sm:$0xff] }
 0x2cc   :  { %v6904_v13 = vpop.eup %6903  ;;  %4274 = vst.msk [vmem:[%s12939_s3 + $0x78] sm:$0xff] %vm4258_vm2, %v6902_v9  ;;  %6923 = vrcp.f32 %v3892_v6  ;;  %3308 = vadd.xlane.f32.xlu1 %v3079_v57  ;;  %v3519_v20 = vsub.f32 0.0, %v3391_v10  ;;  %v3087_v5 = vmul.f32 %v8098_v4, %v10964_v36  ;;  %v8099_v6 = vld [vmem:[%s12936_s0 + $0x360] sm:$0xff] }
 0x2cd   :  { %3306 = vadd.xlane.f32.xlu0 %v3078_v63  ;;  %v6906_v18 = vpop.eup %6905  ;;  %v3895_v19 = vadd.f32 1.0, %v6904_v13  ;;  %6925 = vpow2.f32 %v3672_v7  ;;  %v3518_v22 = vsub.f32 0.0, %v3390_v12  ;;  %v3169_v14 = vpop.xlane.xlu1 %3168  ;;  %v3086_v7 = vmul.f32 %v8099_v6, %v10964_v36 }
 0x2ce   :  { %v3167_v23 = vpop.xlane.xlu0 %3166  ;;  %v6908_v24 = vpop.eup %6907  ;;  %v3894_v25 = vadd.f32 1.0, %v6906_v18  ;;  %6927 = vpow2.f32 %v3670_v8  ;;  %v3393_v26 = vadd.f32 %v3169_v14, %v8570_v21  ;;  %v3676_v29 = vmul.f32 1.442695, %v3519_v20  ;;  %v8100_v14 = vld [vmem:[%s12936_s0 + $0x378] sm:$0xff] }
 0x2cf   :  { %v3392_v27 = vadd.f32 %v3167_v23, %v8570_v21  ;;  %v6910_v28 = vpop.eup %6909  ;;  %4273 = vst.msk [vmem:[%s12939_s3 + $0x70] sm:$0xff] %vm4258_vm2, %v6908_v24  ;;  %6929 = vrcp.f32 %v3895_v19  ;;  %v3674_v30 = vmul.f32 1.442695, %v3518_v22  ;;  %v3089_v23 = vmul.f32 %v8100_v14, %v10964_v36  ;;  %v8101_v24 = vld [vmem:[%s12936_s0 + $0x370] sm:$0xff] }
 0x2d0   :  { %v6912_v11 = vpop.eup %6911  ;;  %4276 = vst.msk [vmem:[%s12939_s3 + $0x88] sm:$0xff] %vm4258_vm2, %v6910_v28  ;;  %6931 = vrcp.f32 %v3894_v25  ;;  %v3521_v33 = vsub.f32 0.0, %v3393_v26  ;;  %3312 = vadd.xlane.f32.xlu1 %v3081_v15  ;;  %v3088_v25 = vmul.f32 %v8101_v24, %v10964_v36 }
 0x2d1   :  { %v3520_v35 = vsub.f32 0.0, %v3392_v27  ;;  %3310 = vadd.xlane.f32.xlu0 %v3080_v17  ;;  %v6914_v39 = vpop.eup %6913  ;;  %v3897_v40 = vadd.f32 1.0, %v6912_v11  ;;  %6933 = vpow2.f32 %v3676_v29  ;;  %v3173_v41 = vpop.xlane.xlu1 %3172 }
 0x2d2   :  { %v3171_v42 = vpop.xlane.xlu0 %3170  ;;  %v6916_v43 = vpop.eup %6915  ;;  %4275 = vst.msk [vmem:[%s12939_s3 + $0x80] sm:$0xff] %vm4258_vm2, %v6914_v39  ;;  %6935 = vpow2.f32 %v3674_v30  ;;  %v3680_v1 = vmul.f32 1.442695, %v3521_v33  ;;  %v3395_v44 = vadd.f32 %v3173_v41, %v8570_v21 }
 0x2d3   :  { %v6918_v47 = vpop.eup %6917  ;;  %6937 = vrcp.f32 %v3897_v40  ;;  %v3896_v48 = vadd.f32 1.0, %v6916_v43  ;;  %v3394_v49 = vadd.f32 %v3171_v42, %v8570_v21  ;;  %v3678_v53 = vmul.f32 1.442695, %v3520_v35  ;;  %v8102_v43 = vld [vmem:[%s12936_s0 + $0x388] sm:$0xff] }
 0x2d4   :  { %v6920_v51 = vpop.eup %6919  ;;  %v3899_v52 = vadd.f32 1.0, %v6918_v47  ;;  %6939 = vpow2.f32 %v3680_v1  ;;  %v3523_v54 = vsub.f32 0.0, %v3395_v44  ;;  %3316 = vadd.xlane.f32.xlu1 %v3083_v32  ;;  %v3091_v1 = vmul.f32 %v8102_v43, %v10964_v36  ;;  %v8103_v47 = vld [vmem:[%s12936_s0 + $0x380] sm:$0xff] }
 0x2d5   :  { %3314 = vadd.xlane.f32.xlu0 %v3082_v38  ;;  %v6922_v55 = vpop.eup %6921  ;;  %6941 = vrcp.f32 %v3896_v48  ;;  %v3898_v56 = vadd.f32 1.0, %v6920_v51  ;;  %v3522_v57 = vsub.f32 0.0, %v3394_v49  ;;  %v3177_v58 = vpop.xlane.xlu1 %3176  ;;  %v3090_v48 = vmul.f32 %v8103_v47, %v10964_v36 }
 0x2d6   :  { %v3175_v59 = vpop.xlane.xlu0 %3174  ;;  %v6924_v61 = vpop.eup %6923  ;;  %4278 = vst.msk [vmem:[%s12939_s3 + $0x98] sm:$0xff] %vm4258_vm2, %v6922_v55  ;;  %6943 = vrcp.f32 %v3899_v52  ;;  %v3684_v62 = vmul.f32 1.442695, %v3523_v54  ;;  %v3397_v63 = vadd.f32 %v3177_v58, %v8570_v21  ;;  %v8104_v54 = vld [vmem:[%s12936_s0 + $0x398] sm:$0xff] }
 0x2d7   :  { %v3396_v0 = vadd.f32 %v3175_v59, %v8570_v21  ;;  %v6926_v2 = vpop.eup %6925  ;;  %4277 = vst.msk [vmem:[%s12939_s3 + $0x90] sm:$0xff] %vm4258_vm2, %v6924_v61  ;;  %6945 = vrcp.f32 %v3898_v56  ;;  %v3682_v3 = vmul.f32 1.442695, %v3522_v57  ;;  %v3093_v55 = vmul.f32 %v8104_v54, %v10964_v36 }
 0x2d8   :  { %v6928_v8 = vpop.eup %6927  ;;  %v3901_v9 = vadd.f32 1.0, %v6926_v2  ;;  %6947 = vpow2.f32 %v3678_v53  ;;  %v3525_v10 = vsub.f32 0.0, %v3397_v63  ;;  %3320 = vadd.xlane.f32.xlu1 %v3085_v46 }
 0x2d9   :  { %v3524_v12 = vsub.f32 0.0, %v3396_v0  ;;  %3318 = vadd.xlane.f32.xlu0 %v3084_v50  ;;  %v6930_v13 = vpop.eup %6929  ;;  %v3900_v60 = vadd.f32 1.0, %v6928_v8  ;;  %6949 = vpow2.f32 %v3684_v62  ;;  %v3181_v15 = vpop.xlane.xlu1 %3180  ;;  %v8105_v0 = vld [vmem:[%s12936_s0 + $0x390] sm:$0xff] }
 0x2da   :  { %v3179_v16 = vpop.xlane.xlu0 %3178  ;;  %v6932_v17 = vpop.eup %6931  ;;  %4280 = vst.msk [vmem:[%s12939_s3 + $0xa8] sm:$0xff] %vm4258_vm2, %v6930_v13  ;;  %6951 = vrcp.f32 %v3901_v9  ;;  %v3688_v18 = vmul.f32 1.442695, %v3525_v10  ;;  %v3399_v19 = vadd.f32 %v3181_v15, %v8570_v21  ;;  %v3092_v2 = vmul.f32 %v8105_v0, %v10964_v36 }
 0x2db   :  { %v6934_v20 = vpop.eup %6933  ;;  %4279 = vst.msk [vmem:[%s12939_s3 + $0xa0] sm:$0xff] %vm4258_vm2, %v6932_v17  ;;  %6953 = vrcp.f32 %v3900_v60  ;;  %v3398_v22 = vadd.f32 %v3179_v16, %v8570_v21  ;;  %v3686_v28 = vmul.f32 1.442695, %v3524_v12  ;;  %v8107_v17 = vld [vmem:[%s12936_s0 + $0x3a0] sm:$0xff] }
 0x2dc   :  { %v6936_v26 = vpop.eup %6935  ;;  %v3903_v27 = vadd.f32 1.0, %v6934_v20  ;;  %6955 = vpow2.f32 %v3682_v3  ;;  %v3527_v29 = vsub.f32 0.0, %v3399_v19  ;;  %3324 = vadd.xlane.f32.xlu1 %v3087_v5 }
 0x2dd   :  { %3322 = vadd.xlane.f32.xlu0 %v3086_v7  ;;  %v6938_v30 = vpop.eup %6937  ;;  %v3902_v31 = vadd.f32 1.0, %v6936_v26  ;;  %6957 = vpow2.f32 %v3688_v18  ;;  %v3526_v32 = vsub.f32 0.0, %v3398_v22  ;;  %v3185_v11 = vpop.xlane.xlu1 %3184  ;;  %v8106_v7 = vld [vmem:[%s12936_s0 + $0x3a8] sm:$0xff]  ;;  %v3094_v18 = vmul.f32 %v8107_v17, %v10964_v36 }
 0x2de   :  { %v3183_v33 = vpop.xlane.xlu0 %3182  ;;  %v6940_v35 = vpop.eup %6939  ;;  %4282 = vst.msk [vmem:[%s12939_s3 + $0xb8] sm:$0xff] %vm4258_vm2, %v6938_v30  ;;  %6959 = vrcp.f32 %v3903_v27  ;;  %v3692_v37 = vmul.f32 1.442695, %v3527_v29  ;;  %v3401_v38 = vadd.f32 %v3185_v11, %v8570_v21  ;;  %v3095_v8 = vmul.f32 %v8106_v7, %v10964_v36 }
 0x2df   :  { %v3400_v39 = vadd.f32 %v3183_v33, %v8570_v21  ;;  %v6942_v40 = vpop.eup %6941  ;;  %6961 = vrcp.f32 %v3902_v31  ;;  %v3905_v41 = vadd.f32 1.0, %v6940_v35  ;;  %v3690_v42 = vmul.f32 1.442695, %v3526_v32  ;;  %v8108_v35 = vld [vmem:[%s12936_s0 + $0x3b8] sm:$0xff] }
 0x2e0   :  { %v6944_v44 = vpop.eup %6943  ;;  %4281 = vst.msk [vmem:[%s12939_s3 + $0xb0] sm:$0xff] %vm4258_vm2, %v6942_v40  ;;  %6963 = vpow2.f32 %v3686_v28  ;;  %v3529_v45 = vsub.f32 0.0, %v3401_v38  ;;  %3328 = vadd.xlane.f32.xlu1 %v3089_v23  ;;  %v8109_v38 = vld [vmem:[%s12936_s0 + $0x3b0] sm:$0xff] }
 0x2e1   :  { %v3528_v46 = vsub.f32 0.0, %v3400_v39  ;;  %3326 = vadd.xlane.f32.xlu0 %v3088_v25  ;;  %v6946_v49 = vpop.eup %6945  ;;  %4284 = vst.msk [vmem:[%s12939_s3 + $0xc8] sm:$0xff] %vm4258_vm2, %v6944_v44  ;;  %6965 = vrcp.f32 %v3905_v41  ;;  %v3189_v34 = vpop.xlane.xlu1 %3188  ;;  %v3096_v39 = vmul.f32 %v8109_v38, %v10964_v36 }
 0x2e2   :  { %v3187_v50 = vpop.xlane.xlu0 %3186  ;;  %v6948_v51 = vpop.eup %6947  ;;  %4283 = vst.msk [vmem:[%s12939_s3 + $0xc0] sm:$0xff] %vm4258_vm2, %v6946_v49  ;;  %6967 = vpow2.f32 %v3692_v37  ;;  %v3696_v52 = vmul.f32 1.442695, %v3529_v45  ;;  %v3403_v53 = vadd.f32 %v3189_v34, %v8570_v21  ;;  %v3097_v37 = vmul.f32 %v8108_v35, %v10964_v36 }
 0x2e3   :  { %v6950_v56 = vpop.eup %6949  ;;  %v3904_v57 = vadd.f32 1.0, %v6948_v51  ;;  %6969 = vpow2.f32 %v3690_v42  ;;  %v3694_v58 = vmul.f32 1.442695, %v3528_v46  ;;  %v3402_v59 = vadd.f32 %v3187_v50, %v8570_v21 }
 0x2e4   :  { %v6952_v61 = vpop.eup %6951  ;;  %v3907_v62 = vadd.f32 1.0, %v6950_v56  ;;  %6971 = vpow2.f32 %v3696_v52  ;;  %v3531_v63 = vsub.f32 0.0, %v3403_v53  ;;  %3332 = vadd.xlane.f32.xlu1 %v3091_v1  ;;  %v8110_v53 = vld [vmem:[%s12936_s0 + $0x3c8] sm:$0xff] }
 0x2e5   :  { %3330 = vadd.xlane.f32.xlu0 %v3090_v48  ;;  %v6954_v3 = vpop.eup %6953  ;;  %4286 = vst.msk [vmem:[%s12939_s3 + $0xd8] sm:$0xff] %vm4258_vm2, %v6952_v61  ;;  %6973 = vrcp.f32 %v3904_v57  ;;  %v3530_v4 = vsub.f32 0.0, %v3402_v59  ;;  %v3193_v5 = vpop.xlane.xlu1 %3192  ;;  %v3099_v54 = vmul.f32 %v8110_v53, %v10964_v36  ;;  %v11342_v53 = vld [vmem:[%s12937_s1 + $0x3] ss:$0 sm:$0xff] }
 0x2e6   :  { %v3191_v6 = vpop.xlane.xlu0 %3190  ;;  %v6956_v9 = vpop.eup %6955  ;;  %4285 = vst.msk [vmem:[%s12939_s3 + $0xd0] sm:$0xff] %vm4258_vm2, %v6954_v3  ;;  %6975 = vrcp.f32 %v3907_v62  ;;  %v3700_v10 = vmul.f32 1.442695, %v3531_v63  ;;  %v3405_v12 = vadd.f32 %v3193_v5, %v8570_v21 }
 0x2e7   :  { %v3404_v13 = vadd.f32 %v3191_v6, %v8570_v21  ;;  %v6958_v60 = vpop.eup %6957  ;;  %v3906_v15 = vadd.f32 1.0, %v6956_v9  ;;  %6977 = vpow2.f32 %v3694_v58  ;;  %v3698_v16 = vmul.f32 1.442695, %v3530_v4  ;;  %v8112_v9 = vld [vmem:[%s12936_s0 + $0x3d8] sm:$0xff] }
 0x2e8   :  { %v6960_v19 = vpop.eup %6959  ;;  %v3909_v20 = vadd.f32 1.0, %v6958_v60  ;;  %6979 = vpow2.f32 %v3700_v10  ;;  %v3533_v22 = vsub.f32 0.0, %v3405_v12  ;;  %3336 = vadd.xlane.f32.xlu1 %v3093_v55  ;;  %v8111_v55 = vld [vmem:[%s12936_s0 + $0x3c0] sm:$0xff]  ;;  %v3101_v10 = vmul.f32 %v8112_v9, %v10964_v36  ;;  %v8113_v12 = vld [vmem:[%s12936_s0 + $0x3d0] sm:$0xff] }
 0x2e9   :  { %v3532_v14 = vsub.f32 0.0, %v3404_v13  ;;  %3334 = vadd.xlane.f32.xlu0 %v3092_v2  ;;  %v6962_v23 = vpop.eup %6961  ;;  %4288 = vst.msk [vmem:[%s12939_s3 + $0xe8] sm:$0xff] %vm4258_vm2, %v6960_v19  ;;  %6981 = vrcp.f32 %v3906_v15  ;;  %v3197_v24 = vpop.xlane.xlu1 %3196  ;;  %v3098_v56 = vmul.f32 %v8111_v55, %v10964_v36  ;;  %v3100_v13 = vmul.f32 %v8113_v12, %v10964_v36 }
 0x2ea   :  { %v3195_v25 = vpop.xlane.xlu0 %3194  ;;  %v6964_v26 = vpop.eup %6963  ;;  %4287 = vst.msk [vmem:[%s12939_s3 + $0xe0] sm:$0xff] %vm4258_vm2, %v6962_v23  ;;  %6983 = vrcp.f32 %v3909_v20  ;;  %v3704_v27 = vmul.f32 1.442695, %v3533_v22  ;;  %v3407_v29 = vadd.f32 %v3197_v24, %v8570_v21 }
 0x2eb   :  { %v3702_v28 = vmul.f32 1.442695, %v3532_v14  ;;  %v6966_v30 = vpop.eup %6965  ;;  %v3908_v31 = vadd.f32 1.0, %v6964_v26  ;;  %6985 = vpow2.f32 %v3698_v16  ;;  %v3406_v32 = vadd.f32 %v3195_v25, %v8570_v21  ;;  %v8114_v25 = vld [vmem:[%s12936_s0 + $0x3e8] sm:$0xff] }
 0x2ec   :  { %v6968_v11 = vpop.eup %6967  ;;  %4290 = vst.msk [vmem:[%s12939_s3 + $0xf8] sm:$0xff] %vm4258_vm2, %v6966_v30  ;;  %6987 = vpow2.f32 %v3704_v27  ;;  %v3535_v33 = vsub.f32 0.0, %v3407_v29  ;;  %3340 = vadd.xlane.f32.xlu1 %v3095_v8  ;;  %v3103_v26 = vmul.f32 %v8114_v25, %v10964_v36  ;;  %v8115_v30 = vld [vmem:[%s12936_s0 + $0x3e0] sm:$0xff] }
 0x2ed   :  { %3338 = vadd.xlane.f32.xlu0 %v3094_v18  ;;  %v6970_v40 = vpop.eup %6969  ;;  %6989 = vrcp.f32 %v3908_v31  ;;  %v3911_v41 = vadd.f32 1.0, %v6968_v11  ;;  %v3534_v42 = vsub.f32 0.0, %v3406_v32  ;;  %v3201_v43 = vpop.xlane.xlu1 %3200  ;;  %v3102_v31 = vmul.f32 %v8115_v30, %v10964_v36 }
 0x2ee   :  { %v3199_v1 = vpop.xlane.xlu0 %3198  ;;  %v6972_v44 = vpop.eup %6971  ;;  %v3910_v45 = vadd.f32 1.0, %v6970_v40  ;;  %6991 = vpow2.f32 %v3702_v28  ;;  %v3708_v46 = vmul.f32 1.442695, %v3535_v33  ;;  %v3409_v47 = vadd.f32 %v3201_v43, %v8570_v21 }
 0x2ef   :  { %v6974_v48 = vpop.eup %6973  ;;  %6993 = vrcp.f32 %v3911_v41  ;;  %v3913_v49 = vadd.f32 1.0, %v6972_v44  ;;  %v3706_v34 = vmul.f32 1.442695, %v3534_v42  ;;  %v3408_v50 = vadd.f32 %v3199_v1, %v8570_v21  ;;  %v8116_v1 = vld [vmem:[%s12936_s0 + $0x3f8] sm:$0xff] }
 0x2f0   :  { %v6976_v51 = vpop.eup %6975  ;;  %4289 = vst.msk [vmem:[%s12939_s3 + $0xf0] sm:$0xff] %vm4258_vm2, %v6974_v48  ;;  %6995 = vrcp.f32 %v3910_v45  ;;  %v3537_v52 = vsub.f32 0.0, %v3409_v47  ;;  %3344 = vadd.xlane.f32.xlu1 %v3097_v37  ;;  %v3105_v44 = vmul.f32 %v8116_v1, %v10964_v36  ;;  %v8117_v48 = vld [vmem:[%s12936_s0 + $0x3f0] sm:$0xff] }
 0x2f1   :  { %3342 = vadd.xlane.f32.xlu0 %v3096_v39  ;;  %v6978_v57 = vpop.eup %6977  ;;  %4292 = vst.msk [vmem:[%s12939_s3 + $0x108] sm:$0xff] %vm4258_vm2, %v6976_v51  ;;  %6997 = vrcp.f32 %v3913_v49  ;;  %v3536_v58 = vsub.f32 0.0, %v3408_v50  ;;  %v3205_v59 = vpop.xlane.xlu1 %3204  ;;  %v3104_v49 = vmul.f32 %v8117_v48, %v10964_v36 }
 0x2f2   :  { %v3203_v61 = vpop.xlane.xlu0 %3202  ;;  %v6980_v62 = vpop.eup %6979  ;;  %v3912_v63 = vadd.f32 1.0, %v6978_v57  ;;  %6999 = vpow2.f32 %v3708_v46  ;;  %v3712_v0 = vmul.f32 1.442695, %v3537_v52  ;;  %v3411_v2 = vadd.f32 %v3205_v59, %v8570_v21 }
 0x2f3   :  { %v6982_v3 = vpop.eup %6981  ;;  %v3915_v4 = vadd.f32 1.0, %v6980_v62  ;;  %7001 = vpow2.f32 %v3706_v34  ;;  %v3710_v5 = vmul.f32 1.442695, %v3536_v58  ;;  %v3410_v6 = vadd.f32 %v3203_v61, %v8570_v21  ;;  %v8118_v62 = vld [vmem:[%s12936_s0 + $0x8] sm:$0xff] }
 0x2f4   :  { %v6984_v7 = vpop.eup %6983  ;;  %4291 = vst.msk [vmem:[%s12939_s3 + $0x100] sm:$0xff] %vm4258_vm2, %v6982_v3  ;;  %7003 = vrcp.f32 %v3912_v63  ;;  %v3539_v8 = vsub.f32 0.0, %v3411_v2  ;;  %3348 = vadd.xlane.f32.xlu1 %v3099_v54  ;;  %v4393_v63 = vmul.f32 %v8118_v62, %v11342_v53 }
 0x2f5   :  { %3346 = vadd.xlane.f32.xlu0 %v3098_v56  ;;  %v6986_v60 = vpop.eup %6985  ;;  %4294 = vst.msk [vmem:[%s12939_s3 + $0x118] sm:$0xff] %vm4258_vm2, %v6984_v7  ;;  %7005 = vrcp.f32 %v3915_v4  ;;  %v3538_v15 = vsub.f32 0.0, %v3410_v6  ;;  %v3209_v16 = vpop.xlane.xlu1 %3208 }
 0x2f6   :  { %v3207_v17 = vpop.xlane.xlu0 %3206  ;;  %v6988_v18 = vpop.eup %6987  ;;  %v3914_v19 = vadd.f32 1.0, %v6986_v60  ;;  %7007 = vpow2.f32 %v3712_v0  ;;  %v3716_v20 = vmul.f32 1.442695, %v3539_v8  ;;  %v3413_v22 = vadd.f32 %v3209_v16, %v8570_v21  ;;  %v8119_v0 = vld [vmem:[%s12936_s0] sm:$0xff] }
 0x2f7   :  { %v6990_v14 = vpop.eup %6989  ;;  %v3917_v23 = vadd.f32 1.0, %v6988_v18  ;;  %7009 = vpow2.f32 %v3710_v5  ;;  %v3412_v24 = vadd.f32 %v3207_v17, %v8570_v21  ;;  %v3714_v28 = vmul.f32 1.442695, %v3538_v15  ;;  %v8120_v17 = vld [vmem:[%s12936_s0 + $0x18] sm:$0xff] }
 0x2f8   :  { %v6992_v27 = vpop.eup %6991  ;;  %4293 = vst.msk [vmem:[%s12939_s3 + $0x110] sm:$0xff] %vm4258_vm2, %v6990_v14  ;;  %7011 = vrcp.f32 %v3914_v19  ;;  %v3541_v29 = vsub.f32 0.0, %v3413_v22  ;;  %3352 = vadd.xlane.f32.xlu1 %v3101_v10  ;;  %v4392_v2 = vmul.f32 %v8119_v0, %v11342_v53  ;;  %v4395_v18 = vmul.f32 %v8120_v17, %v11342_v53  ;;  %v8121_v14 = vld [vmem:[%s12936_s0 + $0x10] sm:$0xff] }
 0x2f9   :  { %3350 = vadd.xlane.f32.xlu0 %v3100_v13  ;;  %v6994_v32 = vpop.eup %6993  ;;  %7013 = vrcp.f32 %v3917_v23  ;;  %v3916_v11 = vadd.f32 1.0, %v6992_v27  ;;  %v3540_v33 = vsub.f32 0.0, %v3412_v24  ;;  %v3213_v35 = vpop.xlane.xlu1 %3212  ;;  %v4394_v23 = vmul.f32 %v8121_v14, %v11342_v53 }
 0x2fa   :  { %v3211_v37 = vpop.xlane.xlu0 %3210  ;;  %v6996_v38 = vpop.eup %6995  ;;  %4296 = vst.msk [vmem:[%s12939_s3 + $0x128] sm:$0xff] %vm4258_vm2, %v6994_v32  ;;  %7015 = vpow2.f32 %v3716_v20  ;;  %v3720_v39 = vmul.f32 1.442695, %v3541_v29  ;;  %v3415_v40 = vadd.f32 %v3213_v35, %v8570_v21 }
 0x2fb   :  { %v3414_v41 = vadd.f32 %v3211_v37, %v8570_v21  ;;  %v6998_v42 = vpop.eup %6997  ;;  %4295 = vst.msk [vmem:[%s12939_s3 + $0x120] sm:$0xff] %vm4258_vm2, %v6996_v38  ;;  %7017 = vrcp.f32 %v3916_v11  ;;  %v3718_v43 = vmul.f32 1.442695, %v3540_v33  ;;  %v8123_v37 = vld [vmem:[%s12936_s0 + $0x20] sm:$0xff] }
 0x2fc   :  { %v7000_v45 = vpop.eup %6999  ;;  %4298 = vst.msk [vmem:[%s12939_s3 + $0x138] sm:$0xff] %vm4258_vm2, %v6998_v42  ;;  %7019 = vpow2.f32 %v3714_v28  ;;  %v3543_v46 = vsub.f32 0.0, %v3415_v40  ;;  %3356 = vadd.xlane.f32.xlu1 %v3103_v26  ;;  %v4396_v38 = vmul.f32 %v8123_v37, %v11342_v53 }
 0x2fd   :  { %v3542_v47 = vsub.f32 0.0, %v3414_v41  ;;  %3354 = vadd.xlane.f32.xlu0 %v3102_v31  ;;  %v7002_v34 = vpop.eup %7001  ;;  %v3919_v50 = vadd.f32 1.0, %v7000_v45  ;;  %7021 = vpow2.f32 %v3720_v39  ;;  %v3217_v51 = vpop.xlane.xlu1 %3216  ;;  %v8122_v31 = vld [vmem:[%s12936_s0 + $0x28] sm:$0xff] }
 0x2fe   :  { %v3215_v52 = vpop.xlane.xlu0 %3214  ;;  %v7004_v54 = vpop.eup %7003  ;;  %v3918_v55 = vadd.f32 1.0, %v7002_v34  ;;  %7023 = vpow2.f32 %v3718_v43  ;;  %v3724_v56 = vmul.f32 1.442695, %v3543_v46  ;;  %v3417_v36 = vadd.f32 %v3217_v51, %v8570_v21 }
 0x2ff   :  { %v3722_v57 = vmul.f32 1.442695, %v3542_v47  ;;  %v7006_v58 = vpop.eup %7005  ;;  %4297 = vst.msk [vmem:[%s12939_s3 + $0x130] sm:$0xff] %vm4258_vm2, %v7004_v54  ;;  %7025 = vrcp.f32 %v3919_v50  ;;  %v3416_v59 = vadd.f32 %v3215_v52, %v8570_v21  ;;  %v4397_v32 = vmul.f32 %v8122_v31, %v11342_v53  ;;  %v8124_v52 = vld [vmem:[%s12936_s0 + $0x38] sm:$0xff] }
 0x300   :  { %v7008_v61 = vpop.eup %7007  ;;  %4300 = vst.msk [vmem:[%s12939_s3 + $0x148] sm:$0xff] %vm4258_vm2, %v7006_v58  ;;  %7027 = vrcp.f32 %v3918_v55  ;;  %3360 = vadd.xlane.f32.xlu1 %v3105_v44  ;;  %v3545_v5 = vsub.f32 0.0, %v3417_v36  ;;  %v4399_v54 = vmul.f32 %v8124_v52, %v11342_v53  ;;  %v8125_v55 = vld [vmem:[%s12936_s0 + $0x30] sm:$0xff] }
 0x301   :  { %3358 = vadd.xlane.f32.xlu0 %v3104_v49  ;;  %v7010_v3 = vpop.eup %7009  ;;  %v3921_v4 = vadd.f32 1.0, %v7008_v61  ;;  %7029 = vpow2.f32 %v3724_v56  ;;  %v3544_v6 = vsub.f32 0.0, %v3416_v59  ;;  %v3221_v7 = vpop.xlane.xlu1 %3220  ;;  %v4398_v56 = vmul.f32 %v8125_v55, %v11342_v53 }
 0x302   :  { %v3219_v8 = vpop.xlane.xlu0 %3218  ;;  %v7012_v9 = vpop.eup %7011  ;;  %v3920_v10 = vadd.f32 1.0, %v7010_v3  ;;  %7031 = vpow2.f32 %v3722_v57  ;;  %v3419_v12 = vadd.f32 %v3221_v7, %v8570_v21  ;;  %v3728_v15 = vmul.f32 1.442695, %v3545_v5  ;;  %v8126_v7 = vld [vmem:[%s12936_s0 + $0x48] sm:$0xff] }
 0x303   :  { %v3418_v13 = vadd.f32 %v3219_v8, %v8570_v21  ;;  %v7014_v60 = vpop.eup %7013  ;;  %4299 = vst.msk [vmem:[%s12939_s3 + $0x140] sm:$0xff] %vm4258_vm2, %v7012_v9  ;;  %7033 = vrcp.f32 %v3921_v4  ;;  %v3726_v16 = vmul.f32 1.442695, %v3544_v6  ;;  %v4401_v8 = vmul.f32 %v8126_v7, %v11342_v53  ;;  %v8127_v9 = vld [vmem:[%s12936_s0 + $0x40] sm:$0xff] }
 0x304   :  { %v7016_v19 = vpop.eup %7015  ;;  %4302 = vst.msk [vmem:[%s12939_s3 + $0x158] sm:$0xff] %vm4258_vm2, %v7014_v60  ;;  %7035 = vrcp.f32 %v3920_v10  ;;  %v3547_v20 = vsub.f32 0.0, %v3419_v12  ;;  %4522 = vadd.xlane.f32.xlu1 %v4393_v63  ;;  %v4400_v10 = vmul.f32 %v8127_v9, %v11342_v53 }
 0x305   :  { %v3546_v22 = vsub.f32 0.0, %v3418_v13  ;;  %4520 = vadd.xlane.f32.xlu0 %v4392_v2  ;;  %v7018_v24 = vpop.eup %7017  ;;  %v3923_v25 = vadd.f32 1.0, %v7016_v19  ;;  %7037 = vpow2.f32 %v3728_v15  ;;  %v3225_v26 = vpop.xlane.xlu1 %3224 }
 0x306   :  { %v3223_v27 = vpop.xlane.xlu0 %3222  ;;  %v7020_v28 = vpop.eup %7019  ;;  %4301 = vst.msk [vmem:[%s12939_s3 + $0x150] sm:$0xff] %vm4258_vm2, %v7018_v24  ;;  %7039 = vpow2.f32 %v3726_v16  ;;  %v3732_v29 = vmul.f32 1.442695, %v3547_v20  ;;  %v3421_v30 = vadd.f32 %v3225_v26, %v8570_v21 }
 0x307   :  { %v7022_v11 = vpop.eup %7021  ;;  %7041 = vrcp.f32 %v3923_v25  ;;  %v3922_v33 = vadd.f32 1.0, %v7020_v28  ;;  %v3420_v35 = vadd.f32 %v3223_v27, %v8570_v21  ;;  %v3730_v41 = vmul.f32 1.442695, %v3546_v22  ;;  %v8128_v28 = vld [vmem:[%s12936_s0 + $0x58] sm:$0xff] }
 0x308   :  { %v7024_v39 = vpop.eup %7023  ;;  %v3925_v40 = vadd.f32 1.0, %v7022_v11  ;;  %7043 = vpow2.f32 %v3732_v29  ;;  %v3549_v42 = vsub.f32 0.0, %v3421_v30  ;;  %4526 = vadd.xlane.f32.xlu1 %v4395_v18  ;;  %v4403_v29 = vmul.f32 %v8128_v28, %v11342_v53  ;;  %v8129_v11 = vld [vmem:[%s12936_s0 + $0x50] sm:$0xff] }
 0x309   :  { %4524 = vadd.xlane.f32.xlu0 %v4394_v23  ;;  %v7026_v43 = vpop.eup %7025  ;;  %7045 = vrcp.f32 %v3922_v33  ;;  %v3924_v1 = vadd.f32 1.0, %v7024_v39  ;;  %v3548_v44 = vsub.f32 0.0, %v3420_v35  ;;  %v3229_v45 = vpop.xlane.xlu1 %3228  ;;  %v4402_v33 = vmul.f32 %v8129_v11, %v11342_v53 }
 0x30a   :  { %v3227_v46 = vpop.xlane.xlu0 %3226  ;;  %v7028_v47 = vpop.eup %7027  ;;  %4304 = vst.msk [vmem:[%s12939_s3 + $0x168] sm:$0xff] %vm4258_vm2, %v7026_v43  ;;  %7047 = vrcp.f32 %v3925_v40  ;;  %v3736_v48 = vmul.f32 1.442695, %v3549_v42  ;;  %v3423_v49 = vadd.f32 %v3229_v45, %v8570_v21  ;;  %v8130_v42 = vld [vmem:[%s12936_s0 + $0x68] sm:$0xff] }
 0x30b   :  { %v3422_v34 = vadd.f32 %v3227_v46, %v8570_v21  ;;  %v7030_v50 = vpop.eup %7029  ;;  %4303 = vst.msk [vmem:[%s12939_s3 + $0x160] sm:$0xff] %vm4258_vm2, %v7028_v47  ;;  %7049 = vrcp.f32 %v3924_v1  ;;  %v3734_v51 = vmul.f32 1.442695, %v3548_v44  ;;  %v4405_v43 = vmul.f32 %v8130_v42, %v11342_v53 }
 0x30c   :  { %v7032_v57 = vpop.eup %7031  ;;  %v3927_v58 = vadd.f32 1.0, %v7030_v50  ;;  %7051 = vpow2.f32 %v3730_v41  ;;  %v3551_v36 = vsub.f32 0.0, %v3423_v49  ;;  %4530 = vadd.xlane.f32.xlu1 %v4397_v32 }
 0x30d   :  { %v3550_v59 = vsub.f32 0.0, %v3422_v34  ;;  %4528 = vadd.xlane.f32.xlu0 %v4396_v38  ;;  %v7034_v61 = vpop.eup %7033  ;;  %v3926_v62 = vadd.f32 1.0, %v7032_v57  ;;  %7053 = vpow2.f32 %v3736_v48  ;;  %v3233_v63 = vpop.xlane.xlu1 %3232  ;;  %v8131_v34 = vld [vmem:[%s12936_s0 + $0x60] sm:$0xff] }
 0x30e   :  { %v3231_v0 = vpop.xlane.xlu0 %3230  ;;  %v7036_v2 = vpop.eup %7035  ;;  %4306 = vst.msk [vmem:[%s12939_s3 + $0x178] sm:$0xff] %vm4258_vm2, %v7034_v61  ;;  %7055 = vrcp.f32 %v3927_v58  ;;  %v3740_v3 = vmul.f32 1.442695, %v3551_v36  ;;  %v3425_v4 = vadd.f32 %v3233_v63, %v8570_v21  ;;  %v4404_v50 = vmul.f32 %v8131_v34, %v11342_v53 }
 0x30f   :  { %v7038_v5 = vpop.eup %7037  ;;  %4305 = vst.msk [vmem:[%s12939_s3 + $0x170] sm:$0xff] %vm4258_vm2, %v7036_v2  ;;  %7057 = vrcp.f32 %v3926_v62  ;;  %v3424_v6 = vadd.f32 %v3231_v0, %v8570_v21  ;;  %v3738_v60 = vmul.f32 1.442695, %v3550_v59  ;;  %v8133_v2 = vld [vmem:[%s12936_s0 + $0x70] sm:$0xff] }
 0x310   :  { %v7040_v12 = vpop.eup %7039  ;;  %v3929_v13 = vadd.f32 1.0, %v7038_v5  ;;  %7059 = vpow2.f32 %v3734_v51  ;;  %v3553_v15 = vsub.f32 0.0, %v3425_v4  ;;  %4534 = vadd.xlane.f32.xlu1 %v4399_v54 }
 0x311   :  { %4532 = vadd.xlane.f32.xlu0 %v4398_v56  ;;  %v7042_v16 = vpop.eup %7041  ;;  %v3928_v17 = vadd.f32 1.0, %v7040_v12  ;;  %7061 = vpow2.f32 %v3740_v3  ;;  %v3552_v18 = vsub.f32 0.0, %v3424_v6  ;;  %v3237_v19 = vpop.xlane.xlu1 %3236  ;;  %v8132_v56 = vld [vmem:[%s12936_s0 + $0x78] sm:$0xff]  ;;  %v4406_v3 = vmul.f32 %v8133_v2, %v11342_v53 }
 0x312   :  { %v3235_v20 = vpop.xlane.xlu0 %3234  ;;  %v7044_v22 = vpop.eup %7043  ;;  %4308 = vst.msk [vmem:[%s12939_s3 + $0x188] sm:$0xff] %vm4258_vm2, %v7042_v16  ;;  %7063 = vrcp.f32 %v3929_v13  ;;  %v3744_v14 = vmul.f32 1.442695, %v3553_v15  ;;  %v3427_v23 = vadd.f32 %v3237_v19, %v8570_v21  ;;  %v4407_v57 = vmul.f32 %v8132_v56, %v11342_v53 }
 0x313   :  { %v3426_v24 = vadd.f32 %v3235_v20, %v8570_v21  ;;  %v7046_v25 = vpop.eup %7045  ;;  %7065 = vrcp.f32 %v3928_v17  ;;  %v3931_v26 = vadd.f32 1.0, %v7044_v22  ;;  %v3742_v27 = vmul.f32 1.442695, %v3552_v18  ;;  %v8134_v22 = vld [vmem:[%s12936_s0 + $0x88] sm:$0xff] }
 0x314   :  { %v7048_v30 = vpop.eup %7047  ;;  %4307 = vst.msk [vmem:[%s12939_s3 + $0x180] sm:$0xff] %vm4258_vm2, %v7046_v25  ;;  %7067 = vpow2.f32 %v3738_v60  ;;  %v3555_v31 = vsub.f32 0.0, %v3427_v23  ;;  %4538 = vadd.xlane.f32.xlu1 %v4401_v8  ;;  %v8135_v23 = vld [vmem:[%s12936_s0 + $0x80] sm:$0xff] }
 0x315   :  { %v3554_v32 = vsub.f32 0.0, %v3426_v24  ;;  %4536 = vadd.xlane.f32.xlu0 %v4400_v10  ;;  %v7050_v35 = vpop.eup %7049  ;;  %4310 = vst.msk [vmem:[%s12939_s3 + $0x198] sm:$0xff] %vm4258_vm2, %v7048_v30  ;;  %7069 = vrcp.f32 %v3931_v26  ;;  %v3241_v37 = vpop.xlane.xlu1 %3240  ;;  %v4408_v24 = vmul.f32 %v8135_v23, %v11342_v53 }
 0x316   :  { %v3239_v38 = vpop.xlane.xlu0 %3238  ;;  %v7052_v39 = vpop.eup %7051  ;;  %4309 = vst.msk [vmem:[%s12939_s3 + $0x190] sm:$0xff] %vm4258_vm2, %v7050_v35  ;;  %7071 = vpow2.f32 %v3744_v14  ;;  %v3748_v40 = vmul.f32 1.442695, %v3555_v31  ;;  %v3429_v41 = vadd.f32 %v3241_v37, %v8570_v21  ;;  %v4409_v14 = vmul.f32 %v8134_v22, %v11342_v53 }
 0x317   :  { %v7054_v1 = vpop.eup %7053  ;;  %v3930_v44 = vadd.f32 1.0, %v7052_v39  ;;  %7073 = vpow2.f32 %v3742_v27  ;;  %v3746_v45 = vmul.f32 1.442695, %v3554_v32  ;;  %v3428_v46 = vadd.f32 %v3239_v38, %v8570_v21 }
 0x318   :  { %v7056_v47 = vpop.eup %7055  ;;  %v3933_v48 = vadd.f32 1.0, %v7054_v1  ;;  %7075 = vpow2.f32 %v3748_v40  ;;  %v3557_v49 = vsub.f32 0.0, %v3429_v41  ;;  %4542 = vadd.xlane.f32.xlu1 %v4403_v29  ;;  %v8136_v41 = vld [vmem:[%s12936_s0 + $0x98] sm:$0xff] }
 0x319   :  { %4540 = vadd.xlane.f32.xlu0 %v4402_v33  ;;  %v7058_v51 = vpop.eup %7057  ;;  %4312 = vst.msk [vmem:[%s12939_s3 + $0x1a8] sm:$0xff] %vm4258_vm2, %v7056_v47  ;;  %7077 = vrcp.f32 %v3930_v44  ;;  %v3556_v52 = vsub.f32 0.0, %v3428_v46  ;;  %v3245_v54 = vpop.xlane.xlu1 %3244  ;;  %v4411_v42 = vmul.f32 %v8136_v41, %v11342_v53 }
 0x31a   :  { %v3243_v55 = vpop.xlane.xlu0 %3242  ;;  %v7060_v58 = vpop.eup %7059  ;;  %4311 = vst.msk [vmem:[%s12939_s3 + $0x1a0] sm:$0xff] %vm4258_vm2, %v7058_v51  ;;  %7079 = vrcp.f32 %v3933_v48  ;;  %v3752_v36 = vmul.f32 1.442695, %v3557_v49  ;;  %v3431_v59 = vadd.f32 %v3245_v54, %v8570_v21 }
 0x31b   :  { %v3430_v61 = vadd.f32 %v3243_v55, %v8570_v21  ;;  %v7062_v62 = vpop.eup %7061  ;;  %v3932_v63 = vadd.f32 1.0, %v7060_v58  ;;  %7081 = vpow2.f32 %v3746_v45  ;;  %v3750_v0 = vmul.f32 1.442695, %v3556_v52  ;;  %v8138_v58 = vld [vmem:[%s12936_s0 + $0xa8] sm:$0xff] }
 0x31c   :  { %v7064_v4 = vpop.eup %7063  ;;  %v3935_v5 = vadd.f32 1.0, %v7062_v62  ;;  %7083 = vpow2.f32 %v3752_v36  ;;  %v3559_v6 = vsub.f32 0.0, %v3431_v59  ;;  %4546 = vadd.xlane.f32.xlu1 %v4405_v43  ;;  %v8137_v43 = vld [vmem:[%s12936_s0 + $0x90] sm:$0xff]  ;;  %v4413_v36 = vmul.f32 %v8138_v58, %v11342_v53  ;;  %v8139_v59 = vld [vmem:[%s12936_s0 + $0xa0] sm:$0xff] }
 0x31d   :  { %v3558_v7 = vsub.f32 0.0, %v3430_v61  ;;  %4544 = vadd.xlane.f32.xlu0 %v4404_v50  ;;  %v7066_v8 = vpop.eup %7065  ;;  %4314 = vst.msk [vmem:[%s12939_s3 + $0x1b8] sm:$0xff] %vm4258_vm2, %v7064_v4  ;;  %7085 = vrcp.f32 %v3932_v63  ;;  %v3249_v9 = vpop.xlane.xlu1 %3248  ;;  %v4410_v1 = vmul.f32 %v8137_v43, %v11342_v53  ;;  %v4412_v61 = vmul.f32 %v8139_v59, %v11342_v53 }
 0x31e   :  { %v3247_v10 = vpop.xlane.xlu0 %3246  ;;  %v7068_v12 = vpop.eup %7067  ;;  %4313 = vst.msk [vmem:[%s12939_s3 + $0x1b0] sm:$0xff] %vm4258_vm2, %v7066_v8  ;;  %7087 = vrcp.f32 %v3935_v5  ;;  %v3756_v13 = vmul.f32 1.442695, %v3559_v6  ;;  %v3433_v15 = vadd.f32 %v3249_v9, %v8570_v21 }
 0x31f   :  { %v3754_v60 = vmul.f32 1.442695, %v3558_v7  ;;  %v7070_v16 = vpop.eup %7069  ;;  %v3934_v17 = vadd.f32 1.0, %v7068_v12  ;;  %7089 = vpow2.f32 %v3750_v0  ;;  %v3432_v18 = vadd.f32 %v3247_v10, %v8570_v21  ;;  %v8140_v10 = vld [vmem:[%s12936_s0 + $0xb8] sm:$0xff] }
 0x320   :  { %v7072_v19 = vpop.eup %7071  ;;  %4316 = vst.msk [vmem:[%s12939_s3 + $0x1c8] sm:$0xff] %vm4258_vm2, %v7070_v16  ;;  %7091 = vpow2.f32 %v3756_v13  ;;  %v3561_v20 = vsub.f32 0.0, %v3433_v15  ;;  %4550 = vadd.xlane.f32.xlu1 %v4407_v57  ;;  %v4415_v12 = vmul.f32 %v8140_v10, %v11342_v53  ;;  %v8141_v16 = vld [vmem:[%s12936_s0 + $0xb0] sm:$0xff] }
 0x321   :  { %4548 = vadd.xlane.f32.xlu0 %v4406_v3  ;;  %v7074_v25 = vpop.eup %7073  ;;  %7093 = vrcp.f32 %v3934_v17  ;;  %v3937_v26 = vadd.f32 1.0, %v7072_v19  ;;  %v3560_v27 = vsub.f32 0.0, %v3432_v18  ;;  %v3253_v28 = vpop.xlane.xlu1 %3252  ;;  %v4414_v17 = vmul.f32 %v8141_v16, %v11342_v53 }
 0x322   :  { %v3251_v29 = vpop.xlane.xlu0 %3250  ;;  %v7076_v30 = vpop.eup %7075  ;;  %v3936_v31 = vadd.f32 1.0, %v7074_v25  ;;  %7095 = vpow2.f32 %v3754_v60  ;;  %v3760_v32 = vmul.f32 1.442695, %v3561_v20  ;;  %v3435_v11 = vadd.f32 %v3253_v28, %v8570_v21 }
 0x323   :  { %v7078_v33 = vpop.eup %7077  ;;  %7097 = vrcp.f32 %v3937_v26  ;;  %v3939_v35 = vadd.f32 1.0, %v7076_v30  ;;  %v3758_v37 = vmul.f32 1.442695, %v3560_v27  ;;  %v3434_v38 = vadd.f32 %v3251_v29, %v8570_v21  ;;  %v8142_v29 = vld [vmem:[%s12936_s0 + $0xc8] sm:$0xff] }
 0x324   :  { %v7080_v39 = vpop.eup %7079  ;;  %4315 = vst.msk [vmem:[%s12939_s3 + $0x1c0] sm:$0xff] %vm4258_vm2, %v7078_v33  ;;  %7099 = vrcp.f32 %v3936_v31  ;;  %v3563_v40 = vsub.f32 0.0, %v3435_v11  ;;  %4554 = vadd.xlane.f32.xlu1 %v4409_v14  ;;  %v4417_v30 = vmul.f32 %v8142_v29, %v11342_v53  ;;  %v8143_v33 = vld [vmem:[%s12936_s0 + $0xc0] sm:$0xff] }
 0x325   :  { %4552 = vadd.xlane.f32.xlu0 %v4408_v24  ;;  %v7082_v44 = vpop.eup %7081  ;;  %4318 = vst.msk [vmem:[%s12939_s3 + $0x1d8] sm:$0xff] %vm4258_vm2, %v7080_v39  ;;  %7101 = vrcp.f32 %v3939_v35  ;;  %v3562_v45 = vsub.f32 0.0, %v3434_v38  ;;  %v3257_v46 = vpop.xlane.xlu1 %3256  ;;  %v4416_v35 = vmul.f32 %v8143_v33, %v11342_v53 }
 0x326   :  { %v3255_v47 = vpop.xlane.xlu0 %3254  ;;  %v7084_v48 = vpop.eup %7083  ;;  %v3938_v49 = vadd.f32 1.0, %v7082_v44  ;;  %7103 = vpow2.f32 %v3760_v32  ;;  %v3764_v34 = vmul.f32 1.442695, %v3563_v40  ;;  %v3437_v50 = vadd.f32 %v3257_v46, %v8570_v21 }
 0x327   :  { %v7086_v51 = vpop.eup %7085  ;;  %v3941_v52 = vadd.f32 1.0, %v7084_v48  ;;  %7105 = vpow2.f32 %v3758_v37  ;;  %v3762_v54 = vmul.f32 1.442695, %v3562_v45  ;;  %v3436_v55 = vadd.f32 %v3255_v47, %v8570_v21  ;;  %v8144_v48 = vld [vmem:[%s12936_s0 + $0xd8] sm:$0xff] }
 0x328   :  { %v7088_v56 = vpop.eup %7087  ;;  %4317 = vst.msk [vmem:[%s12939_s3 + $0x1d0] sm:$0xff] %vm4258_vm2, %v7086_v51  ;;  %7107 = vrcp.f32 %v3938_v49  ;;  %v3565_v57 = vsub.f32 0.0, %v3437_v50  ;;  %4558 = vadd.xlane.f32.xlu1 %v4411_v42  ;;  %v4419_v49 = vmul.f32 %v8144_v48, %v11342_v53 }
 0x329   :  { %4556 = vadd.xlane.f32.xlu0 %v4410_v1  ;;  %v7090_v62 = vpop.eup %7089  ;;  %4320 = vst.msk [vmem:[%s12939_s3 + $0x1e8] sm:$0xff] %vm4258_vm2, %v7088_v56  ;;  %7109 = vrcp.f32 %v3941_v52  ;;  %v3564_v63 = vsub.f32 0.0, %v3436_v55  ;;  %v3261_v0 = vpop.xlane.xlu1 %3260 }
 0x32a   :  { %v3259_v2 = vpop.xlane.xlu0 %3258  ;;  %v7092_v3 = vpop.eup %7091  ;;  %v3940_v4 = vadd.f32 1.0, %v7090_v62  ;;  %7111 = vpow2.f32 %v3764_v34  ;;  %v3768_v5 = vmul.f32 1.442695, %v3565_v57  ;;  %v3439_v6 = vadd.f32 %v3261_v0, %v8570_v21  ;;  %v8145_v34 = vld [vmem:[%s12936_s0 + $0xd0] sm:$0xff] }
 0x32b   :  { %v7094_v7 = vpop.eup %7093  ;;  %v3943_v8 = vadd.f32 1.0, %v7092_v3  ;;  %7113 = vpow2.f32 %v3762_v54  ;;  %v3438_v9 = vadd.f32 %v3259_v2, %v8570_v21  ;;  %v3766_v60 = vmul.f32 1.442695, %v3564_v63  ;;  %v8146_v2 = vld [vmem:[%s12936_s0 + $0xe8] sm:$0xff] }
 0x32c   :  { %v7096_v13 = vpop.eup %7095  ;;  %4319 = vst.msk [vmem:[%s12939_s3 + $0x1e0] sm:$0xff] %vm4258_vm2, %v7094_v7  ;;  %7115 = vrcp.f32 %v3940_v4  ;;  %v3567_v15 = vsub.f32 0.0, %v3439_v6  ;;  %4562 = vadd.xlane.f32.xlu1 %v4413_v36  ;;  %v4418_v50 = vmul.f32 %v8145_v34, %v11342_v53  ;;  %v4421_v3 = vmul.f32 %v8146_v2, %v11342_v53  ;;  %v8147_v7 = vld [vmem:[%s12936_s0 + $0xe0] sm:$0xff] }
 0x32d   :  { %4560 = vadd.xlane.f32.xlu0 %v4412_v61  ;;  %v7098_v18 = vpop.eup %7097  ;;  %7117 = vrcp.f32 %v3943_v8  ;;  %v3942_v19 = vadd.f32 1.0, %v7096_v13  ;;  %v3566_v20 = vsub.f32 0.0, %v3438_v9  ;;  %v3265_v22 = vpop.xlane.xlu1 %3264  ;;  %v4420_v8 = vmul.f32 %v8147_v7, %v11342_v53 }
 0x32e   :  { %v3263_v14 = vpop.xlane.xlu0 %3262  ;;  %v7100_v23 = vpop.eup %7099  ;;  %4322 = vst.msk [vmem:[%s12939_s3 + $0x1f8] sm:$0xff] %vm4258_vm2, %v7098_v18  ;;  %7119 = vpow2.f32 %v3768_v5  ;;  %v3772_v24 = vmul.f32 1.442695, %v3567_v15  ;;  %v3441_v25 = vadd.f32 %v3265_v22, %v8570_v21 }
 0x32f   :  { %v3440_v26 = vadd.f32 %v3263_v14, %v8570_v21  ;;  %v7102_v27 = vpop.eup %7101  ;;  %4321 = vst.msk [vmem:[%s12939_s3 + $0x1f0] sm:$0xff] %vm4258_vm2, %v7100_v23  ;;  %7121 = vrcp.f32 %v3942_v19  ;;  %v3770_v28 = vmul.f32 1.442695, %v3566_v20  ;;  %v8149_v14 = vld [vmem:[%s12936_s0 + $0xf0] sm:$0xff] }
 0x330   :  { %v7104_v31 = vpop.eup %7103  ;;  %4324 = vst.msk [vmem:[%s12939_s3 + $0x208] sm:$0xff] %vm4258_vm2, %v7102_v27  ;;  %7123 = vpow2.f32 %v3766_v60  ;;  %v3569_v32 = vsub.f32 0.0, %v3441_v25  ;;  %4566 = vadd.xlane.f32.xlu1 %v4415_v12  ;;  %v4422_v23 = vmul.f32 %v8149_v14, %v11342_v53 }
 0x331   :  { %v3568_v11 = vsub.f32 0.0, %v3440_v26  ;;  %4564 = vadd.xlane.f32.xlu0 %v4414_v17  ;;  %v7106_v37 = vpop.eup %7105  ;;  %v3945_v38 = vadd.f32 1.0, %v7104_v31  ;;  %7125 = vpow2.f32 %v3772_v24  ;;  %v3269_v39 = vpop.xlane.xlu1 %3268  ;;  %v8148_v17 = vld [vmem:[%s12936_s0 + $0xf8] sm:$0xff] }
 0x332   :  { %v3267_v40 = vpop.xlane.xlu0 %3266  ;;  %v7108_v41 = vpop.eup %7107  ;;  %v3944_v42 = vadd.f32 1.0, %v7106_v37  ;;  %7127 = vpow2.f32 %v3770_v28  ;;  %v3776_v43 = vmul.f32 1.442695, %v3569_v32  ;;  %v3443_v45 = vadd.f32 %v3269_v39, %v8570_v21 }
 0x333   :  { %v3774_v1 = vmul.f32 1.442695, %v3568_v11  ;;  %v7110_v44 = vpop.eup %7109  ;;  %4323 = vst.msk [vmem:[%s12939_s3 + $0x200] sm:$0xff] %vm4258_vm2, %v7108_v41  ;;  %7129 = vrcp.f32 %v3945_v38  ;;  %v3442_v46 = vadd.f32 %v3267_v40, %v8570_v21  ;;  %v4423_v18 = vmul.f32 %v8148_v17, %v11342_v53  ;;  %v8150_v40 = vld [vmem:[%s12936_s0 + $0x108] sm:$0xff] }
 0x334   :  { %v7112_v47 = vpop.eup %7111  ;;  %4326 = vst.msk [vmem:[%s12939_s3 + $0x218] sm:$0xff] %vm4258_vm2, %v7110_v44  ;;  %7131 = vrcp.f32 %v3944_v42  ;;  %4570 = vadd.xlane.f32.xlu1 %v4417_v30  ;;  %v3571_v54 = vsub.f32 0.0, %v3443_v45  ;;  %v4425_v41 = vmul.f32 %v8150_v40, %v11342_v53  ;;  %v8151_v42 = vld [vmem:[%s12936_s0 + $0x100] sm:$0xff] }
 0x335   :  { %4568 = vadd.xlane.f32.xlu0 %v4416_v35  ;;  %v7114_v51 = vpop.eup %7113  ;;  %v3947_v52 = vadd.f32 1.0, %v7112_v47  ;;  %7133 = vpow2.f32 %v3776_v43  ;;  %v3570_v55 = vsub.f32 0.0, %v3442_v46  ;;  %v3273_v56 = vpop.xlane.xlu1 %3272  ;;  %v4424_v43 = vmul.f32 %v8151_v42, %v11342_v53 }
 0x336   :  { %v3271_v57 = vpop.xlane.xlu0 %3270  ;;  %v7116_v58 = vpop.eup %7115  ;;  %v3946_v36 = vadd.f32 1.0, %v7114_v51  ;;  %7135 = vpow2.f32 %v3774_v1  ;;  %v3445_v59 = vadd.f32 %v3273_v56, %v8570_v21  ;;  %v3780_v63 = vmul.f32 1.442695, %v3571_v54  ;;  %v8152_v56 = vld [vmem:[%s12936_s0 + $0x118] sm:$0xff] }
 0x337   :  { %v3444_v61 = vadd.f32 %v3271_v57, %v8570_v21  ;;  %v7118_v62 = vpop.eup %7117  ;;  %4325 = vst.msk [vmem:[%s12939_s3 + $0x210] sm:$0xff] %vm4258_vm2, %v7116_v58  ;;  %7137 = vrcp.f32 %v3947_v52  ;;  %v3778_v0 = vmul.f32 1.442695, %v3570_v55  ;;  %v4427_v57 = vmul.f32 %v8152_v56, %v11342_v53  ;;  %v8153_v58 = vld [vmem:[%s12936_s0 + $0x110] sm:$0xff] }
 0x338   :  { %v7120_v4 = vpop.eup %7119  ;;  %4328 = vst.msk [vmem:[%s12939_s3 + $0x228] sm:$0xff] %vm4258_vm2, %v7118_v62  ;;  %7139 = vrcp.f32 %v3946_v36  ;;  %v3573_v5 = vsub.f32 0.0, %v3445_v59  ;;  %4574 = vadd.xlane.f32.xlu1 %v4419_v49  ;;  %v4426_v36 = vmul.f32 %v8153_v58, %v11342_v53 }
 0x339   :  { %v3572_v6 = vsub.f32 0.0, %v3444_v61  ;;  %4572 = vadd.xlane.f32.xlu0 %v4418_v50  ;;  %v7122_v9 = vpop.eup %7121  ;;  %v3949_v10 = vadd.f32 1.0, %v7120_v4  ;;  %7141 = vpow2.f32 %v3780_v63  ;;  %v3277_v12 = vpop.xlane.xlu1 %3276 }
 0x33a   :  { %v3275_v13 = vpop.xlane.xlu0 %3274  ;;  %v7124_v60 = vpop.eup %7123  ;;  %4327 = vst.msk [vmem:[%s12939_s3 + $0x220] sm:$0xff] %vm4258_vm2, %v7122_v9  ;;  %7143 = vpow2.f32 %v3778_v0  ;;  %v3784_v15 = vmul.f32 1.442695, %v3573_v5  ;;  %v3447_v16 = vadd.f32 %v3277_v12, %v8570_v21 }
 0x33b   :  { %v7126_v19 = vpop.eup %7125  ;;  %7145 = vrcp.f32 %v3949_v10  ;;  %v3948_v20 = vadd.f32 1.0, %v7124_v60  ;;  %v3446_v22 = vadd.f32 %v3275_v13, %v8570_v21  ;;  %v3782_v26 = vmul.f32 1.442695, %v3572_v6  ;;  %v8154_v60 = vld [vmem:[%s12936_s0 + $0x128] sm:$0xff] }
 0x33c   :  { %v7128_v24 = vpop.eup %7127  ;;  %v3951_v25 = vadd.f32 1.0, %v7126_v19  ;;  %7147 = vpow2.f32 %v3784_v15  ;;  %v3575_v27 = vsub.f32 0.0, %v3447_v16  ;;  %4578 = vadd.xlane.f32.xlu1 %v4421_v3  ;;  %v4429_v15 = vmul.f32 %v8154_v60, %v11342_v53  ;;  %v8155_v19 = vld [vmem:[%s12936_s0 + $0x120] sm:$0xff] }
 0x33d   :  { %4576 = vadd.xlane.f32.xlu0 %v4420_v8  ;;  %v7130_v28 = vpop.eup %7129  ;;  %7149 = vrcp.f32 %v3948_v20  ;;  %v3950_v29 = vadd.f32 1.0, %v7128_v24  ;;  %v3574_v30 = vsub.f32 0.0, %v3446_v22  ;;  %v3281_v31 = vpop.xlane.xlu1 %3280  ;;  %v4428_v20 = vmul.f32 %v8155_v19, %v11342_v53 }
 0x33e   :  { %v3279_v32 = vpop.xlane.xlu0 %3278  ;;  %v7132_v11 = vpop.eup %7131  ;;  %4330 = vst.msk [vmem:[%s12939_s3 + $0x238] sm:$0xff] %vm4258_vm2, %v7130_v28  ;;  %7151 = vrcp.f32 %v3951_v25  ;;  %v3788_v33 = vmul.f32 1.442695, %v3575_v27  ;;  %v3449_v35 = vadd.f32 %v3281_v31, %v8570_v21  ;;  %v8156_v27 = vld [vmem:[%s12936_s0 + $0x138] sm:$0xff] }
 0x33f   :  { %v3448_v37 = vadd.f32 %v3279_v32, %v8570_v21  ;;  %v7134_v38 = vpop.eup %7133  ;;  %4329 = vst.msk [vmem:[%s12939_s3 + $0x230] sm:$0xff] %vm4258_vm2, %v7132_v11  ;;  %7153 = vrcp.f32 %v3950_v29  ;;  %v3786_v39 = vmul.f32 1.442695, %v3574_v30  ;;  %v4431_v28 = vmul.f32 %v8156_v27, %v11342_v53 }
 0x340   :  { %v7136_v1 = vpop.eup %7135  ;;  %v3953_v44 = vadd.f32 1.0, %v7134_v38  ;;  %7155 = vpow2.f32 %v3782_v26  ;;  %v3577_v45 = vsub.f32 0.0, %v3449_v35  ;;  %4582 = vadd.xlane.f32.xlu1 %v4423_v18 }
 0x341   :  { %v3576_v46 = vsub.f32 0.0, %v3448_v37  ;;  %4580 = vadd.xlane.f32.xlu0 %v4422_v23  ;;  %v7138_v47 = vpop.eup %7137  ;;  %v3952_v48 = vadd.f32 1.0, %v7136_v1  ;;  %7157 = vpow2.f32 %v3788_v33  ;;  %v3285_v49 = vpop.xlane.xlu1 %3284  ;;  %v8157_v37 = vld [vmem:[%s12936_s0 + $0x130] sm:$0xff] }
 0x342   :  { %v3283_v34 = vpop.xlane.xlu0 %3282  ;;  %v7140_v50 = vpop.eup %7139  ;;  %4332 = vst.msk [vmem:[%s12939_s3 + $0x248] sm:$0xff] %vm4258_vm2, %v7138_v47  ;;  %7159 = vrcp.f32 %v3953_v44  ;;  %v3792_v51 = vmul.f32 1.442695, %v3577_v45  ;;  %v3451_v52 = vadd.f32 %v3285_v49, %v8570_v21  ;;  %v4430_v38 = vmul.f32 %v8157_v37, %v11342_v53 }
 0x343   :  { %v7142_v54 = vpop.eup %7141  ;;  %4331 = vst.msk [vmem:[%s12939_s3 + $0x240] sm:$0xff] %vm4258_vm2, %v7140_v50  ;;  %7161 = vrcp.f32 %v3952_v48  ;;  %v3450_v55 = vadd.f32 %v3283_v34, %v8570_v21  ;;  %v3790_v62 = vmul.f32 1.442695, %v3576_v46  ;;  %v8159_v50 = vld [vmem:[%s12936_s0 + $0x140] sm:$0xff] }
 0x344   :  { %v7144_v59 = vpop.eup %7143  ;;  %v3955_v61 = vadd.f32 1.0, %v7142_v54  ;;  %7163 = vpow2.f32 %v3786_v39  ;;  %v3579_v63 = vsub.f32 0.0, %v3451_v52  ;;  %4586 = vadd.xlane.f32.xlu1 %v4425_v41 }
 0x345   :  { %4584 = vadd.xlane.f32.xlu0 %v4424_v43  ;;  %v7146_v0 = vpop.eup %7145  ;;  %v3954_v2 = vadd.f32 1.0, %v7144_v59  ;;  %7165 = vpow2.f32 %v3792_v51  ;;  %v3578_v3 = vsub.f32 0.0, %v3450_v55  ;;  %v3289_v4 = vpop.xlane.xlu1 %3288  ;;  %v8158_v43 = vld [vmem:[%s12936_s0 + $0x148] sm:$0xff]  ;;  %v4432_v51 = vmul.f32 %v8159_v50, %v11342_v53 }
 0x346   :  { %v3287_v5 = vpop.xlane.xlu0 %3286  ;;  %v7148_v6 = vpop.eup %7147  ;;  %4334 = vst.msk [vmem:[%s12939_s3 + $0x258] sm:$0xff] %vm4258_vm2, %v7146_v0  ;;  %7167 = vrcp.f32 %v3955_v61  ;;  %v3796_v7 = vmul.f32 1.442695, %v3579_v63  ;;  %v3453_v8 = vadd.f32 %v3289_v4, %v8570_v21  ;;  %v4433_v1 = vmul.f32 %v8158_v43, %v11342_v53 }
 0x347   :  { %v3452_v9 = vadd.f32 %v3287_v5, %v8570_v21  ;;  %v7150_v10 = vpop.eup %7149  ;;  %7169 = vrcp.f32 %v3954_v2  ;;  %v3957_v12 = vadd.f32 1.0, %v7148_v6  ;;  %v3794_v13 = vmul.f32 1.442695, %v3578_v3  ;;  %v8160_v5 = vld [vmem:[%s12936_s0 + $0x158] sm:$0xff]  ;;  %v11738_v6 = vld [vmem:[%s12937_s1 + $0x3] ss:$0 sm:$0xff] }
 0x348   :  { %v7152_v16 = vpop.eup %7151  ;;  %4333 = vst.msk [vmem:[%s12939_s3 + $0x250] sm:$0xff] %vm4258_vm2, %v7150_v10  ;;  %7171 = vpow2.f32 %v3790_v62  ;;  %v3581_v17 = vsub.f32 0.0, %v3453_v8  ;;  %4590 = vadd.xlane.f32.xlu1 %v4427_v57  ;;  %v8162_v8 = vld [vmem:[%s12936_s0 + $0x150] sm:$0xff] }
 0x349   :  { %v3580_v18 = vsub.f32 0.0, %v3452_v9  ;;  %4588 = vadd.xlane.f32.xlu0 %v4426_v36  ;;  %v7154_v22 = vpop.eup %7153  ;;  %4336 = vst.msk [vmem:[%s12939_s3 + $0x268] sm:$0xff] %vm4258_vm2, %v7152_v16  ;;  %7173 = vrcp.f32 %v3957_v12  ;;  %v3293_v14 = vpop.xlane.xlu1 %3292  ;;  %v4434_v9 = vmul.f32 %v8162_v8, %v11738_v6 }
 0x34a   :  { %v3291_v23 = vpop.xlane.xlu0 %3290  ;;  %v7156_v24 = vpop.eup %7155  ;;  %4335 = vst.msk [vmem:[%s12939_s3 + $0x260] sm:$0xff] %vm4258_vm2, %v7154_v22  ;;  %7175 = vpow2.f32 %v3796_v7  ;;  %v3800_v25 = vmul.f32 1.442695, %v3581_v17  ;;  %v3455_v26 = vadd.f32 %v3293_v14, %v8570_v21  ;;  %v4435_v7 = vmul.f32 %v11738_v6, %v8160_v5 }
 0x34b   :  { %v7158_v29 = vpop.eup %7157  ;;  %v3956_v30 = vadd.f32 1.0, %v7156_v24  ;;  %7177 = vpow2.f32 %v3794_v13  ;;  %v3798_v31 = vmul.f32 1.442695, %v3580_v18  ;;  %v3454_v32 = vadd.f32 %v3291_v23, %v8570_v21 }
 0x34c   :  { %v7160_v11 = vpop.eup %7159  ;;  %v3959_v33 = vadd.f32 1.0, %v7158_v29  ;;  %7179 = vpow2.f32 %v3800_v25  ;;  %v3583_v35 = vsub.f32 0.0, %v3455_v26  ;;  %4594 = vadd.xlane.f32.xlu1 %v4429_v15  ;;  %v8163_v26 = vld [vmem:[%s12936_s0 + $0x168] sm:$0xff] }
 0x34d   :  { %4592 = vadd.xlane.f32.xlu0 %v4428_v20  ;;  %v7162_v39 = vpop.eup %7161  ;;  %4338 = vst.msk [vmem:[%s12939_s3 + $0x278] sm:$0xff] %vm4258_vm2, %v7160_v11  ;;  %7181 = vrcp.f32 %v3956_v30  ;;  %v3582_v40 = vsub.f32 0.0, %v3454_v32  ;;  %v3297_v41 = vpop.xlane.xlu1 %3296  ;;  %v4437_v27 = vmul.f32 %v8163_v26, %v11738_v6 }
 0x34e   :  { %v3295_v42 = vpop.xlane.xlu0 %3294  ;;  %v7164_v44 = vpop.eup %7163  ;;  %4337 = vst.msk [vmem:[%s12939_s3 + $0x270] sm:$0xff] %vm4258_vm2, %v7162_v39  ;;  %7183 = vrcp.f32 %v3959_v33  ;;  %v3804_v45 = vmul.f32 1.442695, %v3583_v35  ;;  %v3457_v46 = vadd.f32 %v3297_v41, %v8570_v21 }
 0x34f   :  { %v3456_v47 = vadd.f32 %v3295_v42, %v8570_v21  ;;  %v7166_v48 = vpop.eup %7165  ;;  %v3958_v49 = vadd.f32 1.0, %v7164_v44  ;;  %7185 = vpow2.f32 %v3798_v31  ;;  %v3802_v34 = vmul.f32 1.442695, %v3582_v40  ;;  %v8165_v44 = vld [vmem:[%s12936_s0 + $0x178] sm:$0xff] }
 0x350   :  { %v7168_v52 = vpop.eup %7167  ;;  %v3961_v54 = vadd.f32 1.0, %v7166_v48  ;;  %7187 = vpow2.f32 %v3804_v45  ;;  %v3585_v55 = vsub.f32 0.0, %v3457_v46  ;;  %4598 = vadd.xlane.f32.xlu1 %v4431_v28  ;;  %v8164_v28 = vld [vmem:[%s12936_s0 + $0x160] sm:$0xff]  ;;  %v4439_v45 = vmul.f32 %v8165_v44, %v11738_v6  ;;  %v8166_v46 = vld [vmem:[%s12936_s0 + $0x170] sm:$0xff] }
 0x351   :  { %v3584_v56 = vsub.f32 0.0, %v3456_v47  ;;  %4596 = vadd.xlane.f32.xlu0 %v4430_v38  ;;  %v7170_v57 = vpop.eup %7169  ;;  %4340 = vst.msk [vmem:[%s12939_s3 + $0x288] sm:$0xff] %vm4258_vm2, %v7168_v52  ;;  %7189 = vrcp.f32 %v3958_v49  ;;  %v3301_v58 = vpop.xlane.xlu1 %3300  ;;  %v4436_v29 = vmul.f32 %v8164_v28, %v11738_v6  ;;  %v4438_v47 = vmul.f32 %v8166_v46, %v11738_v6 }
 0x352   :  { %v3299_v36 = vpop.xlane.xlu0 %3298  ;;  %v7172_v59 = vpop.eup %7171  ;;  %4339 = vst.msk [vmem:[%s12939_s3 + $0x280] sm:$0xff] %vm4258_vm2, %v7170_v57  ;;  %7191 = vrcp.f32 %v3961_v54  ;;  %v3808_v53 = vmul.f32 1.442695, %v3585_v55  ;;  %v3459_v62 = vadd.f32 %v3301_v58, %v8570_v21 }
 0x353   :  { %v3806_v61 = vmul.f32 1.442695, %v3584_v56  ;;  %v7174_v63 = vpop.eup %7173  ;;  %v3960_v0 = vadd.f32 1.0, %v7172_v59  ;;  %7193 = vpow2.f32 %v3802_v34  ;;  %v3458_v2 = vadd.f32 %v3299_v36, %v8570_v21  ;;  %v8167_v36 = vld [vmem:[%s12936_s0 + $0x188] sm:$0xff] }
 0x354   :  { %v7176_v3 = vpop.eup %7175  ;;  %4342 = vst.msk [vmem:[%s12939_s3 + $0x298] sm:$0xff] %vm4258_vm2, %v7174_v63  ;;  %7195 = vpow2.f32 %v3808_v53  ;;  %v3587_v4 = vsub.f32 0.0, %v3459_v62  ;;  %4602 = vadd.xlane.f32.xlu1 %v4433_v1  ;;  %v4441_v59 = vmul.f32 %v8167_v36, %v11738_v6  ;;  %v8168_v63 = vld [vmem:[%s12936_s0 + $0x180] sm:$0xff] }
 0x355   :  { %4600 = vadd.xlane.f32.xlu0 %v4432_v51  ;;  %v7178_v10 = vpop.eup %7177  ;;  %7197 = vrcp.f32 %v3960_v0  ;;  %v3963_v12 = vadd.f32 1.0, %v7176_v3  ;;  %v3586_v13 = vsub.f32 0.0, %v3458_v2  ;;  %v3305_v60 = vpop.xlane.xlu1 %3304  ;;  %v4440_v0 = vmul.f32 %v8168_v63, %v11738_v6 }
 0x356   :  { %v3303_v15 = vpop.xlane.xlu0 %3302  ;;  %v7180_v16 = vpop.eup %7179  ;;  %v3962_v17 = vadd.f32 1.0, %v7178_v10  ;;  %7199 = vpow2.f32 %v3806_v61  ;;  %v3812_v18 = vmul.f32 1.442695, %v3587_v4  ;;  %v3461_v19 = vadd.f32 %v3305_v60, %v8570_v21 }
 0x357   :  { %v7182_v20 = vpop.eup %7181  ;;  %7201 = vrcp.f32 %v3963_v12  ;;  %v3965_v22 = vadd.f32 1.0, %v7180_v16  ;;  %v3810_v14 = vmul.f32 1.442695, %v3586_v13  ;;  %v3460_v23 = vadd.f32 %v3303_v15, %v8570_v21  ;;  %v8169_v15 = vld [vmem:[%s12936_s0 + $0x198] sm:$0xff] }
 0x358   :  { %v7184_v24 = vpop.eup %7183  ;;  %4341 = vst.msk [vmem:[%s12939_s3 + $0x290] sm:$0xff] %vm4258_vm2, %v7182_v20  ;;  %7203 = vrcp.f32 %v3962_v17  ;;  %v3589_v25 = vsub.f32 0.0, %v3461_v19  ;;  %4606 = vadd.xlane.f32.xlu1 %v4435_v7  ;;  %v4443_v16 = vmul.f32 %v8169_v15, %v11738_v6  ;;  %v8170_v20 = vld [vmem:[%s12936_s0 + $0x190] sm:$0xff] }
 0x359   :  { %4604 = vadd.xlane.f32.xlu0 %v4434_v9  ;;  %v7186_v30 = vpop.eup %7185  ;;  %4344 = vst.msk [vmem:[%s12939_s3 + $0x2a8] sm:$0xff] %vm4258_vm2, %v7184_v24  ;;  %7205 = vrcp.f32 %v3965_v22  ;;  %v3588_v31 = vsub.f32 0.0, %v3460_v23  ;;  %v3309_v32 = vpop.xlane.xlu1 %3308  ;;  %v4442_v22 = vmul.f32 %v8170_v20, %v11738_v6 }
 0x35a   :  { %v3307_v11 = vpop.xlane.xlu0 %3306  ;;  %v7188_v33 = vpop.eup %7187  ;;  %v3964_v35 = vadd.f32 1.0, %v7186_v30  ;;  %7207 = vpow2.f32 %v3812_v18  ;;  %v3816_v37 = vmul.f32 1.442695, %v3589_v25  ;;  %v3463_v38 = vadd.f32 %v3309_v32, %v8570_v21 }
 0x35b   :  { %v7190_v39 = vpop.eup %7189  ;;  %v3967_v40 = vadd.f32 1.0, %v7188_v33  ;;  %7209 = vpow2.f32 %v3810_v14  ;;  %v3814_v41 = vmul.f32 1.442695, %v3588_v31  ;;  %v3462_v42 = vadd.f32 %v3307_v11, %v8570_v21  ;;  %v8171_v33 = vld [vmem:[%s12936_s0 + $0x1a8] sm:$0xff] }
 0x35c   :  { %v7192_v43 = vpop.eup %7191  ;;  %4343 = vst.msk [vmem:[%s12939_s3 + $0x2a0] sm:$0xff] %vm4258_vm2, %v7190_v39  ;;  %7211 = vrcp.f32 %v3964_v35  ;;  %v3591_v1 = vsub.f32 0.0, %v3463_v38  ;;  %4610 = vadd.xlane.f32.xlu1 %v4437_v27  ;;  %v4445_v35 = vmul.f32 %v8171_v33, %v11738_v6 }
 0x35d   :  { %4608 = vadd.xlane.f32.xlu0 %v4436_v29  ;;  %v7194_v48 = vpop.eup %7193  ;;  %4346 = vst.msk [vmem:[%s12939_s3 + $0x2b8] sm:$0xff] %vm4258_vm2, %v7192_v43  ;;  %7213 = vrcp.f32 %v3967_v40  ;;  %v3590_v49 = vsub.f32 0.0, %v3462_v42  ;;  %v3313_v34 = vpop.xlane.xlu1 %3312 }
 0x35e   :  { %v3311_v50 = vpop.xlane.xlu0 %3310  ;;  %v7196_v51 = vpop.eup %7195  ;;  %v3966_v52 = vadd.f32 1.0, %v7194_v48  ;;  %7215 = vpow2.f32 %v3816_v37  ;;  %v3820_v54 = vmul.f32 1.442695, %v3591_v1  ;;  %v3465_v55 = vadd.f32 %v3313_v34, %v8570_v21  ;;  %v8172_v37 = vld [vmem:[%s12936_s0 + $0x1a0] sm:$0xff] }
 0x35f   :  { %v7198_v56 = vpop.eup %7197  ;;  %v3969_v57 = vadd.f32 1.0, %v7196_v51  ;;  %7217 = vpow2.f32 %v3814_v41  ;;  %v3464_v58 = vadd.f32 %v3311_v50, %v8570_v21  ;;  %v3818_v61 = vmul.f32 1.442695, %v3590_v49  ;;  %v8173_v50 = vld [vmem:[%s12936_s0 + $0x1b8] sm:$0xff] }
 0x360   :  { %v7200_v53 = vpop.eup %7199  ;;  %4345 = vst.msk [vmem:[%s12939_s3 + $0x2b0] sm:$0xff] %vm4258_vm2, %v7198_v56  ;;  %7219 = vrcp.f32 %v3966_v52  ;;  %v3593_v62 = vsub.f32 0.0, %v3465_v55  ;;  %4614 = vadd.xlane.f32.xlu1 %v4439_v45  ;;  %v4444_v38 = vmul.f32 %v8172_v37, %v11738_v6  ;;  %v4447_v51 = vmul.f32 %v8173_v50, %v11738_v6  ;;  %v8174_v56 = vld [vmem:[%s12936_s0 + $0x1b0] sm:$0xff] }
 0x361   :  { %4612 = vadd.xlane.f32.xlu0 %v4438_v47  ;;  %v7202_v2 = vpop.eup %7201  ;;  %7221 = vrcp.f32 %v3969_v57  ;;  %v3968_v3 = vadd.f32 1.0, %v7200_v53  ;;  %v3592_v4 = vsub.f32 0.0, %v3464_v58  ;;  %v3317_v5 = vpop.xlane.xlu1 %3316  ;;  %v4446_v57 = vmul.f32 %v8174_v56, %v11738_v6 }
 0x362   :  { %v3315_v7 = vpop.xlane.xlu0 %3314  ;;  %v7204_v8 = vpop.eup %7203  ;;  %4348 = vst.msk [vmem:[%s12939_s3 + $0x2c8] sm:$0xff] %vm4258_vm2, %v7202_v2  ;;  %7223 = vpow2.f32 %v3820_v54  ;;  %v3824_v9 = vmul.f32 1.442695, %v3593_v62  ;;  %v3467_v10 = vadd.f32 %v3317_v5, %v8570_v21 }
 0x363   :  { %v3466_v12 = vadd.f32 %v3315_v7, %v8570_v21  ;;  %v7206_v13 = vpop.eup %7205  ;;  %4347 = vst.msk [vmem:[%s12939_s3 + $0x2c0] sm:$0xff] %vm4258_vm2, %v7204_v8  ;;  %7225 = vrcp.f32 %v3968_v3  ;;  %v3822_v60 = vmul.f32 1.442695, %v3592_v4  ;;  %v8176_v7 = vld [vmem:[%s12936_s0 + $0x1c0] sm:$0xff] }
 0x364   :  { %v7208_v17 = vpop.eup %7207  ;;  %4350 = vst.msk [vmem:[%s12939_s3 + $0x2d8] sm:$0xff] %vm4258_vm2, %v7206_v13  ;;  %7227 = vpow2.f32 %v3818_v61  ;;  %v3595_v18 = vsub.f32 0.0, %v3467_v10  ;;  %4618 = vadd.xlane.f32.xlu1 %v4441_v59  ;;  %v4448_v8 = vmul.f32 %v8176_v7, %v11738_v6 }
 0x365   :  { %v3594_v19 = vsub.f32 0.0, %v3466_v12  ;;  %4616 = vadd.xlane.f32.xlu0 %v4440_v0  ;;  %v7210_v14 = vpop.eup %7209  ;;  %v3971_v23 = vadd.f32 1.0, %v7208_v17  ;;  %7229 = vpow2.f32 %v3824_v9  ;;  %v3321_v24 = vpop.xlane.xlu1 %3320  ;;  %v8175_v0 = vld [vmem:[%s12936_s0 + $0x1c8] sm:$0xff] }
 0x366   :  { %v3319_v25 = vpop.xlane.xlu0 %3318  ;;  %v7212_v26 = vpop.eup %7211  ;;  %v3970_v27 = vadd.f32 1.0, %v7210_v14  ;;  %7231 = vpow2.f32 %v3822_v60  ;;  %v3828_v28 = vmul.f32 1.442695, %v3595_v18  ;;  %v3469_v31 = vadd.f32 %v3321_v24, %v8570_v21 }
 0x367   :  { %v3826_v29 = vmul.f32 1.442695, %v3594_v19  ;;  %v7214_v30 = vpop.eup %7213  ;;  %4349 = vst.msk [vmem:[%s12939_s3 + $0x2d0] sm:$0xff] %vm4258_vm2, %v7212_v26  ;;  %7233 = vrcp.f32 %v3971_v23  ;;  %v3468_v32 = vadd.f32 %v3319_v25, %v8570_v21  ;;  %v4449_v2 = vmul.f32 %v8175_v0, %v11738_v6  ;;  %v8177_v25 = vld [vmem:[%s12936_s0 + $0x1d8] sm:$0xff] }
 0x368   :  { %v7216_v11 = vpop.eup %7215  ;;  %4352 = vst.msk [vmem:[%s12939_s3 + $0x2e8] sm:$0xff] %vm4258_vm2, %v7214_v30  ;;  %7235 = vrcp.f32 %v3970_v27  ;;  %4622 = vadd.xlane.f32.xlu1 %v4443_v16  ;;  %v3597_v41 = vsub.f32 0.0, %v3469_v31  ;;  %v4451_v26 = vmul.f32 %v8177_v25, %v11738_v6  ;;  %v8178_v27 = vld [vmem:[%s12936_s0 + $0x1d0] sm:$0xff] }
 0x369   :  { %4620 = vadd.xlane.f32.xlu0 %v4442_v22  ;;  %v7218_v39 = vpop.eup %7217  ;;  %v3973_v40 = vadd.f32 1.0, %v7216_v11  ;;  %7237 = vpow2.f32 %v3828_v28  ;;  %v3596_v42 = vsub.f32 0.0, %v3468_v32  ;;  %v3325_v43 = vpop.xlane.xlu1 %3324  ;;  %v4450_v28 = vmul.f32 %v8178_v27, %v11738_v6 }
 0x36a   :  { %v3323_v1 = vpop.xlane.xlu0 %3322  ;;  %v7220_v44 = vpop.eup %7219  ;;  %v3972_v45 = vadd.f32 1.0, %v7218_v39  ;;  %7239 = vpow2.f32 %v3826_v29  ;;  %v3471_v46 = vadd.f32 %v3325_v43, %v8570_v21  ;;  %v3832_v49 = vmul.f32 1.442695, %v3597_v41  ;;  %v8179_v43 = vld [vmem:[%s12936_s0 + $0x1e8] sm:$0xff] }
 0x36b   :  { %v3470_v47 = vadd.f32 %v3323_v1, %v8570_v21  ;;  %v7222_v48 = vpop.eup %7221  ;;  %4351 = vst.msk [vmem:[%s12939_s3 + $0x2e0] sm:$0xff] %vm4258_vm2, %v7220_v44  ;;  %7241 = vrcp.f32 %v3973_v40  ;;  %v3830_v34 = vmul.f32 1.442695, %v3596_v42  ;;  %v4453_v1 = vmul.f32 %v8179_v43, %v11738_v6  ;;  %v8180_v44 = vld [vmem:[%s12936_s0 + $0x1e0] sm:$0xff] }
 0x36c   :  { %v7224_v52 = vpop.eup %7223  ;;  %4354 = vst.msk [vmem:[%s12939_s3 + $0x2f8] sm:$0xff] %vm4258_vm2, %v7222_v48  ;;  %7243 = vrcp.f32 %v3972_v45  ;;  %v3599_v54 = vsub.f32 0.0, %v3471_v46  ;;  %4626 = vadd.xlane.f32.xlu1 %v4445_v35  ;;  %v4452_v45 = vmul.f32 %v8180_v44, %v11738_v6 }
 0x36d   :  { %v3598_v55 = vsub.f32 0.0, %v3470_v47  ;;  %4624 = vadd.xlane.f32.xlu0 %v4444_v38  ;;  %v7226_v58 = vpop.eup %7225  ;;  %v3975_v36 = vadd.f32 1.0, %v7224_v52  ;;  %7245 = vpow2.f32 %v3832_v49  ;;  %v3329_v59 = vpop.xlane.xlu1 %3328 }
 0x36e   :  { %v3327_v53 = vpop.xlane.xlu0 %3326  ;;  %v7228_v61 = vpop.eup %7227  ;;  %4353 = vst.msk [vmem:[%s12939_s3 + $0x2f0] sm:$0xff] %vm4258_vm2, %v7226_v58  ;;  %7247 = vpow2.f32 %v3830_v34  ;;  %v3836_v62 = vmul.f32 1.442695, %v3599_v54  ;;  %v3473_v63 = vadd.f32 %v3329_v59, %v8570_v21 }
 0x36f   :  { %v7230_v3 = vpop.eup %7229  ;;  %7249 = vrcp.f32 %v3975_v36  ;;  %v3974_v4 = vadd.f32 1.0, %v7228_v61  ;;  %v3472_v5 = vadd.f32 %v3327_v53, %v8570_v21  ;;  %v3834_v12 = vmul.f32 1.442695, %v3598_v55  ;;  %v8181_v61 = vld [vmem:[%s12936_s0 + $0x1f8] sm:$0xff] }
 0x370   :  { %v7232_v9 = vpop.eup %7231  ;;  %v3977_v10 = vadd.f32 1.0, %v7230_v3  ;;  %7251 = vpow2.f32 %v3836_v62  ;;  %v3601_v13 = vsub.f32 0.0, %v3473_v63  ;;  %4630 = vadd.xlane.f32.xlu1 %v4447_v51  ;;  %v4455_v62 = vmul.f32 %v8181_v61, %v11738_v6  ;;  %v8182_v3 = vld [vmem:[%s12936_s0 + $0x1f0] sm:$0xff] }
 0x371   :  { %4628 = vadd.xlane.f32.xlu0 %v4446_v57  ;;  %v7234_v60 = vpop.eup %7233  ;;  %7253 = vrcp.f32 %v3974_v4  ;;  %v3976_v15 = vadd.f32 1.0, %v7232_v9  ;;  %v3600_v16 = vsub.f32 0.0, %v3472_v5  ;;  %v3333_v17 = vpop.xlane.xlu1 %3332  ;;  %v4454_v4 = vmul.f32 %v8182_v3, %v11738_v6 }
 0x372   :  { %v3331_v18 = vpop.xlane.xlu0 %3330  ;;  %v7236_v19 = vpop.eup %7235  ;;  %4356 = vst.msk [vmem:[%s12939_s3 + $0x308] sm:$0xff] %vm4258_vm2, %v7234_v60  ;;  %7255 = vrcp.f32 %v3977_v10  ;;  %v3840_v20 = vmul.f32 1.442695, %v3601_v13  ;;  %v3475_v22 = vadd.f32 %v3333_v17, %v8570_v21  ;;  %v8183_v13 = vld [vmem:[%s12936_s0 + $0x208] sm:$0xff] }
 0x373   :  { %v3474_v14 = vadd.f32 %v3331_v18, %v8570_v21  ;;  %v7238_v23 = vpop.eup %7237  ;;  %4355 = vst.msk [vmem:[%s12939_s3 + $0x300] sm:$0xff] %vm4258_vm2, %v7236_v19  ;;  %7257 = vrcp.f32 %v3976_v15  ;;  %v3838_v24 = vmul.f32 1.442695, %v3600_v16  ;;  %v4457_v60 = vmul.f32 %v8183_v13, %v11738_v6 }
 0x374   :  { %v7240_v29 = vpop.eup %7239  ;;  %v3979_v30 = vadd.f32 1.0, %v7238_v23  ;;  %7259 = vpow2.f32 %v3834_v12  ;;  %v3603_v31 = vsub.f32 0.0, %v3475_v22  ;;  %4634 = vadd.xlane.f32.xlu1 %v4449_v2 }
 0x375   :  { %v3602_v32 = vsub.f32 0.0, %v3474_v14  ;;  %4632 = vadd.xlane.f32.xlu0 %v4448_v8  ;;  %v7242_v11 = vpop.eup %7241  ;;  %v3978_v33 = vadd.f32 1.0, %v7240_v29  ;;  %7261 = vpow2.f32 %v3840_v20  ;;  %v3337_v35 = vpop.xlane.xlu1 %3336  ;;  %v8184_v14 = vld [vmem:[%s12936_s0 + $0x200] sm:$0xff] }
 0x376   :  { %v3335_v37 = vpop.xlane.xlu0 %3334  ;;  %v7244_v38 = vpop.eup %7243  ;;  %4358 = vst.msk [vmem:[%s12939_s3 + $0x318] sm:$0xff] %vm4258_vm2, %v7242_v11  ;;  %7263 = vrcp.f32 %v3979_v30  ;;  %v3844_v39 = vmul.f32 1.442695, %v3603_v31  ;;  %v3477_v40 = vadd.f32 %v3337_v35, %v8570_v21  ;;  %v4456_v23 = vmul.f32 %v8184_v14, %v11738_v6 }
 0x377   :  { %v7246_v41 = vpop.eup %7245  ;;  %4357 = vst.msk [vmem:[%s12939_s3 + $0x310] sm:$0xff] %vm4258_vm2, %v7244_v38  ;;  %7265 = vrcp.f32 %v3978_v33  ;;  %v3476_v42 = vadd.f32 %v3335_v37, %v8570_v21  ;;  %v3842_v48 = vmul.f32 1.442695, %v3602_v32  ;;  %v8186_v38 = vld [vmem:[%s12936_s0 + $0x210] sm:$0xff] }
 0x378   :  { %v7248_v46 = vpop.eup %7247  ;;  %v3981_v47 = vadd.f32 1.0, %v7246_v41  ;;  %7267 = vpow2.f32 %v3838_v24  ;;  %v3605_v49 = vsub.f32 0.0, %v3477_v40  ;;  %4638 = vadd.xlane.f32.xlu1 %v4451_v26 }
 0x379   :  { %4636 = vadd.xlane.f32.xlu0 %v4450_v28  ;;  %v7250_v34 = vpop.eup %7249  ;;  %v3980_v50 = vadd.f32 1.0, %v7248_v46  ;;  %7269 = vpow2.f32 %v3844_v39  ;;  %v3604_v51 = vsub.f32 0.0, %v3476_v42  ;;  %v3341_v52 = vpop.xlane.xlu1 %3340  ;;  %v8185_v28 = vld [vmem:[%s12936_s0 + $0x218] sm:$0xff]  ;;  %v4458_v39 = vmul.f32 %v8186_v38, %v11738_v6 }
 0x37a   :  { %v3339_v54 = vpop.xlane.xlu0 %3338  ;;  %v7252_v55 = vpop.eup %7251  ;;  %4360 = vst.msk [vmem:[%s12939_s3 + $0x328] sm:$0xff] %vm4258_vm2, %v7250_v34  ;;  %7271 = vrcp.f32 %v3981_v47  ;;  %v3848_v56 = vmul.f32 1.442695, %v3605_v49  ;;  %v3479_v57 = vadd.f32 %v3341_v52, %v8570_v21  ;;  %v4459_v29 = vmul.f32 %v8185_v28, %v11738_v6 }
 0x37b   :  { %v3478_v58 = vadd.f32 %v3339_v54, %v8570_v21  ;;  %v7254_v36 = vpop.eup %7253  ;;  %7273 = vrcp.f32 %v3980_v50  ;;  %v3983_v59 = vadd.f32 1.0, %v7252_v55  ;;  %v3846_v53 = vmul.f32 1.442695, %v3604_v51  ;;  %v8187_v55 = vld [vmem:[%s12936_s0 + $0x228] sm:$0xff] }
 0x37c   :  { %v7256_v63 = vpop.eup %7255  ;;  %4359 = vst.msk [vmem:[%s12939_s3 + $0x320] sm:$0xff] %vm4258_vm2, %v7254_v36  ;;  %7275 = vpow2.f32 %v3842_v48  ;;  %v3607_v0 = vsub.f32 0.0, %v3479_v57  ;;  %4642 = vadd.xlane.f32.xlu1 %v4453_v1  ;;  %v8188_v57 = vld [vmem:[%s12936_s0 + $0x220] sm:$0xff] }
 0x37d   :  { %v3606_v2 = vsub.f32 0.0, %v3478_v58  ;;  %4640 = vadd.xlane.f32.xlu0 %v4452_v45  ;;  %v7258_v5 = vpop.eup %7257  ;;  %4362 = vst.msk [vmem:[%s12939_s3 + $0x338] sm:$0xff] %vm4258_vm2, %v7256_v63  ;;  %7277 = vrcp.f32 %v3983_v59  ;;  %v3345_v7 = vpop.xlane.xlu1 %3344  ;;  %v4460_v58 = vmul.f32 %v8188_v57, %v11738_v6 }
 0x37e   :  { %v3343_v8 = vpop.xlane.xlu0 %3342  ;;  %v7260_v9 = vpop.eup %7259  ;;  %4361 = vst.msk [vmem:[%s12939_s3 + $0x330] sm:$0xff] %vm4258_vm2, %v7258_v5  ;;  %7279 = vpow2.f32 %v3848_v56  ;;  %v3852_v10 = vmul.f32 1.442695, %v3607_v0  ;;  %v3481_v12 = vadd.f32 %v3345_v7, %v8570_v21  ;;  %v4461_v56 = vmul.f32 %v8187_v55, %v11738_v6 }
 0x37f   :  { %v7262_v15 = vpop.eup %7261  ;;  %v3982_v16 = vadd.f32 1.0, %v7260_v9  ;;  %7281 = vpow2.f32 %v3846_v53  ;;  %v3850_v17 = vmul.f32 1.442695, %v3606_v2  ;;  %v3480_v18 = vadd.f32 %v3343_v8, %v8570_v21 }
 0x380   :  { %v7264_v19 = vpop.eup %7263  ;;  %v3985_v20 = vadd.f32 1.0, %v7262_v15  ;;  %7283 = vpow2.f32 %v3852_v10  ;;  %v3609_v22 = vsub.f32 0.0, %v3481_v12  ;;  %4646 = vadd.xlane.f32.xlu1 %v4455_v62  ;;  %v8189_v12 = vld [vmem:[%s12936_s0 + $0x238] sm:$0xff] }
 0x381   :  { %4644 = vadd.xlane.f32.xlu0 %v4454_v4  ;;  %v7266_v24 = vpop.eup %7265  ;;  %4364 = vst.msk [vmem:[%s12939_s3 + $0x348] sm:$0xff] %vm4258_vm2, %v7264_v19  ;;  %7285 = vrcp.f32 %v3982_v16  ;;  %v3608_v25 = vsub.f32 0.0, %v3480_v18  ;;  %v3349_v26 = vpop.xlane.xlu1 %3348  ;;  %v4463_v13 = vmul.f32 %v8189_v12, %v11738_v6 }
 0x382   :  { %v3347_v27 = vpop.xlane.xlu0 %3346  ;;  %v7268_v30 = vpop.eup %7267  ;;  %4363 = vst.msk [vmem:[%s12939_s3 + $0x340] sm:$0xff] %vm4258_vm2, %v7266_v24  ;;  %7287 = vrcp.f32 %v3985_v20  ;;  %v3856_v31 = vmul.f32 1.442695, %v3609_v22  ;;  %v3483_v32 = vadd.f32 %v3349_v26, %v8570_v21 }
 0x383   :  { %v3482_v11 = vadd.f32 %v3347_v27, %v8570_v21  ;;  %v7270_v33 = vpop.eup %7269  ;;  %v3984_v35 = vadd.f32 1.0, %v7268_v30  ;;  %7289 = vpow2.f32 %v3850_v17  ;;  %v3854_v37 = vmul.f32 1.442695, %v3608_v25  ;;  %v8191_v30 = vld [vmem:[%s12936_s0 + $0x248] sm:$0xff] }
 0x384   :  { %v7272_v40 = vpop.eup %7271  ;;  %v3987_v41 = vadd.f32 1.0, %v7270_v33  ;;  %7291 = vpow2.f32 %v3856_v31  ;;  %v3611_v42 = vsub.f32 0.0, %v3483_v32  ;;  %4650 = vadd.xlane.f32.xlu1 %v4457_v60  ;;  %v8190_v60 = vld [vmem:[%s12936_s0 + $0x230] sm:$0xff]  ;;  %v4465_v31 = vmul.f32 %v8191_v30, %v11738_v6  ;;  %v8192_v32 = vld [vmem:[%s12936_s0 + $0x240] sm:$0xff] }
 0x385   :  { %v3610_v43 = vsub.f32 0.0, %v3482_v11  ;;  %4648 = vadd.xlane.f32.xlu0 %v4456_v23  ;;  %v7274_v1 = vpop.eup %7273  ;;  %4366 = vst.msk [vmem:[%s12939_s3 + $0x358] sm:$0xff] %vm4258_vm2, %v7272_v40  ;;  %7293 = vrcp.f32 %v3984_v35  ;;  %v3353_v44 = vpop.xlane.xlu1 %3352  ;;  %v4462_v15 = vmul.f32 %v8190_v60, %v11738_v6  ;;  %v4464_v11 = vmul.f32 %v8192_v32, %v11738_v6 }
 0x386   :  { %v3351_v45 = vpop.xlane.xlu0 %3350  ;;  %v7276_v46 = vpop.eup %7275  ;;  %4365 = vst.msk [vmem:[%s12939_s3 + $0x350] sm:$0xff] %vm4258_vm2, %v7274_v1  ;;  %7295 = vrcp.f32 %v3987_v41  ;;  %v3860_v47 = vmul.f32 1.442695, %v3611_v42  ;;  %v3485_v49 = vadd.f32 %v3353_v44, %v8570_v21 }
 0x387   :  { %v3858_v48 = vmul.f32 1.442695, %v3610_v43  ;;  %v7278_v34 = vpop.eup %7277  ;;  %v3986_v50 = vadd.f32 1.0, %v7276_v46  ;;  %7297 = vpow2.f32 %v3854_v37  ;;  %v3484_v51 = vadd.f32 %v3351_v45, %v8570_v21  ;;  %v8193_v45 = vld [vmem:[%s12936_s0 + $0x258] sm:$0xff] }
 0x388   :  { %v7280_v52 = vpop.eup %7279  ;;  %4368 = vst.msk [vmem:[%s12939_s3 + $0x368] sm:$0xff] %vm4258_vm2, %v7278_v34  ;;  %7299 = vpow2.f32 %v3860_v47  ;;  %v3613_v54 = vsub.f32 0.0, %v3485_v49  ;;  %4654 = vadd.xlane.f32.xlu1 %v4459_v29  ;;  %v4467_v46 = vmul.f32 %v8193_v45, %v11738_v6  ;;  %v8194_v34 = vld [vmem:[%s12936_s0 + $0x250] sm:$0xff] }
 0x389   :  { %4652 = vadd.xlane.f32.xlu0 %v4458_v39  ;;  %v7282_v36 = vpop.eup %7281  ;;  %7301 = vrcp.f32 %v3986_v50  ;;  %v3989_v59 = vadd.f32 1.0, %v7280_v52  ;;  %v3612_v53 = vsub.f32 0.0, %v3484_v51  ;;  %v3357_v61 = vpop.xlane.xlu1 %3356  ;;  %v4466_v50 = vmul.f32 %v8194_v34, %v11738_v6 }
 0x38a   :  { %v3355_v62 = vpop.xlane.xlu0 %3354  ;;  %v7284_v63 = vpop.eup %7283  ;;  %v3988_v0 = vadd.f32 1.0, %v7282_v36  ;;  %7303 = vpow2.f32 %v3858_v48  ;;  %v3864_v2 = vmul.f32 1.442695, %v3613_v54  ;;  %v3487_v3 = vadd.f32 %v3357_v61, %v8570_v21 }
 0x38b   :  { %v7286_v4 = vpop.eup %7285  ;;  %7305 = vrcp.f32 %v3989_v59  ;;  %v3991_v5 = vadd.f32 1.0, %v7284_v63  ;;  %v3862_v7 = vmul.f32 1.442695, %v3612_v53  ;;  %v3486_v8 = vadd.f32 %v3355_v62, %v8570_v21  ;;  %v8195_v62 = vld [vmem:[%s12936_s0 + $0x268] sm:$0xff] }
 0x38c   :  { %v7288_v9 = vpop.eup %7287  ;;  %4367 = vst.msk [vmem:[%s12939_s3 + $0x360] sm:$0xff] %vm4258_vm2, %v7286_v4  ;;  %7307 = vrcp.f32 %v3988_v0  ;;  %v3615_v10 = vsub.f32 0.0, %v3487_v3  ;;  %4658 = vadd.xlane.f32.xlu1 %v4461_v56  ;;  %v4469_v63 = vmul.f32 %v8195_v62, %v11738_v6  ;;  %v8196_v4 = vld [vmem:[%s12936_s0 + $0x260] sm:$0xff] }
 0x38d   :  { %4656 = vadd.xlane.f32.xlu0 %v4460_v58  ;;  %v7290_v16 = vpop.eup %7289  ;;  %4370 = vst.msk [vmem:[%s12939_s3 + $0x378] sm:$0xff] %vm4258_vm2, %v7288_v9  ;;  %7309 = vrcp.f32 %v3991_v5  ;;  %v3614_v17 = vsub.f32 0.0, %v3486_v8  ;;  %v3361_v18 = vpop.xlane.xlu1 %3360  ;;  %v4468_v5 = vmul.f32 %v8196_v4, %v11738_v6 }
 0x38e   :  { %v3359_v19 = vpop.xlane.xlu0 %3358  ;;  %v7292_v20 = vpop.eup %7291  ;;  %v3990_v22 = vadd.f32 1.0, %v7290_v16  ;;  %7311 = vpow2.f32 %v3864_v2  ;;  %v3868_v14 = vmul.f32 1.442695, %v3615_v10  ;;  %v3489_v23 = vadd.f32 %v3361_v18, %v8570_v21 }
 0x38f   :  { %v7294_v24 = vpop.eup %7293  ;;  %v3993_v25 = vadd.f32 1.0, %v7292_v20  ;;  %7313 = vpow2.f32 %v3862_v7  ;;  %v3866_v26 = vmul.f32 1.442695, %v3614_v17  ;;  %v3488_v27 = vadd.f32 %v3359_v19, %v8570_v21  ;;  %v8197_v20 = vld [vmem:[%s12936_s0 + $0x278] sm:$0xff] }
 0x390   :  { %v7296_v28 = vpop.eup %7295  ;;  %4369 = vst.msk [vmem:[%s12939_s3 + $0x370] sm:$0xff] %vm4258_vm2, %v7294_v24  ;;  %7315 = vrcp.f32 %v3990_v22  ;;  %v3617_v29 = vsub.f32 0.0, %v3489_v23  ;;  %4662 = vadd.xlane.f32.xlu1 %v4463_v13  ;;  %v4471_v22 = vmul.f32 %v8197_v20, %v11738_v6 }
 0x391   :  { %4660 = vadd.xlane.f32.xlu0 %v4462_v15  ;;  %v7298_v33 = vpop.eup %7297  ;;  %4372 = vst.msk [vmem:[%s12939_s3 + $0x388] sm:$0xff] %vm4258_vm2, %v7296_v28  ;;  %7317 = vrcp.f32 %v3993_v25  ;;  %v3616_v35 = vsub.f32 0.0, %v3488_v27  ;;  %v4523_v37 = vpop.xlane.xlu1 %4522 }
 0x392   :  { %v4521_v38 = vpop.xlane.xlu0 %4520  ;;  %v7300_v39 = vpop.eup %7299  ;;  %v3992_v40 = vadd.f32 1.0, %v7298_v33  ;;  %7319 = vpow2.f32 %v3868_v14  ;;  %v3872_v41 = vmul.f32 1.442695, %v3617_v29  ;;  %v4777_v42 = vadd.f32 %v4523_v37, %v8570_v21  ;;  %v8198_v14 = vld [vmem:[%s12936_s0 + $0x270] sm:$0xff] }
 0x393   :  { %v7302_v43 = vpop.eup %7301  ;;  %v3995_v1 = vadd.f32 1.0, %v7300_v39  ;;  %7321 = vpow2.f32 %v3866_v26  ;;  %v4776_v44 = vadd.f32 %v4521_v38, %v8570_v21  ;;  %v3870_v48 = vmul.f32 1.442695, %v3616_v35  ;;  %v8199_v38 = vld [vmem:[%s12936_s0 + $0x288] sm:$0xff] }
 0x394   :  { %v7304_v47 = vpop.eup %7303  ;;  %4371 = vst.msk [vmem:[%s12939_s3 + $0x380] sm:$0xff] %vm4258_vm2, %v7302_v43  ;;  %7323 = vrcp.f32 %v3992_v40  ;;  %v4905_v49 = vsub.f32 0.0, %v4777_v42  ;;  %4666 = vadd.xlane.f32.xlu1 %v4465_v31  ;;  %v4470_v23 = vmul.f32 %v8198_v14, %v11738_v6  ;;  %v4473_v39 = vmul.f32 %v8199_v38, %v11738_v6  ;;  %v8200_v43 = vld [vmem:[%s12936_s0 + $0x280] sm:$0xff] }
 0x395   :  { %4664 = vadd.xlane.f32.xlu0 %v4464_v11  ;;  %v7306_v51 = vpop.eup %7305  ;;  %7325 = vrcp.f32 %v3995_v1  ;;  %v3994_v52 = vadd.f32 1.0, %v7304_v47  ;;  %v4904_v54 = vsub.f32 0.0, %v4776_v44  ;;  %v4527_v55 = vpop.xlane.xlu1 %4526  ;;  %v4472_v1 = vmul.f32 %v8200_v43, %v11738_v6 }
 0x396   :  { %v4525_v56 = vpop.xlane.xlu0 %4524  ;;  %v7308_v57 = vpop.eup %7307  ;;  %4374 = vst.msk [vmem:[%s12939_s3 + $0x398] sm:$0xff] %vm4258_vm2, %v7306_v51  ;;  %7327 = vpow2.f32 %v3872_v41  ;;  %v5034_v58 = vmul.f32 1.442695, %v4905_v49  ;;  %v4779_v36 = vadd.f32 %v4527_v55, %v8570_v21 }
 0x397   :  { %v4778_v59 = vadd.f32 %v4525_v56, %v8570_v21  ;;  %v7310_v53 = vpop.eup %7309  ;;  %4373 = vst.msk [vmem:[%s12939_s3 + $0x390] sm:$0xff] %vm4258_vm2, %v7308_v57  ;;  %7329 = vrcp.f32 %v3994_v52  ;;  %v5032_v61 = vmul.f32 1.442695, %v4904_v54  ;;  %v8202_v56 = vld [vmem:[%s12936_s0 + $0x290] sm:$0xff] }
 0x398   :  { %v7312_v0 = vpop.eup %7311  ;;  %4376 = vst.msk [vmem:[%s12939_s3 + $0x3a8] sm:$0xff] %vm4258_vm2, %v7310_v53  ;;  %7331 = vpow2.f32 %v3870_v48  ;;  %v4907_v2 = vsub.f32 0.0, %v4779_v36  ;;  %4670 = vadd.xlane.f32.xlu1 %v4467_v46  ;;  %v4474_v57 = vmul.f32 %v8202_v56, %v11738_v6 }
 0x399   :  { %v4906_v3 = vsub.f32 0.0, %v4778_v59  ;;  %4668 = vadd.xlane.f32.xlu0 %v4466_v50  ;;  %v7314_v7 = vpop.eup %7313  ;;  %v3997_v8 = vadd.f32 1.0, %v7312_v0  ;;  %7333 = vpow2.f32 %v5034_v58  ;;  %v4531_v9 = vpop.xlane.xlu1 %4530  ;;  %v8201_v50 = vld [vmem:[%s12936_s0 + $0x298] sm:$0xff] }
 0x39a   :  { %v4529_v10 = vpop.xlane.xlu0 %4528  ;;  %v7316_v12 = vpop.eup %7315  ;;  %v3996_v13 = vadd.f32 1.0, %v7314_v7  ;;  %7335 = vpow2.f32 %v5032_v61  ;;  %v5038_v60 = vmul.f32 1.442695, %v4907_v2  ;;  %v4781_v17 = vadd.f32 %v4531_v9, %v8570_v21 }
 0x39b   :  { %v5036_v15 = vmul.f32 1.442695, %v4906_v3  ;;  %v7318_v16 = vpop.eup %7317  ;;  %4375 = vst.msk [vmem:[%s12939_s3 + $0x3a0] sm:$0xff] %vm4258_vm2, %v7316_v12  ;;  %7337 = vrcp.f32 %v3997_v8  ;;  %v4780_v18 = vadd.f32 %v4529_v10, %v8570_v21  ;;  %v4475_v51 = vmul.f32 %v8201_v50, %v11738_v6  ;;  %v8203_v10 = vld [vmem:[%s12936_s0 + $0x2a8] sm:$0xff] }
 0x39c   :  { %v7320_v19 = vpop.eup %7319  ;;  %4378 = vst.msk [vmem:[%s12939_s3 + $0x3b8] sm:$0xff] %vm4258_vm2, %v7318_v16  ;;  %7339 = vrcp.f32 %v3996_v13  ;;  %4674 = vadd.xlane.f32.xlu1 %v4469_v63  ;;  %v4909_v26 = vsub.f32 0.0, %v4781_v17  ;;  %v4477_v12 = vmul.f32 %v8203_v10, %v11738_v6  ;;  %v8204_v13 = vld [vmem:[%s12936_s0 + $0x2a0] sm:$0xff] }
 0x39d   :  { %4672 = vadd.xlane.f32.xlu0 %v4468_v5  ;;  %v7322_v24 = vpop.eup %7321  ;;  %v3999_v25 = vadd.f32 1.0, %v7320_v19  ;;  %7341 = vpow2.f32 %v5038_v60  ;;  %v4908_v27 = vsub.f32 0.0, %v4780_v18  ;;  %v4535_v28 = vpop.xlane.xlu1 %4534  ;;  %v4476_v60 = vmul.f32 %v8204_v13, %v11738_v6 }
 0x39e   :  { %v4533_v29 = vpop.xlane.xlu0 %4532  ;;  %v7324_v30 = vpop.eup %7323  ;;  %v3998_v31 = vadd.f32 1.0, %v7322_v24  ;;  %7343 = vpow2.f32 %v5036_v15  ;;  %v4783_v32 = vadd.f32 %v4535_v28, %v8570_v21  ;;  %v5042_v35 = vmul.f32 1.442695, %v4909_v26  ;;  %v12135_v28 = vld [vmem:[%s12937_s1 + $0x3] ss:$0 sm:$0xff] }
 0x39f   :  { %v4782_v11 = vadd.f32 %v4533_v29, %v8570_v21  ;;  %v7326_v33 = vpop.eup %7325  ;;  %4377 = vst.msk [vmem:[%s12939_s3 + $0x3b0] sm:$0xff] %vm4258_vm2, %v7324_v30  ;;  %7345 = vrcp.f32 %v3999_v25  ;;  %v5040_v37 = vmul.f32 1.442695, %v4908_v27  ;;  %v8205_v27 = vld [vmem:[%s12936_s0 + $0x2b8] sm:$0xff]  ;;  %v8207_v30 = vld [vmem:[%s12936_s0 + $0x2b0] sm:$0xff] }
 0x3a0   :  { %v7328_v40 = vpop.eup %7327  ;;  %4380 = vst.msk [vmem:[%s12939_s3 + $0x3c8] sm:$0xff] %vm4258_vm2, %v7326_v33  ;;  %7347 = vrcp.f32 %v3998_v31  ;;  %v4911_v41 = vsub.f32 0.0, %v4783_v32  ;;  %4678 = vadd.xlane.f32.xlu1 %v4471_v22  ;;  %v4479_v29 = vmul.f32 %v12135_v28, %v8205_v27  ;;  %v4478_v31 = vmul.f32 %v8207_v30, %v12135_v28 }
 0x3a1   :  { %v4910_v42 = vsub.f32 0.0, %v4782_v11  ;;  %4676 = vadd.xlane.f32.xlu0 %v4470_v23  ;;  %v7330_v44 = vpop.eup %7329  ;;  %v4001_v45 = vadd.f32 1.0, %v7328_v40  ;;  %7349 = vpow2.f32 %v5042_v35  ;;  %v4539_v46 = vpop.xlane.xlu1 %4538 }
 0x3a2   :  { %v4537_v47 = vpop.xlane.xlu0 %4536  ;;  %v7332_v48 = vpop.eup %7331  ;;  %4379 = vst.msk [vmem:[%s12939_s3 + $0x3c0] sm:$0xff] %vm4258_vm2, %v7330_v44  ;;  %7351 = vpow2.f32 %v5040_v37  ;;  %v5046_v49 = vmul.f32 1.442695, %v4911_v41  ;;  %v4785_v34 = vadd.f32 %v4539_v46, %v8570_v21 }
 0x3a3   :  { %v7334_v52 = vpop.eup %7333  ;;  %7353 = vrcp.f32 %v4001_v45  ;;  %v4000_v54 = vadd.f32 1.0, %v7332_v48  ;;  %v4784_v55 = vadd.f32 %v4537_v47, %v8570_v21  ;;  %v5044_v59 = vmul.f32 1.442695, %v4910_v42  ;;  %v8208_v48 = vld [vmem:[%s12936_s0 + $0x2c8] sm:$0xff] }
 0x3a4   :  { %v7336_v58 = vpop.eup %7335  ;;  %v5289_v36 = vadd.f32 1.0, %v7334_v52  ;;  %7355 = vpow2.f32 %v5046_v49  ;;  %v4913_v53 = vsub.f32 0.0, %v4785_v34  ;;  %4682 = vadd.xlane.f32.xlu1 %v4473_v39  ;;  %v4481_v49 = vmul.f32 %v8208_v48, %v12135_v28  ;;  %v8209_v52 = vld [vmem:[%s12936_s0 + $0x2c0] sm:$0xff] }
 0x3a5   :  { %4680 = vadd.xlane.f32.xlu0 %v4472_v1  ;;  %v7338_v61 = vpop.eup %7337  ;;  %7357 = vrcp.f32 %v4000_v54  ;;  %v5288_v62 = vadd.f32 1.0, %v7336_v58  ;;  %v4912_v63 = vsub.f32 0.0, %v4784_v55  ;;  %v4543_v0 = vpop.xlane.xlu1 %4542  ;;  %v4480_v54 = vmul.f32 %v8209_v52, %v12135_v28 }
 0x3a6   :  { %v4541_v2 = vpop.xlane.xlu0 %4540  ;;  %v7340_v3 = vpop.eup %7339  ;;  %4382 = vst.msk [vmem:[%s12939_s3 + $0x3d8] sm:$0xff] %vm4258_vm2, %v7338_v61  ;;  %7359 = vrcp.f32 %v5289_v36  ;;  %v5050_v4 = vmul.f32 1.442695, %v4913_v53  ;;  %v4787_v5 = vadd.f32 %v4543_v0, %v8570_v21  ;;  %v8210_v53 = vld [vmem:[%s12936_s0 + $0x2d8] sm:$0xff] }
 0x3a7   :  { %v4786_v7 = vadd.f32 %v4541_v2, %v8570_v21  ;;  %v7342_v8 = vpop.eup %7341  ;;  %4381 = vst.msk [vmem:[%s12939_s3 + $0x3d0] sm:$0xff] %vm4258_vm2, %v7340_v3  ;;  %7361 = vrcp.f32 %v5288_v62  ;;  %v5048_v9 = vmul.f32 1.442695, %v4912_v63  ;;  %v4483_v61 = vmul.f32 %v8210_v53, %v12135_v28 }
 0x3a8   :  { %v7344_v15 = vpop.eup %7343  ;;  %v5291_v16 = vadd.f32 1.0, %v7342_v8  ;;  %7363 = vpow2.f32 %v5044_v59  ;;  %v4915_v17 = vsub.f32 0.0, %v4787_v5  ;;  %4686 = vadd.xlane.f32.xlu1 %v4475_v51 }
 0x3a9   :  { %v4914_v18 = vsub.f32 0.0, %v4786_v7  ;;  %4684 = vadd.xlane.f32.xlu0 %v4474_v57  ;;  %v7346_v19 = vpop.eup %7345  ;;  %v5290_v20 = vadd.f32 1.0, %v7344_v15  ;;  %7365 = vpow2.f32 %v5050_v4  ;;  %v4547_v22 = vpop.xlane.xlu1 %4546  ;;  %v8211_v7 = vld [vmem:[%s12936_s0 + $0x2d0] sm:$0xff] }
 0x3aa   :  { %v4545_v14 = vpop.xlane.xlu0 %4544  ;;  %v7348_v23 = vpop.eup %7347  ;;  %4384 = vst.msk [vmem:[%s12939_s3 + $0x3e8] sm:$0xff] %vm4258_vm2, %v7346_v19  ;;  %7367 = vrcp.f32 %v5291_v16  ;;  %v5054_v6 = vmul.f32 1.442695, %v4915_v17  ;;  %v4789_v24 = vadd.f32 %v4547_v22, %v8570_v21  ;;  %v4482_v8 = vmul.f32 %v8211_v7, %v12135_v28 }
 0x3ab   :  { %v7350_v25 = vpop.eup %7349  ;;  %4383 = vst.msk [vmem:[%s12939_s3 + $0x3e0] sm:$0xff] %vm4258_vm2, %v7348_v23  ;;  %7369 = vrcp.f32 %v5290_v20  ;;  %v4788_v26 = vadd.f32 %v4545_v14, %v8570_v21  ;;  %v5052_v33 = vmul.f32 1.442695, %v4914_v18  ;;  %v8213_v23 = vld [vmem:[%s12936_s0 + $0x2e0] sm:$0xff] }
 0x3ac   :  { %v7352_v32 = vpop.eup %7351  ;;  %v5293_v11 = vadd.f32 1.0, %v7350_v25  ;;  %7371 = vpow2.f32 %v5048_v9  ;;  %v4917_v35 = vsub.f32 0.0, %v4789_v24  ;;  %4690 = vadd.xlane.f32.xlu1 %v4477_v12 }
 0x3ad   :  { %4688 = vadd.xlane.f32.xlu0 %v4476_v60  ;;  %v7354_v37 = vpop.eup %7353  ;;  %v5292_v38 = vadd.f32 1.0, %v7352_v32  ;;  %7373 = vpow2.f32 %v5054_v6  ;;  %v4916_v39 = vsub.f32 0.0, %v4788_v26  ;;  %v4551_v40 = vpop.xlane.xlu1 %4550  ;;  %v8212_v60 = vld [vmem:[%s12936_s0 + $0x2e8] sm:$0xff]  ;;  %v4484_v6 = vmul.f32 %v8213_v23, %v12135_v28 }
 0x3ae   :  { %v4549_v41 = vpop.xlane.xlu0 %4548  ;;  %v7356_v42 = vpop.eup %7355  ;;  %4386 = vst.msk [vmem:[%s12939_s3 + $0x3f8] sm:$0xff] %vm4258_vm2, %v7354_v37  ;;  %7375 = vrcp.f32 %v5293_v11  ;;  %v5058_v43 = vmul.f32 1.442695, %v4917_v35  ;;  %v4791_v1 = vadd.f32 %v4551_v40, %v8570_v21  ;;  %v4485_v15 = vmul.f32 %v8212_v60, %v12135_v28 }
 0x3af   :  { %v4790_v44 = vadd.f32 %v4549_v41, %v8570_v21  ;;  %v7358_v45 = vpop.eup %7357  ;;  %7377 = vrcp.f32 %v5292_v38  ;;  %v5295_v46 = vadd.f32 1.0, %v7356_v42  ;;  %v5056_v47 = vmul.f32 1.442695, %v4916_v39  ;;  %v8214_v42 = vld [vmem:[%s12936_s0 + $0x2f8] sm:$0xff] }
 0x3b0   :  { %v7360_v34 = vpop.eup %7359  ;;  %4385 = vst.msk [vmem:[%s12939_s3 + $0x3f0] sm:$0xff] %vm4258_vm2, %v7358_v45  ;;  %7379 = vpow2.f32 %v5052_v33  ;;  %v4919_v50 = vsub.f32 0.0, %v4791_v1  ;;  %4694 = vadd.xlane.f32.xlu1 %v4479_v29  ;;  %v8215_v1 = vld [vmem:[%s12936_s0 + $0x2f0] sm:$0xff] }
 0x3b1   :  { %v4918_v51 = vsub.f32 0.0, %v4790_v44  ;;  %4692 = vadd.xlane.f32.xlu0 %v4478_v31  ;;  %v7362_v55 = vpop.eup %7361  ;;  %5674 = vst.msk [vmem:[%s12939_s3 + $0x8] sm:$0xff] %vm5672_vm3, %v7360_v34  ;;  %7381 = vrcp.f32 %v5295_v46  ;;  %v4555_v56 = vpop.xlane.xlu1 %4554  ;;  %v4486_v44 = vmul.f32 %v8215_v1, %v12135_v28 }
 0x3b2   :  { %v4553_v57 = vpop.xlane.xlu0 %4552  ;;  %v7364_v58 = vpop.eup %7363  ;;  %5673 = vst.msk [vmem:[%s12939_s3] sm:$0xff] %vm5672_vm3, %v7362_v55  ;;  %7383 = vpow2.f32 %v5058_v43  ;;  %v5062_v36 = vmul.f32 1.442695, %v4919_v50  ;;  %v4793_v59 = vadd.f32 %v4555_v56, %v8570_v21  ;;  %v4487_v43 = vmul.f32 %v8214_v42, %v12135_v28 }
 0x3b3   :  { %v7366_v62 = vpop.eup %7365  ;;  %v5294_v63 = vadd.f32 1.0, %v7364_v58  ;;  %7385 = vpow2.f32 %v5056_v47  ;;  %v5060_v0 = vmul.f32 1.442695, %v4918_v51  ;;  %v4792_v2 = vadd.f32 %v4553_v57, %v8570_v21 }
 0x3b4   :  { %v7368_v3 = vpop.eup %7367  ;;  %v5297_v4 = vadd.f32 1.0, %v7366_v62  ;;  %7387 = vpow2.f32 %v5062_v36  ;;  %v4921_v5 = vsub.f32 0.0, %v4793_v59  ;;  %4698 = vadd.xlane.f32.xlu1 %v4481_v49  ;;  %v8216_v59 = vld [vmem:[%s12936_s0 + $0x308] sm:$0xff] }
 0x3b5   :  { %4696 = vadd.xlane.f32.xlu0 %v4480_v54  ;;  %v7370_v9 = vpop.eup %7369  ;;  %5676 = vst.msk [vmem:[%s12939_s3 + $0x18] sm:$0xff] %vm5672_vm3, %v7368_v3  ;;  %7389 = vrcp.f32 %v5294_v63  ;;  %v4920_v10 = vsub.f32 0.0, %v4792_v2  ;;  %v4559_v12 = vpop.xlane.xlu1 %4558  ;;  %v4489_v53 = vmul.f32 %v8216_v59, %v12135_v28 }
 0x3b6   :  { %v4557_v13 = vpop.xlane.xlu0 %4556  ;;  %v7372_v16 = vpop.eup %7371  ;;  %5675 = vst.msk [vmem:[%s12939_s3 + $0x10] sm:$0xff] %vm5672_vm3, %v7370_v9  ;;  %7391 = vrcp.f32 %v5297_v4  ;;  %v5066_v17 = vmul.f32 1.442695, %v4921_v5  ;;  %v4795_v18 = vadd.f32 %v4559_v12, %v8570_v21 }
 0x3b7   :  { %v4794_v19 = vadd.f32 %v4557_v13, %v8570_v21  ;;  %v7374_v20 = vpop.eup %7373  ;;  %v5296_v22 = vadd.f32 1.0, %v7372_v16  ;;  %7393 = vpow2.f32 %v5060_v0  ;;  %v5064_v14 = vmul.f32 1.442695, %v4920_v10  ;;  %v8218_v16 = vld [vmem:[%s12936_s0 + $0x318] sm:$0xff] }
 0x3b8   :  { %v7376_v24 = vpop.eup %7375  ;;  %v5299_v25 = vadd.f32 1.0, %v7374_v20  ;;  %7395 = vpow2.f32 %v5066_v17  ;;  %v4923_v26 = vsub.f32 0.0, %v4795_v18  ;;  %4702 = vadd.xlane.f32.xlu1 %v4483_v61  ;;  %v8217_v61 = vld [vmem:[%s12936_s0 + $0x300] sm:$0xff]  ;;  %v4491_v17 = vmul.f32 %v8218_v16, %v12135_v28  ;;  %v8219_v18 = vld [vmem:[%s12936_s0 + $0x310] sm:$0xff] }
 0x3b9   :  { %v4922_v27 = vsub.f32 0.0, %v4794_v19  ;;  %4700 = vadd.xlane.f32.xlu0 %v4482_v8  ;;  %v7378_v29 = vpop.eup %7377  ;;  %5678 = vst.msk [vmem:[%s12939_s3 + $0x28] sm:$0xff] %vm5672_vm3, %v7376_v24  ;;  %7397 = vrcp.f32 %v5296_v22  ;;  %v4563_v30 = vpop.xlane.xlu1 %4562  ;;  %v4488_v62 = vmul.f32 %v8217_v61, %v12135_v28  ;;  %v4490_v19 = vmul.f32 %v8219_v18, %v12135_v28 }
 0x3ba   :  { %v4561_v31 = vpop.xlane.xlu0 %4560  ;;  %v7380_v32 = vpop.eup %7379  ;;  %5677 = vst.msk [vmem:[%s12939_s3 + $0x20] sm:$0xff] %vm5672_vm3, %v7378_v29  ;;  %7399 = vrcp.f32 %v5299_v25  ;;  %v5070_v11 = vmul.f32 1.442695, %v4923_v26  ;;  %v4797_v35 = vadd.f32 %v4563_v30, %v8570_v21 }
 0x3bb   :  { %v5068_v33 = vmul.f32 1.442695, %v4922_v27  ;;  %v7382_v37 = vpop.eup %7381  ;;  %v5298_v38 = vadd.f32 1.0, %v7380_v32  ;;  %7401 = vpow2.f32 %v5064_v14  ;;  %v4796_v39 = vadd.f32 %v4561_v31, %v8570_v21  ;;  %v8220_v31 = vld [vmem:[%s12936_s0 + $0x328] sm:$0xff] }
 0x3bc   :  { %v7384_v40 = vpop.eup %7383  ;;  %5680 = vst.msk [vmem:[%s12939_s3 + $0x38] sm:$0xff] %vm5672_vm3, %v7382_v37  ;;  %7403 = vpow2.f32 %v5070_v11  ;;  %v4925_v41 = vsub.f32 0.0, %v4797_v35  ;;  %4706 = vadd.xlane.f32.xlu1 %v4485_v15  ;;  %v4493_v32 = vmul.f32 %v8220_v31, %v12135_v28  ;;  %v8221_v37 = vld [vmem:[%s12936_s0 + $0x320] sm:$0xff] }
 0x3bd   :  { %4704 = vadd.xlane.f32.xlu0 %v4484_v6  ;;  %v7386_v45 = vpop.eup %7385  ;;  %7405 = vrcp.f32 %v5298_v38  ;;  %v5301_v46 = vadd.f32 1.0, %v7384_v40  ;;  %v4924_v47 = vsub.f32 0.0, %v4796_v39  ;;  %v4567_v48 = vpop.xlane.xlu1 %4566  ;;  %v4492_v38 = vmul.f32 %v8221_v37, %v12135_v28 }
 0x3be   :  { %v4565_v49 = vpop.xlane.xlu0 %4564  ;;  %v7388_v34 = vpop.eup %7387  ;;  %v5300_v50 = vadd.f32 1.0, %v7386_v45  ;;  %7407 = vpow2.f32 %v5068_v33  ;;  %v5074_v51 = vmul.f32 1.442695, %v4925_v41  ;;  %v4799_v52 = vadd.f32 %v4567_v48, %v8570_v21 }
 0x3bf   :  { %v7390_v54 = vpop.eup %7389  ;;  %7409 = vrcp.f32 %v5301_v46  ;;  %v5303_v55 = vadd.f32 1.0, %v7388_v34  ;;  %v5072_v56 = vmul.f32 1.442695, %v4924_v47  ;;  %v4798_v57 = vadd.f32 %v4565_v49, %v8570_v21  ;;  %v8222_v49 = vld [vmem:[%s12936_s0 + $0x338] sm:$0xff] }
 0x3c0   :  { %v7392_v58 = vpop.eup %7391  ;;  %5679 = vst.msk [vmem:[%s12939_s3 + $0x30] sm:$0xff] %vm5672_vm3, %v7390_v54  ;;  %7411 = vrcp.f32 %v5300_v50  ;;  %v4927_v36 = vsub.f32 0.0, %v4799_v52  ;;  %4710 = vadd.xlane.f32.xlu1 %v4487_v43  ;;  %v4495_v34 = vmul.f32 %v8222_v49, %v12135_v28  ;;  %v8223_v54 = vld [vmem:[%s12936_s0 + $0x330] sm:$0xff] }
 0x3c1   :  { %4708 = vadd.xlane.f32.xlu0 %v4486_v44  ;;  %v7394_v63 = vpop.eup %7393  ;;  %5682 = vst.msk [vmem:[%s12939_s3 + $0x48] sm:$0xff] %vm5672_vm3, %v7392_v58  ;;  %7413 = vrcp.f32 %v5303_v55  ;;  %v4926_v0 = vsub.f32 0.0, %v4798_v57  ;;  %v4571_v2 = vpop.xlane.xlu1 %4570  ;;  %v4494_v55 = vmul.f32 %v8223_v54, %v12135_v28 }
 0x3c2   :  { %v4569_v3 = vpop.xlane.xlu0 %4568  ;;  %v7396_v4 = vpop.eup %7395  ;;  %v5302_v5 = vadd.f32 1.0, %v7394_v63  ;;  %7415 = vpow2.f32 %v5074_v51  ;;  %v5078_v7 = vmul.f32 1.442695, %v4927_v36  ;;  %v4801_v8 = vadd.f32 %v4571_v2, %v8570_v21 }
 0x3c3   :  { %v7398_v9 = vpop.eup %7397  ;;  %v5305_v10 = vadd.f32 1.0, %v7396_v4  ;;  %7417 = vpow2.f32 %v5072_v56  ;;  %v5076_v12 = vmul.f32 1.442695, %v4926_v0  ;;  %v4800_v13 = vadd.f32 %v4569_v3, %v8570_v21  ;;  %v8224_v4 = vld [vmem:[%s12936_s0 + $0x348] sm:$0xff] }
 0x3c4   :  { %v7400_v60 = vpop.eup %7399  ;;  %5681 = vst.msk [vmem:[%s12939_s3 + $0x40] sm:$0xff] %vm5672_vm3, %v7398_v9  ;;  %7419 = vrcp.f32 %v5302_v5  ;;  %v4929_v15 = vsub.f32 0.0, %v4801_v8  ;;  %4714 = vadd.xlane.f32.xlu1 %v4489_v53  ;;  %v4497_v5 = vmul.f32 %v8224_v4, %v12135_v28 }
 0x3c5   :  { %4712 = vadd.xlane.f32.xlu0 %v4488_v62  ;;  %v7402_v20 = vpop.eup %7401  ;;  %5684 = vst.msk [vmem:[%s12939_s3 + $0x58] sm:$0xff] %vm5672_vm3, %v7400_v60  ;;  %7421 = vrcp.f32 %v5305_v10  ;;  %v4928_v22 = vsub.f32 0.0, %v4800_v13  ;;  %v4575_v14 = vpop.xlane.xlu1 %4574 }
 0x3c6   :  { %v4573_v23 = vpop.xlane.xlu0 %4572  ;;  %v7404_v6 = vpop.eup %7403  ;;  %v5304_v24 = vadd.f32 1.0, %v7402_v20  ;;  %7423 = vpow2.f32 %v5078_v7  ;;  %v5082_v25 = vmul.f32 1.442695, %v4929_v15  ;;  %v4803_v26 = vadd.f32 %v4575_v14, %v8570_v21  ;;  %v8225_v7 = vld [vmem:[%s12936_s0 + $0x340] sm:$0xff] }
 0x3c7   :  { %v7406_v27 = vpop.eup %7405  ;;  %v5307_v29 = vadd.f32 1.0, %v7404_v6  ;;  %7425 = vpow2.f32 %v5076_v12  ;;  %v4802_v30 = vadd.f32 %v4573_v23, %v8570_v21  ;;  %v5080_v33 = vmul.f32 1.442695, %v4928_v22  ;;  %v8226_v23 = vld [vmem:[%s12936_s0 + $0x358] sm:$0xff] }
 0x3c8   :  { %v7408_v11 = vpop.eup %7407  ;;  %5683 = vst.msk [vmem:[%s12939_s3 + $0x50] sm:$0xff] %vm5672_vm3, %v7406_v27  ;;  %7427 = vrcp.f32 %v5304_v24  ;;  %v4931_v35 = vsub.f32 0.0, %v4803_v26  ;;  %4718 = vadd.xlane.f32.xlu1 %v4491_v17  ;;  %v4496_v8 = vmul.f32 %v8225_v7, %v12135_v28  ;;  %v4499_v6 = vmul.f32 %v8226_v23, %v12135_v28  ;;  %v8227_v27 = vld [vmem:[%s12936_s0 + $0x350] sm:$0xff] }
 0x3c9   :  { %4716 = vadd.xlane.f32.xlu0 %v4490_v19  ;;  %v7410_v39 = vpop.eup %7409  ;;  %7429 = vrcp.f32 %v5307_v29  ;;  %v5306_v40 = vadd.f32 1.0, %v7408_v11  ;;  %v4930_v41 = vsub.f32 0.0, %v4802_v30  ;;  %v4579_v42 = vpop.xlane.xlu1 %4578  ;;  %v4498_v29 = vmul.f32 %v8227_v27, %v12135_v28 }
 0x3ca   :  { %v4577_v43 = vpop.xlane.xlu0 %4576  ;;  %v7412_v1 = vpop.eup %7411  ;;  %5686 = vst.msk [vmem:[%s12939_s3 + $0x68] sm:$0xff] %vm5672_vm3, %v7410_v39  ;;  %7431 = vpow2.f32 %v5082_v25  ;;  %v5086_v44 = vmul.f32 1.442695, %v4931_v35  ;;  %v4805_v45 = vadd.f32 %v4579_v42, %v8570_v21 }
 0x3cb   :  { %v4804_v46 = vadd.f32 %v4577_v43, %v8570_v21  ;;  %v7414_v47 = vpop.eup %7413  ;;  %5685 = vst.msk [vmem:[%s12939_s3 + $0x60] sm:$0xff] %vm5672_vm3, %v7412_v1  ;;  %7433 = vrcp.f32 %v5306_v40  ;;  %v5084_v48 = vmul.f32 1.442695, %v4930_v41  ;;  %v8229_v43 = vld [vmem:[%s12936_s0 + $0x360] sm:$0xff] }
 0x3cc   :  { %v7416_v50 = vpop.eup %7415  ;;  %5688 = vst.msk [vmem:[%s12939_s3 + $0x78] sm:$0xff] %vm5672_vm3, %v7414_v47  ;;  %7435 = vpow2.f32 %v5080_v33  ;;  %v4933_v51 = vsub.f32 0.0, %v4805_v45  ;;  %4722 = vadd.xlane.f32.xlu1 %v4493_v32  ;;  %v4500_v1 = vmul.f32 %v8229_v43, %v12135_v28 }
 0x3cd   :  { %v4932_v52 = vsub.f32 0.0, %v4804_v46  ;;  %4720 = vadd.xlane.f32.xlu0 %v4492_v38  ;;  %v7418_v56 = vpop.eup %7417  ;;  %v5309_v57 = vadd.f32 1.0, %v7416_v50  ;;  %7437 = vpow2.f32 %v5086_v44  ;;  %v4583_v58 = vpop.xlane.xlu1 %4582  ;;  %v8228_v38 = vld [vmem:[%s12936_s0 + $0x368] sm:$0xff] }
 0x3ce   :  { %v4581_v36 = vpop.xlane.xlu0 %4580  ;;  %v7420_v59 = vpop.eup %7419  ;;  %v5308_v53 = vadd.f32 1.0, %v7418_v56  ;;  %7439 = vpow2.f32 %v5084_v48  ;;  %v5090_v61 = vmul.f32 1.442695, %v4933_v51  ;;  %v4807_v0 = vadd.f32 %v4583_v58, %v8570_v21 }
 0x3cf   :  { %v5088_v62 = vmul.f32 1.442695, %v4932_v52  ;;  %v7422_v63 = vpop.eup %7421  ;;  %5687 = vst.msk [vmem:[%s12939_s3 + $0x70] sm:$0xff] %vm5672_vm3, %v7420_v59  ;;  %7441 = vrcp.f32 %v5309_v57  ;;  %v4806_v2 = vadd.f32 %v4581_v36, %v8570_v21  ;;  %v4501_v39 = vmul.f32 %v8228_v38, %v12135_v28  ;;  %v8230_v36 = vld [vmem:[%s12936_s0 + $0x378] sm:$0xff] }
 0x3d0   :  { %v7424_v3 = vpop.eup %7423  ;;  %5690 = vst.msk [vmem:[%s12939_s3 + $0x88] sm:$0xff] %vm5672_vm3, %v7422_v63  ;;  %7443 = vrcp.f32 %v5308_v53  ;;  %4726 = vadd.xlane.f32.xlu1 %v4495_v34  ;;  %v4935_v12 = vsub.f32 0.0, %v4807_v0  ;;  %v4503_v59 = vmul.f32 %v8230_v36, %v12135_v28  ;;  %v8231_v53 = vld [vmem:[%s12936_s0 + $0x370] sm:$0xff] }
 0x3d1   :  { %4724 = vadd.xlane.f32.xlu0 %v4494_v55  ;;  %v7426_v9 = vpop.eup %7425  ;;  %v5311_v10 = vadd.f32 1.0, %v7424_v3  ;;  %7445 = vpow2.f32 %v5090_v61  ;;  %v4934_v13 = vsub.f32 0.0, %v4806_v2  ;;  %v4587_v60 = vpop.xlane.xlu1 %4586  ;;  %v4502_v61 = vmul.f32 %v8231_v53, %v12135_v28 }
 0x3d2   :  { %v4585_v15 = vpop.xlane.xlu0 %4584  ;;  %v7428_v16 = vpop.eup %7427  ;;  %v5310_v17 = vadd.f32 1.0, %v7426_v9  ;;  %7447 = vpow2.f32 %v5088_v62  ;;  %v4809_v18 = vadd.f32 %v4587_v60, %v8570_v21  ;;  %v5094_v22 = vmul.f32 1.442695, %v4935_v12  ;;  %v8232_v60 = vld [vmem:[%s12936_s0 + $0x388] sm:$0xff] }
 0x3d3   :  { %v4808_v19 = vadd.f32 %v4585_v15, %v8570_v21  ;;  %v7430_v20 = vpop.eup %7429  ;;  %5689 = vst.msk [vmem:[%s12939_s3 + $0x80] sm:$0xff] %vm5672_vm3, %v7428_v16  ;;  %7449 = vrcp.f32 %v5311_v10  ;;  %v5092_v14 = vmul.f32 1.442695, %v4934_v13  ;;  %v4505_v15 = vmul.f32 %v8232_v60, %v12135_v28  ;;  %v8233_v16 = vld [vmem:[%s12936_s0 + $0x380] sm:$0xff] }
 0x3d4   :  { %v7432_v24 = vpop.eup %7431  ;;  %5692 = vst.msk [vmem:[%s12939_s3 + $0x98] sm:$0xff] %vm5672_vm3, %v7430_v20  ;;  %7451 = vrcp.f32 %v5310_v17  ;;  %v4937_v25 = vsub.f32 0.0, %v4809_v18  ;;  %4730 = vadd.xlane.f32.xlu1 %v4497_v5  ;;  %v4504_v17 = vmul.f32 %v8233_v16, %v12135_v28 }
 0x3d5   :  { %v4936_v26 = vsub.f32 0.0, %v4808_v19  ;;  %4728 = vadd.xlane.f32.xlu0 %v4496_v8  ;;  %v7434_v30 = vpop.eup %7433  ;;  %v5313_v31 = vadd.f32 1.0, %v7432_v24  ;;  %7453 = vpow2.f32 %v5094_v22  ;;  %v4591_v32 = vpop.xlane.xlu1 %4590 }
 0x3d6   :  { %v4589_v11 = vpop.xlane.xlu0 %4588  ;;  %v7436_v33 = vpop.eup %7435  ;;  %5691 = vst.msk [vmem:[%s12939_s3 + $0x90] sm:$0xff] %vm5672_vm3, %v7434_v30  ;;  %7455 = vpow2.f32 %v5092_v14  ;;  %v5098_v35 = vmul.f32 1.442695, %v4937_v25  ;;  %v4811_v37 = vadd.f32 %v4591_v32, %v8570_v21 }
 0x3d7   :  { %v7438_v40 = vpop.eup %7437  ;;  %7457 = vrcp.f32 %v5313_v31  ;;  %v5312_v41 = vadd.f32 1.0, %v7436_v33  ;;  %v4810_v42 = vadd.f32 %v4589_v11, %v8570_v21  ;;  %v5096_v46 = vmul.f32 1.442695, %v4936_v26  ;;  %v8234_v33 = vld [vmem:[%s12936_s0 + $0x398] sm:$0xff] }
 0x3d8   :  { %v7440_v44 = vpop.eup %7439  ;;  %v5315_v45 = vadd.f32 1.0, %v7438_v40  ;;  %7459 = vpow2.f32 %v5098_v35  ;;  %v4939_v47 = vsub.f32 0.0, %v4811_v37  ;;  %4734 = vadd.xlane.f32.xlu1 %v4499_v6  ;;  %v4507_v35 = vmul.f32 %v8234_v33, %v12135_v28  ;;  %v8235_v40 = vld [vmem:[%s12936_s0 + $0x390] sm:$0xff] }
 0x3d9   :  { %4732 = vadd.xlane.f32.xlu0 %v4498_v29  ;;  %v7442_v48 = vpop.eup %7441  ;;  %7461 = vrcp.f32 %v5312_v41  ;;  %v5314_v49 = vadd.f32 1.0, %v7440_v44  ;;  %v4938_v34 = vsub.f32 0.0, %v4810_v42  ;;  %v4595_v50 = vpop.xlane.xlu1 %4594  ;;  %v4506_v41 = vmul.f32 %v8235_v40, %v12135_v28 }
 0x3da   :  { %v4593_v51 = vpop.xlane.xlu0 %4592  ;;  %v7444_v52 = vpop.eup %7443  ;;  %5694 = vst.msk [vmem:[%s12939_s3 + $0xa8] sm:$0xff] %vm5672_vm3, %v7442_v48  ;;  %7463 = vrcp.f32 %v5315_v45  ;;  %v5102_v54 = vmul.f32 1.442695, %v4939_v47  ;;  %v4813_v55 = vadd.f32 %v4595_v50, %v8570_v21  ;;  %v8236_v47 = vld [vmem:[%s12936_s0 + $0x3a8] sm:$0xff] }
 0x3db   :  { %v4812_v56 = vadd.f32 %v4593_v51, %v8570_v21  ;;  %v7446_v57 = vpop.eup %7445  ;;  %5693 = vst.msk [vmem:[%s12939_s3 + $0xa0] sm:$0xff] %vm5672_vm3, %v7444_v52  ;;  %7465 = vrcp.f32 %v5314_v49  ;;  %v5100_v58 = vmul.f32 1.442695, %v4938_v34  ;;  %v4509_v48 = vmul.f32 %v8236_v47, %v12135_v28 }
 0x3dc   :  { %v7448_v62 = vpop.eup %7447  ;;  %v5317_v63 = vadd.f32 1.0, %v7446_v57  ;;  %7467 = vpow2.f32 %v5096_v46  ;;  %v4941_v0 = vsub.f32 0.0, %v4813_v55  ;;  %4738 = vadd.xlane.f32.xlu1 %v4501_v39 }
 0x3dd   :  { %v4940_v2 = vsub.f32 0.0, %v4812_v56  ;;  %4736 = vadd.xlane.f32.xlu0 %v4500_v1  ;;  %v7450_v3 = vpop.eup %7449  ;;  %v5316_v4 = vadd.f32 1.0, %v7448_v62  ;;  %7469 = vpow2.f32 %v5102_v54  ;;  %v4599_v5 = vpop.xlane.xlu1 %4598  ;;  %v8237_v56 = vld [vmem:[%s12936_s0 + $0x3a0] sm:$0xff] }
 0x3de   :  { %v4597_v7 = vpop.xlane.xlu0 %4596  ;;  %v7452_v8 = vpop.eup %7451  ;;  %5696 = vst.msk [vmem:[%s12939_s3 + $0xb8] sm:$0xff] %vm5672_vm3, %v7450_v3  ;;  %7471 = vrcp.f32 %v5317_v63  ;;  %v5106_v9 = vmul.f32 1.442695, %v4941_v0  ;;  %v4815_v10 = vadd.f32 %v4599_v5, %v8570_v21  ;;  %v4508_v57 = vmul.f32 %v8237_v56, %v12135_v28 }
 0x3df   :  { %v7454_v12 = vpop.eup %7453  ;;  %5695 = vst.msk [vmem:[%s12939_s3 + $0xb0] sm:$0xff] %vm5672_vm3, %v7452_v8  ;;  %7473 = vrcp.f32 %v5316_v4  ;;  %v4814_v13 = vadd.f32 %v4597_v7, %v8570_v21  ;;  %v5104_v20 = vmul.f32 1.442695, %v4940_v2  ;;  %v8239_v8 = vld [vmem:[%s12936_s0 + $0x3b0] sm:$0xff] }
 0x3e0   :  { %v7456_v18 = vpop.eup %7455  ;;  %v5319_v19 = vadd.f32 1.0, %v7454_v12  ;;  %7475 = vpow2.f32 %v5100_v58  ;;  %v4943_v22 = vsub.f32 0.0, %v4815_v10  ;;  %4742 = vadd.xlane.f32.xlu1 %v4503_v59 }
 0x3e1   :  { %4740 = vadd.xlane.f32.xlu0 %v4502_v61  ;;  %v7458_v14 = vpop.eup %7457  ;;  %v5318_v23 = vadd.f32 1.0, %v7456_v18  ;;  %7477 = vpow2.f32 %v5106_v9  ;;  %v4942_v6 = vsub.f32 0.0, %v4814_v13  ;;  %v4603_v24 = vpop.xlane.xlu1 %4602  ;;  %v8238_v61 = vld [vmem:[%s12936_s0 + $0x3b8] sm:$0xff]  ;;  %v4510_v9 = vmul.f32 %v8239_v8, %v12135_v28 }
 0x3e2   :  { %v4601_v25 = vpop.xlane.xlu0 %4600  ;;  %v7460_v26 = vpop.eup %7459  ;;  %5698 = vst.msk [vmem:[%s12939_s3 + $0xc8] sm:$0xff] %vm5672_vm3, %v7458_v14  ;;  %7479 = vrcp.f32 %v5319_v19  ;;  %v5110_v27 = vmul.f32 1.442695, %v4943_v22  ;;  %v4817_v29 = vadd.f32 %v4603_v24, %v8570_v21  ;;  %v4511_v62 = vmul.f32 %v8238_v61, %v12135_v28 }
 0x3e3   :  { %v4816_v30 = vadd.f32 %v4601_v25, %v8570_v21  ;;  %v7462_v31 = vpop.eup %7461  ;;  %7481 = vrcp.f32 %v5318_v23  ;;  %v5321_v32 = vadd.f32 1.0, %v7460_v26  ;;  %v5108_v11 = vmul.f32 1.442695, %v4942_v6  ;;  %v8240_v26 = vld [vmem:[%s12936_s0 + $0x3c8] sm:$0xff] }
 0x3e4   :  { %v7464_v37 = vpop.eup %7463  ;;  %5697 = vst.msk [vmem:[%s12939_s3 + $0xc0] sm:$0xff] %vm5672_vm3, %v7462_v31  ;;  %7483 = vpow2.f32 %v5104_v20  ;;  %v4945_v38 = vsub.f32 0.0, %v4817_v29  ;;  %4746 = vadd.xlane.f32.xlu1 %v4505_v15  ;;  %v8241_v29 = vld [vmem:[%s12936_s0 + $0x3c0] sm:$0xff] }
 0x3e5   :  { %v4944_v39 = vsub.f32 0.0, %v4816_v30  ;;  %4744 = vadd.xlane.f32.xlu0 %v4504_v17  ;;  %v7466_v42 = vpop.eup %7465  ;;  %5700 = vst.msk [vmem:[%s12939_s3 + $0xd8] sm:$0xff] %vm5672_vm3, %v7464_v37  ;;  %7485 = vrcp.f32 %v5321_v32  ;;  %v4607_v43 = vpop.xlane.xlu1 %4606  ;;  %v4512_v30 = vmul.f32 %v8241_v29, %v12135_v28 }
 0x3e6   :  { %v4605_v1 = vpop.xlane.xlu0 %4604  ;;  %v7468_v44 = vpop.eup %7467  ;;  %5699 = vst.msk [vmem:[%s12939_s3 + $0xd0] sm:$0xff] %vm5672_vm3, %v7466_v42  ;;  %7487 = vpow2.f32 %v5110_v27  ;;  %v5114_v45 = vmul.f32 1.442695, %v4945_v38  ;;  %v4819_v46 = vadd.f32 %v4607_v43, %v8570_v21  ;;  %v4513_v27 = vmul.f32 %v8240_v26, %v12135_v28 }
 0x3e7   :  { %v7470_v49 = vpop.eup %7469  ;;  %v5320_v34 = vadd.f32 1.0, %v7468_v44  ;;  %7489 = vpow2.f32 %v5108_v11  ;;  %v5112_v50 = vmul.f32 1.442695, %v4944_v39  ;;  %v4818_v51 = vadd.f32 %v4605_v1, %v8570_v21 }
 0x3e8   :  { %v7472_v52 = vpop.eup %7471  ;;  %v5323_v54 = vadd.f32 1.0, %v7470_v49  ;;  %7491 = vpow2.f32 %v5114_v45  ;;  %v4947_v55 = vsub.f32 0.0, %v4819_v46  ;;  %4750 = vadd.xlane.f32.xlu1 %v4507_v35  ;;  %v8242_v46 = vld [vmem:[%s12936_s0 + $0x3d8] sm:$0xff] }
 0x3e9   :  { %4748 = vadd.xlane.f32.xlu0 %v4506_v41  ;;  %v7474_v58 = vpop.eup %7473  ;;  %5702 = vst.msk [vmem:[%s12939_s3 + $0xe8] sm:$0xff] %vm5672_vm3, %v7472_v52  ;;  %7493 = vrcp.f32 %v5320_v34  ;;  %v4946_v36 = vsub.f32 0.0, %v4818_v51  ;;  %v4611_v59 = vpop.xlane.xlu1 %4610  ;;  %v4515_v47 = vmul.f32 %v8242_v46, %v12135_v28 }
 0x3ea   :  { %v4609_v53 = vpop.xlane.xlu0 %4608  ;;  %v7476_v63 = vpop.eup %7475  ;;  %5701 = vst.msk [vmem:[%s12939_s3 + $0xe0] sm:$0xff] %vm5672_vm3, %v7474_v58  ;;  %7495 = vrcp.f32 %v5323_v54  ;;  %v5118_v0 = vmul.f32 1.442695, %v4947_v55  ;;  %v4821_v2 = vadd.f32 %v4611_v59, %v8570_v21 }
 0x3eb   :  { %v4820_v3 = vadd.f32 %v4609_v53, %v8570_v21  ;;  %v7478_v4 = vpop.eup %7477  ;;  %v5322_v5 = vadd.f32 1.0, %v7476_v63  ;;  %7497 = vpow2.f32 %v5112_v50  ;;  %v5116_v7 = vmul.f32 1.442695, %v4946_v36  ;;  %v8244_v63 = vld [vmem:[%s12936_s0 + $0x3e8] sm:$0xff] }
 0x3ec   :  { %v7480_v10 = vpop.eup %7479  ;;  %v5325_v12 = vadd.f32 1.0, %v7478_v4  ;;  %7499 = vpow2.f32 %v5118_v0  ;;  %v4949_v13 = vsub.f32 0.0, %v4821_v2  ;;  %4754 = vadd.xlane.f32.xlu1 %v4509_v48  ;;  %v8243_v48 = vld [vmem:[%s12936_s0 + $0x3d0] sm:$0xff]  ;;  %v4517_v0 = vmul.f32 %v8244_v63, %v12135_v28  ;;  %v8245_v2 = vld [vmem:[%s12936_s0 + $0x3e0] sm:$0xff] }
 0x3ed   :  { %v4948_v60 = vsub.f32 0.0, %v4820_v3  ;;  %4752 = vadd.xlane.f32.xlu0 %v4508_v57  ;;  %v7482_v15 = vpop.eup %7481  ;;  %5704 = vst.msk [vmem:[%s12939_s3 + $0xf8] sm:$0xff] %vm5672_vm3, %v7480_v10  ;;  %7501 = vrcp.f32 %v5322_v5  ;;  %v4615_v16 = vpop.xlane.xlu1 %4614  ;;  %v4514_v49 = vmul.f32 %v8243_v48, %v12135_v28  ;;  %v4516_v3 = vmul.f32 %v8245_v2, %v12135_v28 }
 0x3ee   :  { %v4613_v17 = vpop.xlane.xlu0 %4612  ;;  %v7484_v18 = vpop.eup %7483  ;;  %5703 = vst.msk [vmem:[%s12939_s3 + $0xf0] sm:$0xff] %vm5672_vm3, %v7482_v15  ;;  %7503 = vrcp.f32 %v5325_v12  ;;  %v5122_v19 = vmul.f32 1.442695, %v4949_v13  ;;  %v4823_v22 = vadd.f32 %v4615_v16, %v8570_v21 }
 0x3ef   :  { %v5120_v20 = vmul.f32 1.442695, %v4948_v60  ;;  %v7486_v14 = vpop.eup %7485  ;;  %v5324_v23 = vadd.f32 1.0, %v7484_v18  ;;  %7505 = vpow2.f32 %v5116_v7  ;;  %v4822_v6 = vadd.f32 %v4613_v17, %v8570_v21  ;;  %v8246_v17 = vld [vmem:[%s12936_s0 + $0x3f8] sm:$0xff] }
 0x3f0   :  { %v7488_v24 = vpop.eup %7487  ;;  %5706 = vst.msk [vmem:[%s12939_s3 + $0x108] sm:$0xff] %vm5672_vm3, %v7486_v14  ;;  %7507 = vpow2.f32 %v5122_v19  ;;  %v4951_v25 = vsub.f32 0.0, %v4823_v22  ;;  %4758 = vadd.xlane.f32.xlu1 %v4511_v62  ;;  %v4519_v18 = vmul.f32 %v8246_v17, %v12135_v28  ;;  %v8247_v14 = vld [vmem:[%s12936_s0 + $0x3f0] sm:$0xff] }
 0x3f1   :  { %4756 = vadd.xlane.f32.xlu0 %v4510_v9  ;;  %v7490_v31 = vpop.eup %7489  ;;  %7509 = vrcp.f32 %v5324_v23  ;;  %v5327_v32 = vadd.f32 1.0, %v7488_v24  ;;  %v4950_v11 = vsub.f32 0.0, %v4822_v6  ;;  %v4619_v33 = vpop.xlane.xlu1 %4618  ;;  %v4518_v23 = vmul.f32 %v8247_v14, %v12135_v28 }
 0x3f2   :  { %v4617_v35 = vpop.xlane.xlu0 %4616  ;;  %v7492_v37 = vpop.eup %7491  ;;  %v5326_v38 = vadd.f32 1.0, %v7490_v31  ;;  %7511 = vpow2.f32 %v5120_v20  ;;  %v5126_v39 = vmul.f32 1.442695, %v4951_v25  ;;  %v4825_v40 = vadd.f32 %v4619_v33, %v8570_v21 }
 0x3f3   :  { %v7494_v41 = vpop.eup %7493  ;;  %7513 = vrcp.f32 %v5327_v32  ;;  %v5329_v42 = vadd.f32 1.0, %v7492_v37  ;;  %v5124_v43 = vmul.f32 1.442695, %v4950_v11  ;;  %v4824_v1 = vadd.f32 %v4617_v35, %v8570_v21 }
 0x3f4   :  { %v7496_v44 = vpop.eup %7495  ;;  %5705 = vst.msk [vmem:[%s12939_s3 + $0x100] sm:$0xff] %vm5672_vm3, %v7494_v41  ;;  %7515 = vrcp.f32 %v5326_v38  ;;  %v4953_v45 = vsub.f32 0.0, %v4825_v40  ;;  %4762 = vadd.xlane.f32.xlu1 %v4513_v27 }
 0x3f5   :  { %4760 = vadd.xlane.f32.xlu0 %v4512_v30  ;;  %v7498_v34 = vpop.eup %7497  ;;  %5708 = vst.msk [vmem:[%s12939_s3 + $0x118] sm:$0xff] %vm5672_vm3, %v7496_v44  ;;  %7517 = vrcp.f32 %v5329_v42  ;;  %v4952_v50 = vsub.f32 0.0, %v4824_v1  ;;  %v4623_v51 = vpop.xlane.xlu1 %4622 }
 0x3f6   :  { %v4621_v52 = vpop.xlane.xlu0 %4620  ;;  %v7500_v54 = vpop.eup %7499  ;;  %v5328_v55 = vadd.f32 1.0, %v7498_v34  ;;  %7519 = vpow2.f32 %v5126_v39  ;;  %v5130_v56 = vmul.f32 1.442695, %v4953_v45  ;;  %v4827_v57 = vadd.f32 %v4623_v51, %v8570_v21 }
 0x3f7   :  { %v7502_v58 = vpop.eup %7501  ;;  %v5331_v36 = vadd.f32 1.0, %v7500_v54  ;;  %7521 = vpow2.f32 %v5124_v43  ;;  %v5128_v59 = vmul.f32 1.442695, %v4952_v50  ;;  %v4826_v53 = vadd.f32 %v4621_v52, %v8570_v21 }
 0x3f8   :  { %v7504_v61 = vpop.eup %7503  ;;  %5707 = vst.msk [vmem:[%s12939_s3 + $0x110] sm:$0xff] %vm5672_vm3, %v7502_v58  ;;  %7523 = vrcp.f32 %v5328_v55  ;;  %v4955_v62 = vsub.f32 0.0, %v4827_v57  ;;  %4766 = vadd.xlane.f32.xlu1 %v4515_v47 }
 0x3f9   :  { %4764 = vadd.xlane.f32.xlu0 %v4514_v49  ;;  %v7506_v4 = vpop.eup %7505  ;;  %5710 = vst.msk [vmem:[%s12939_s3 + $0x128] sm:$0xff] %vm5672_vm3, %v7504_v61  ;;  %7525 = vrcp.f32 %v5331_v36  ;;  %v4954_v5 = vsub.f32 0.0, %v4826_v53  ;;  %v4627_v7 = vpop.xlane.xlu1 %4626 }
 0x3fa   :  { %v4625_v8 = vpop.xlane.xlu0 %4624  ;;  %v7508_v9 = vpop.eup %7507  ;;  %v5330_v10 = vadd.f32 1.0, %v7506_v4  ;;  %7527 = vpow2.f32 %v5130_v56  ;;  %v5134_v12 = vmul.f32 1.442695, %v4955_v62  ;;  %v4829_v13 = vadd.f32 %v4627_v7, %v8570_v21 }
 0x3fb   :  { %v7510_v60 = vpop.eup %7509  ;;  %v5333_v15 = vadd.f32 1.0, %v7508_v9  ;;  %7529 = vpow2.f32 %v5128_v59  ;;  %v4828_v16 = vadd.f32 %v4625_v8, %v8570_v21  ;;  %v5132_v20 = vmul.f32 1.442695, %v4954_v5 }
 0x3fc   :  { %v7512_v19 = vpop.eup %7511  ;;  %5709 = vst.msk [vmem:[%s12939_s3 + $0x120] sm:$0xff] %vm5672_vm3, %v7510_v60  ;;  %7531 = vrcp.f32 %v5330_v10  ;;  %v4957_v22 = vsub.f32 0.0, %v4829_v13  ;;  %4770 = vadd.xlane.f32.xlu1 %v4517_v0 }
 0x3fd   :  { %4768 = vadd.xlane.f32.xlu0 %v4516_v3  ;;  %v7514_v6 = vpop.eup %7513  ;;  %7533 = vrcp.f32 %v5333_v15  ;;  %v5332_v24 = vadd.f32 1.0, %v7512_v19  ;;  %v4956_v25 = vsub.f32 0.0, %v4828_v16  ;;  %v4631_v26 = vpop.xlane.xlu1 %4630 }
 0x3fe   :  { %v4629_v27 = vpop.xlane.xlu0 %4628  ;;  %v7516_v29 = vpop.eup %7515  ;;  %5712 = vst.msk [vmem:[%s12939_s3 + $0x138] sm:$0xff] %vm5672_vm3, %v7514_v6  ;;  %7535 = vpow2.f32 %v5134_v12  ;;  %v5138_v30 = vmul.f32 1.442695, %v4957_v22  ;;  %v4831_v31 = vadd.f32 %v4631_v26, %v8570_v21 }
 0x3ff   :  { %v4830_v32 = vadd.f32 %v4629_v27, %v8570_v21  ;;  %v7518_v11 = vpop.eup %7517  ;;  %5711 = vst.msk [vmem:[%s12939_s3 + $0x130] sm:$0xff] %vm5672_vm3, %v7516_v29  ;;  %7537 = vrcp.f32 %v5332_v24  ;;  %v5136_v28 = vmul.f32 1.442695, %v4956_v25 }
 0x400   :  { %v7520_v33 = vpop.eup %7519  ;;  %5714 = vst.msk [vmem:[%s12939_s3 + $0x148] sm:$0xff] %vm5672_vm3, %v7518_v11  ;;  %7539 = vpow2.f32 %v5132_v20  ;;  %v4959_v35 = vsub.f32 0.0, %v4831_v31  ;;  %4774 = vadd.xlane.f32.xlu1 %v4519_v18 }
 0x401   :  { %v4958_v37 = vsub.f32 0.0, %v4830_v32  ;;  %4772 = vadd.xlane.f32.xlu0 %v4518_v23  ;;  %v7522_v38 = vpop.eup %7521  ;;  %v5335_v39 = vadd.f32 1.0, %v7520_v33  ;;  %7541 = vpow2.f32 %v5138_v30  ;;  %v4635_v40 = vpop.xlane.xlu1 %4634 }
 0x402   :  { %v4633_v41 = vpop.xlane.xlu0 %4632  ;;  %v7524_v42 = vpop.eup %7523  ;;  %v5334_v43 = vadd.f32 1.0, %v7522_v38  ;;  %7543 = vpow2.f32 %v5136_v28  ;;  %v5142_v1 = vmul.f32 1.442695, %v4959_v35  ;;  %v4833_v46 = vadd.f32 %v4635_v40, %v8570_v21 }
 0x403   :  { %v5140_v44 = vmul.f32 1.442695, %v4958_v37  ;;  %v7526_v45 = vpop.eup %7525  ;;  %5713 = vst.msk [vmem:[%s12939_s3 + $0x140] sm:$0xff] %vm5672_vm3, %v7524_v42  ;;  %7545 = vrcp.f32 %v5335_v39  ;;  %v4832_v47 = vadd.f32 %v4633_v41, %v8570_v21 }
 0x404   :  { %v7528_v48 = vpop.eup %7527  ;;  %5716 = vst.msk [vmem:[%s12939_s3 + $0x158] sm:$0xff] %vm5672_vm3, %v7526_v45  ;;  %7547 = vrcp.f32 %v5334_v43  ;;  %v4961_v50 = vsub.f32 0.0, %v4833_v46 }
 0x405   :  { %v7530_v49 = vpop.eup %7529  ;;  %v5337_v34 = vadd.f32 1.0, %v7528_v48  ;;  %7549 = vpow2.f32 %v5142_v1  ;;  %v4960_v51 = vsub.f32 0.0, %v4832_v47  ;;  %v4639_v52 = vpop.xlane.xlu1 %4638 }
 0x406   :  { %v4637_v54 = vpop.xlane.xlu0 %4636  ;;  %v7532_v55 = vpop.eup %7531  ;;  %v5336_v56 = vadd.f32 1.0, %v7530_v49  ;;  %7551 = vpow2.f32 %v5140_v44  ;;  %v4835_v57 = vadd.f32 %v4639_v52, %v8570_v21  ;;  %v5146_v59 = vmul.f32 1.442695, %v4961_v50 }
 0x407   :  { %v4834_v58 = vadd.f32 %v4637_v54, %v8570_v21  ;;  %v7534_v36 = vpop.eup %7533  ;;  %5715 = vst.msk [vmem:[%s12939_s3 + $0x150] sm:$0xff] %vm5672_vm3, %v7532_v55  ;;  %7553 = vrcp.f32 %v5337_v34  ;;  %v5144_v53 = vmul.f32 1.442695, %v4960_v51 }
 0x408   :  { %v7536_v61 = vpop.eup %7535  ;;  %5718 = vst.msk [vmem:[%s12939_s3 + $0x168] sm:$0xff] %vm5672_vm3, %v7534_v36  ;;  %7555 = vrcp.f32 %v5336_v56  ;;  %v4963_v62 = vsub.f32 0.0, %v4835_v57 }
 0x409   :  { %v4962_v63 = vsub.f32 0.0, %v4834_v58  ;;  %v7538_v0 = vpop.eup %7537  ;;  %v5339_v2 = vadd.f32 1.0, %v7536_v61  ;;  %7557 = vpow2.f32 %v5146_v59  ;;  %v4643_v3 = vpop.xlane.xlu1 %4642 }
 0x40a   :  { %v4641_v4 = vpop.xlane.xlu0 %4640  ;;  %v7540_v5 = vpop.eup %7539  ;;  %5717 = vst.msk [vmem:[%s12939_s3 + $0x160] sm:$0xff] %vm5672_vm3, %v7538_v0  ;;  %7559 = vpow2.f32 %v5144_v53  ;;  %v5150_v7 = vmul.f32 1.442695, %v4963_v62  ;;  %v4837_v8 = vadd.f32 %v4643_v3, %v8570_v21 }
 0x40b   :  { %v7542_v9 = vpop.eup %7541  ;;  %7561 = vrcp.f32 %v5339_v2  ;;  %v5338_v10 = vadd.f32 1.0, %v7540_v5  ;;  %v4836_v12 = vadd.f32 %v4641_v4, %v8570_v21  ;;  %v5148_v15 = vmul.f32 1.442695, %v4962_v63 }
 0x40c   :  { %v7544_v13 = vpop.eup %7543  ;;  %v5341_v60 = vadd.f32 1.0, %v7542_v9  ;;  %7563 = vpow2.f32 %v5150_v7  ;;  %v4965_v16 = vsub.f32 0.0, %v4837_v8 }
 0x40d   :  { %v7546_v17 = vpop.eup %7545  ;;  %7565 = vrcp.f32 %v5338_v10  ;;  %v5340_v18 = vadd.f32 1.0, %v7544_v13  ;;  %v4964_v19 = vsub.f32 0.0, %v4836_v12  ;;  %v4647_v20 = vpop.xlane.xlu1 %4646 }
 0x40e   :  { %v4645_v22 = vpop.xlane.xlu0 %4644  ;;  %v7548_v14 = vpop.eup %7547  ;;  %5720 = vst.msk [vmem:[%s12939_s3 + $0x178] sm:$0xff] %vm5672_vm3, %v7546_v17  ;;  %7567 = vrcp.f32 %v5341_v60  ;;  %v5154_v23 = vmul.f32 1.442695, %v4965_v16  ;;  %v4839_v6 = vadd.f32 %v4647_v20, %v8570_v21 }
 0x40f   :  { %v4838_v24 = vadd.f32 %v4645_v22, %v8570_v21  ;;  %v7550_v25 = vpop.eup %7549  ;;  %5719 = vst.msk [vmem:[%s12939_s3 + $0x170] sm:$0xff] %vm5672_vm3, %v7548_v14  ;;  %7569 = vrcp.f32 %v5340_v18  ;;  %v5152_v26 = vmul.f32 1.442695, %v4964_v19 }
 0x410   :  { %v7552_v27 = vpop.eup %7551  ;;  %v5343_v29 = vadd.f32 1.0, %v7550_v25  ;;  %7571 = vpow2.f32 %v5148_v15  ;;  %v4967_v30 = vsub.f32 0.0, %v4839_v6 }
 0x411   :  { %v4966_v31 = vsub.f32 0.0, %v4838_v24  ;;  %v7554_v32 = vpop.eup %7553  ;;  %v5342_v11 = vadd.f32 1.0, %v7552_v27  ;;  %7573 = vpow2.f32 %v5154_v23  ;;  %v4651_v28 = vpop.xlane.xlu1 %4650 }
 0x412   :  { %v4649_v33 = vpop.xlane.xlu0 %4648  ;;  %v7556_v35 = vpop.eup %7555  ;;  %5722 = vst.msk [vmem:[%s12939_s3 + $0x188] sm:$0xff] %vm5672_vm3, %v7554_v32  ;;  %7575 = vrcp.f32 %v5343_v29  ;;  %v5158_v37 = vmul.f32 1.442695, %v4967_v30  ;;  %v4841_v38 = vadd.f32 %v4651_v28, %v8570_v21 }
 0x413   :  { %v7558_v39 = vpop.eup %7557  ;;  %5721 = vst.msk [vmem:[%s12939_s3 + $0x180] sm:$0xff] %vm5672_vm3, %v7556_v35  ;;  %7577 = vrcp.f32 %v5342_v11  ;;  %v4840_v40 = vadd.f32 %v4649_v33, %v8570_v21  ;;  %v5156_v43 = vmul.f32 1.442695, %v4966_v31 }
 0x414   :  { %v7560_v41 = vpop.eup %7559  ;;  %v5345_v42 = vadd.f32 1.0, %v7558_v39  ;;  %7579 = vpow2.f32 %v5152_v26  ;;  %v4969_v1 = vsub.f32 0.0, %v4841_v38 }
 0x415   :  { %v7562_v44 = vpop.eup %7561  ;;  %v5344_v45 = vadd.f32 1.0, %v7560_v41  ;;  %7581 = vpow2.f32 %v5158_v37  ;;  %v4968_v46 = vsub.f32 0.0, %v4840_v40  ;;  %v4655_v47 = vpop.xlane.xlu1 %4654 }
 0x416   :  { %v4653_v48 = vpop.xlane.xlu0 %4652  ;;  %v7564_v49 = vpop.eup %7563  ;;  %5724 = vst.msk [vmem:[%s12939_s3 + $0x198] sm:$0xff] %vm5672_vm3, %v7562_v44  ;;  %7583 = vrcp.f32 %v5345_v42  ;;  %v5162_v34 = vmul.f32 1.442695, %v4969_v1  ;;  %v4843_v50 = vadd.f32 %v4655_v47, %v8570_v21 }
 0x417   :  { %v4842_v51 = vadd.f32 %v4653_v48, %v8570_v21  ;;  %v7566_v52 = vpop.eup %7565  ;;  %7585 = vrcp.f32 %v5344_v45  ;;  %v5347_v54 = vadd.f32 1.0, %v7564_v49  ;;  %v5160_v55 = vmul.f32 1.442695, %v4968_v46 }
 0x418   :  { %v7568_v56 = vpop.eup %7567  ;;  %5723 = vst.msk [vmem:[%s12939_s3 + $0x190] sm:$0xff] %vm5672_vm3, %v7566_v52  ;;  %7587 = vpow2.f32 %v5156_v43  ;;  %v4971_v57 = vsub.f32 0.0, %v4843_v50 }
 0x419   :  { %v4970_v58 = vsub.f32 0.0, %v4842_v51  ;;  %v7570_v36 = vpop.eup %7569  ;;  %5726 = vst.msk [vmem:[%s12939_s3 + $0x1a8] sm:$0xff] %vm5672_vm3, %v7568_v56  ;;  %7589 = vrcp.f32 %v5347_v54  ;;  %v4659_v59 = vpop.xlane.xlu1 %4658 }
 0x41a   :  { %v4657_v53 = vpop.xlane.xlu0 %4656  ;;  %v7572_v61 = vpop.eup %7571  ;;  %5725 = vst.msk [vmem:[%s12939_s3 + $0x1a0] sm:$0xff] %vm5672_vm3, %v7570_v36  ;;  %7591 = vpow2.f32 %v5162_v34  ;;  %v5166_v62 = vmul.f32 1.442695, %v4971_v57  ;;  %v4845_v63 = vadd.f32 %v4659_v59, %v8570_v21 }
 0x41b   :  { %v7574_v0 = vpop.eup %7573  ;;  %v5346_v2 = vadd.f32 1.0, %v7572_v61  ;;  %7593 = vpow2.f32 %v5160_v55  ;;  %v5164_v3 = vmul.f32 1.442695, %v4970_v58  ;;  %v4844_v4 = vadd.f32 %v4657_v53, %v8570_v21 }
 0x41c   :  { %v7576_v5 = vpop.eup %7575  ;;  %v5349_v7 = vadd.f32 1.0, %v7574_v0  ;;  %7595 = vpow2.f32 %v5166_v62  ;;  %v4973_v8 = vsub.f32 0.0, %v4845_v63 }
 0x41d   :  { %v7578_v9 = vpop.eup %7577  ;;  %5728 = vst.msk [vmem:[%s12939_s3 + $0x1b8] sm:$0xff] %vm5672_vm3, %v7576_v5  ;;  %7597 = vrcp.f32 %v5346_v2  ;;  %v4972_v10 = vsub.f32 0.0, %v4844_v4  ;;  %v4663_v12 = vpop.xlane.xlu1 %4662 }
 0x41e   :  { %v4661_v13 = vpop.xlane.xlu0 %4660  ;;  %v7580_v60 = vpop.eup %7579  ;;  %5727 = vst.msk [vmem:[%s12939_s3 + $0x1b0] sm:$0xff] %vm5672_vm3, %v7578_v9  ;;  %7599 = vrcp.f32 %v5349_v7  ;;  %v5170_v15 = vmul.f32 1.442695, %v4973_v8  ;;  %v4847_v16 = vadd.f32 %v4663_v12, %v8570_v21 }
 0x41f   :  { %v4846_v17 = vadd.f32 %v4661_v13, %v8570_v21  ;;  %v7582_v18 = vpop.eup %7581  ;;  %v5348_v19 = vadd.f32 1.0, %v7580_v60  ;;  %7601 = vpow2.f32 %v5164_v3  ;;  %v5168_v20 = vmul.f32 1.442695, %v4972_v10 }
 0x420   :  { %v7584_v22 = vpop.eup %7583  ;;  %v5351_v14 = vadd.f32 1.0, %v7582_v18  ;;  %7603 = vpow2.f32 %v5170_v15  ;;  %v4975_v23 = vsub.f32 0.0, %v4847_v16 }
 0x421   :  { %v4974_v6 = vsub.f32 0.0, %v4846_v17  ;;  %v7586_v24 = vpop.eup %7585  ;;  %5730 = vst.msk [vmem:[%s12939_s3 + $0x1c8] sm:$0xff] %vm5672_vm3, %v7584_v22  ;;  %7605 = vrcp.f32 %v5348_v19  ;;  %v4667_v25 = vpop.xlane.xlu1 %4666 }
 0x422   :  { %v4665_v26 = vpop.xlane.xlu0 %4664  ;;  %v7588_v27 = vpop.eup %7587  ;;  %5729 = vst.msk [vmem:[%s12939_s3 + $0x1c0] sm:$0xff] %vm5672_vm3, %v7586_v24  ;;  %7607 = vrcp.f32 %v5351_v14  ;;  %v5174_v29 = vmul.f32 1.442695, %v4975_v23  ;;  %v4849_v31 = vadd.f32 %v4667_v25, %v8570_v21 }
 0x423   :  { %v5172_v30 = vmul.f32 1.442695, %v4974_v6  ;;  %v7590_v32 = vpop.eup %7589  ;;  %v5350_v11 = vadd.f32 1.0, %v7588_v27  ;;  %7609 = vpow2.f32 %v5168_v20  ;;  %v4848_v28 = vadd.f32 %v4665_v26, %v8570_v21 }
 0x424   :  { %v7592_v33 = vpop.eup %7591  ;;  %5732 = vst.msk [vmem:[%s12939_s3 + $0x1d8] sm:$0xff] %vm5672_vm3, %v7590_v32  ;;  %7611 = vpow2.f32 %v5174_v29  ;;  %v4977_v35 = vsub.f32 0.0, %v4849_v31 }
 0x425   :  { %v7594_v37 = vpop.eup %7593  ;;  %7613 = vrcp.f32 %v5350_v11  ;;  %v5353_v38 = vadd.f32 1.0, %v7592_v33  ;;  %v4976_v39 = vsub.f32 0.0, %v4848_v28  ;;  %v4671_v40 = vpop.xlane.xlu1 %4670 }
 0x426   :  { %v4669_v41 = vpop.xlane.xlu0 %4668  ;;  %v7596_v42 = vpop.eup %7595  ;;  %v5352_v43 = vadd.f32 1.0, %v7594_v37  ;;  %7615 = vpow2.f32 %v5172_v30  ;;  %v5178_v1 = vmul.f32 1.442695, %v4977_v35  ;;  %v4851_v44 = vadd.f32 %v4671_v40, %v8570_v21 }
 0x427   :  { %v7598_v45 = vpop.eup %7597  ;;  %7617 = vrcp.f32 %v5353_v38  ;;  %v5355_v46 = vadd.f32 1.0, %v7596_v42  ;;  %v5176_v47 = vmul.f32 1.442695, %v4976_v39  ;;  %v4850_v48 = vadd.f32 %v4669_v41, %v8570_v21 }
 0x428   :  { %v7600_v49 = vpop.eup %7599  ;;  %5731 = vst.msk [vmem:[%s12939_s3 + $0x1d0] sm:$0xff] %vm5672_vm3, %v7598_v45  ;;  %7619 = vrcp.f32 %v5352_v43  ;;  %v4979_v34 = vsub.f32 0.0, %v4851_v44 }
 0x429   :  { %v7602_v50 = vpop.eup %7601  ;;  %5734 = vst.msk [vmem:[%s12939_s3 + $0x1e8] sm:$0xff] %vm5672_vm3, %v7600_v49  ;;  %7621 = vrcp.f32 %v5355_v46  ;;  %v4978_v51 = vsub.f32 0.0, %v4850_v48  ;;  %v4675_v52 = vpop.xlane.xlu1 %4674 }
 0x42a   :  { %v4673_v54 = vpop.xlane.xlu0 %4672  ;;  %v7604_v55 = vpop.eup %7603  ;;  %v5354_v56 = vadd.f32 1.0, %v7602_v50  ;;  %7623 = vpow2.f32 %v5178_v1  ;;  %v5182_v57 = vmul.f32 1.442695, %v4979_v34  ;;  %v4853_v58 = vadd.f32 %v4675_v52, %v8570_v21 }
 0x42b   :  { %v7606_v36 = vpop.eup %7605  ;;  %v5357_v59 = vadd.f32 1.0, %v7604_v55  ;;  %7625 = vpow2.f32 %v5176_v47  ;;  %v5180_v53 = vmul.f32 1.442695, %v4978_v51  ;;  %v4852_v61 = vadd.f32 %v4673_v54, %v8570_v21 }
 0x42c   :  { %v7608_v62 = vpop.eup %7607  ;;  %5733 = vst.msk [vmem:[%s12939_s3 + $0x1e0] sm:$0xff] %vm5672_vm3, %v7606_v36  ;;  %7627 = vrcp.f32 %v5354_v56  ;;  %v4981_v63 = vsub.f32 0.0, %v4853_v58 }
 0x42d   :  { %v7610_v0 = vpop.eup %7609  ;;  %5736 = vst.msk [vmem:[%s12939_s3 + $0x1f8] sm:$0xff] %vm5672_vm3, %v7608_v62  ;;  %7629 = vrcp.f32 %v5357_v59  ;;  %v4980_v2 = vsub.f32 0.0, %v4852_v61  ;;  %v4679_v3 = vpop.xlane.xlu1 %4678 }
 0x42e   :  { %v4677_v4 = vpop.xlane.xlu0 %4676  ;;  %v7612_v5 = vpop.eup %7611  ;;  %v5356_v7 = vadd.f32 1.0, %v7610_v0  ;;  %7631 = vpow2.f32 %v5182_v57  ;;  %v5186_v8 = vmul.f32 1.442695, %v4981_v63  ;;  %v4855_v9 = vadd.f32 %v4679_v3, %v8570_v21 }
 0x42f   :  { %v7614_v10 = vpop.eup %7613  ;;  %v5359_v12 = vadd.f32 1.0, %v7612_v5  ;;  %7633 = vpow2.f32 %v5180_v53  ;;  %v4854_v13 = vadd.f32 %v4677_v4, %v8570_v21  ;;  %v5184_v15 = vmul.f32 1.442695, %v4980_v2 }
 0x430   :  { %v7616_v60 = vpop.eup %7615  ;;  %5735 = vst.msk [vmem:[%s12939_s3 + $0x1f0] sm:$0xff] %vm5672_vm3, %v7614_v10  ;;  %7635 = vrcp.f32 %v5356_v7  ;;  %v4983_v16 = vsub.f32 0.0, %v4855_v9 }
 0x431   :  { %v7618_v17 = vpop.eup %7617  ;;  %7637 = vrcp.f32 %v5359_v12  ;;  %v5358_v18 = vadd.f32 1.0, %v7616_v60  ;;  %v4982_v19 = vsub.f32 0.0, %v4854_v13  ;;  %v4683_v20 = vpop.xlane.xlu1 %4682 }
 0x432   :  { %v4681_v22 = vpop.xlane.xlu0 %4680  ;;  %v7620_v14 = vpop.eup %7619  ;;  %5738 = vst.msk [vmem:[%s12939_s3 + $0x208] sm:$0xff] %vm5672_vm3, %v7618_v17  ;;  %7639 = vpow2.f32 %v5186_v8  ;;  %v5190_v23 = vmul.f32 1.442695, %v4983_v16  ;;  %v4857_v6 = vadd.f32 %v4683_v20, %v8570_v21 }
 0x433   :  { %v4856_v24 = vadd.f32 %v4681_v22, %v8570_v21  ;;  %v7622_v25 = vpop.eup %7621  ;;  %5737 = vst.msk [vmem:[%s12939_s3 + $0x200] sm:$0xff] %vm5672_vm3, %v7620_v14  ;;  %7641 = vrcp.f32 %v5358_v18  ;;  %v5188_v26 = vmul.f32 1.442695, %v4982_v19 }
 0x434   :  { %v7624_v27 = vpop.eup %7623  ;;  %5740 = vst.msk [vmem:[%s12939_s3 + $0x218] sm:$0xff] %vm5672_vm3, %v7622_v25  ;;  %7643 = vpow2.f32 %v5184_v15  ;;  %v4985_v29 = vsub.f32 0.0, %v4857_v6 }
 0x435   :  { %v4984_v30 = vsub.f32 0.0, %v4856_v24  ;;  %v7626_v31 = vpop.eup %7625  ;;  %v5361_v32 = vadd.f32 1.0, %v7624_v27  ;;  %7645 = vpow2.f32 %v5190_v23  ;;  %v4687_v11 = vpop.xlane.xlu1 %4686 }
 0x436   :  { %v4685_v28 = vpop.xlane.xlu0 %4684  ;;  %v7628_v33 = vpop.eup %7627  ;;  %v5360_v35 = vadd.f32 1.0, %v7626_v31  ;;  %7647 = vpow2.f32 %v5188_v26  ;;  %v5194_v37 = vmul.f32 1.442695, %v4985_v29  ;;  %v4859_v40 = vadd.f32 %v4687_v11, %v8570_v21 }
 0x437   :  { %v5192_v38 = vmul.f32 1.442695, %v4984_v30  ;;  %v7630_v39 = vpop.eup %7629  ;;  %5739 = vst.msk [vmem:[%s12939_s3 + $0x210] sm:$0xff] %vm5672_vm3, %v7628_v33  ;;  %7649 = vrcp.f32 %v5361_v32  ;;  %v4858_v41 = vadd.f32 %v4685_v28, %v8570_v21 }
 0x438   :  { %v7632_v42 = vpop.eup %7631  ;;  %5742 = vst.msk [vmem:[%s12939_s3 + $0x228] sm:$0xff] %vm5672_vm3, %v7630_v39  ;;  %7651 = vrcp.f32 %v5360_v35  ;;  %v4987_v44 = vsub.f32 0.0, %v4859_v40 }
 0x439   :  { %v7634_v43 = vpop.eup %7633  ;;  %v5363_v1 = vadd.f32 1.0, %v7632_v42  ;;  %7653 = vpow2.f32 %v5194_v37  ;;  %v4986_v45 = vsub.f32 0.0, %v4858_v41  ;;  %v4691_v46 = vpop.xlane.xlu1 %4690 }
 0x43a   :  { %v4689_v47 = vpop.xlane.xlu0 %4688  ;;  %v7636_v48 = vpop.eup %7635  ;;  %v5362_v49 = vadd.f32 1.0, %v7634_v43  ;;  %7655 = vpow2.f32 %v5192_v38  ;;  %v4861_v34 = vadd.f32 %v4691_v46, %v8570_v21  ;;  %v5198_v52 = vmul.f32 1.442695, %v4987_v44 }
 0x43b   :  { %v4860_v50 = vadd.f32 %v4689_v47, %v8570_v21  ;;  %v7638_v51 = vpop.eup %7637  ;;  %5741 = vst.msk [vmem:[%s12939_s3 + $0x220] sm:$0xff] %vm5672_vm3, %v7636_v48  ;;  %7657 = vrcp.f32 %v5363_v1  ;;  %v5196_v54 = vmul.f32 1.442695, %v4986_v45 }
 0x43c   :  { %v7640_v55 = vpop.eup %7639  ;;  %5744 = vst.msk [vmem:[%s12939_s3 + $0x238] sm:$0xff] %vm5672_vm3, %v7638_v51  ;;  %7659 = vrcp.f32 %v5362_v49  ;;  %v4989_v56 = vsub.f32 0.0, %v4861_v34 }
 0x43d   :  { %v4988_v57 = vsub.f32 0.0, %v4860_v50  ;;  %v7642_v58 = vpop.eup %7641  ;;  %v5365_v36 = vadd.f32 1.0, %v7640_v55  ;;  %7661 = vpow2.f32 %v5198_v52  ;;  %v4695_v59 = vpop.xlane.xlu1 %4694 }
 0x43e   :  { %v4693_v53 = vpop.xlane.xlu0 %4692  ;;  %v7644_v61 = vpop.eup %7643  ;;  %5743 = vst.msk [vmem:[%s12939_s3 + $0x230] sm:$0xff] %vm5672_vm3, %v7642_v58  ;;  %7663 = vpow2.f32 %v5196_v54  ;;  %v5202_v62 = vmul.f32 1.442695, %v4989_v56  ;;  %v4863_v63 = vadd.f32 %v4695_v59, %v8570_v21 }
 0x43f   :  { %v7646_v0 = vpop.eup %7645  ;;  %7665 = vrcp.f32 %v5365_v36  ;;  %v5364_v2 = vadd.f32 1.0, %v7644_v61  ;;  %v4862_v3 = vadd.f32 %v4693_v53, %v8570_v21  ;;  %v5200_v7 = vmul.f32 1.442695, %v4988_v57 }
 0x440   :  { %v7648_v4 = vpop.eup %7647  ;;  %v5367_v5 = vadd.f32 1.0, %v7646_v0  ;;  %7667 = vpow2.f32 %v5202_v62  ;;  %v4991_v8 = vsub.f32 0.0, %v4863_v63 }
 0x441   :  { %v7650_v9 = vpop.eup %7649  ;;  %7669 = vrcp.f32 %v5364_v2  ;;  %v5366_v10 = vadd.f32 1.0, %v7648_v4  ;;  %v4990_v12 = vsub.f32 0.0, %v4862_v3  ;;  %v4699_v13 = vpop.xlane.xlu1 %4698 }
 0x442   :  { %v4697_v60 = vpop.xlane.xlu0 %4696  ;;  %v7652_v15 = vpop.eup %7651  ;;  %5746 = vst.msk [vmem:[%s12939_s3 + $0x248] sm:$0xff] %vm5672_vm3, %v7650_v9  ;;  %7671 = vrcp.f32 %v5367_v5  ;;  %v5206_v16 = vmul.f32 1.442695, %v4991_v8  ;;  %v4865_v17 = vadd.f32 %v4699_v13, %v8570_v21 }
 0x443   :  { %v4864_v18 = vadd.f32 %v4697_v60, %v8570_v21  ;;  %v7654_v19 = vpop.eup %7653  ;;  %5745 = vst.msk [vmem:[%s12939_s3 + $0x240] sm:$0xff] %vm5672_vm3, %v7652_v15  ;;  %7673 = vrcp.f32 %v5366_v10  ;;  %v5204_v20 = vmul.f32 1.442695, %v4990_v12 }
 0x444   :  { %v7656_v22 = vpop.eup %7655  ;;  %v5369_v14 = vadd.f32 1.0, %v7654_v19  ;;  %7675 = vpow2.f32 %v5200_v7  ;;  %v4993_v23 = vsub.f32 0.0, %v4865_v17 }
 0x445   :  { %v4992_v6 = vsub.f32 0.0, %v4864_v18  ;;  %v7658_v24 = vpop.eup %7657  ;;  %v5368_v25 = vadd.f32 1.0, %v7656_v22  ;;  %7677 = vpow2.f32 %v5206_v16  ;;  %v4703_v26 = vpop.xlane.xlu1 %4702 }
 0x446   :  { %v4701_v27 = vpop.xlane.xlu0 %4700  ;;  %v7660_v29 = vpop.eup %7659  ;;  %5748 = vst.msk [vmem:[%s12939_s3 + $0x258] sm:$0xff] %vm5672_vm3, %v7658_v24  ;;  %7679 = vrcp.f32 %v5369_v14  ;;  %v5210_v30 = vmul.f32 1.442695, %v4993_v23  ;;  %v4867_v31 = vadd.f32 %v4703_v26, %v8570_v21 }
 0x447   :  { %v7662_v32 = vpop.eup %7661  ;;  %5747 = vst.msk [vmem:[%s12939_s3 + $0x250] sm:$0xff] %vm5672_vm3, %v7660_v29  ;;  %7681 = vrcp.f32 %v5368_v25  ;;  %v4866_v11 = vadd.f32 %v4701_v27, %v8570_v21  ;;  %v5208_v35 = vmul.f32 1.442695, %v4992_v6 }
 0x448   :  { %v7664_v28 = vpop.eup %7663  ;;  %v5371_v33 = vadd.f32 1.0, %v7662_v32  ;;  %7683 = vpow2.f32 %v5204_v20  ;;  %v4995_v37 = vsub.f32 0.0, %v4867_v31 }
 0x449   :  { %v7666_v38 = vpop.eup %7665  ;;  %v5370_v39 = vadd.f32 1.0, %v7664_v28  ;;  %7685 = vpow2.f32 %v5210_v30  ;;  %v4994_v40 = vsub.f32 0.0, %v4866_v11  ;;  %v4707_v41 = vpop.xlane.xlu1 %4706 }
 0x44a   :  { %v4705_v42 = vpop.xlane.xlu0 %4704  ;;  %v7668_v43 = vpop.eup %7667  ;;  %5750 = vst.msk [vmem:[%s12939_s3 + $0x268] sm:$0xff] %vm5672_vm3, %v7666_v38  ;;  %7687 = vrcp.f32 %v5371_v33  ;;  %v5214_v1 = vmul.f32 1.442695, %v4995_v37  ;;  %v4869_v44 = vadd.f32 %v4707_v41, %v8570_v21 }
 0x44b   :  { %v4868_v45 = vadd.f32 %v4705_v42, %v8570_v21  ;;  %v7670_v46 = vpop.eup %7669  ;;  %7689 = vrcp.f32 %v5370_v39  ;;  %v5373_v47 = vadd.f32 1.0, %v7668_v43  ;;  %v5212_v48 = vmul.f32 1.442695, %v4994_v40 }
 0x44c   :  { %v7672_v49 = vpop.eup %7671  ;;  %5749 = vst.msk [vmem:[%s12939_s3 + $0x260] sm:$0xff] %vm5672_vm3, %v7670_v46  ;;  %7691 = vpow2.f32 %v5208_v35  ;;  %v4997_v34 = vsub.f32 0.0, %v4869_v44 }
 0x44d   :  { %v4996_v50 = vsub.f32 0.0, %v4868_v45  ;;  %v7674_v51 = vpop.eup %7673  ;;  %5752 = vst.msk [vmem:[%s12939_s3 + $0x278] sm:$0xff] %vm5672_vm3, %v7672_v49  ;;  %7693 = vrcp.f32 %v5373_v47  ;;  %v4711_v52 = vpop.xlane.xlu1 %4710 }
 0x44e   :  { %v4709_v54 = vpop.xlane.xlu0 %4708  ;;  %v7676_v55 = vpop.eup %7675  ;;  %5751 = vst.msk [vmem:[%s12939_s3 + $0x270] sm:$0xff] %vm5672_vm3, %v7674_v51  ;;  %7695 = vpow2.f32 %v5214_v1  ;;  %v5218_v56 = vmul.f32 1.442695, %v4997_v34  ;;  %v4871_v57 = vadd.f32 %v4711_v52, %v8570_v21 }
 0x44f   :  { %v7678_v58 = vpop.eup %7677  ;;  %v5372_v36 = vadd.f32 1.0, %v7676_v55  ;;  %7697 = vpow2.f32 %v5212_v48  ;;  %v5216_v59 = vmul.f32 1.442695, %v4996_v50  ;;  %v4870_v53 = vadd.f32 %v4709_v54, %v8570_v21 }
 0x450   :  { %v7680_v61 = vpop.eup %7679  ;;  %v5375_v62 = vadd.f32 1.0, %v7678_v58  ;;  %7699 = vpow2.f32 %v5218_v56  ;;  %v4999_v63 = vsub.f32 0.0, %v4871_v57 }
 0x451   :  { %v7682_v0 = vpop.eup %7681  ;;  %5754 = vst.msk [vmem:[%s12939_s3 + $0x288] sm:$0xff] %vm5672_vm3, %v7680_v61  ;;  %7701 = vrcp.f32 %v5372_v36  ;;  %v4998_v2 = vsub.f32 0.0, %v4870_v53  ;;  %v4715_v3 = vpop.xlane.xlu1 %4714 }
 0x452   :  { %v4713_v4 = vpop.xlane.xlu0 %4712  ;;  %v7684_v5 = vpop.eup %7683  ;;  %5753 = vst.msk [vmem:[%s12939_s3 + $0x280] sm:$0xff] %vm5672_vm3, %v7682_v0  ;;  %7703 = vrcp.f32 %v5375_v62  ;;  %v5222_v7 = vmul.f32 1.442695, %v4999_v63  ;;  %v4873_v8 = vadd.f32 %v4715_v3, %v8570_v21 }
 0x453   :  { %v4872_v9 = vadd.f32 %v4713_v4, %v8570_v21  ;;  %v7686_v10 = vpop.eup %7685  ;;  %v5374_v12 = vadd.f32 1.0, %v7684_v5  ;;  %7705 = vpow2.f32 %v5216_v59  ;;  %v5220_v13 = vmul.f32 1.442695, %v4998_v2 }
 0x454   :  { %v7688_v60 = vpop.eup %7687  ;;  %v5377_v15 = vadd.f32 1.0, %v7686_v10  ;;  %7707 = vpow2.f32 %v5222_v7  ;;  %v5001_v16 = vsub.f32 0.0, %v4873_v8 }
 0x455   :  { %v5000_v17 = vsub.f32 0.0, %v4872_v9  ;;  %v7690_v18 = vpop.eup %7689  ;;  %5756 = vst.msk [vmem:[%s12939_s3 + $0x298] sm:$0xff] %vm5672_vm3, %v7688_v60  ;;  %7709 = vrcp.f32 %v5374_v12  ;;  %v4719_v19 = vpop.xlane.xlu1 %4718 }
 0x456   :  { %v4717_v20 = vpop.xlane.xlu0 %4716  ;;  %v7692_v22 = vpop.eup %7691  ;;  %5755 = vst.msk [vmem:[%s12939_s3 + $0x290] sm:$0xff] %vm5672_vm3, %v7690_v18  ;;  %7711 = vrcp.f32 %v5377_v15  ;;  %v5226_v14 = vmul.f32 1.442695, %v5001_v16  ;;  %v4875_v6 = vadd.f32 %v4719_v19, %v8570_v21 }
 0x457   :  { %v5224_v23 = vmul.f32 1.442695, %v5000_v17  ;;  %v7694_v24 = vpop.eup %7693  ;;  %v5376_v25 = vadd.f32 1.0, %v7692_v22  ;;  %7713 = vpow2.f32 %v5220_v13  ;;  %v4874_v26 = vadd.f32 %v4717_v20, %v8570_v21 }
 0x458   :  { %v7696_v27 = vpop.eup %7695  ;;  %5758 = vst.msk [vmem:[%s12939_s3 + $0x2a8] sm:$0xff] %vm5672_vm3, %v7694_v24  ;;  %7715 = vpow2.f32 %v5226_v14  ;;  %v5003_v29 = vsub.f32 0.0, %v4875_v6 }
 0x459   :  { %v7698_v30 = vpop.eup %7697  ;;  %7717 = vrcp.f32 %v5376_v25  ;;  %v5379_v31 = vadd.f32 1.0, %v7696_v27  ;;  %v5002_v32 = vsub.f32 0.0, %v4874_v26  ;;  %v4723_v11 = vpop.xlane.xlu1 %4722 }
 0x45a   :  { %v4721_v28 = vpop.xlane.xlu0 %4720  ;;  %v7700_v33 = vpop.eup %7699  ;;  %v5378_v35 = vadd.f32 1.0, %v7698_v30  ;;  %7719 = vpow2.f32 %v5224_v23  ;;  %v5230_v37 = vmul.f32 1.442695, %v5003_v29  ;;  %v4877_v38 = vadd.f32 %v4723_v11, %v8570_v21 }
 0x45b   :  { %v7702_v39 = vpop.eup %7701  ;;  %7721 = vrcp.f32 %v5379_v31  ;;  %v5381_v40 = vadd.f32 1.0, %v7700_v33  ;;  %v5228_v41 = vmul.f32 1.442695, %v5002_v32  ;;  %v4876_v42 = vadd.f32 %v4721_v28, %v8570_v21 }
 0x45c   :  { %v7704_v43 = vpop.eup %7703  ;;  %5757 = vst.msk [vmem:[%s12939_s3 + $0x2a0] sm:$0xff] %vm5672_vm3, %v7702_v39  ;;  %7723 = vrcp.f32 %v5378_v35  ;;  %v5005_v1 = vsub.f32 0.0, %v4877_v38 }
 0x45d   :  { %v7706_v44 = vpop.eup %7705  ;;  %5760 = vst.msk [vmem:[%s12939_s3 + $0x2b8] sm:$0xff] %vm5672_vm3, %v7704_v43  ;;  %7725 = vrcp.f32 %v5381_v40  ;;  %v5004_v45 = vsub.f32 0.0, %v4876_v42  ;;  %v4727_v46 = vpop.xlane.xlu1 %4726 }
 0x45e   :  { %v4725_v47 = vpop.xlane.xlu0 %4724  ;;  %v7708_v48 = vpop.eup %7707  ;;  %v5380_v49 = vadd.f32 1.0, %v7706_v44  ;;  %7727 = vpow2.f32 %v5230_v37  ;;  %v5234_v34 = vmul.f32 1.442695, %v5005_v1  ;;  %v4879_v50 = vadd.f32 %v4727_v46, %v8570_v21 }
 0x45f   :  { %v7710_v51 = vpop.eup %7709  ;;  %v5383_v52 = vadd.f32 1.0, %v7708_v48  ;;  %7729 = vpow2.f32 %v5228_v41  ;;  %v5232_v54 = vmul.f32 1.442695, %v5004_v45  ;;  %v4878_v55 = vadd.f32 %v4725_v47, %v8570_v21 }
 0x460   :  { %v7712_v56 = vpop.eup %7711  ;;  %5759 = vst.msk [vmem:[%s12939_s3 + $0x2b0] sm:$0xff] %vm5672_vm3, %v7710_v51  ;;  %7731 = vrcp.f32 %v5380_v49  ;;  %v5007_v57 = vsub.f32 0.0, %v4879_v50 }
 0x461   :  { %v7714_v58 = vpop.eup %7713  ;;  %5762 = vst.msk [vmem:[%s12939_s3 + $0x2c8] sm:$0xff] %vm5672_vm3, %v7712_v56  ;;  %7733 = vrcp.f32 %v5383_v52  ;;  %v5006_v36 = vsub.f32 0.0, %v4878_v55  ;;  %v4731_v59 = vpop.xlane.xlu1 %4730 }
 0x462   :  { %v4729_v53 = vpop.xlane.xlu0 %4728  ;;  %v7716_v61 = vpop.eup %7715  ;;  %v5382_v62 = vadd.f32 1.0, %v7714_v58  ;;  %7735 = vpow2.f32 %v5234_v34  ;;  %v5238_v63 = vmul.f32 1.442695, %v5007_v57  ;;  %v4881_v0 = vadd.f32 %v4731_v59, %v8570_v21 }
 0x463   :  { %v7718_v2 = vpop.eup %7717  ;;  %v5385_v3 = vadd.f32 1.0, %v7716_v61  ;;  %7737 = vpow2.f32 %v5232_v54  ;;  %v4880_v4 = vadd.f32 %v4729_v53, %v8570_v21  ;;  %v5236_v7 = vmul.f32 1.442695, %v5006_v36 }
 0x464   :  { %v7720_v5 = vpop.eup %7719  ;;  %5761 = vst.msk [vmem:[%s12939_s3 + $0x2c0] sm:$0xff] %vm5672_vm3, %v7718_v2  ;;  %7739 = vrcp.f32 %v5382_v62  ;;  %v5009_v8 = vsub.f32 0.0, %v4881_v0 }
 0x465   :  { %v7722_v9 = vpop.eup %7721  ;;  %7741 = vrcp.f32 %v5385_v3  ;;  %v5384_v10 = vadd.f32 1.0, %v7720_v5  ;;  %v5008_v12 = vsub.f32 0.0, %v4880_v4  ;;  %v4735_v13 = vpop.xlane.xlu1 %4734 }
 0x466   :  { %v4733_v60 = vpop.xlane.xlu0 %4732  ;;  %v7724_v15 = vpop.eup %7723  ;;  %5764 = vst.msk [vmem:[%s12939_s3 + $0x2d8] sm:$0xff] %vm5672_vm3, %v7722_v9  ;;  %7743 = vpow2.f32 %v5238_v63  ;;  %v5242_v16 = vmul.f32 1.442695, %v5009_v8  ;;  %v4883_v17 = vadd.f32 %v4735_v13, %v8570_v21 }
 0x467   :  { %v4882_v18 = vadd.f32 %v4733_v60, %v8570_v21  ;;  %v7726_v19 = vpop.eup %7725  ;;  %5763 = vst.msk [vmem:[%s12939_s3 + $0x2d0] sm:$0xff] %vm5672_vm3, %v7724_v15  ;;  %7745 = vrcp.f32 %v5384_v10  ;;  %v5240_v20 = vmul.f32 1.442695, %v5008_v12 }
 0x468   :  { %v7728_v22 = vpop.eup %7727  ;;  %5766 = vst.msk [vmem:[%s12939_s3 + $0x2e8] sm:$0xff] %vm5672_vm3, %v7726_v19  ;;  %7747 = vpow2.f32 %v5236_v7  ;;  %v5011_v14 = vsub.f32 0.0, %v4883_v17 }
 0x469   :  { %v5010_v23 = vsub.f32 0.0, %v4882_v18  ;;  %v7730_v6 = vpop.eup %7729  ;;  %v5387_v24 = vadd.f32 1.0, %v7728_v22  ;;  %7749 = vpow2.f32 %v5242_v16  ;;  %v4739_v25 = vpop.xlane.xlu1 %4738 }
 0x46a   :  { %v4737_v26 = vpop.xlane.xlu0 %4736  ;;  %v7732_v27 = vpop.eup %7731  ;;  %v5386_v29 = vadd.f32 1.0, %v7730_v6  ;;  %7751 = vpow2.f32 %v5240_v20  ;;  %v5246_v30 = vmul.f32 1.442695, %v5011_v14  ;;  %v4885_v11 = vadd.f32 %v4739_v25, %v8570_v21 }
 0x46b   :  { %v5244_v31 = vmul.f32 1.442695, %v5010_v23  ;;  %v7734_v32 = vpop.eup %7733  ;;  %5765 = vst.msk [vmem:[%s12939_s3 + $0x2e0] sm:$0xff] %vm5672_vm3, %v7732_v27  ;;  %7753 = vrcp.f32 %v5387_v24  ;;  %v4884_v28 = vadd.f32 %v4737_v26, %v8570_v21 }
 0x46c   :  { %v7736_v33 = vpop.eup %7735  ;;  %5768 = vst.msk [vmem:[%s12939_s3 + $0x2f8] sm:$0xff] %vm5672_vm3, %v7734_v32  ;;  %7755 = vrcp.f32 %v5386_v29  ;;  %v5013_v38 = vsub.f32 0.0, %v4885_v11 }
 0x46d   :  { %v7738_v35 = vpop.eup %7737  ;;  %v5389_v37 = vadd.f32 1.0, %v7736_v33  ;;  %7757 = vpow2.f32 %v5246_v30  ;;  %v5012_v39 = vsub.f32 0.0, %v4884_v28  ;;  %v4743_v40 = vpop.xlane.xlu1 %4742 }
 0x46e   :  { %v4741_v41 = vpop.xlane.xlu0 %4740  ;;  %v7740_v42 = vpop.eup %7739  ;;  %v5388_v43 = vadd.f32 1.0, %v7738_v35  ;;  %7759 = vpow2.f32 %v5244_v31  ;;  %v4887_v1 = vadd.f32 %v4743_v40, %v8570_v21  ;;  %v5250_v46 = vmul.f32 1.442695, %v5013_v38 }
 0x46f   :  { %v4886_v44 = vadd.f32 %v4741_v41, %v8570_v21  ;;  %v7742_v45 = vpop.eup %7741  ;;  %5767 = vst.msk [vmem:[%s12939_s3 + $0x2f0] sm:$0xff] %vm5672_vm3, %v7740_v42  ;;  %7761 = vrcp.f32 %v5389_v37  ;;  %v5248_v47 = vmul.f32 1.442695, %v5012_v39 }
 0x470   :  { %v7744_v48 = vpop.eup %7743  ;;  %5770 = vst.msk [vmem:[%s12939_s3 + $0x308] sm:$0xff] %vm5672_vm3, %v7742_v45  ;;  %7763 = vrcp.f32 %v5388_v43  ;;  %v5015_v49 = vsub.f32 0.0, %v4887_v1 }
 0x471   :  { %v5014_v34 = vsub.f32 0.0, %v4886_v44  ;;  %v7746_v50 = vpop.eup %7745  ;;  %v5391_v51 = vadd.f32 1.0, %v7744_v48  ;;  %7765 = vpow2.f32 %v5250_v46  ;;  %v4747_v52 = vpop.xlane.xlu1 %4746 }
 0x472   :  { %v4745_v54 = vpop.xlane.xlu0 %4744  ;;  %v7748_v55 = vpop.eup %7747  ;;  %5769 = vst.msk [vmem:[%s12939_s3 + $0x300] sm:$0xff] %vm5672_vm3, %v7746_v50  ;;  %7767 = vpow2.f32 %v5248_v47  ;;  %v5254_v56 = vmul.f32 1.442695, %v5015_v49  ;;  %v4889_v57 = vadd.f32 %v4747_v52, %v8570_v21 }
 0x473   :  { %v7750_v58 = vpop.eup %7749  ;;  %7769 = vrcp.f32 %v5391_v51  ;;  %v5390_v36 = vadd.f32 1.0, %v7748_v55  ;;  %v4888_v59 = vadd.f32 %v4745_v54, %v8570_v21  ;;  %v5252_v62 = vmul.f32 1.442695, %v5014_v34 }
 0x474   :  { %v7752_v53 = vpop.eup %7751  ;;  %v5393_v61 = vadd.f32 1.0, %v7750_v58  ;;  %7771 = vpow2.f32 %v5254_v56  ;;  %v5017_v63 = vsub.f32 0.0, %v4889_v57 }
 0x475   :  { %v7754_v0 = vpop.eup %7753  ;;  %7773 = vrcp.f32 %v5390_v36  ;;  %v5392_v2 = vadd.f32 1.0, %v7752_v53  ;;  %v5016_v3 = vsub.f32 0.0, %v4888_v59  ;;  %v4751_v4 = vpop.xlane.xlu1 %4750 }
 0x476   :  { %v4749_v5 = vpop.xlane.xlu0 %4748  ;;  %v7756_v7 = vpop.eup %7755  ;;  %5772 = vst.msk [vmem:[%s12939_s3 + $0x318] sm:$0xff] %vm5672_vm3, %v7754_v0  ;;  %7775 = vrcp.f32 %v5393_v61  ;;  %v5258_v8 = vmul.f32 1.442695, %v5017_v63  ;;  %v4891_v9 = vadd.f32 %v4751_v4, %v8570_v21 }
 0x477   :  { %v4890_v10 = vadd.f32 %v4749_v5, %v8570_v21  ;;  %v7758_v12 = vpop.eup %7757  ;;  %5771 = vst.msk [vmem:[%s12939_s3 + $0x310] sm:$0xff] %vm5672_vm3, %v7756_v7  ;;  %7777 = vrcp.f32 %v5392_v2  ;;  %v5256_v13 = vmul.f32 1.442695, %v5016_v3 }
 0x478   :  { %v7760_v60 = vpop.eup %7759  ;;  %v5395_v15 = vadd.f32 1.0, %v7758_v12  ;;  %7779 = vpow2.f32 %v5252_v62  ;;  %v5019_v16 = vsub.f32 0.0, %v4891_v9 }
 0x479   :  { %v5018_v17 = vsub.f32 0.0, %v4890_v10  ;;  %v7762_v18 = vpop.eup %7761  ;;  %v5394_v19 = vadd.f32 1.0, %v7760_v60  ;;  %7781 = vpow2.f32 %v5258_v8  ;;  %v4755_v20 = vpop.xlane.xlu1 %4754 }
 0x47a   :  { %v4753_v22 = vpop.xlane.xlu0 %4752  ;;  %v7764_v14 = vpop.eup %7763  ;;  %5774 = vst.msk [vmem:[%s12939_s3 + $0x328] sm:$0xff] %vm5672_vm3, %v7762_v18  ;;  %7783 = vrcp.f32 %v5395_v15  ;;  %v5262_v23 = vmul.f32 1.442695, %v5019_v16  ;;  %v4893_v6 = vadd.f32 %v4755_v20, %v8570_v21 }
 0x47b   :  { %v7766_v24 = vpop.eup %7765  ;;  %5773 = vst.msk [vmem:[%s12939_s3 + $0x320] sm:$0xff] %vm5672_vm3, %v7764_v14  ;;  %7785 = vrcp.f32 %v5394_v19  ;;  %v4892_v25 = vadd.f32 %v4753_v22, %v8570_v21  ;;  %v5260_v29 = vmul.f32 1.442695, %v5018_v17 }
 0x47c   :  { %v7768_v26 = vpop.eup %7767  ;;  %v5397_v27 = vadd.f32 1.0, %v7766_v24  ;;  %7787 = vpow2.f32 %v5256_v13  ;;  %v5021_v30 = vsub.f32 0.0, %v4893_v6 }
 0x47d   :  { %v7770_v31 = vpop.eup %7769  ;;  %v5396_v32 = vadd.f32 1.0, %v7768_v26  ;;  %7789 = vpow2.f32 %v5262_v23  ;;  %v5020_v11 = vsub.f32 0.0, %v4892_v25  ;;  %v4759_v28 = vpop.xlane.xlu1 %4758 }
 0x47e   :  { %v4757_v33 = vpop.xlane.xlu0 %4756  ;;  %v7772_v35 = vpop.eup %7771  ;;  %5776 = vst.msk [vmem:[%s12939_s3 + $0x338] sm:$0xff] %vm5672_vm3, %v7770_v31  ;;  %7791 = vrcp.f32 %v5397_v27  ;;  %v5266_v37 = vmul.f32 1.442695, %v5021_v30  ;;  %v4895_v38 = vadd.f32 %v4759_v28, %v8570_v21 }
 0x47f   :  { %v4894_v39 = vadd.f32 %v4757_v33, %v8570_v21  ;;  %v7774_v40 = vpop.eup %7773  ;;  %7793 = vrcp.f32 %v5396_v32  ;;  %v5399_v41 = vadd.f32 1.0, %v7772_v35  ;;  %v5264_v42 = vmul.f32 1.442695, %v5020_v11 }
 0x480   :  { %v7776_v43 = vpop.eup %7775  ;;  %5775 = vst.msk [vmem:[%s12939_s3 + $0x330] sm:$0xff] %vm5672_vm3, %v7774_v40  ;;  %7795 = vpow2.f32 %v5260_v29  ;;  %v5023_v1 = vsub.f32 0.0, %v4895_v38 }
 0x481   :  { %v5022_v44 = vsub.f32 0.0, %v4894_v39  ;;  %v7778_v45 = vpop.eup %7777  ;;  %5778 = vst.msk [vmem:[%s12939_s3 + $0x348] sm:$0xff] %vm5672_vm3, %v7776_v43  ;;  %7797 = vrcp.f32 %v5399_v41  ;;  %v4763_v46 = vpop.xlane.xlu1 %4762 }
 0x482   :  { %v4761_v47 = vpop.xlane.xlu0 %4760  ;;  %v7780_v48 = vpop.eup %7779  ;;  %5777 = vst.msk [vmem:[%s12939_s3 + $0x340] sm:$0xff] %vm5672_vm3, %v7778_v45  ;;  %7799 = vpow2.f32 %v5266_v37  ;;  %v5270_v49 = vmul.f32 1.442695, %v5023_v1  ;;  %v4897_v34 = vadd.f32 %v4763_v46, %v8570_v21 }
 0x483   :  { %v7782_v50 = vpop.eup %7781  ;;  %v5398_v51 = vadd.f32 1.0, %v7780_v48  ;;  %7801 = vpow2.f32 %v5264_v42  ;;  %v5268_v52 = vmul.f32 1.442695, %v5022_v44  ;;  %v4896_v54 = vadd.f32 %v4761_v47, %v8570_v21 }
 0x484   :  { %v7784_v55 = vpop.eup %7783  ;;  %v5401_v56 = vadd.f32 1.0, %v7782_v50  ;;  %7803 = vpow2.f32 %v5270_v49  ;;  %v5025_v57 = vsub.f32 0.0, %v4897_v34 }
 0x485   :  { %v7786_v58 = vpop.eup %7785  ;;  %5780 = vst.msk [vmem:[%s12939_s3 + $0x358] sm:$0xff] %vm5672_vm3, %v7784_v55  ;;  %7805 = vrcp.f32 %v5398_v51  ;;  %v5024_v36 = vsub.f32 0.0, %v4896_v54  ;;  %v4767_v59 = vpop.xlane.xlu1 %4766 }
 0x486   :  { %v4765_v53 = vpop.xlane.xlu0 %4764  ;;  %v7788_v61 = vpop.eup %7787  ;;  %5779 = vst.msk [vmem:[%s12939_s3 + $0x350] sm:$0xff] %vm5672_vm3, %v7786_v58  ;;  %7807 = vrcp.f32 %v5401_v56  ;;  %v5274_v62 = vmul.f32 1.442695, %v5025_v57  ;;  %v4899_v63 = vadd.f32 %v4767_v59, %v8570_v21 }
 0x487   :  { %v4898_v0 = vadd.f32 %v4765_v53, %v8570_v21  ;;  %v7790_v2 = vpop.eup %7789  ;;  %v5400_v3 = vadd.f32 1.0, %v7788_v61  ;;  %7809 = vpow2.f32 %v5268_v52  ;;  %v5272_v4 = vmul.f32 1.442695, %v5024_v36 }
 0x488   :  { %v7792_v5 = vpop.eup %7791  ;;  %v5403_v7 = vadd.f32 1.0, %v7790_v2  ;;  %7811 = vpow2.f32 %v5274_v62  ;;  %v5027_v8 = vsub.f32 0.0, %v4899_v63 }
 0x489   :  { %v5026_v9 = vsub.f32 0.0, %v4898_v0  ;;  %v7794_v10 = vpop.eup %7793  ;;  %5782 = vst.msk [vmem:[%s12939_s3 + $0x368] sm:$0xff] %vm5672_vm3, %v7792_v5  ;;  %7813 = vrcp.f32 %v5400_v3  ;;  %v4771_v12 = vpop.xlane.xlu1 %4770 }
 0x48a   :  { %v4769_v13 = vpop.xlane.xlu0 %4768  ;;  %v7796_v60 = vpop.eup %7795  ;;  %5781 = vst.msk [vmem:[%s12939_s3 + $0x360] sm:$0xff] %vm5672_vm3, %v7794_v10  ;;  %7815 = vrcp.f32 %v5403_v7  ;;  %v5278_v15 = vmul.f32 1.442695, %v5027_v8  ;;  %v4901_v17 = vadd.f32 %v4771_v12, %v8570_v21 }
 0x48b   :  { %v5276_v16 = vmul.f32 1.442695, %v5026_v9  ;;  %v7798_v18 = vpop.eup %7797  ;;  %v5402_v19 = vadd.f32 1.0, %v7796_v60  ;;  %7817 = vpow2.f32 %v5272_v4  ;;  %v4900_v20 = vadd.f32 %v4769_v13, %v8570_v21 }
 0x48c   :  { %v7800_v22 = vpop.eup %7799  ;;  %5784 = vst.msk [vmem:[%s12939_s3 + $0x378] sm:$0xff] %vm5672_vm3, %v7798_v18  ;;  %7819 = vpow2.f32 %v5278_v15  ;;  %v5029_v14 = vsub.f32 0.0, %v4901_v17 }
 0x48d   :  { %v7802_v23 = vpop.eup %7801  ;;  %7821 = vrcp.f32 %v5402_v19  ;;  %v5405_v6 = vadd.f32 1.0, %v7800_v22  ;;  %v5028_v24 = vsub.f32 0.0, %v4900_v20  ;;  %v4775_v25 = vpop.xlane.xlu1 %4774 }
 0x48e   :  { %v4773_v26 = vpop.xlane.xlu0 %4772  ;;  %v7804_v27 = vpop.eup %7803  ;;  %v5404_v29 = vadd.f32 1.0, %v7802_v23  ;;  %7823 = vpow2.f32 %v5276_v16  ;;  %v5282_v30 = vmul.f32 1.442695, %v5029_v14  ;;  %v4903_v31 = vadd.f32 %v4775_v25, %v8570_v21 }
 0x48f   :  { %v7806_v32 = vpop.eup %7805  ;;  %7825 = vrcp.f32 %v5405_v6  ;;  %v5407_v11 = vadd.f32 1.0, %v7804_v27  ;;  %v5280_v28 = vmul.f32 1.442695, %v5028_v24  ;;  %v4902_v33 = vadd.f32 %v4773_v26, %v8570_v21 }
 0x490   :  { %v7808_v35 = vpop.eup %7807  ;;  %5783 = vst.msk [vmem:[%s12939_s3 + $0x370] sm:$0xff] %vm5672_vm3, %v7806_v32  ;;  %7827 = vrcp.f32 %v5404_v29  ;;  %v5031_v37 = vsub.f32 0.0, %v4903_v31 }
 0x491   :  { %v7810_v38 = vpop.eup %7809  ;;  %5786 = vst.msk [vmem:[%s12939_s3 + $0x388] sm:$0xff] %vm5672_vm3, %v7808_v35  ;;  %7829 = vrcp.f32 %v5407_v11  ;;  %v5030_v39 = vsub.f32 0.0, %v4902_v33 }
 0x492   :  { %v7812_v40 = vpop.eup %7811  ;;  %v5406_v41 = vadd.f32 1.0, %v7810_v38  ;;  %7831 = vpow2.f32 %v5282_v30  ;;  %v5286_v21 = vmul.f32 1.442695, %v5031_v37 }
 0x493   :  { %v7814_v42 = vpop.eup %7813  ;;  %v5409_v43 = vadd.f32 1.0, %v7812_v40  ;;  %7833 = vpow2.f32 %v5280_v28  ;;  %v5284_v1 = vmul.f32 1.442695, %v5030_v39 }
 0x494   :  { %v7816_v44 = vpop.eup %7815  ;;  %5785 = vst.msk [vmem:[%s12939_s3 + $0x380] sm:$0xff] %vm5672_vm3, %v7814_v42  ;;  %7835 = vrcp.f32 %v5406_v41 }
 0x495   :  { %v7818_v45 = vpop.eup %7817  ;;  %5788 = vst.msk [vmem:[%s12939_s3 + $0x398] sm:$0xff] %vm5672_vm3, %v7816_v44  ;;  %7837 = vrcp.f32 %v5409_v43 }
 0x496   :  { %v7820_v46 = vpop.eup %7819  ;;  %v5408_v47 = vadd.f32 1.0, %v7818_v45  ;;  %7839 = vpow2.f32 %v5286_v21 }
 0x497   :  { %v7822_v48 = vpop.eup %7821  ;;  %v5411_v49 = vadd.f32 1.0, %v7820_v46  ;;  %7841 = vpow2.f32 %v5284_v1 }
 0x498   :  { %v7824_v34 = vpop.eup %7823  ;;  %5787 = vst.msk [vmem:[%s12939_s3 + $0x390] sm:$0xff] %vm5672_vm3, %v7822_v48  ;;  %7843 = vrcp.f32 %v5408_v47 }
 0x499   :  { %v7826_v50 = vpop.eup %7825  ;;  %7845 = vrcp.f32 %v5411_v49  ;;  %v5410_v51 = vadd.f32 1.0, %v7824_v34 }
 0x49a   :  { %v7828_v52 = vpop.eup %7827  ;;  %5790 = vst.msk [vmem:[%s12939_s3 + $0x3a8] sm:$0xff] %vm5672_vm3, %v7826_v50 }
 0x49b   :  { %v7830_v54 = vpop.eup %7829  ;;  %5789 = vst.msk [vmem:[%s12939_s3 + $0x3a0] sm:$0xff] %vm5672_vm3, %v7828_v52  ;;  %7847 = vrcp.f32 %v5410_v51 }
 0x49c   :  { %v7832_v55 = vpop.eup %7831  ;;  %5792 = vst.msk [vmem:[%s12939_s3 + $0x3b8] sm:$0xff] %vm5672_vm3, %v7830_v54 }
 0x49d   :  { %v7834_v56 = vpop.eup %7833  ;;  %v5413_v57 = vadd.f32 1.0, %v7832_v55 }
 0x49e   :  { %v7836_v58 = vpop.eup %7835  ;;  %v5412_v36 = vadd.f32 1.0, %v7834_v56 }
 0x49f   :  { %v7838_v59 = vpop.eup %7837  ;;  %5791 = vst.msk [vmem:[%s12939_s3 + $0x3b0] sm:$0xff] %vm5672_vm3, %v7836_v58  ;;  %7849 = vrcp.f32 %v5413_v57 }
 0x4a0   :  { %v7840_v53 = vpop.eup %7839  ;;  %5794 = vst.msk [vmem:[%s12939_s3 + $0x3c8] sm:$0xff] %vm5672_vm3, %v7838_v59  ;;  %7851 = vrcp.f32 %v5412_v36 }
 0x4a1   :  { %v7842_v61 = vpop.eup %7841  ;;  %v5415_v62 = vadd.f32 1.0, %v7840_v53 }
 0x4a2   :  { %v7844_v63 = vpop.eup %7843  ;;  %v5414_v0 = vadd.f32 1.0, %v7842_v61 }
 0x4a3   :  { %v7846_v2 = vpop.eup %7845  ;;  %5793 = vst.msk [vmem:[%s12939_s3 + $0x3c0] sm:$0xff] %vm5672_vm3, %v7844_v63  ;;  %7853 = vrcp.f32 %v5415_v62 }
 0x4a4   :  { %5796 = vst.msk [vmem:[%s12939_s3 + $0x3d8] sm:$0xff] %vm5672_vm3, %v7846_v2  ;;  %7855 = vrcp.f32 %v5414_v0 }
 0x4a5   :  { %v7848_v3 = vpop.eup %7847 }
 0x4a6   :  { %5795 = vst.msk [vmem:[%s12939_s3 + $0x3d0] sm:$0xff] %vm5672_vm3, %v7848_v3 }
 0x4a9   :  { %v7850_v4 = vpop.eup %7849 }
 0x4aa   :  { %v7852_v5 = vpop.eup %7851  ;;  %5798 = vst.msk [vmem:[%s12939_s3 + $0x3e8] sm:$0xff] %vm5672_vm3, %v7850_v4 }
 0x4ab   :  { %5797 = vst.msk [vmem:[%s12939_s3 + $0x3e0] sm:$0xff] %vm5672_vm3, %v7852_v5 }
 0x4ad   :  { %v7854_v7 = vpop.eup %7853 }
 0x4ae   :  { %v7856_v8 = vpop.eup %7855  ;;  %5800 = vst.msk [vmem:[%s12939_s3 + $0x3f8] sm:$0xff] %vm5672_vm3, %v7854_v7 }
 0x4af   :  { %5799 = vst.msk [vmem:[%s12939_s3 + $0x3f0] sm:$0xff] %vm5672_vm3, %v7856_v8 }

</bundles_post_ra>
